<compile_context>
chip_gen: v7x
topology: tpu7x:2x2x1
jax: 0.10.0
libtpu: 0.0.40
codegen_flags: <defaults>
</compile_context>

<pallas_src>
import functools

import jax
import jax.numpy as jnp
from jax.experimental import pallas as pl
from jax.experimental.pallas import tpu as pltpu

EPS = 1e-5
NUM_CLASSES = 10
MM_DTYPE = jnp.bfloat16                 # matmul operands (accumulation is f32)
# 5-tap "plus" pattern inside a 3x3 window: N, W, center, E, S
PLUS_TAPS = ((0, 1), (1, 0), (1, 1), (1, 2), (2, 1))


def _round_up(x, m):
    return ((x + m - 1) // m) * m


# --------------------------- Pallas kernels ----------------------------------

def _conv_kernel(*refs, has_skip):
    """(tm,K)@(K,N) + fused per-channel epilogue (+ optional residual add).

    epi rows: 0 = bias (added before ReLU), 1 = scale, 2 = shift, 3 = mode
      mode==1 : Conv -> BN -> ReLU  => max(z*scale + shift, 0)  (bias folded)
      mode==0 : Conv -> ReLU -> BN  => max(z + bias, 0)*scale + shift
    """
    if has_skip:
        x_ref, w_ref, e_ref, s_ref, o_ref = refs
    else:
        x_ref, w_ref, e_ref, o_ref = refs
        s_ref = None
    z = jnp.dot(x_ref[...], w_ref[...], preferred_element_type=jnp.float32)
    bias = e_ref[0:1, :]
    scale = e_ref[1:2, :]
    shift = e_ref[2:3, :]
    mode = e_ref[3:4, :]
    zb = z + bias
    bn_then_relu = jnp.maximum(zb * scale + shift, 0.0)
    relu_then_bn = jnp.maximum(zb, 0.0) * scale + shift
    out = mode * bn_then_relu + (1.0 - mode) * relu_then_bn
    if has_skip:
        out = out + s_ref[...]
    o_ref[...] = out.astype(o_ref.dtype)


def _pick_tile(m):
    """Tile M so big layers keep >= 2 parallel grid steps (dual-TC friendly)."""
    if m >= 1024:
        return 512
    if m >= 256:
        return max(128, _round_up(m // 2, 8))
    return m                                    # m is already a multiple of 8


def fused_matmul(x, w, epi, skip=None):
    """x:(M,K) f32, w:(K,N) packed bf16, epi:(4,N) f32, skip:(M,N) f32|None."""
    M, K = x.shape
    N = w.shape[1]
    Mr = _round_up(M, 8)
    if Mr != M:                                 # never hit at the shapes below
        x = jnp.pad(x, ((0, Mr - M), (0, 0)))
        if skip is not None:
            skip = jnp.pad(skip, ((0, Mr - M), (0, 0)))
    tm = _pick_tile(Mr)
    in_specs = [
        pl.BlockSpec((tm, K), lambda i: (i, 0)),
        pl.BlockSpec((K, N), lambda i: (0, 0)),
        pl.BlockSpec((4, N), lambda i: (0, 0)),
    ]
    args = [x.astype(MM_DTYPE), w, epi]
    if skip is not None:
        in_specs.append(pl.BlockSpec((tm, N), lambda i: (i, 0)))
        args.append(skip)
    out = pl.pallas_call(
        functools.partial(_conv_kernel, has_skip=skip is not None),
        out_shape=jax.ShapeDtypeStruct((Mr, N), jnp.float32),
        grid=(pl.cdiv(Mr, tm),),
        in_specs=in_specs,
        out_specs=pl.BlockSpec((tm, N), lambda i: (i, 0)),
        compiler_params=pltpu.CompilerParams(
            dimension_semantics=("parallel",)),
    )(*args)
    return out if Mr == M else out[:M]


def _head_kernel(x_ref, lam_ref, w_ref, b_ref, o_ref):
    # flatten * lamda -> ReLU -> Linear (output padded to 128 lanes)
    emb = jnp.maximum(x_ref[...] * lam_ref[...], 0.0)
    o_ref[...] = (jnp.dot(emb, w_ref[...], preferred_element_type=jnp.float32)
                  + b_ref[...]).astype(o_ref.dtype)


def head(x, lam, w_pad, b_pad, frame_length):
    """AvgPool2d((2, fl//128)) + flatten + *lamda + ReLU + Linear."""
    B, H, W, C = x.shape
    kh, kw = 2, frame_length // 128
    Ho, Wo = (H - kh) // kh + 1, (W - kw) // kw + 1
    # base_MCNet's 512-wide lamda/flatten only line up when the pool -> 1x1.
    assert Ho == 1 and Wo == 1 and C == 512
    xm = jnp.mean(x[:, :kh, :kw, :], axis=(1, 2))    # avg-pool == flatten (B,512)
    nout = w_pad.shape[1]
    out = pl.pallas_call(
        _head_kernel,
        out_shape=jax.ShapeDtypeStruct((B, nout), jnp.float32),
        grid=(1,),
        in_specs=[
            pl.BlockSpec((B, C), lambda i: (0, 0)),
            pl.BlockSpec((1, C), lambda i: (0, 0)),
            pl.BlockSpec((C, nout), lambda i: (0, 0)),
            pl.BlockSpec((1, nout), lambda i: (0, 0)),
        ],
        out_specs=pl.BlockSpec((B, nout), lambda i: (0, 0)),
    )(xm, lam.reshape(1, C), w_pad, b_pad.reshape(1, nout))
    return out[:, :NUM_CLASSES]


# --------------------------- conv / pool glue (NHWC) --------------------------

def conv(x, layer, kh, kw, stride=(1, 1), pad=((0, 0), (0, 0)),
         taps=None, skip=None):
    """NHWC conv via im2col + fused Pallas matmul; `taps` selects kernel taps."""
    wpack, epi = layer
    B, H, W, C = x.shape
    (ph0, ph1), (pw0, pw1) = pad
    xp = jnp.pad(x, ((0, 0), (ph0, ph1), (pw0, pw1), (0, 0)))
    Hp, Wp = H + ph0 + ph1, W + pw0 + pw1
    sh, sw = stride
    Ho = (Hp - kh) // sh + 1
    Wo = (Wp - kw) // sw + 1
    if taps is None:
        taps = [(dh, dw) for dh in range(kh) for dw in range(kw)]
    cols = [xp[:, dh:dh + (Ho - 1) * sh + 1:sh,
               dw:dw + (Wo - 1) * sw + 1:sw, :] for (dh, dw) in taps]
    patches = cols[0] if len(cols) == 1 else jnp.concatenate(cols, axis=-1)
    xm = patches.reshape(B * Ho * Wo, len(taps) * C)
    skm = None if skip is None else skip.reshape(B * Ho * Wo, -1)
    out = fused_matmul(xm, wpack, epi, skip=skm)
    return out.reshape(B, Ho, Wo, wpack.shape[1])


def maxpool_w(x):
    """MaxPool2d(kernel=(1,3), stride=(1,2), padding=(0,1)); -inf padding."""
    B, H, W, C = x.shape
    xp = jnp.pad(x, ((0, 0), (0, 0), (1, 1), (0, 0)),
                 constant_values=-jnp.inf)
    Wo = (W + 2 - 3) // 2 + 1
    s0 = xp[:, :, 0:(Wo - 1) * 2 + 1:2, :]
    s1 = xp[:, :, 1:(Wo - 1) * 2 + 2:2, :]
    s2 = xp[:, :, 2:(Wo - 1) * 2 + 3:2, :]
    return jnp.maximum(jnp.maximum(s0, s1), s2)


def blockb_skip_pool(x):
    """ZeroPad2d((0,0,1,0)) then MaxPool2d((2,2), stride=(1,2))."""
    xp = jnp.pad(x, ((0, 0), (1, 0), (0, 0), (0, 0)))       # real zeros
    B, H, W, C = xp.shape
    Ho = H - 1
    Wo = (W - 2) // 2 + 1
    m = jnp.maximum(xp[:, 0:Ho, :, :], xp[:, 1:Ho + 1, :, :])
    w0 = m[:, :, 0:(Wo - 1) * 2 + 1:2, :]
    w1 = m[:, :, 1:(Wo - 1) * 2 + 2:2, :]
    return jnp.maximum(w0, w1)


def pooled_branches(y, n1, n2):
    """Split fused branch output when c1 is pooled and c2/c3 run at stride 2."""
    x1 = maxpool_w(y[..., :n1])
    x2 = y[:, :, ::2, n1:n1 + n2]
    x3 = y[:, :, ::2, n1 + n2:]
    return jnp.concatenate([x1, x2, x3], axis=-1)


# --------------------------- MCNet blocks -------------------------------------

def pre_block(x, p):
    y = conv(x, p, kh=3, kw=3, pad=((1, 1), (1, 1)), taps=PLUS_TAPS)
    x1 = maxpool_w(y[..., :32])            # c1: (3,1) s1 -> relu -> bn -> pool
    x2 = y[:, :, ::2, 32:]                 # c2: (1,3) s(1,2) -> bn -> relu
    return jnp.concatenate([x1, x2], axis=-1)


def block_a(x, p):
    sx = maxpool_w(conv(x, p["skip"], kh=1, kw=1, stride=(1, 2)))
    xc = conv(maxpool_w(x), p["conv"], kh=1, kw=1)
    y = conv(xc, p["branches"], kh=3, kw=3, pad=((1, 1), (1, 1)),
             taps=PLUS_TAPS)
    return sx + pooled_branches(y, 48, 48)


def block_b(x, p, has_pooling):
    if x.shape[2] % 2 != 0:                # odd width -> append one zero column
        x = jnp.pad(x, ((0, 0), (0, 0), (0, 1), (0, 0)))
    xc = conv(x, p["conv"], kh=1, kw=1)
    if has_pooling:
        sx = blockb_skip_pool(x)
        y = conv(xc, p["branches"], kh=3, kw=3, pad=((1, 1), (1, 1)),
                 taps=PLUS_TAPS)
        return sx + pooled_branches(y, 48, 48)
    # stride-1 branches: fused output already equals concat([x1,x2,x3]);
    # identity skip is added inside the kernel epilogue.
    return conv(xc, p["branches"], kh=3, kw=3, pad=((1, 1), (1, 1)),
                taps=PLUS_TAPS, skip=x)


def block_c(x, p):
    xc = conv(x, p["conv"], kh=1, kw=1)
    y = conv(xc, p["branches"], kh=3, kw=3, pad=((1, 1), (1, 1)),
             taps=PLUS_TAPS)               # y == concat([x1,x2,x3]), 384-wide
    return jnp.concatenate([x, y], axis=-1)


def mcnet_forward(x, params, frame_length):
    p = params
    x = jnp.transpose(x, (0, 2, 3, 1))     # NCHW -> NHWC, once
    x = conv(x, p["conv1"], kh=3, kw=3, stride=(1, 2), pad=((1, 1), (1, 1)))
    x = conv(x, p["conv2"], kh=3, kw=3, stride=(1, 2), pad=((1, 1), (1, 1)))
    x = conv(x, p["fea"], kh=3, kw=7, stride=(1, 2), pad=((1, 1), (3, 3)))
    x = maxpool_w(x)
    x = pre_block(x, p["pre"])
    x = block_a(x, p["A"])
    x = block_b(x, p["B1"], has_pooling=False)
    x = block_b(x, p["B2"], has_pooling=True)
    x = block_b(x, p["B3"], has_pooling=False)
    x = block_b(x, p["B4"], has_pooling=True)
    x = block_c(x, p["C"])
    return head(x, p["lamda"], p["lin_w"], p["lin_b"], frame_length)


# --------------------------- parameter init / packing -------------------------

def conv_init(key, cout, cin, kh, kw):
    k1, k2 = jax.random.split(key)
    fan_in = cin * kh * kw
    bound = float(fan_in) ** -0.5
    w = jax.random.uniform(k1, (cout, cin, kh, kw), jnp.float32, -bound, bound)
    b = jax.random.uniform(k2, (cout,), jnp.float32, -bound, bound)
    return w, b


def bn_init(key, c):
    k1, k2 = jax.random.split(key)
    gamma = 1.0 + 0.1 * jax.random.normal(k1, (c,), jnp.float32)
    beta = 0.05 * jax.random.normal(k2, (c,), jnp.float32)
    scale = gamma / jnp.sqrt(1.0 + EPS)          # running mean 0, var 1
    shift = beta
    return scale, shift


def raw_conv_bn(key, cout, cin, kh, kw, use_bn=True):
    k1, k2 = jax.random.split(key)
    w, b = conv_init(k1, cout, cin, kh, kw)
    if use_bn:
        s, t = bn_init(k2, cout)
    else:
        s = jnp.ones((cout,), jnp.float32)
        t = jnp.zeros((cout,), jnp.float32)
    return w, b, s, t


def make_epi(bias, scale, shift, mode):
    """Pack (bias, scale, shift, mode) into one (4, N) epilogue operand."""
    if mode == "bn_relu":                        # fold conv bias into BN shift
        rows = [jnp.zeros_like(bias), scale, bias * scale + shift,
                jnp.ones_like(bias)]
    else:                                        # "relu_bn" (also plain ReLU)
        rows = [bias, scale, shift, jnp.zeros_like(bias)]
    return jnp.stack(rows, axis=0).astype(jnp.float32)


def std_layer(key, cout, cin, kh, kw, mode, use_bn=True):
    w, b, s, t = raw_conv_bn(key, cout, cin, kh, kw, use_bn)
    wpack = w.transpose(2, 3, 1, 0).reshape(kh * kw * cin, cout)
    return (wpack.astype(MM_DTYPE), make_epi(b, s, t, mode))


def pack_plus_weights(w_3x1, w_1x3, w_1x1):
    """Pack (3,1)/(1,3)/(1,1) branch weights onto the shared 5-tap plus layout."""
    parts = [w for w in (w_3x1, w_1x3, w_1x1) if w is not None]
    cin = parts[0].shape[1]
    n = sum(w.shape[0] for w in parts)
    full = jnp.zeros((3, 3, cin, n), jnp.float32)   # [dh, dw, cin, cout]
    off = 0
    if w_3x1 is not None:
        m = w_3x1.shape[0]
        full = full.at[:, 1, :, off:off + m].set(
            w_3x1[:, :, :, 0].transpose(2, 1, 0))   # kh -> dh, dw = 1
        off += m
    if w_1x3 is not None:
        m = w_1x3.shape[0]
        full = full.at[1, :, :, off:off + m].set(
            w_1x3[:, :, 0, :].transpose(2, 1, 0))   # kw -> dw, dh = 1
        off += m
    if w_1x1 is not None:
        m = w_1x1.shape[0]
        full = full.at[1, 1, :, off:off + m].set(
            w_1x1[:, :, 0, 0].transpose(1, 0))      # center tap
        off += m
    rows = jnp.stack([full[dh, dw] for (dh, dw) in PLUS_TAPS], axis=0)
    return rows.reshape(len(PLUS_TAPS) * cin, n)


def plus_branch_layer(key, cin, couts, modes):
    """Branches in fixed order (3,1), (1,3)[, (1,1)] packed into one matmul."""
    shapes = [(3, 1), (1, 3), (1, 1)][:len(couts)]
    keys = jax.random.split(key, len(couts))
    raws = [raw_conv_bn(k, co, cin, kh, kw)
            for k, co, (kh, kw) in zip(keys, couts, shapes)]
    ws = [r[0] for r in raws] + [None] * (3 - len(raws))
    wpack = pack_plus_weights(ws[0], ws[1], ws[2]).astype(MM_DTYPE)
    epi = jnp.concatenate(
        [make_epi(b, s, t, m) for (_, b, s, t), m in zip(raws, modes)], axis=1)
    return (wpack, epi)


def build_params(key):
    keys = iter(jax.random.split(key, 16))
    nk = lambda: next(keys)
    p = {}
    p["conv1"] = std_layer(nk(), 64, 1, 3, 3, "relu_bn")
    p["conv2"] = std_layer(nk(), 64, 64, 3, 3, "relu_bn")
    p["fea"] = std_layer(nk(), 64, 64, 3, 7, "relu_bn", use_bn=False)  # ReLU only
    p["pre"] = plus_branch_layer(nk(), 64, (32, 32), ("relu_bn", "bn_relu"))
    p["A"] = {
        "skip": std_layer(nk(), 128, 64, 1, 1, "relu_bn"),
        "conv": std_layer(nk(), 32, 64, 1, 1, "bn_relu"),
        "branches": plus_branch_layer(nk(), 32, (48, 48, 32),
                                      ("relu_bn", "bn_relu", "bn_relu")),
    }

    def block_b_params(k):
        k1, k2 = jax.random.split(k)
        return {"conv": std_layer(k1, 32, 128, 1, 1, "bn_relu"),
                "branches": plus_branch_layer(
                    k2, 32, (48, 48, 32), ("relu_bn", "relu_bn", "relu_bn"))}

    p["B1"] = block_b_params(nk())
    p["B2"] = block_b_params(nk())
    p["B3"] = block_b_params(nk())
    p["B4"] = block_b_params(nk())
    p["C"] = {
        "conv": std_layer(nk(), 64, 128, 1, 1, "relu_bn"),
        "branches": plus_branch_layer(nk(), 64, (128, 128, 128),
                                      ("relu_bn", "relu_bn", "relu_bn")),
    }
    p["lamda"] = jnp.ones((512,), jnp.float32)       # torch init: np.ones(512)
    kw_, kb_ = jax.random.split(nk())
    bound = 512.0 ** -0.5
    lw = jax.random.uniform(kw_, (512, NUM_CLASSES), jnp.float32, -bound, bound)
    lb = jax.random.uniform(kb_, (NUM_CLASSES,), jnp.float32, -bound, bound)
    # pad head to 128 output lanes (lane-dense store); logits sliced after
    p["lin_w"] = jnp.pad(lw, ((0, 0), (0, 128 - NUM_CLASSES)))
    p["lin_b"] = jnp.pad(lb, (0, 128 - NUM_CLASSES))
    return p


# --------------------------- main ---------------------------------------------

if __name__ == "__main__":
    key = jax.random.PRNGKey(0)
    pkey, xkey = jax.random.split(key)

    # Small but internally consistent shapes: input frame (B, 1, 2, L) with
    # L = 1024 and frame_length = 256 gives a 2x2 feature map of 512 channels
    # before the (2, frame_length // 128) = (2, 2) average pool, so the
    # flattened embedding has exactly 512 features (matching lamda).
    frame_length = 256
    x = jax.random.normal(xkey, (2, 1, 2, 1024), jnp.float32)

    params = build_params(pkey)
    fwd = jax.jit(functools.partial(mcnet_forward, frame_length=frame_length))
    out = fwd(x, params)
    jax.block_until_ready(out)
    assert out.shape == (2, NUM_CLASSES) and out.dtype == jnp.float32
    print("KERNEL_OK")
</pallas_src>

<mosaic_0001>
module attributes {stable_mosaic.version = 11 : i64} {
  func.func @_conv_kernel(%arg0: i32, %arg1: memref<512x9xbf16, #tpu.memory_space<vmem>>, %arg2: memref<9x64xbf16, #tpu.memory_space<vmem>>, %arg3: memref<4x64xf32, #tpu.memory_space<vmem>>, %arg4: memref<512x64xf32, #tpu.memory_space<vmem>>) attributes {dimension_semantics = [#tpu.dimension_semantics<parallel>], iteration_bounds = array<i64: 4>, scalar_prefetch = 0 : i64, scratch_operands = 0 : i64, tpu.core_type = #tpu.core_type<tc>, window_params = [{transform_indices = @transform_0, window_bounds = array<i64: 512, 9>}, {pipeline_mode = #tpu.pipeline_mode<synchronous>, transform_indices = @transform_1, window_bounds = array<i64: 9, 64>}, {pipeline_mode = #tpu.pipeline_mode<synchronous>, transform_indices = @transform_2, window_bounds = array<i64: 4, 64>}, {transform_indices = @transform_3, window_bounds = array<i64: 512, 64>}]} {
    %c0 = arith.constant 0 : index
    %c0_0 = arith.constant 0 : index
    %0 = vector.load %arg1[%c0, %c0_0] : memref<512x9xbf16, #tpu.memory_space<vmem>>, vector<512x9xbf16>
    %c0_1 = arith.constant 0 : index
    %c0_2 = arith.constant 0 : index
    %1 = vector.load %arg2[%c0_1, %c0_2] : memref<9x64xbf16, #tpu.memory_space<vmem>>, vector<9x64xbf16>
    %cst = arith.constant dense<0.000000e+00> : vector<512x64xf32>
    %2 = tpu.matmul %0, %1, %cst {dimension_numbers = #tpu.dot_dimension_numbers<[1], [0], [0], [1], [0, 0, 1, 1], [], []>} : vector<512x9xbf16>, vector<9x64xbf16>, vector<512x64xf32> -> vector<512x64xf32>
    %c0_3 = arith.constant 0 : index
    %c0_4 = arith.constant 0 : index
    %3 = vector.load %arg3[%c0_3, %c0_4] : memref<4x64xf32, #tpu.memory_space<vmem>>, vector<1x64xf32>
    %c1 = arith.constant 1 : index
    %c0_5 = arith.constant 0 : index
    %4 = vector.load %arg3[%c1, %c0_5] : memref<4x64xf32, #tpu.memory_space<vmem>>, vector<1x64xf32>
    %c2 = arith.constant 2 : index
    %c0_6 = arith.constant 0 : index
    %5 = vector.load %arg3[%c2, %c0_6] : memref<4x64xf32, #tpu.memory_space<vmem>>, vector<1x64xf32>
    %c3 = arith.constant 3 : index
    %c0_7 = arith.constant 0 : index
    %6 = vector.load %arg3[%c3, %c0_7] : memref<4x64xf32, #tpu.memory_space<vmem>>, vector<1x64xf32>
    %7 = vector.broadcast %3 : vector<1x64xf32> to vector<512x64xf32>
    %8 = arith.addf %2, %7 : vector<512x64xf32>
    %9 = vector.broadcast %4 : vector<1x64xf32> to vector<512x64xf32>
    %10 = arith.mulf %8, %9 : vector<512x64xf32>
    %11 = vector.broadcast %5 : vector<1x64xf32> to vector<512x64xf32>
    %12 = arith.addf %10, %11 : vector<512x64xf32>
    %cst_8 = arith.constant 0.000000e+00 : f32
    %13 = vector.broadcast %cst_8 : f32 to vector<512x64xf32>
    %14 = arith.maximumf %12, %13 : vector<512x64xf32>
    %cst_9 = arith.constant 0.000000e+00 : f32
    %15 = vector.broadcast %cst_9 : f32 to vector<512x64xf32>
    %16 = arith.maximumf %8, %15 : vector<512x64xf32>
    %17 = vector.broadcast %4 : vector<1x64xf32> to vector<512x64xf32>
    %18 = arith.mulf %16, %17 : vector<512x64xf32>
    %19 = vector.broadcast %5 : vector<1x64xf32> to vector<512x64xf32>
    %20 = arith.addf %18, %19 : vector<512x64xf32>
    %21 = vector.broadcast %6 : vector<1x64xf32> to vector<512x64xf32>
    %22 = arith.mulf %21, %14 : vector<512x64xf32>
    %cst_10 = arith.constant 1.000000e+00 : f32
    %23 = vector.broadcast %cst_10 : f32 to vector<1x64xf32>
    %24 = arith.subf %23, %6 : vector<1x64xf32>
    %25 = vector.broadcast %24 : vector<1x64xf32> to vector<512x64xf32>
    %26 = arith.mulf %25, %20 : vector<512x64xf32>
    %27 = arith.addf %22, %26 : vector<512x64xf32>
    %c0_11 = arith.constant 0 : index
    %c0_12 = arith.constant 0 : index
    %28 = vector.load %arg4[%c0_11, %c0_12] : memref<512x64xf32, #tpu.memory_space<vmem>>, vector<512x64xf32>
    tpu.vector_store %arg4[%c0_11, %c0_12], %27 {strides = array<i32>} : memref<512x64xf32, #tpu.memory_space<vmem>>, vector<512x64xf32>,
    return
  }
  func.func @transform_0(%arg0: i32) -> (i32, i32) {
    %c0_i32 = arith.constant 0 : i32
    %c0_i32_0 = arith.constant 0 : i32
    return %arg0, %c0_i32 : i32, i32
  }
  func.func @transform_1(%arg0: i32) -> (i32, i32) {
    %c0_i32 = arith.constant 0 : i32
    %c0_i32_0 = arith.constant 0 : i32
    %c0_i32_1 = arith.constant 0 : i32
    return %c0_i32, %c0_i32_0 : i32, i32
  }
  func.func @transform_2(%arg0: i32) -> (i32, i32) {
    %c0_i32 = arith.constant 0 : i32
    %c0_i32_0 = arith.constant 0 : i32
    %c0_i32_1 = arith.constant 0 : i32
    return %c0_i32, %c0_i32_0 : i32, i32
  }
  func.func @transform_3(%arg0: i32) -> (i32, i32) {
    %c0_i32 = arith.constant 0 : i32
    %c0_i32_0 = arith.constant 0 : i32
    return %arg0, %c0_i32 : i32, i32
  }
}

module attributes {stable_mosaic.version = 11 : i64} {
  func.func @_conv_kernel(%arg0: i32, %arg1: memref<512x576xbf16, #tpu.memory_space<vmem>>, %arg2: memref<576x64xbf16, #tpu.memory_space<vmem>>, %arg3: memref<4x64xf32, #tpu.memory_space<vmem>>, %arg4: memref<512x64xf32, #tpu.memory_space<vmem>>) attributes {dimension_semantics = [#tpu.dimension_semantics<parallel>], iteration_bounds = array<i64: 2>, scalar_prefetch = 0 : i64, scratch_operands = 0 : i64, tpu.core_type = #tpu.core_type<tc>, window_params = [{transform_indices = @transform_0, window_bounds = array<i64: 512, 576>}, {pipeline_mode = #tpu.pipeline_mode<synchronous>, transform_indices = @transform_1, window_bounds = array<i64: 576, 64>}, {pipeline_mode = #tpu.pipeline_mode<synchronous>, transform_indices = @transform_2, window_bounds = array<i64: 4, 64>}, {transform_indices = @transform_3, window_bounds = array<i64: 512, 64>}]} {
    %c0 = arith.constant 0 : index
    %c0_0 = arith.constant 0 : index
    %0 = vector.load %arg1[%c0, %c0_0] : memref<512x576xbf16, #tpu.memory_space<vmem>>, vector<512x576xbf16>
    %c0_1 = arith.constant 0 : index
    %c0_2 = arith.constant 0 : index
    %1 = vector.load %arg2[%c0_1, %c0_2] : memref<576x64xbf16, #tpu.memory_space<vmem>>, vector<576x64xbf16>
    %cst = arith.constant dense<0.000000e+00> : vector<512x64xf32>
    %2 = tpu.matmul %0, %1, %cst {dimension_numbers = #tpu.dot_dimension_numbers<[1], [0], [0], [1], [0, 0, 1, 1], [], []>} : vector<512x576xbf16>, vector<576x64xbf16>, vector<512x64xf32> -> vector<512x64xf32>
    %c0_3 = arith.constant 0 : index
    %c0_4 = arith.constant 0 : index
    %3 = vector.load %arg3[%c0_3, %c0_4] : memref<4x64xf32, #tpu.memory_space<vmem>>, vector<1x64xf32>
    %c1 = arith.constant 1 : index
    %c0_5 = arith.constant 0 : index
    %4 = vector.load %arg3[%c1, %c0_5] : memref<4x64xf32, #tpu.memory_space<vmem>>, vector<1x64xf32>
    %c2 = arith.constant 2 : index
    %c0_6 = arith.constant 0 : index
    %5 = vector.load %arg3[%c2, %c0_6] : memref<4x64xf32, #tpu.memory_space<vmem>>, vector<1x64xf32>
    %c3 = arith.constant 3 : index
    %c0_7 = arith.constant 0 : index
    %6 = vector.load %arg3[%c3, %c0_7] : memref<4x64xf32, #tpu.memory_space<vmem>>, vector<1x64xf32>
    %7 = vector.broadcast %3 : vector<1x64xf32> to vector<512x64xf32>
    %8 = arith.addf %2, %7 : vector<512x64xf32>
    %9 = vector.broadcast %4 : vector<1x64xf32> to vector<512x64xf32>
    %10 = arith.mulf %8, %9 : vector<512x64xf32>
    %11 = vector.broadcast %5 : vector<1x64xf32> to vector<512x64xf32>
    %12 = arith.addf %10, %11 : vector<512x64xf32>
    %cst_8 = arith.constant 0.000000e+00 : f32
    %13 = vector.broadcast %cst_8 : f32 to vector<512x64xf32>
    %14 = arith.maximumf %12, %13 : vector<512x64xf32>
    %cst_9 = arith.constant 0.000000e+00 : f32
    %15 = vector.broadcast %cst_9 : f32 to vector<512x64xf32>
    %16 = arith.maximumf %8, %15 : vector<512x64xf32>
    %17 = vector.broadcast %4 : vector<1x64xf32> to vector<512x64xf32>
    %18 = arith.mulf %16, %17 : vector<512x64xf32>
    %19 = vector.broadcast %5 : vector<1x64xf32> to vector<512x64xf32>
    %20 = arith.addf %18, %19 : vector<512x64xf32>
    %21 = vector.broadcast %6 : vector<1x64xf32> to vector<512x64xf32>
    %22 = arith.mulf %21, %14 : vector<512x64xf32>
    %cst_10 = arith.constant 1.000000e+00 : f32
    %23 = vector.broadcast %cst_10 : f32 to vector<1x64xf32>
    %24 = arith.subf %23, %6 : vector<1x64xf32>
    %25 = vector.broadcast %24 : vector<1x64xf32> to vector<512x64xf32>
    %26 = arith.mulf %25, %20 : vector<512x64xf32>
    %27 = arith.addf %22, %26 : vector<512x64xf32>
    %c0_11 = arith.constant 0 : index
    %c0_12 = arith.constant 0 : index
    %28 = vector.load %arg4[%c0_11, %c0_12] : memref<512x64xf32, #tpu.memory_space<vmem>>, vector<512x64xf32>
    tpu.vector_store %arg4[%c0_11, %c0_12], %27 {strides = array<i32>} : memref<512x64xf32, #tpu.memory_space<vmem>>, vector<512x64xf32>,
    return
  }
  func.func @transform_0(%arg0: i32) -> (i32, i32) {
    %c0_i32 = arith.constant 0 : i32
    %c0_i32_0 = arith.constant 0 : i32
    return %arg0, %c0_i32 : i32, i32
  }
  func.func @transform_1(%arg0: i32) -> (i32, i32) {
    %c0_i32 = arith.constant 0 : i32
    %c0_i32_0 = arith.constant 0 : i32
    %c0_i32_1 = arith.constant 0 : i32
    return %c0_i32, %c0_i32_0 : i32, i32
  }
  func.func @transform_2(%arg0: i32) -> (i32, i32) {
    %c0_i32 = arith.constant 0 : i32
    %c0_i32_0 = arith.constant 0 : i32
    %c0_i32_1 = arith.constant 0 : i32
    return %c0_i32, %c0_i32_0 : i32, i32
  }
  func.func @transform_3(%arg0: i32) -> (i32, i32) {
    %c0_i32 = arith.constant 0 : i32
    %c0_i32_0 = arith.constant 0 : i32
    return %arg0, %c0_i32 : i32, i32
  }
}

module attributes {stable_mosaic.version = 11 : i64} {
  func.func @_conv_kernel(%arg0: i32, %arg1: memref<256x1344xbf16, #tpu.memory_space<vmem>>, %arg2: memref<1344x64xbf16, #tpu.memory_space<vmem>>, %arg3: memref<4x64xf32, #tpu.memory_space<vmem>>, %arg4: memref<256x64xf32, #tpu.memory_space<vmem>>) attributes {dimension_semantics = [#tpu.dimension_semantics<parallel>], iteration_bounds = array<i64: 2>, scalar_prefetch = 0 : i64, scratch_operands = 0 : i64, tpu.core_type = #tpu.core_type<tc>, window_params = [{transform_indices = @transform_0, window_bounds = array<i64: 256, 1344>}, {pipeline_mode = #tpu.pipeline_mode<synchronous>, transform_indices = @transform_1, window_bounds = array<i64: 1344, 64>}, {pipeline_mode = #tpu.pipeline_mode<synchronous>, transform_indices = @transform_2, window_bounds = array<i64: 4, 64>}, {transform_indices = @transform_3, window_bounds = array<i64: 256, 64>}]} {
    %c0 = arith.constant 0 : index
    %c0_0 = arith.constant 0 : index
    %0 = vector.load %arg1[%c0, %c0_0] : memref<256x1344xbf16, #tpu.memory_space<vmem>>, vector<256x1344xbf16>
    %c0_1 = arith.constant 0 : index
    %c0_2 = arith.constant 0 : index
    %1 = vector.load %arg2[%c0_1, %c0_2] : memref<1344x64xbf16, #tpu.memory_space<vmem>>, vector<1344x64xbf16>
    %cst = arith.constant dense<0.000000e+00> : vector<256x64xf32>
    %2 = tpu.matmul %0, %1, %cst {dimension_numbers = #tpu.dot_dimension_numbers<[1], [0], [0], [1], [0, 0, 1, 1], [], []>} : vector<256x1344xbf16>, vector<1344x64xbf16>, vector<256x64xf32> -> vector<256x64xf32>
    %c0_3 = arith.constant 0 : index
    %c0_4 = arith.constant 0 : index
    %3 = vector.load %arg3[%c0_3, %c0_4] : memref<4x64xf32, #tpu.memory_space<vmem>>, vector<1x64xf32>
    %c1 = arith.constant 1 : index
    %c0_5 = arith.constant 0 : index
    %4 = vector.load %arg3[%c1, %c0_5] : memref<4x64xf32, #tpu.memory_space<vmem>>, vector<1x64xf32>
    %c2 = arith.constant 2 : index
    %c0_6 = arith.constant 0 : index
    %5 = vector.load %arg3[%c2, %c0_6] : memref<4x64xf32, #tpu.memory_space<vmem>>, vector<1x64xf32>
    %c3 = arith.constant 3 : index
    %c0_7 = arith.constant 0 : index
    %6 = vector.load %arg3[%c3, %c0_7] : memref<4x64xf32, #tpu.memory_space<vmem>>, vector<1x64xf32>
    %7 = vector.broadcast %3 : vector<1x64xf32> to vector<256x64xf32>
    %8 = arith.addf %2, %7 : vector<256x64xf32>
    %9 = vector.broadcast %4 : vector<1x64xf32> to vector<256x64xf32>
    %10 = arith.mulf %8, %9 : vector<256x64xf32>
    %11 = vector.broadcast %5 : vector<1x64xf32> to vector<256x64xf32>
    %12 = arith.addf %10, %11 : vector<256x64xf32>
    %cst_8 = arith.constant 0.000000e+00 : f32
    %13 = vector.broadcast %cst_8 : f32 to vector<256x64xf32>
    %14 = arith.maximumf %12, %13 : vector<256x64xf32>
    %cst_9 = arith.constant 0.000000e+00 : f32
    %15 = vector.broadcast %cst_9 : f32 to vector<256x64xf32>
    %16 = arith.maximumf %8, %15 : vector<256x64xf32>
    %17 = vector.broadcast %4 : vector<1x64xf32> to vector<256x64xf32>
    %18 = arith.mulf %16, %17 : vector<256x64xf32>
    %19 = vector.broadcast %5 : vector<1x64xf32> to vector<256x64xf32>
    %20 = arith.addf %18, %19 : vector<256x64xf32>
    %21 = vector.broadcast %6 : vector<1x64xf32> to vector<256x64xf32>
    %22 = arith.mulf %21, %14 : vector<256x64xf32>
    %cst_10 = arith.constant 1.000000e+00 : f32
    %23 = vector.broadcast %cst_10 : f32 to vector<1x64xf32>
    %24 = arith.subf %23, %6 : vector<1x64xf32>
    %25 = vector.broadcast %24 : vector<1x64xf32> to vector<256x64xf32>
    %26 = arith.mulf %25, %20 : vector<256x64xf32>
    %27 = arith.addf %22, %26 : vector<256x64xf32>
    %c0_11 = arith.constant 0 : index
    %c0_12 = arith.constant 0 : index
    %28 = vector.load %arg4[%c0_11, %c0_12] : memref<256x64xf32, #tpu.memory_space<vmem>>, vector<256x64xf32>
    tpu.vector_store %arg4[%c0_11, %c0_12], %27 {strides = array<i32>} : memref<256x64xf32, #tpu.memory_space<vmem>>, vector<256x64xf32>,
    return
  }
  func.func @transform_0(%arg0: i32) -> (i32, i32) {
    %c0_i32 = arith.constant 0 : i32
    %c0_i32_0 = arith.constant 0 : i32
    return %arg0, %c0_i32 : i32, i32
  }
  func.func @transform_1(%arg0: i32) -> (i32, i32) {
    %c0_i32 = arith.constant 0 : i32
    %c0_i32_0 = arith.constant 0 : i32
    %c0_i32_1 = arith.constant 0 : i32
    return %c0_i32, %c0_i32_0 : i32, i32
  }
  func.func @transform_2(%arg0: i32) -> (i32, i32) {
    %c0_i32 = arith.constant 0 : i32
    %c0_i32_0 = arith.constant 0 : i32
    %c0_i32_1 = arith.constant 0 : i32
    return %c0_i32, %c0_i32_0 : i32, i32
  }
  func.func @transform_3(%arg0: i32) -> (i32, i32) {
    %c0_i32 = arith.constant 0 : i32
    %c0_i32_0 = arith.constant 0 : i32
    return %arg0, %c0_i32 : i32, i32
  }
}

module attributes {stable_mosaic.version = 11 : i64} {
  func.func @_conv_kernel(%arg0: i32, %arg1: memref<128x320xbf16, #tpu.memory_space<vmem>>, %arg2: memref<320x64xbf16, #tpu.memory_space<vmem>>, %arg3: memref<4x64xf32, #tpu.memory_space<vmem>>, %arg4: memref<128x64xf32, #tpu.memory_space<vmem>>) attributes {dimension_semantics = [#tpu.dimension_semantics<parallel>], iteration_bounds = array<i64: 2>, scalar_prefetch = 0 : i64, scratch_operands = 0 : i64, tpu.core_type = #tpu.core_type<tc>, window_params = [{transform_indices = @transform_0, window_bounds = array<i64: 128, 320>}, {pipeline_mode = #tpu.pipeline_mode<synchronous>, transform_indices = @transform_1, window_bounds = array<i64: 320, 64>}, {pipeline_mode = #tpu.pipeline_mode<synchronous>, transform_indices = @transform_2, window_bounds = array<i64: 4, 64>}, {transform_indices = @transform_3, window_bounds = array<i64: 128, 64>}]} {
    %c0 = arith.constant 0 : index
    %c0_0 = arith.constant 0 : index
    %0 = vector.load %arg1[%c0, %c0_0] : memref<128x320xbf16, #tpu.memory_space<vmem>>, vector<128x320xbf16>
    %c0_1 = arith.constant 0 : index
    %c0_2 = arith.constant 0 : index
    %1 = vector.load %arg2[%c0_1, %c0_2] : memref<320x64xbf16, #tpu.memory_space<vmem>>, vector<320x64xbf16>
    %cst = arith.constant dense<0.000000e+00> : vector<128x64xf32>
    %2 = tpu.matmul %0, %1, %cst {dimension_numbers = #tpu.dot_dimension_numbers<[1], [0], [0], [1], [0, 0, 1, 1], [], []>} : vector<128x320xbf16>, vector<320x64xbf16>, vector<128x64xf32> -> vector<128x64xf32>
    %c0_3 = arith.constant 0 : index
    %c0_4 = arith.constant 0 : index
    %3 = vector.load %arg3[%c0_3, %c0_4] : memref<4x64xf32, #tpu.memory_space<vmem>>, vector<1x64xf32>
    %c1 = arith.constant 1 : index
    %c0_5 = arith.constant 0 : index
    %4 = vector.load %arg3[%c1, %c0_5] : memref<4x64xf32, #tpu.memory_space<vmem>>, vector<1x64xf32>
    %c2 = arith.constant 2 : index
    %c0_6 = arith.constant 0 : index
    %5 = vector.load %arg3[%c2, %c0_6] : memref<4x64xf32, #tpu.memory_space<vmem>>, vector<1x64xf32>
    %c3 = arith.constant 3 : index
    %c0_7 = arith.constant 0 : index
    %6 = vector.load %arg3[%c3, %c0_7] : memref<4x64xf32, #tpu.memory_space<vmem>>, vector<1x64xf32>
    %7 = vector.broadcast %3 : vector<1x64xf32> to vector<128x64xf32>
    %8 = arith.addf %2, %7 : vector<128x64xf32>
    %9 = vector.broadcast %4 : vector<1x64xf32> to vector<128x64xf32>
    %10 = arith.mulf %8, %9 : vector<128x64xf32>
    %11 = vector.broadcast %5 : vector<1x64xf32> to vector<128x64xf32>
    %12 = arith.addf %10, %11 : vector<128x64xf32>
    %cst_8 = arith.constant 0.000000e+00 : f32
    %13 = vector.broadcast %cst_8 : f32 to vector<128x64xf32>
    %14 = arith.maximumf %12, %13 : vector<128x64xf32>
    %cst_9 = arith.constant 0.000000e+00 : f32
    %15 = vector.broadcast %cst_9 : f32 to vector<128x64xf32>
    %16 = arith.maximumf %8, %15 : vector<128x64xf32>
    %17 = vector.broadcast %4 : vector<1x64xf32> to vector<128x64xf32>
    %18 = arith.mulf %16, %17 : vector<128x64xf32>
    %19 = vector.broadcast %5 : vector<1x64xf32> to vector<128x64xf32>
    %20 = arith.addf %18, %19 : vector<128x64xf32>
    %21 = vector.broadcast %6 : vector<1x64xf32> to vector<128x64xf32>
    %22 = arith.mulf %21, %14 : vector<128x64xf32>
    %cst_10 = arith.constant 1.000000e+00 : f32
    %23 = vector.broadcast %cst_10 : f32 to vector<1x64xf32>
    %24 = arith.subf %23, %6 : vector<1x64xf32>
    %25 = vector.broadcast %24 : vector<1x64xf32> to vector<128x64xf32>
    %26 = arith.mulf %25, %20 : vector<128x64xf32>
    %27 = arith.addf %22, %26 : vector<128x64xf32>
    %c0_11 = arith.constant 0 : index
    %c0_12 = arith.constant 0 : index
    %28 = vector.load %arg4[%c0_11, %c0_12] : memref<128x64xf32, #tpu.memory_space<vmem>>, vector<128x64xf32>
    tpu.vector_store %arg4[%c0_11, %c0_12], %27 {strides = array<i32>} : memref<128x64xf32, #tpu.memory_space<vmem>>, vector<128x64xf32>,
    return
  }
  func.func @transform_0(%arg0: i32) -> (i32, i32) {
    %c0_i32 = arith.constant 0 : i32
    %c0_i32_0 = arith.constant 0 : i32
    return %arg0, %c0_i32 : i32, i32
  }
  func.func @transform_1(%arg0: i32) -> (i32, i32) {
    %c0_i32 = arith.constant 0 : i32
    %c0_i32_0 = arith.constant 0 : i32
    %c0_i32_1 = arith.constant 0 : i32
    return %c0_i32, %c0_i32_0 : i32, i32
  }
  func.func @transform_2(%arg0: i32) -> (i32, i32) {
    %c0_i32 = arith.constant 0 : i32
    %c0_i32_0 = arith.constant 0 : i32
    %c0_i32_1 = arith.constant 0 : i32
    return %c0_i32, %c0_i32_0 : i32, i32
  }
  func.func @transform_3(%arg0: i32) -> (i32, i32) {
    %c0_i32 = arith.constant 0 : i32
    %c0_i32_0 = arith.constant 0 : i32
    return %arg0, %c0_i32 : i32, i32
  }
}

module attributes {stable_mosaic.version = 11 : i64} {
  func.func @_conv_kernel(%arg0: i32, %arg1: memref<64x64xbf16, #tpu.memory_space<vmem>>, %arg2: memref<64x32xbf16, #tpu.memory_space<vmem>>, %arg3: memref<4x32xf32, #tpu.memory_space<vmem>>, %arg4: memref<64x32xf32, #tpu.memory_space<vmem>>) attributes {dimension_semantics = [#tpu.dimension_semantics<parallel>], iteration_bounds = array<i64: 1>, scalar_prefetch = 0 : i64, scratch_operands = 0 : i64, tpu.core_type = #tpu.core_type<tc>, window_params = [{transform_indices = @transform_0, window_bounds = array<i64: 64, 64>}, {pipeline_mode = #tpu.pipeline_mode<synchronous>, transform_indices = @transform_1, window_bounds = array<i64: 64, 32>}, {pipeline_mode = #tpu.pipeline_mode<synchronous>, transform_indices = @transform_2, window_bounds = array<i64: 4, 32>}, {transform_indices = @transform_3, window_bounds = array<i64: 64, 32>}]} {
    %c0 = arith.constant 0 : index
    %c0_0 = arith.constant 0 : index
    %0 = vector.load %arg1[%c0, %c0_0] : memref<64x64xbf16, #tpu.memory_space<vmem>>, vector<64x64xbf16>
    %c0_1 = arith.constant 0 : index
    %c0_2 = arith.constant 0 : index
    %1 = vector.load %arg2[%c0_1, %c0_2] : memref<64x32xbf16, #tpu.memory_space<vmem>>, vector<64x32xbf16>
    %cst = arith.constant dense<0.000000e+00> : vector<64x32xf32>
    %2 = tpu.matmul %0, %1, %cst {dimension_numbers = #tpu.dot_dimension_numbers<[1], [0], [0], [1], [0, 0, 1, 1], [], []>} : vector<64x64xbf16>, vector<64x32xbf16>, vector<64x32xf32> -> vector<64x32xf32>
    %c0_3 = arith.constant 0 : index
    %c0_4 = arith.constant 0 : index
    %3 = vector.load %arg3[%c0_3, %c0_4] : memref<4x32xf32, #tpu.memory_space<vmem>>, vector<1x32xf32>
    %c1 = arith.constant 1 : index
    %c0_5 = arith.constant 0 : index
    %4 = vector.load %arg3[%c1, %c0_5] : memref<4x32xf32, #tpu.memory_space<vmem>>, vector<1x32xf32>
    %c2 = arith.constant 2 : index
    %c0_6 = arith.constant 0 : index
    %5 = vector.load %arg3[%c2, %c0_6] : memref<4x32xf32, #tpu.memory_space<vmem>>, vector<1x32xf32>
    %c3 = arith.constant 3 : index
    %c0_7 = arith.constant 0 : index
    %6 = vector.load %arg3[%c3, %c0_7] : memref<4x32xf32, #tpu.memory_space<vmem>>, vector<1x32xf32>
    %7 = vector.broadcast %3 : vector<1x32xf32> to vector<64x32xf32>
    %8 = arith.addf %2, %7 : vector<64x32xf32>
    %9 = vector.broadcast %4 : vector<1x32xf32> to vector<64x32xf32>
    %10 = arith.mulf %8, %9 : vector<64x32xf32>
    %11 = vector.broadcast %5 : vector<1x32xf32> to vector<64x32xf32>
    %12 = arith.addf %10, %11 : vector<64x32xf32>
    %cst_8 = arith.constant 0.000000e+00 : f32
    %13 = vector.broadcast %cst_8 : f32 to vector<64x32xf32>
    %14 = arith.maximumf %12, %13 : vector<64x32xf32>
    %cst_9 = arith.constant 0.000000e+00 : f32
    %15 = vector.broadcast %cst_9 : f32 to vector<64x32xf32>
    %16 = arith.maximumf %8, %15 : vector<64x32xf32>
    %17 = vector.broadcast %4 : vector<1x32xf32> to vector<64x32xf32>
    %18 = arith.mulf %16, %17 : vector<64x32xf32>
    %19 = vector.broadcast %5 : vector<1x32xf32> to vector<64x32xf32>
    %20 = arith.addf %18, %19 : vector<64x32xf32>
    %21 = vector.broadcast %6 : vector<1x32xf32> to vector<64x32xf32>
    %22 = arith.mulf %21, %14 : vector<64x32xf32>
    %cst_10 = arith.constant 1.000000e+00 : f32
    %23 = vector.broadcast %cst_10 : f32 to vector<1x32xf32>
    %24 = arith.subf %23, %6 : vector<1x32xf32>
    %25 = vector.broadcast %24 : vector<1x32xf32> to vector<64x32xf32>
    %26 = arith.mulf %25, %20 : vector<64x32xf32>
    %27 = arith.addf %22, %26 : vector<64x32xf32>
    %c0_11 = arith.constant 0 : index
    %c0_12 = arith.constant 0 : index
    %28 = vector.load %arg4[%c0_11, %c0_12] : memref<64x32xf32, #tpu.memory_space<vmem>>, vector<64x32xf32>
    tpu.vector_store %arg4[%c0_11, %c0_12], %27 {strides = array<i32>} : memref<64x32xf32, #tpu.memory_space<vmem>>, vector<64x32xf32>,
    return
  }
  func.func @transform_0(%arg0: i32) -> (i32, i32) {
    %c0_i32 = arith.constant 0 : i32
    %c0_i32_0 = arith.constant 0 : i32
    return %arg0, %c0_i32 : i32, i32
  }
  func.func @transform_1(%arg0: i32) -> (i32, i32) {
    %c0_i32 = arith.constant 0 : i32
    %c0_i32_0 = arith.constant 0 : i32
    %c0_i32_1 = arith.constant 0 : i32
    return %c0_i32, %c0_i32_0 : i32, i32
  }
  func.func @transform_2(%arg0: i32) -> (i32, i32) {
    %c0_i32 = arith.constant 0 : i32
    %c0_i32_0 = arith.constant 0 : i32
    %c0_i32_1 = arith.constant 0 : i32
    return %c0_i32, %c0_i32_0 : i32, i32
  }
  func.func @transform_3(%arg0: i32) -> (i32, i32) {
    %c0_i32 = arith.constant 0 : i32
    %c0_i32_0 = arith.constant 0 : i32
    return %arg0, %c0_i32 : i32, i32
  }
}

module attributes {stable_mosaic.version = 11 : i64} {
  func.func @_conv_kernel(%arg0: i32, %arg1: memref<64x160xbf16, #tpu.memory_space<vmem>>, %arg2: memref<160x128xbf16, #tpu.memory_space<vmem>>, %arg3: memref<4x128xf32, #tpu.memory_space<vmem>>, %arg4: memref<64x128xf32, #tpu.memory_space<vmem>>) attributes {dimension_semantics = [#tpu.dimension_semantics<parallel>], iteration_bounds = array<i64: 1>, scalar_prefetch = 0 : i64, scratch_operands = 0 : i64, tpu.core_type = #tpu.core_type<tc>, window_params = [{transform_indices = @transform_0, window_bounds = array<i64: 64, 160>}, {pipeline_mode = #tpu.pipeline_mode<synchronous>, transform_indices = @transform_1, window_bounds = array<i64: 160, 128>}, {pipeline_mode = #tpu.pipeline_mode<synchronous>, transform_indices = @transform_2, window_bounds = array<i64: 4, 128>}, {transform_indices = @transform_3, window_bounds = array<i64: 64, 128>}]} {
    %c0 = arith.constant 0 : index
    %c0_0 = arith.constant 0 : index
    %0 = vector.load %arg1[%c0, %c0_0] : memref<64x160xbf16, #tpu.memory_space<vmem>>, vector<64x160xbf16>
    %c0_1 = arith.constant 0 : index
    %c0_2 = arith.constant 0 : index
    %1 = vector.load %arg2[%c0_1, %c0_2] : memref<160x128xbf16, #tpu.memory_space<vmem>>, vector<160x128xbf16>
    %cst = arith.constant dense<0.000000e+00> : vector<64x128xf32>
    %2 = tpu.matmul %0, %1, %cst {dimension_numbers = #tpu.dot_dimension_numbers<[1], [0], [0], [1], [0, 0, 1, 1], [], []>} : vector<64x160xbf16>, vector<160x128xbf16>, vector<64x128xf32> -> vector<64x128xf32>
    %c0_3 = arith.constant 0 : index
    %c0_4 = arith.constant 0 : index
    %3 = vector.load %arg3[%c0_3, %c0_4] : memref<4x128xf32, #tpu.memory_space<vmem>>, vector<1x128xf32>
    %c1 = arith.constant 1 : index
    %c0_5 = arith.constant 0 : index
    %4 = vector.load %arg3[%c1, %c0_5] : memref<4x128xf32, #tpu.memory_space<vmem>>, vector<1x128xf32>
    %c2 = arith.constant 2 : index
    %c0_6 = arith.constant 0 : index
    %5 = vector.load %arg3[%c2, %c0_6] : memref<4x128xf32, #tpu.memory_space<vmem>>, vector<1x128xf32>
    %c3 = arith.constant 3 : index
    %c0_7 = arith.constant 0 : index
    %6 = vector.load %arg3[%c3, %c0_7] : memref<4x128xf32, #tpu.memory_space<vmem>>, vector<1x128xf32>
    %7 = vector.broadcast %3 : vector<1x128xf32> to vector<64x128xf32>
    %8 = arith.addf %2, %7 : vector<64x128xf32>
    %9 = vector.broadcast %4 : vector<1x128xf32> to vector<64x128xf32>
    %10 = arith.mulf %8, %9 : vector<64x128xf32>
    %11 = vector.broadcast %5 : vector<1x128xf32> to vector<64x128xf32>
    %12 = arith.addf %10, %11 : vector<64x128xf32>
    %cst_8 = arith.constant 0.000000e+00 : f32
    %13 = vector.broadcast %cst_8 : f32 to vector<64x128xf32>
    %14 = arith.maximumf %12, %13 : vector<64x128xf32>
    %cst_9 = arith.constant 0.000000e+00 : f32
    %15 = vector.broadcast %cst_9 : f32 to vector<64x128xf32>
    %16 = arith.maximumf %8, %15 : vector<64x128xf32>
    %17 = vector.broadcast %4 : vector<1x128xf32> to vector<64x128xf32>
    %18 = arith.mulf %16, %17 : vector<64x128xf32>
    %19 = vector.broadcast %5 : vector<1x128xf32> to vector<64x128xf32>
    %20 = arith.addf %18, %19 : vector<64x128xf32>
    %21 = vector.broadcast %6 : vector<1x128xf32> to vector<64x128xf32>
    %22 = arith.mulf %21, %14 : vector<64x128xf32>
    %cst_10 = arith.constant 1.000000e+00 : f32
    %23 = vector.broadcast %cst_10 : f32 to vector<1x128xf32>
    %24 = arith.subf %23, %6 : vector<1x128xf32>
    %25 = vector.broadcast %24 : vector<1x128xf32> to vector<64x128xf32>
    %26 = arith.mulf %25, %20 : vector<64x128xf32>
    %27 = arith.addf %22, %26 : vector<64x128xf32>
    %c0_11 = arith.constant 0 : index
    %c0_12 = arith.constant 0 : index
    %28 = vector.load %arg4[%c0_11, %c0_12] : memref<64x128xf32, #tpu.memory_space<vmem>>, vector<64x128xf32>
    tpu.vector_store %arg4[%c0_11, %c0_12], %27 {strides = array<i32>} : memref<64x128xf32, #tpu.memory_space<vmem>>, vector<64x128xf32>,
    return
  }
  func.func @transform_0(%arg0: i32) -> (i32, i32) {
    %c0_i32 = arith.constant 0 : i32
    %c0_i32_0 = arith.constant 0 : i32
    return %arg0, %c0_i32 : i32, i32
  }
  func.func @transform_1(%arg0: i32) -> (i32, i32) {
    %c0_i32 = arith.constant 0 : i32
    %c0_i32_0 = arith.constant 0 : i32
    %c0_i32_1 = arith.constant 0 : i32
    return %c0_i32, %c0_i32_0 : i32, i32
  }
  func.func @transform_2(%arg0: i32) -> (i32, i32) {
    %c0_i32 = arith.constant 0 : i32
    %c0_i32_0 = arith.constant 0 : i32
    %c0_i32_1 = arith.constant 0 : i32
    return %c0_i32, %c0_i32_0 : i32, i32
  }
  func.func @transform_3(%arg0: i32) -> (i32, i32) {
    %c0_i32 = arith.constant 0 : i32
    %c0_i32_0 = arith.constant 0 : i32
    return %arg0, %c0_i32 : i32, i32
  }
}

module attributes {stable_mosaic.version = 11 : i64} {
  func.func @_conv_kernel(%arg0: i32, %arg1: memref<64x64xbf16, #tpu.memory_space<vmem>>, %arg2: memref<64x128xbf16, #tpu.memory_space<vmem>>, %arg3: memref<4x128xf32, #tpu.memory_space<vmem>>, %arg4: memref<64x128xf32, #tpu.memory_space<vmem>>) attributes {dimension_semantics = [#tpu.dimension_semantics<parallel>], iteration_bounds = array<i64: 1>, scalar_prefetch = 0 : i64, scratch_operands = 0 : i64, tpu.core_type = #tpu.core_type<tc>, window_params = [{transform_indices = @transform_0, window_bounds = array<i64: 64, 64>}, {pipeline_mode = #tpu.pipeline_mode<synchronous>, transform_indices = @transform_1, window_bounds = array<i64: 64, 128>}, {pipeline_mode = #tpu.pipeline_mode<synchronous>, transform_indices = @transform_2, window_bounds = array<i64: 4, 128>}, {transform_indices = @transform_3, window_bounds = array<i64: 64, 128>}]} {
    %c0 = arith.constant 0 : index
    %c0_0 = arith.constant 0 : index
    %0 = vector.load %arg1[%c0, %c0_0] : memref<64x64xbf16, #tpu.memory_space<vmem>>, vector<64x64xbf16>
    %c0_1 = arith.constant 0 : index
    %c0_2 = arith.constant 0 : index
    %1 = vector.load %arg2[%c0_1, %c0_2] : memref<64x128xbf16, #tpu.memory_space<vmem>>, vector<64x128xbf16>
    %cst = arith.constant dense<0.000000e+00> : vector<64x128xf32>
    %2 = tpu.matmul %0, %1, %cst {dimension_numbers = #tpu.dot_dimension_numbers<[1], [0], [0], [1], [0, 0, 1, 1], [], []>} : vector<64x64xbf16>, vector<64x128xbf16>, vector<64x128xf32> -> vector<64x128xf32>
    %c0_3 = arith.constant 0 : index
    %c0_4 = arith.constant 0 : index
    %3 = vector.load %arg3[%c0_3, %c0_4] : memref<4x128xf32, #tpu.memory_space<vmem>>, vector<1x128xf32>
    %c1 = arith.constant 1 : index
    %c0_5 = arith.constant 0 : index
    %4 = vector.load %arg3[%c1, %c0_5] : memref<4x128xf32, #tpu.memory_space<vmem>>, vector<1x128xf32>
    %c2 = arith.constant 2 : index
    %c0_6 = arith.constant 0 : index
    %5 = vector.load %arg3[%c2, %c0_6] : memref<4x128xf32, #tpu.memory_space<vmem>>, vector<1x128xf32>
    %c3 = arith.constant 3 : index
    %c0_7 = arith.constant 0 : index
    %6 = vector.load %arg3[%c3, %c0_7] : memref<4x128xf32, #tpu.memory_space<vmem>>, vector<1x128xf32>
    %7 = vector.broadcast %3 : vector<1x128xf32> to vector<64x128xf32>
    %8 = arith.addf %2, %7 : vector<64x128xf32>
    %9 = vector.broadcast %4 : vector<1x128xf32> to vector<64x128xf32>
    %10 = arith.mulf %8, %9 : vector<64x128xf32>
    %11 = vector.broadcast %5 : vector<1x128xf32> to vector<64x128xf32>
    %12 = arith.addf %10, %11 : vector<64x128xf32>
    %cst_8 = arith.constant 0.000000e+00 : f32
    %13 = vector.broadcast %cst_8 : f32 to vector<64x128xf32>
    %14 = arith.maximumf %12, %13 : vector<64x128xf32>
    %cst_9 = arith.constant 0.000000e+00 : f32
    %15 = vector.broadcast %cst_9 : f32 to vector<64x128xf32>
    %16 = arith.maximumf %8, %15 : vector<64x128xf32>
    %17 = vector.broadcast %4 : vector<1x128xf32> to vector<64x128xf32>
    %18 = arith.mulf %16, %17 : vector<64x128xf32>
    %19 = vector.broadcast %5 : vector<1x128xf32> to vector<64x128xf32>
    %20 = arith.addf %18, %19 : vector<64x128xf32>
    %21 = vector.broadcast %6 : vector<1x128xf32> to vector<64x128xf32>
    %22 = arith.mulf %21, %14 : vector<64x128xf32>
    %cst_10 = arith.constant 1.000000e+00 : f32
    %23 = vector.broadcast %cst_10 : f32 to vector<1x128xf32>
    %24 = arith.subf %23, %6 : vector<1x128xf32>
    %25 = vector.broadcast %24 : vector<1x128xf32> to vector<64x128xf32>
    %26 = arith.mulf %25, %20 : vector<64x128xf32>
    %27 = arith.addf %22, %26 : vector<64x128xf32>
    %c0_11 = arith.constant 0 : index
    %c0_12 = arith.constant 0 : index
    %28 = vector.load %arg4[%c0_11, %c0_12] : memref<64x128xf32, #tpu.memory_space<vmem>>, vector<64x128xf32>
    tpu.vector_store %arg4[%c0_11, %c0_12], %27 {strides = array<i32>} : memref<64x128xf32, #tpu.memory_space<vmem>>, vector<64x128xf32>,
    return
  }
  func.func @transform_0(%arg0: i32) -> (i32, i32) {
    %c0_i32 = arith.constant 0 : i32
    %c0_i32_0 = arith.constant 0 : i32
    return %arg0, %c0_i32 : i32, i32
  }
  func.func @transform_1(%arg0: i32) -> (i32, i32) {
    %c0_i32 = arith.constant 0 : i32
    %c0_i32_0 = arith.constant 0 : i32
    %c0_i32_1 = arith.constant 0 : i32
    return %c0_i32, %c0_i32_0 : i32, i32
  }
  func.func @transform_2(%arg0: i32) -> (i32, i32) {
    %c0_i32 = arith.constant 0 : i32
    %c0_i32_0 = arith.constant 0 : i32
    %c0_i32_1 = arith.constant 0 : i32
    return %c0_i32, %c0_i32_0 : i32, i32
  }
  func.func @transform_3(%arg0: i32) -> (i32, i32) {
    %c0_i32 = arith.constant 0 : i32
    %c0_i32_0 = arith.constant 0 : i32
    return %arg0, %c0_i32 : i32, i32
  }
}

module attributes {stable_mosaic.version = 11 : i64} {
  func.func @_conv_kernel(%arg0: i32, %arg1: memref<32x128xbf16, #tpu.memory_space<vmem>>, %arg2: memref<128x32xbf16, #tpu.memory_space<vmem>>, %arg3: memref<4x32xf32, #tpu.memory_space<vmem>>, %arg4: memref<32x32xf32, #tpu.memory_space<vmem>>) attributes {dimension_semantics = [#tpu.dimension_semantics<parallel>], iteration_bounds = array<i64: 1>, scalar_prefetch = 0 : i64, scratch_operands = 0 : i64, tpu.core_type = #tpu.core_type<tc>, window_params = [{transform_indices = @transform_0, window_bounds = array<i64: 32, 128>}, {pipeline_mode = #tpu.pipeline_mode<synchronous>, transform_indices = @transform_1, window_bounds = array<i64: 128, 32>}, {pipeline_mode = #tpu.pipeline_mode<synchronous>, transform_indices = @transform_2, window_bounds = array<i64: 4, 32>}, {transform_indices = @transform_3, window_bounds = array<i64: 32, 32>}]} {
    %c0 = arith.constant 0 : index
    %c0_0 = arith.constant 0 : index
    %0 = vector.load %arg1[%c0, %c0_0] : memref<32x128xbf16, #tpu.memory_space<vmem>>, vector<32x128xbf16>
    %c0_1 = arith.constant 0 : index
    %c0_2 = arith.constant 0 : index
    %1 = vector.load %arg2[%c0_1, %c0_2] : memref<128x32xbf16, #tpu.memory_space<vmem>>, vector<128x32xbf16>
    %cst = arith.constant dense<0.000000e+00> : vector<32x32xf32>
    %2 = tpu.matmul %0, %1, %cst {dimension_numbers = #tpu.dot_dimension_numbers<[1], [0], [0], [1], [0, 0, 1, 1], [], []>} : vector<32x128xbf16>, vector<128x32xbf16>, vector<32x32xf32> -> vector<32x32xf32>
    %c0_3 = arith.constant 0 : index
    %c0_4 = arith.constant 0 : index
    %3 = vector.load %arg3[%c0_3, %c0_4] : memref<4x32xf32, #tpu.memory_space<vmem>>, vector<1x32xf32>
    %c1 = arith.constant 1 : index
    %c0_5 = arith.constant 0 : index
    %4 = vector.load %arg3[%c1, %c0_5] : memref<4x32xf32, #tpu.memory_space<vmem>>, vector<1x32xf32>
    %c2 = arith.constant 2 : index
    %c0_6 = arith.constant 0 : index
    %5 = vector.load %arg3[%c2, %c0_6] : memref<4x32xf32, #tpu.memory_space<vmem>>, vector<1x32xf32>
    %c3 = arith.constant 3 : index
    %c0_7 = arith.constant 0 : index
    %6 = vector.load %arg3[%c3, %c0_7] : memref<4x32xf32, #tpu.memory_space<vmem>>, vector<1x32xf32>
    %7 = vector.broadcast %3 : vector<1x32xf32> to vector<32x32xf32>
    %8 = arith.addf %2, %7 : vector<32x32xf32>
    %9 = vector.broadcast %4 : vector<1x32xf32> to vector<32x32xf32>
    %10 = arith.mulf %8, %9 : vector<32x32xf32>
    %11 = vector.broadcast %5 : vector<1x32xf32> to vector<32x32xf32>
    %12 = arith.addf %10, %11 : vector<32x32xf32>
    %cst_8 = arith.constant 0.000000e+00 : f32
    %13 = vector.broadcast %cst_8 : f32 to vector<32x32xf32>
    %14 = arith.maximumf %12, %13 : vector<32x32xf32>
    %cst_9 = arith.constant 0.000000e+00 : f32
    %15 = vector.broadcast %cst_9 : f32 to vector<32x32xf32>
    %16 = arith.maximumf %8, %15 : vector<32x32xf32>
    %17 = vector.broadcast %4 : vector<1x32xf32> to vector<32x32xf32>
    %18 = arith.mulf %16, %17 : vector<32x32xf32>
    %19 = vector.broadcast %5 : vector<1x32xf32> to vector<32x32xf32>
    %20 = arith.addf %18, %19 : vector<32x32xf32>
    %21 = vector.broadcast %6 : vector<1x32xf32> to vector<32x32xf32>
    %22 = arith.mulf %21, %14 : vector<32x32xf32>
    %cst_10 = arith.constant 1.000000e+00 : f32
    %23 = vector.broadcast %cst_10 : f32 to vector<1x32xf32>
    %24 = arith.subf %23, %6 : vector<1x32xf32>
    %25 = vector.broadcast %24 : vector<1x32xf32> to vector<32x32xf32>
    %26 = arith.mulf %25, %20 : vector<32x32xf32>
    %27 = arith.addf %22, %26 : vector<32x32xf32>
    %c0_11 = arith.constant 0 : index
    %c0_12 = arith.constant 0 : index
    %28 = vector.load %arg4[%c0_11, %c0_12] : memref<32x32xf32, #tpu.memory_space<vmem>>, vector<32x32xf32>
    tpu.vector_store %arg4[%c0_11, %c0_12], %27 {strides = array<i32>} : memref<32x32xf32, #tpu.memory_space<vmem>>, vector<32x32xf32>,
    return
  }
  func.func @transform_0(%arg0: i32) -> (i32, i32) {
    %c0_i32 = arith.constant 0 : i32
    %c0_i32_0 = arith.constant 0 : i32
    return %arg0, %c0_i32 : i32, i32
  }
  func.func @transform_1(%arg0: i32) -> (i32, i32) {
    %c0_i32 = arith.constant 0 : i32
    %c0_i32_0 = arith.constant 0 : i32
    %c0_i32_1 = arith.constant 0 : i32
    return %c0_i32, %c0_i32_0 : i32, i32
  }
  func.func @transform_2(%arg0: i32) -> (i32, i32) {
    %c0_i32 = arith.constant 0 : i32
    %c0_i32_0 = arith.constant 0 : i32
    %c0_i32_1 = arith.constant 0 : i32
    return %c0_i32, %c0_i32_0 : i32, i32
  }
  func.func @transform_3(%arg0: i32) -> (i32, i32) {
    %c0_i32 = arith.constant 0 : i32
    %c0_i32_0 = arith.constant 0 : i32
    return %arg0, %c0_i32 : i32, i32
  }
}

module attributes {stable_mosaic.version = 11 : i64} {
  func.func @_conv_kernel(%arg0: i32, %arg1: memref<32x160xbf16, #tpu.memory_space<vmem>>, %arg2: memref<160x128xbf16, #tpu.memory_space<vmem>>, %arg3: memref<4x128xf32, #tpu.memory_space<vmem>>, %arg4: memref<32x128xf32, #tpu.memory_space<vmem>>) attributes {dimension_semantics = [#tpu.dimension_semantics<parallel>], iteration_bounds = array<i64: 1>, scalar_prefetch = 0 : i64, scratch_operands = 0 : i64, tpu.core_type = #tpu.core_type<tc>, window_params = [{transform_indices = @transform_0, window_bounds = array<i64: 32, 160>}, {pipeline_mode = #tpu.pipeline_mode<synchronous>, transform_indices = @transform_1, window_bounds = array<i64: 160, 128>}, {pipeline_mode = #tpu.pipeline_mode<synchronous>, transform_indices = @transform_2, window_bounds = array<i64: 4, 128>}, {transform_indices = @transform_3, window_bounds = array<i64: 32, 128>}]} {
    %c0 = arith.constant 0 : index
    %c0_0 = arith.constant 0 : index
    %0 = vector.load %arg1[%c0, %c0_0] : memref<32x160xbf16, #tpu.memory_space<vmem>>, vector<32x160xbf16>
    %c0_1 = arith.constant 0 : index
    %c0_2 = arith.constant 0 : index
    %1 = vector.load %arg2[%c0_1, %c0_2] : memref<160x128xbf16, #tpu.memory_space<vmem>>, vector<160x128xbf16>
    %cst = arith.constant dense<0.000000e+00> : vector<32x128xf32>
    %2 = tpu.matmul %0, %1, %cst {dimension_numbers = #tpu.dot_dimension_numbers<[1], [0], [0], [1], [0, 0, 1, 1], [], []>} : vector<32x160xbf16>, vector<160x128xbf16>, vector<32x128xf32> -> vector<32x128xf32>
    %c0_3 = arith.constant 0 : index
    %c0_4 = arith.constant 0 : index
    %3 = vector.load %arg3[%c0_3, %c0_4] : memref<4x128xf32, #tpu.memory_space<vmem>>, vector<1x128xf32>
    %c1 = arith.constant 1 : index
    %c0_5 = arith.constant 0 : index
    %4 = vector.load %arg3[%c1, %c0_5] : memref<4x128xf32, #tpu.memory_space<vmem>>, vector<1x128xf32>
    %c2 = arith.constant 2 : index
    %c0_6 = arith.constant 0 : index
    %5 = vector.load %arg3[%c2, %c0_6] : memref<4x128xf32, #tpu.memory_space<vmem>>, vector<1x128xf32>
    %c3 = arith.constant 3 : index
    %c0_7 = arith.constant 0 : index
    %6 = vector.load %arg3[%c3, %c0_7] : memref<4x128xf32, #tpu.memory_space<vmem>>, vector<1x128xf32>
    %7 = vector.broadcast %3 : vector<1x128xf32> to vector<32x128xf32>
    %8 = arith.addf %2, %7 : vector<32x128xf32>
    %9 = vector.broadcast %4 : vector<1x128xf32> to vector<32x128xf32>
    %10 = arith.mulf %8, %9 : vector<32x128xf32>
    %11 = vector.broadcast %5 : vector<1x128xf32> to vector<32x128xf32>
    %12 = arith.addf %10, %11 : vector<32x128xf32>
    %cst_8 = arith.constant 0.000000e+00 : f32
    %13 = vector.broadcast %cst_8 : f32 to vector<32x128xf32>
    %14 = arith.maximumf %12, %13 : vector<32x128xf32>
    %cst_9 = arith.constant 0.000000e+00 : f32
    %15 = vector.broadcast %cst_9 : f32 to vector<32x128xf32>
    %16 = arith.maximumf %8, %15 : vector<32x128xf32>
    %17 = vector.broadcast %4 : vector<1x128xf32> to vector<32x128xf32>
    %18 = arith.mulf %16, %17 : vector<32x128xf32>
    %19 = vector.broadcast %5 : vector<1x128xf32> to vector<32x128xf32>
    %20 = arith.addf %18, %19 : vector<32x128xf32>
    %21 = vector.broadcast %6 : vector<1x128xf32> to vector<32x128xf32>
    %22 = arith.mulf %21, %14 : vector<32x128xf32>
    %cst_10 = arith.constant 1.000000e+00 : f32
    %23 = vector.broadcast %cst_10 : f32 to vector<1x128xf32>
    %24 = arith.subf %23, %6 : vector<1x128xf32>
    %25 = vector.broadcast %24 : vector<1x128xf32> to vector<32x128xf32>
    %26 = arith.mulf %25, %20 : vector<32x128xf32>
    %27 = arith.addf %22, %26 : vector<32x128xf32>
    %c0_11 = arith.constant 0 : index
    %c0_12 = arith.constant 0 : index
    %28 = vector.load %arg4[%c0_11, %c0_12] : memref<32x128xf32, #tpu.memory_space<vmem>>, vector<32x128xf32>
    tpu.vector_store %arg4[%c0_11, %c0_12], %27 {strides = array<i32>} : memref<32x128xf32, #tpu.memory_space<vmem>>, vector<32x128xf32>,
    return
  }
  func.func @transform_0(%arg0: i32) -> (i32, i32) {
    %c0_i32 = arith.constant 0 : i32
    %c0_i32_0 = arith.constant 0 : i32
    return %arg0, %c0_i32 : i32, i32
  }
  func.func @transform_1(%arg0: i32) -> (i32, i32) {
    %c0_i32 = arith.constant 0 : i32
    %c0_i32_0 = arith.constant 0 : i32
    %c0_i32_1 = arith.constant 0 : i32
    return %c0_i32, %c0_i32_0 : i32, i32
  }
  func.func @transform_2(%arg0: i32) -> (i32, i32) {
    %c0_i32 = arith.constant 0 : i32
    %c0_i32_0 = arith.constant 0 : i32
    %c0_i32_1 = arith.constant 0 : i32
    return %c0_i32, %c0_i32_0 : i32, i32
  }
  func.func @transform_3(%arg0: i32) -> (i32, i32) {
    %c0_i32 = arith.constant 0 : i32
    %c0_i32_0 = arith.constant 0 : i32
    return %arg0, %c0_i32 : i32, i32
  }
}

module attributes {stable_mosaic.version = 11 : i64} {
  func.func @_conv_kernel(%arg0: i32, %arg1: memref<32x160xbf16, #tpu.memory_space<vmem>>, %arg2: memref<160x128xbf16, #tpu.memory_space<vmem>>, %arg3: memref<4x128xf32, #tpu.memory_space<vmem>>, %arg4: memref<32x128xf32, #tpu.memory_space<vmem>>, %arg5: memref<32x128xf32, #tpu.memory_space<vmem>>) attributes {dimension_semantics = [#tpu.dimension_semantics<parallel>], iteration_bounds = array<i64: 1>, scalar_prefetch = 0 : i64, scratch_operands = 0 : i64, tpu.core_type = #tpu.core_type<tc>, window_params = [{transform_indices = @transform_0, window_bounds = array<i64: 32, 160>}, {pipeline_mode = #tpu.pipeline_mode<synchronous>, transform_indices = @transform_1, window_bounds = array<i64: 160, 128>}, {pipeline_mode = #tpu.pipeline_mode<synchronous>, transform_indices = @transform_2, window_bounds = array<i64: 4, 128>}, {transform_indices = @transform_3, window_bounds = array<i64: 32, 128>}, {transform_indices = @transform_4, window_bounds = array<i64: 32, 128>}]} {
    %c0 = arith.constant 0 : index
    %c0_0 = arith.constant 0 : index
    %0 = vector.load %arg1[%c0, %c0_0] : memref<32x160xbf16, #tpu.memory_space<vmem>>, vector<32x160xbf16>
    %c0_1 = arith.constant 0 : index
    %c0_2 = arith.constant 0 : index
    %1 = vector.load %arg2[%c0_1, %c0_2] : memref<160x128xbf16, #tpu.memory_space<vmem>>, vector<160x128xbf16>
    %cst = arith.constant dense<0.000000e+00> : vector<32x128xf32>
    %2 = tpu.matmul %0, %1, %cst {dimension_numbers = #tpu.dot_dimension_numbers<[1], [0], [0], [1], [0, 0, 1, 1], [], []>} : vector<32x160xbf16>, vector<160x128xbf16>, vector<32x128xf32> -> vector<32x128xf32>
    %c0_3 = arith.constant 0 : index
    %c0_4 = arith.constant 0 : index
    %3 = vector.load %arg3[%c0_3, %c0_4] : memref<4x128xf32, #tpu.memory_space<vmem>>, vector<1x128xf32>
    %c1 = arith.constant 1 : index
    %c0_5 = arith.constant 0 : index
    %4 = vector.load %arg3[%c1, %c0_5] : memref<4x128xf32, #tpu.memory_space<vmem>>, vector<1x128xf32>
    %c2 = arith.constant 2 : index
    %c0_6 = arith.constant 0 : index
    %5 = vector.load %arg3[%c2, %c0_6] : memref<4x128xf32, #tpu.memory_space<vmem>>, vector<1x128xf32>
    %c3 = arith.constant 3 : index
    %c0_7 = arith.constant 0 : index
    %6 = vector.load %arg3[%c3, %c0_7] : memref<4x128xf32, #tpu.memory_space<vmem>>, vector<1x128xf32>
    %7 = vector.broadcast %3 : vector<1x128xf32> to vector<32x128xf32>
    %8 = arith.addf %2, %7 : vector<32x128xf32>
    %9 = vector.broadcast %4 : vector<1x128xf32> to vector<32x128xf32>
    %10 = arith.mulf %8, %9 : vector<32x128xf32>
    %11 = vector.broadcast %5 : vector<1x128xf32> to vector<32x128xf32>
    %12 = arith.addf %10, %11 : vector<32x128xf32>
    %cst_8 = arith.constant 0.000000e+00 : f32
    %13 = vector.broadcast %cst_8 : f32 to vector<32x128xf32>
    %14 = arith.maximumf %12, %13 : vector<32x128xf32>
    %cst_9 = arith.constant 0.000000e+00 : f32
    %15 = vector.broadcast %cst_9 : f32 to vector<32x128xf32>
    %16 = arith.maximumf %8, %15 : vector<32x128xf32>
    %17 = vector.broadcast %4 : vector<1x128xf32> to vector<32x128xf32>
    %18 = arith.mulf %16, %17 : vector<32x128xf32>
    %19 = vector.broadcast %5 : vector<1x128xf32> to vector<32x128xf32>
    %20 = arith.addf %18, %19 : vector<32x128xf32>
    %21 = vector.broadcast %6 : vector<1x128xf32> to vector<32x128xf32>
    %22 = arith.mulf %21, %14 : vector<32x128xf32>
    %cst_10 = arith.constant 1.000000e+00 : f32
    %23 = vector.broadcast %cst_10 : f32 to vector<1x128xf32>
    %24 = arith.subf %23, %6 : vector<1x128xf32>
    %25 = vector.broadcast %24 : vector<1x128xf32> to vector<32x128xf32>
    %26 = arith.mulf %25, %20 : vector<32x128xf32>
    %27 = arith.addf %22, %26 : vector<32x128xf32>
    %c0_11 = arith.constant 0 : index
    %c0_12 = arith.constant 0 : index
    %28 = vector.load %arg4[%c0_11, %c0_12] : memref<32x128xf32, #tpu.memory_space<vmem>>, vector<32x128xf32>
    %29 = arith.addf %27, %28 : vector<32x128xf32>
    %c0_13 = arith.constant 0 : index
    %c0_14 = arith.constant 0 : index
    %30 = vector.load %arg5[%c0_13, %c0_14] : memref<32x128xf32, #tpu.memory_space<vmem>>, vector<32x128xf32>
    tpu.vector_store %arg5[%c0_13, %c0_14], %29 {strides = array<i32>} : memref<32x128xf32, #tpu.memory_space<vmem>>, vector<32x128xf32>,
    return
  }
  func.func @transform_0(%arg0: i32) -> (i32, i32) {
    %c0_i32 = arith.constant 0 : i32
    %c0_i32_0 = arith.constant 0 : i32
    return %arg0, %c0_i32 : i32, i32
  }
  func.func @transform_1(%arg0: i32) -> (i32, i32) {
    %c0_i32 = arith.constant 0 : i32
    %c0_i32_0 = arith.constant 0 : i32
    %c0_i32_1 = arith.constant 0 : i32
    return %c0_i32, %c0_i32_0 : i32, i32
  }
  func.func @transform_2(%arg0: i32) -> (i32, i32) {
    %c0_i32 = arith.constant 0 : i32
    %c0_i32_0 = arith.constant 0 : i32
    %c0_i32_1 = arith.constant 0 : i32
    return %c0_i32, %c0_i32_0 : i32, i32
  }
  func.func @transform_3(%arg0: i32) -> (i32, i32) {
    %c0_i32 = arith.constant 0 : i32
    %c0_i32_0 = arith.constant 0 : i32
    return %arg0, %c0_i32 : i32, i32
  }
  func.func @transform_4(%arg0: i32) -> (i32, i32) {
    %c0_i32 = arith.constant 0 : i32
    %c0_i32_0 = arith.constant 0 : i32
    return %arg0, %c0_i32 : i32, i32
  }
}

module attributes {stable_mosaic.version = 11 : i64} {
  func.func @_conv_kernel(%arg0: i32, %arg1: memref<16x128xbf16, #tpu.memory_space<vmem>>, %arg2: memref<128x32xbf16, #tpu.memory_space<vmem>>, %arg3: memref<4x32xf32, #tpu.memory_space<vmem>>, %arg4: memref<16x32xf32, #tpu.memory_space<vmem>>) attributes {dimension_semantics = [#tpu.dimension_semantics<parallel>], iteration_bounds = array<i64: 1>, scalar_prefetch = 0 : i64, scratch_operands = 0 : i64, tpu.core_type = #tpu.core_type<tc>, window_params = [{transform_indices = @transform_0, window_bounds = array<i64: 16, 128>}, {pipeline_mode = #tpu.pipeline_mode<synchronous>, transform_indices = @transform_1, window_bounds = array<i64: 128, 32>}, {pipeline_mode = #tpu.pipeline_mode<synchronous>, transform_indices = @transform_2, window_bounds = array<i64: 4, 32>}, {transform_indices = @transform_3, window_bounds = array<i64: 16, 32>}]} {
    %c0 = arith.constant 0 : index
    %c0_0 = arith.constant 0 : index
    %0 = vector.load %arg1[%c0, %c0_0] : memref<16x128xbf16, #tpu.memory_space<vmem>>, vector<16x128xbf16>
    %c0_1 = arith.constant 0 : index
    %c0_2 = arith.constant 0 : index
    %1 = vector.load %arg2[%c0_1, %c0_2] : memref<128x32xbf16, #tpu.memory_space<vmem>>, vector<128x32xbf16>
    %cst = arith.constant dense<0.000000e+00> : vector<16x32xf32>
    %2 = tpu.matmul %0, %1, %cst {dimension_numbers = #tpu.dot_dimension_numbers<[1], [0], [0], [1], [0, 0, 1, 1], [], []>} : vector<16x128xbf16>, vector<128x32xbf16>, vector<16x32xf32> -> vector<16x32xf32>
    %c0_3 = arith.constant 0 : index
    %c0_4 = arith.constant 0 : index
    %3 = vector.load %arg3[%c0_3, %c0_4] : memref<4x32xf32, #tpu.memory_space<vmem>>, vector<1x32xf32>
    %c1 = arith.constant 1 : index
    %c0_5 = arith.constant 0 : index
    %4 = vector.load %arg3[%c1, %c0_5] : memref<4x32xf32, #tpu.memory_space<vmem>>, vector<1x32xf32>
    %c2 = arith.constant 2 : index
    %c0_6 = arith.constant 0 : index
    %5 = vector.load %arg3[%c2, %c0_6] : memref<4x32xf32, #tpu.memory_space<vmem>>, vector<1x32xf32>
    %c3 = arith.constant 3 : index
    %c0_7 = arith.constant 0 : index
    %6 = vector.load %arg3[%c3, %c0_7] : memref<4x32xf32, #tpu.memory_space<vmem>>, vector<1x32xf32>
    %7 = vector.broadcast %3 : vector<1x32xf32> to vector<16x32xf32>
    %8 = arith.addf %2, %7 : vector<16x32xf32>
    %9 = vector.broadcast %4 : vector<1x32xf32> to vector<16x32xf32>
    %10 = arith.mulf %8, %9 : vector<16x32xf32>
    %11 = vector.broadcast %5 : vector<1x32xf32> to vector<16x32xf32>
    %12 = arith.addf %10, %11 : vector<16x32xf32>
    %cst_8 = arith.constant 0.000000e+00 : f32
    %13 = vector.broadcast %cst_8 : f32 to vector<16x32xf32>
    %14 = arith.maximumf %12, %13 : vector<16x32xf32>
    %cst_9 = arith.constant 0.000000e+00 : f32
    %15 = vector.broadcast %cst_9 : f32 to vector<16x32xf32>
    %16 = arith.maximumf %8, %15 : vector<16x32xf32>
    %17 = vector.broadcast %4 : vector<1x32xf32> to vector<16x32xf32>
    %18 = arith.mulf %16, %17 : vector<16x32xf32>
    %19 = vector.broadcast %5 : vector<1x32xf32> to vector<16x32xf32>
    %20 = arith.addf %18, %19 : vector<16x32xf32>
    %21 = vector.broadcast %6 : vector<1x32xf32> to vector<16x32xf32>
    %22 = arith.mulf %21, %14 : vector<16x32xf32>
    %cst_10 = arith.constant 1.000000e+00 : f32
    %23 = vector.broadcast %cst_10 : f32 to vector<1x32xf32>
    %24 = arith.subf %23, %6 : vector<1x32xf32>
    %25 = vector.broadcast %24 : vector<1x32xf32> to vector<16x32xf32>
    %26 = arith.mulf %25, %20 : vector<16x32xf32>
    %27 = arith.addf %22, %26 : vector<16x32xf32>
    %c0_11 = arith.constant 0 : index
    %c0_12 = arith.constant 0 : index
    %28 = vector.load %arg4[%c0_11, %c0_12] : memref<16x32xf32, #tpu.memory_space<vmem>>, vector<16x32xf32>
    tpu.vector_store %arg4[%c0_11, %c0_12], %27 {strides = array<i32>} : memref<16x32xf32, #tpu.memory_space<vmem>>, vector<16x32xf32>,
    return
  }
  func.func @transform_0(%arg0: i32) -> (i32, i32) {
    %c0_i32 = arith.constant 0 : i32
    %c0_i32_0 = arith.constant 0 : i32
    return %arg0, %c0_i32 : i32, i32
  }
  func.func @transform_1(%arg0: i32) -> (i32, i32) {
    %c0_i32 = arith.constant 0 : i32
    %c0_i32_0 = arith.constant 0 : i32
    %c0_i32_1 = arith.constant 0 : i32
    return %c0_i32, %c0_i32_0 : i32, i32
  }
  func.func @transform_2(%arg0: i32) -> (i32, i32) {
    %c0_i32 = arith.constant 0 : i32
    %c0_i32_0 = arith.constant 0 : i32
    %c0_i32_1 = arith.constant 0 : i32
    return %c0_i32, %c0_i32_0 : i32, i32
  }
  func.func @transform_3(%arg0: i32) -> (i32, i32) {
    %c0_i32 = arith.constant 0 : i32
    %c0_i32_0 = arith.constant 0 : i32
    return %arg0, %c0_i32 : i32, i32
  }
}

module attributes {stable_mosaic.version = 11 : i64} {
  func.func @_conv_kernel(%arg0: i32, %arg1: memref<16x160xbf16, #tpu.memory_space<vmem>>, %arg2: memref<160x128xbf16, #tpu.memory_space<vmem>>, %arg3: memref<4x128xf32, #tpu.memory_space<vmem>>, %arg4: memref<16x128xf32, #tpu.memory_space<vmem>>, %arg5: memref<16x128xf32, #tpu.memory_space<vmem>>) attributes {dimension_semantics = [#tpu.dimension_semantics<parallel>], iteration_bounds = array<i64: 1>, scalar_prefetch = 0 : i64, scratch_operands = 0 : i64, tpu.core_type = #tpu.core_type<tc>, window_params = [{transform_indices = @transform_0, window_bounds = array<i64: 16, 160>}, {pipeline_mode = #tpu.pipeline_mode<synchronous>, transform_indices = @transform_1, window_bounds = array<i64: 160, 128>}, {pipeline_mode = #tpu.pipeline_mode<synchronous>, transform_indices = @transform_2, window_bounds = array<i64: 4, 128>}, {transform_indices = @transform_3, window_bounds = array<i64: 16, 128>}, {transform_indices = @transform_4, window_bounds = array<i64: 16, 128>}]} {
    %c0 = arith.constant 0 : index
    %c0_0 = arith.constant 0 : index
    %0 = vector.load %arg1[%c0, %c0_0] : memref<16x160xbf16, #tpu.memory_space<vmem>>, vector<16x160xbf16>
    %c0_1 = arith.constant 0 : index
    %c0_2 = arith.constant 0 : index
    %1 = vector.load %arg2[%c0_1, %c0_2] : memref<160x128xbf16, #tpu.memory_space<vmem>>, vector<160x128xbf16>
    %cst = arith.constant dense<0.000000e+00> : vector<16x128xf32>
    %2 = tpu.matmul %0, %1, %cst {dimension_numbers = #tpu.dot_dimension_numbers<[1], [0], [0], [1], [0, 0, 1, 1], [], []>} : vector<16x160xbf16>, vector<160x128xbf16>, vector<16x128xf32> -> vector<16x128xf32>
    %c0_3 = arith.constant 0 : index
    %c0_4 = arith.constant 0 : index
    %3 = vector.load %arg3[%c0_3, %c0_4] : memref<4x128xf32, #tpu.memory_space<vmem>>, vector<1x128xf32>
    %c1 = arith.constant 1 : index
    %c0_5 = arith.constant 0 : index
    %4 = vector.load %arg3[%c1, %c0_5] : memref<4x128xf32, #tpu.memory_space<vmem>>, vector<1x128xf32>
    %c2 = arith.constant 2 : index
    %c0_6 = arith.constant 0 : index
    %5 = vector.load %arg3[%c2, %c0_6] : memref<4x128xf32, #tpu.memory_space<vmem>>, vector<1x128xf32>
    %c3 = arith.constant 3 : index
    %c0_7 = arith.constant 0 : index
    %6 = vector.load %arg3[%c3, %c0_7] : memref<4x128xf32, #tpu.memory_space<vmem>>, vector<1x128xf32>
    %7 = vector.broadcast %3 : vector<1x128xf32> to vector<16x128xf32>
    %8 = arith.addf %2, %7 : vector<16x128xf32>
    %9 = vector.broadcast %4 : vector<1x128xf32> to vector<16x128xf32>
    %10 = arith.mulf %8, %9 : vector<16x128xf32>
    %11 = vector.broadcast %5 : vector<1x128xf32> to vector<16x128xf32>
    %12 = arith.addf %10, %11 : vector<16x128xf32>
    %cst_8 = arith.constant 0.000000e+00 : f32
    %13 = vector.broadcast %cst_8 : f32 to vector<16x128xf32>
    %14 = arith.maximumf %12, %13 : vector<16x128xf32>
    %cst_9 = arith.constant 0.000000e+00 : f32
    %15 = vector.broadcast %cst_9 : f32 to vector<16x128xf32>
    %16 = arith.maximumf %8, %15 : vector<16x128xf32>
    %17 = vector.broadcast %4 : vector<1x128xf32> to vector<16x128xf32>
    %18 = arith.mulf %16, %17 : vector<16x128xf32>
    %19 = vector.broadcast %5 : vector<1x128xf32> to vector<16x128xf32>
    %20 = arith.addf %18, %19 : vector<16x128xf32>
    %21 = vector.broadcast %6 : vector<1x128xf32> to vector<16x128xf32>
    %22 = arith.mulf %21, %14 : vector<16x128xf32>
    %cst_10 = arith.constant 1.000000e+00 : f32
    %23 = vector.broadcast %cst_10 : f32 to vector<1x128xf32>
    %24 = arith.subf %23, %6 : vector<1x128xf32>
    %25 = vector.broadcast %24 : vector<1x128xf32> to vector<16x128xf32>
    %26 = arith.mulf %25, %20 : vector<16x128xf32>
    %27 = arith.addf %22, %26 : vector<16x128xf32>
    %c0_11 = arith.constant 0 : index
    %c0_12 = arith.constant 0 : index
    %28 = vector.load %arg4[%c0_11, %c0_12] : memref<16x128xf32, #tpu.memory_space<vmem>>, vector<16x128xf32>
    %29 = arith.addf %27, %28 : vector<16x128xf32>
    %c0_13 = arith.constant 0 : index
    %c0_14 = arith.constant 0 : index
    %30 = vector.load %arg5[%c0_13, %c0_14] : memref<16x128xf32, #tpu.memory_space<vmem>>, vector<16x128xf32>
    tpu.vector_store %arg5[%c0_13, %c0_14], %29 {strides = array<i32>} : memref<16x128xf32, #tpu.memory_space<vmem>>, vector<16x128xf32>,
    return
  }
  func.func @transform_0(%arg0: i32) -> (i32, i32) {
    %c0_i32 = arith.constant 0 : i32
    %c0_i32_0 = arith.constant 0 : i32
    return %arg0, %c0_i32 : i32, i32
  }
  func.func @transform_1(%arg0: i32) -> (i32, i32) {
    %c0_i32 = arith.constant 0 : i32
    %c0_i32_0 = arith.constant 0 : i32
    %c0_i32_1 = arith.constant 0 : i32
    return %c0_i32, %c0_i32_0 : i32, i32
  }
  func.func @transform_2(%arg0: i32) -> (i32, i32) {
    %c0_i32 = arith.constant 0 : i32
    %c0_i32_0 = arith.constant 0 : i32
    %c0_i32_1 = arith.constant 0 : i32
    return %c0_i32, %c0_i32_0 : i32, i32
  }
  func.func @transform_3(%arg0: i32) -> (i32, i32) {
    %c0_i32 = arith.constant 0 : i32
    %c0_i32_0 = arith.constant 0 : i32
    return %arg0, %c0_i32 : i32, i32
  }
  func.func @transform_4(%arg0: i32) -> (i32, i32) {
    %c0_i32 = arith.constant 0 : i32
    %c0_i32_0 = arith.constant 0 : i32
    return %arg0, %c0_i32 : i32, i32
  }
}

module attributes {stable_mosaic.version = 11 : i64} {
  func.func @_conv_kernel(%arg0: i32, %arg1: memref<16x160xbf16, #tpu.memory_space<vmem>>, %arg2: memref<160x128xbf16, #tpu.memory_space<vmem>>, %arg3: memref<4x128xf32, #tpu.memory_space<vmem>>, %arg4: memref<16x128xf32, #tpu.memory_space<vmem>>) attributes {dimension_semantics = [#tpu.dimension_semantics<parallel>], iteration_bounds = array<i64: 1>, scalar_prefetch = 0 : i64, scratch_operands = 0 : i64, tpu.core_type = #tpu.core_type<tc>, window_params = [{transform_indices = @transform_0, window_bounds = array<i64: 16, 160>}, {pipeline_mode = #tpu.pipeline_mode<synchronous>, transform_indices = @transform_1, window_bounds = array<i64: 160, 128>}, {pipeline_mode = #tpu.pipeline_mode<synchronous>, transform_indices = @transform_2, window_bounds = array<i64: 4, 128>}, {transform_indices = @transform_3, window_bounds = array<i64: 16, 128>}]} {
    %c0 = arith.constant 0 : index
    %c0_0 = arith.constant 0 : index
    %0 = vector.load %arg1[%c0, %c0_0] : memref<16x160xbf16, #tpu.memory_space<vmem>>, vector<16x160xbf16>
    %c0_1 = arith.constant 0 : index
    %c0_2 = arith.constant 0 : index
    %1 = vector.load %arg2[%c0_1, %c0_2] : memref<160x128xbf16, #tpu.memory_space<vmem>>, vector<160x128xbf16>
    %cst = arith.constant dense<0.000000e+00> : vector<16x128xf32>
    %2 = tpu.matmul %0, %1, %cst {dimension_numbers = #tpu.dot_dimension_numbers<[1], [0], [0], [1], [0, 0, 1, 1], [], []>} : vector<16x160xbf16>, vector<160x128xbf16>, vector<16x128xf32> -> vector<16x128xf32>
    %c0_3 = arith.constant 0 : index
    %c0_4 = arith.constant 0 : index
    %3 = vector.load %arg3[%c0_3, %c0_4] : memref<4x128xf32, #tpu.memory_space<vmem>>, vector<1x128xf32>
    %c1 = arith.constant 1 : index
    %c0_5 = arith.constant 0 : index
    %4 = vector.load %arg3[%c1, %c0_5] : memref<4x128xf32, #tpu.memory_space<vmem>>, vector<1x128xf32>
    %c2 = arith.constant 2 : index
    %c0_6 = arith.constant 0 : index
    %5 = vector.load %arg3[%c2, %c0_6] : memref<4x128xf32, #tpu.memory_space<vmem>>, vector<1x128xf32>
    %c3 = arith.constant 3 : index
    %c0_7 = arith.constant 0 : index
    %6 = vector.load %arg3[%c3, %c0_7] : memref<4x128xf32, #tpu.memory_space<vmem>>, vector<1x128xf32>
    %7 = vector.broadcast %3 : vector<1x128xf32> to vector<16x128xf32>
    %8 = arith.addf %2, %7 : vector<16x128xf32>
    %9 = vector.broadcast %4 : vector<1x128xf32> to vector<16x128xf32>
    %10 = arith.mulf %8, %9 : vector<16x128xf32>
    %11 = vector.broadcast %5 : vector<1x128xf32> to vector<16x128xf32>
    %12 = arith.addf %10, %11 : vector<16x128xf32>
    %cst_8 = arith.constant 0.000000e+00 : f32
    %13 = vector.broadcast %cst_8 : f32 to vector<16x128xf32>
    %14 = arith.maximumf %12, %13 : vector<16x128xf32>
    %cst_9 = arith.constant 0.000000e+00 : f32
    %15 = vector.broadcast %cst_9 : f32 to vector<16x128xf32>
    %16 = arith.maximumf %8, %15 : vector<16x128xf32>
    %17 = vector.broadcast %4 : vector<1x128xf32> to vector<16x128xf32>
    %18 = arith.mulf %16, %17 : vector<16x128xf32>
    %19 = vector.broadcast %5 : vector<1x128xf32> to vector<16x128xf32>
    %20 = arith.addf %18, %19 : vector<16x128xf32>
    %21 = vector.broadcast %6 : vector<1x128xf32> to vector<16x128xf32>
    %22 = arith.mulf %21, %14 : vector<16x128xf32>
    %cst_10 = arith.constant 1.000000e+00 : f32
    %23 = vector.broadcast %cst_10 : f32 to vector<1x128xf32>
    %24 = arith.subf %23, %6 : vector<1x128xf32>
    %25 = vector.broadcast %24 : vector<1x128xf32> to vector<16x128xf32>
    %26 = arith.mulf %25, %20 : vector<16x128xf32>
    %27 = arith.addf %22, %26 : vector<16x128xf32>
    %c0_11 = arith.constant 0 : index
    %c0_12 = arith.constant 0 : index
    %28 = vector.load %arg4[%c0_11, %c0_12] : memref<16x128xf32, #tpu.memory_space<vmem>>, vector<16x128xf32>
    tpu.vector_store %arg4[%c0_11, %c0_12], %27 {strides = array<i32>} : memref<16x128xf32, #tpu.memory_space<vmem>>, vector<16x128xf32>,
    return
  }
  func.func @transform_0(%arg0: i32) -> (i32, i32) {
    %c0_i32 = arith.constant 0 : i32
    %c0_i32_0 = arith.constant 0 : i32
    return %arg0, %c0_i32 : i32, i32
  }
  func.func @transform_1(%arg0: i32) -> (i32, i32) {
    %c0_i32 = arith.constant 0 : i32
    %c0_i32_0 = arith.constant 0 : i32
    %c0_i32_1 = arith.constant 0 : i32
    return %c0_i32, %c0_i32_0 : i32, i32
  }
  func.func @transform_2(%arg0: i32) -> (i32, i32) {
    %c0_i32 = arith.constant 0 : i32
    %c0_i32_0 = arith.constant 0 : i32
    %c0_i32_1 = arith.constant 0 : i32
    return %c0_i32, %c0_i32_0 : i32, i32
  }
  func.func @transform_3(%arg0: i32) -> (i32, i32) {
    %c0_i32 = arith.constant 0 : i32
    %c0_i32_0 = arith.constant 0 : i32
    return %arg0, %c0_i32 : i32, i32
  }
}

module attributes {stable_mosaic.version = 11 : i64} {
  func.func @_conv_kernel(%arg0: i32, %arg1: memref<8x128xbf16, #tpu.memory_space<vmem>>, %arg2: memref<128x64xbf16, #tpu.memory_space<vmem>>, %arg3: memref<4x64xf32, #tpu.memory_space<vmem>>, %arg4: memref<8x64xf32, #tpu.memory_space<vmem>>) attributes {dimension_semantics = [#tpu.dimension_semantics<parallel>], iteration_bounds = array<i64: 1>, scalar_prefetch = 0 : i64, scratch_operands = 0 : i64, tpu.core_type = #tpu.core_type<tc>, window_params = [{transform_indices = @transform_0, window_bounds = array<i64: 8, 128>}, {pipeline_mode = #tpu.pipeline_mode<synchronous>, transform_indices = @transform_1, window_bounds = array<i64: 128, 64>}, {pipeline_mode = #tpu.pipeline_mode<synchronous>, transform_indices = @transform_2, window_bounds = array<i64: 4, 64>}, {transform_indices = @transform_3, window_bounds = array<i64: 8, 64>}]} {
    %c0 = arith.constant 0 : index
    %c0_0 = arith.constant 0 : index
    %0 = vector.load %arg1[%c0, %c0_0] : memref<8x128xbf16, #tpu.memory_space<vmem>>, vector<8x128xbf16>
    %c0_1 = arith.constant 0 : index
    %c0_2 = arith.constant 0 : index
    %1 = vector.load %arg2[%c0_1, %c0_2] : memref<128x64xbf16, #tpu.memory_space<vmem>>, vector<128x64xbf16>
    %cst = arith.constant dense<0.000000e+00> : vector<8x64xf32>
    %2 = tpu.matmul %0, %1, %cst {dimension_numbers = #tpu.dot_dimension_numbers<[1], [0], [0], [1], [0, 0, 1, 1], [], []>} : vector<8x128xbf16>, vector<128x64xbf16>, vector<8x64xf32> -> vector<8x64xf32>
    %c0_3 = arith.constant 0 : index
    %c0_4 = arith.constant 0 : index
    %3 = vector.load %arg3[%c0_3, %c0_4] : memref<4x64xf32, #tpu.memory_space<vmem>>, vector<1x64xf32>
    %c1 = arith.constant 1 : index
    %c0_5 = arith.constant 0 : index
    %4 = vector.load %arg3[%c1, %c0_5] : memref<4x64xf32, #tpu.memory_space<vmem>>, vector<1x64xf32>
    %c2 = arith.constant 2 : index
    %c0_6 = arith.constant 0 : index
    %5 = vector.load %arg3[%c2, %c0_6] : memref<4x64xf32, #tpu.memory_space<vmem>>, vector<1x64xf32>
    %c3 = arith.constant 3 : index
    %c0_7 = arith.constant 0 : index
    %6 = vector.load %arg3[%c3, %c0_7] : memref<4x64xf32, #tpu.memory_space<vmem>>, vector<1x64xf32>
    %7 = vector.broadcast %3 : vector<1x64xf32> to vector<8x64xf32>
    %8 = arith.addf %2, %7 : vector<8x64xf32>
    %9 = vector.broadcast %4 : vector<1x64xf32> to vector<8x64xf32>
    %10 = arith.mulf %8, %9 : vector<8x64xf32>
    %11 = vector.broadcast %5 : vector<1x64xf32> to vector<8x64xf32>
    %12 = arith.addf %10, %11 : vector<8x64xf32>
    %cst_8 = arith.constant 0.000000e+00 : f32
    %13 = vector.broadcast %cst_8 : f32 to vector<8x64xf32>
    %14 = arith.maximumf %12, %13 : vector<8x64xf32>
    %cst_9 = arith.constant 0.000000e+00 : f32
    %15 = vector.broadcast %cst_9 : f32 to vector<8x64xf32>
    %16 = arith.maximumf %8, %15 : vector<8x64xf32>
    %17 = vector.broadcast %4 : vector<1x64xf32> to vector<8x64xf32>
    %18 = arith.mulf %16, %17 : vector<8x64xf32>
    %19 = vector.broadcast %5 : vector<1x64xf32> to vector<8x64xf32>
    %20 = arith.addf %18, %19 : vector<8x64xf32>
    %21 = vector.broadcast %6 : vector<1x64xf32> to vector<8x64xf32>
    %22 = arith.mulf %21, %14 : vector<8x64xf32>
    %cst_10 = arith.constant 1.000000e+00 : f32
    %23 = vector.broadcast %cst_10 : f32 to vector<1x64xf32>
    %24 = arith.subf %23, %6 : vector<1x64xf32>
    %25 = vector.broadcast %24 : vector<1x64xf32> to vector<8x64xf32>
    %26 = arith.mulf %25, %20 : vector<8x64xf32>
    %27 = arith.addf %22, %26 : vector<8x64xf32>
    %c0_11 = arith.constant 0 : index
    %c0_12 = arith.constant 0 : index
    %28 = vector.load %arg4[%c0_11, %c0_12] : memref<8x64xf32, #tpu.memory_space<vmem>>, vector<8x64xf32>
    tpu.vector_store %arg4[%c0_11, %c0_12], %27 {strides = array<i32>} : memref<8x64xf32, #tpu.memory_space<vmem>>, vector<8x64xf32>,
    return
  }
  func.func @transform_0(%arg0: i32) -> (i32, i32) {
    %c0_i32 = arith.constant 0 : i32
    %c0_i32_0 = arith.constant 0 : i32
    return %arg0, %c0_i32 : i32, i32
  }
  func.func @transform_1(%arg0: i32) -> (i32, i32) {
    %c0_i32 = arith.constant 0 : i32
    %c0_i32_0 = arith.constant 0 : i32
    %c0_i32_1 = arith.constant 0 : i32
    return %c0_i32, %c0_i32_0 : i32, i32
  }
  func.func @transform_2(%arg0: i32) -> (i32, i32) {
    %c0_i32 = arith.constant 0 : i32
    %c0_i32_0 = arith.constant 0 : i32
    %c0_i32_1 = arith.constant 0 : i32
    return %c0_i32, %c0_i32_0 : i32, i32
  }
  func.func @transform_3(%arg0: i32) -> (i32, i32) {
    %c0_i32 = arith.constant 0 : i32
    %c0_i32_0 = arith.constant 0 : i32
    return %arg0, %c0_i32 : i32, i32
  }
}

module attributes {stable_mosaic.version = 11 : i64} {
  func.func @_conv_kernel(%arg0: i32, %arg1: memref<8x320xbf16, #tpu.memory_space<vmem>>, %arg2: memref<320x384xbf16, #tpu.memory_space<vmem>>, %arg3: memref<4x384xf32, #tpu.memory_space<vmem>>, %arg4: memref<8x384xf32, #tpu.memory_space<vmem>>) attributes {dimension_semantics = [#tpu.dimension_semantics<parallel>], iteration_bounds = array<i64: 1>, scalar_prefetch = 0 : i64, scratch_operands = 0 : i64, tpu.core_type = #tpu.core_type<tc>, window_params = [{transform_indices = @transform_0, window_bounds = array<i64: 8, 320>}, {pipeline_mode = #tpu.pipeline_mode<synchronous>, transform_indices = @transform_1, window_bounds = array<i64: 320, 384>}, {pipeline_mode = #tpu.pipeline_mode<synchronous>, transform_indices = @transform_2, window_bounds = array<i64: 4, 384>}, {transform_indices = @transform_3, window_bounds = array<i64: 8, 384>}]} {
    %c0 = arith.constant 0 : index
    %c0_0 = arith.constant 0 : index
    %0 = vector.load %arg1[%c0, %c0_0] : memref<8x320xbf16, #tpu.memory_space<vmem>>, vector<8x320xbf16>
    %c0_1 = arith.constant 0 : index
    %c0_2 = arith.constant 0 : index
    %1 = vector.load %arg2[%c0_1, %c0_2] : memref<320x384xbf16, #tpu.memory_space<vmem>>, vector<320x384xbf16>
    %cst = arith.constant dense<0.000000e+00> : vector<8x384xf32>
    %2 = tpu.matmul %0, %1, %cst {dimension_numbers = #tpu.dot_dimension_numbers<[1], [0], [0], [1], [0, 0, 1, 1], [], []>} : vector<8x320xbf16>, vector<320x384xbf16>, vector<8x384xf32> -> vector<8x384xf32>
    %c0_3 = arith.constant 0 : index
    %c0_4 = arith.constant 0 : index
    %3 = vector.load %arg3[%c0_3, %c0_4] : memref<4x384xf32, #tpu.memory_space<vmem>>, vector<1x384xf32>
    %c1 = arith.constant 1 : index
    %c0_5 = arith.constant 0 : index
    %4 = vector.load %arg3[%c1, %c0_5] : memref<4x384xf32, #tpu.memory_space<vmem>>, vector<1x384xf32>
    %c2 = arith.constant 2 : index
    %c0_6 = arith.constant 0 : index
    %5 = vector.load %arg3[%c2, %c0_6] : memref<4x384xf32, #tpu.memory_space<vmem>>, vector<1x384xf32>
    %c3 = arith.constant 3 : index
    %c0_7 = arith.constant 0 : index
    %6 = vector.load %arg3[%c3, %c0_7] : memref<4x384xf32, #tpu.memory_space<vmem>>, vector<1x384xf32>
    %7 = vector.broadcast %3 : vector<1x384xf32> to vector<8x384xf32>
    %8 = arith.addf %2, %7 : vector<8x384xf32>
    %9 = vector.broadcast %4 : vector<1x384xf32> to vector<8x384xf32>
    %10 = arith.mulf %8, %9 : vector<8x384xf32>
    %11 = vector.broadcast %5 : vector<1x384xf32> to vector<8x384xf32>
    %12 = arith.addf %10, %11 : vector<8x384xf32>
    %cst_8 = arith.constant 0.000000e+00 : f32
    %13 = vector.broadcast %cst_8 : f32 to vector<8x384xf32>
    %14 = arith.maximumf %12, %13 : vector<8x384xf32>
    %cst_9 = arith.constant 0.000000e+00 : f32
    %15 = vector.broadcast %cst_9 : f32 to vector<8x384xf32>
    %16 = arith.maximumf %8, %15 : vector<8x384xf32>
    %17 = vector.broadcast %4 : vector<1x384xf32> to vector<8x384xf32>
    %18 = arith.mulf %16, %17 : vector<8x384xf32>
    %19 = vector.broadcast %5 : vector<1x384xf32> to vector<8x384xf32>
    %20 = arith.addf %18, %19 : vector<8x384xf32>
    %21 = vector.broadcast %6 : vector<1x384xf32> to vector<8x384xf32>
    %22 = arith.mulf %21, %14 : vector<8x384xf32>
    %cst_10 = arith.constant 1.000000e+00 : f32
    %23 = vector.broadcast %cst_10 : f32 to vector<1x384xf32>
    %24 = arith.subf %23, %6 : vector<1x384xf32>
    %25 = vector.broadcast %24 : vector<1x384xf32> to vector<8x384xf32>
    %26 = arith.mulf %25, %20 : vector<8x384xf32>
    %27 = arith.addf %22, %26 : vector<8x384xf32>
    %c0_11 = arith.constant 0 : index
    %c0_12 = arith.constant 0 : index
    %28 = vector.load %arg4[%c0_11, %c0_12] : memref<8x384xf32, #tpu.memory_space<vmem>>, vector<8x384xf32>
    tpu.vector_store %arg4[%c0_11, %c0_12], %27 {strides = array<i32>} : memref<8x384xf32, #tpu.memory_space<vmem>>, vector<8x384xf32>,
    return
  }
  func.func @transform_0(%arg0: i32) -> (i32, i32) {
    %c0_i32 = arith.constant 0 : i32
    %c0_i32_0 = arith.constant 0 : i32
    return %arg0, %c0_i32 : i32, i32
  }
  func.func @transform_1(%arg0: i32) -> (i32, i32) {
    %c0_i32 = arith.constant 0 : i32
    %c0_i32_0 = arith.constant 0 : i32
    %c0_i32_1 = arith.constant 0 : i32
    return %c0_i32, %c0_i32_0 : i32, i32
  }
  func.func @transform_2(%arg0: i32) -> (i32, i32) {
    %c0_i32 = arith.constant 0 : i32
    %c0_i32_0 = arith.constant 0 : i32
    %c0_i32_1 = arith.constant 0 : i32
    return %c0_i32, %c0_i32_0 : i32, i32
  }
  func.func @transform_3(%arg0: i32) -> (i32, i32) {
    %c0_i32 = arith.constant 0 : i32
    %c0_i32_0 = arith.constant 0 : i32
    return %arg0, %c0_i32 : i32, i32
  }
}

module attributes {stable_mosaic.version = 11 : i64} {
  func.func @_head_kernel(%arg0: i32, %arg1: memref<2x512xf32, #tpu.memory_space<vmem>>, %arg2: memref<1x512xf32, #tpu.memory_space<vmem>>, %arg3: memref<512x128xf32, #tpu.memory_space<vmem>>, %arg4: memref<1x128xf32, #tpu.memory_space<vmem>>, %arg5: memref<2x128xf32, #tpu.memory_space<vmem>>) attributes {dimension_semantics = [#tpu.dimension_semantics<arbitrary>], iteration_bounds = array<i64: 1>, scalar_prefetch = 0 : i64, scratch_operands = 0 : i64, tpu.core_type = #tpu.core_type<tc>, window_params = [{pipeline_mode = #tpu.pipeline_mode<synchronous>, transform_indices = @transform_0, window_bounds = array<i64: 2, 512>}, {pipeline_mode = #tpu.pipeline_mode<synchronous>, transform_indices = @transform_1, window_bounds = array<i64: 1, 512>}, {pipeline_mode = #tpu.pipeline_mode<synchronous>, transform_indices = @transform_2, window_bounds = array<i64: 512, 128>}, {pipeline_mode = #tpu.pipeline_mode<synchronous>, transform_indices = @transform_3, window_bounds = array<i64: 1, 128>}, {pipeline_mode = #tpu.pipeline_mode<synchronous>, transform_indices = @transform_4, window_bounds = array<i64: 2, 128>}]} {
    %c0 = arith.constant 0 : index
    %c0_0 = arith.constant 0 : index
    %0 = vector.load %arg1[%c0, %c0_0] : memref<2x512xf32, #tpu.memory_space<vmem>>, vector<2x512xf32>
    %c0_1 = arith.constant 0 : index
    %c0_2 = arith.constant 0 : index
    %1 = vector.load %arg2[%c0_1, %c0_2] : memref<1x512xf32, #tpu.memory_space<vmem>>, vector<1x512xf32>
    %2 = vector.broadcast %1 : vector<1x512xf32> to vector<2x512xf32>
    %3 = arith.mulf %0, %2 : vector<2x512xf32>
    %cst = arith.constant 0.000000e+00 : f32
    %4 = vector.broadcast %cst : f32 to vector<2x512xf32>
    %5 = arith.maximumf %3, %4 : vector<2x512xf32>
    %c0_3 = arith.constant 0 : index
    %c0_4 = arith.constant 0 : index
    %6 = vector.load %arg3[%c0_3, %c0_4] : memref<512x128xf32, #tpu.memory_space<vmem>>, vector<512x128xf32>
    %cst_5 = arith.constant dense<0.000000e+00> : vector<2x128xf32>
    %7 = tpu.matmul %5, %6, %cst_5 {dimension_numbers = #tpu.dot_dimension_numbers<[1], [0], [0], [1], [0, 0, 1, 1], [], []>} : vector<2x512xf32>, vector<512x128xf32>, vector<2x128xf32> -> vector<2x128xf32>
    %c0_6 = arith.constant 0 : index
    %c0_7 = arith.constant 0 : index
    %8 = vector.load %arg4[%c0_6, %c0_7] : memref<1x128xf32, #tpu.memory_space<vmem>>, vector<1x128xf32>
    %9 = vector.broadcast %8 : vector<1x128xf32> to vector<2x128xf32>
    %10 = arith.addf %7, %9 : vector<2x128xf32>
    %c0_8 = arith.constant 0 : index
    %c0_9 = arith.constant 0 : index
    %11 = vector.load %arg5[%c0_8, %c0_9] : memref<2x128xf32, #tpu.memory_space<vmem>>, vector<2x128xf32>
    tpu.vector_store %arg5[%c0_8, %c0_9], %10 {strides = array<i32>} : memref<2x128xf32, #tpu.memory_space<vmem>>, vector<2x128xf32>,
    return
  }
  func.func @transform_0(%arg0: i32) -> (i32, i32) {
    %c0_i32 = arith.constant 0 : i32
    %c0_i32_0 = arith.constant 0 : i32
    %c0_i32_1 = arith.constant 0 : i32
    return %c0_i32, %c0_i32_0 : i32, i32
  }
  func.func @transform_1(%arg0: i32) -> (i32, i32) {
    %c0_i32 = arith.constant 0 : i32
    %c0_i32_0 = arith.constant 0 : i32
    %c0_i32_1 = arith.constant 0 : i32
    return %c0_i32, %c0_i32_0 : i32, i32
  }
  func.func @transform_2(%arg0: i32) -> (i32, i32) {
    %c0_i32 = arith.constant 0 : i32
    %c0_i32_0 = arith.constant 0 : i32
    %c0_i32_1 = arith.constant 0 : i32
    return %c0_i32, %c0_i32_0 : i32, i32
  }
  func.func @transform_3(%arg0: i32) -> (i32, i32) {
    %c0_i32 = arith.constant 0 : i32
    %c0_i32_0 = arith.constant 0 : i32
    %c0_i32_1 = arith.constant 0 : i32
    return %c0_i32, %c0_i32_0 : i32, i32
  }
  func.func @transform_4(%arg0: i32) -> (i32, i32) {
    %c0_i32 = arith.constant 0 : i32
    %c0_i32_0 = arith.constant 0 : i32
    %c0_i32_1 = arith.constant 0 : i32
    return %c0_i32, %c0_i32_0 : i32, i32
  }
}

</mosaic_0001>

<bundles_post_ra>
// kernel: mcnet_forward.18
= control target key start
LH: loop header
LB: loop body
LE: loop exit
PB: predicated region body
PF: predicated region fallthrough
CT: control target
= control target key end

     0   :  { %8 = vsyncpa [#allocation3], 0  ;;  %s2848_s0 = inlined_call_operand.vmem [shape: bf16[2048,9], index: 0, kind: input, shape index: {}]   ;;  %s2849_s1 = inlined_call_operand.hbm [shape: bf16[9,64], index: 1, kind: input, shape index: {}]   ;;  %s2850_s2 = inlined_call_operand.hbm [shape: f32[4,64], index: 2, kind: input, shape index: {}]   ;;  %s2851_s3 = inlined_call_operand.vmem [shape: f32[2048,64], index: 3, kind: output, shape index: {}]  }
   0x1   :  { %9 = vsyncpa [#allocation5], 0  ;;  %s1920_s12 = smov 0  }
   0x2 LB: > { %s1571_s13 = sadd.s32 4294967295, %s1893_s12   ;;  %p1573_p0 = scmp.ge.s32.totalorder %s1893_s12, 1  ;;  %s1893_s12 = sphi %s1920_s12, %s15_s12  }
   0x3   : > { %p114_p1 = scmp.lt.s32.totalorder %s1893_s12, 5  ;;  %s1895_s14 = smov [#allocation2]  }
   0x4   : > { %s126_s15 = sshll.u32 %s1895_s14, 4  ;;  %p1934_p3 = scmp.eq.s32.totalorder %s1571_s13, 0  ;;  %s127_s15 = int_to_ptr.vmem [resolvable:$true] %s126_s15 }
   0x5   : > { %p1928_p2 = pnand %p1573_p0, %p114_p1  ;;  %s1896_s18 = smov [#allocation4]  }
   0x6   : > { %s2856_s17 = scalar_select %p1934_p3, 1, 0 }
   0x7   : > { %s2855_s16 = scalar_select %p1928_p2, 1, 0 }
   0x8   : > { %p1763_p4 = pneg %p1928_p2  ;;  %s140_s19 = sshll.u32 %s1896_s18, 4  ;;  %s1946_s19 = int_to_ptr.vmem [resolvable:$true] %s140_s19 }
   0x9   : > { %s1823_s23 = scalar_lea.hbm %s2849_s1, 128 }
   0xa   : > { %p1942_p5 = pnand %p1934_p3, %p1763_p4  ;;  %p1824_p6 = scmp.ne.s32.totalorder %s2849_s1, %s1823_s23 }
   0xb   : > { %p1830_p10 = scmp.lt.u32.totalorder %s1823_s23, %s2849_s1 }
   0xc   : > { %p1825_p7 = pneg %p1942_p5 }
   0xe   : > { %p1826_p8 = pnand %p1825_p7, %p1824_p6 }
  0x10   : > { %p1827_p9 = pneg %p1826_p8 }
  0x12   : > { %p1832_p11 = pnand %p1830_p10, %p1827_p9 }
  0x14   : > { %1835 = shalt.err (!%p1832_p11)
}
  0x15   : > { %s1836_s28 = scalar_lea.vmem %s127_s15, 128  ;;  %p1844_p1 = scmp.lt.s32.totalorder %s127_s15, %s127_s15 }
  0x16   : > { %p1837_p12 = scmp.ne.s32.totalorder %s127_s15, %s1836_s28  ;;  %p1845_p4 = scmp.lt.s32.totalorder %s1836_s28, %s1836_s28 }
  0x18   : > { %p1839_p13 = pnand %p1837_p12, %p1825_p7  ;;  %p1846_p3 = por %p1845_p4, %p1844_p1 }
  0x1a   : > { %p1840_p0 = pneg %p1839_p13 }
  0x1c   : > { %p1847_p2 = pnand %p1846_p3, %p1840_p0 }
  0x1e   : > { %1850 = shalt.err (!%p1847_p2)
}
  0x1f   : > { %s1897_s29 = smov 64   ;;  %s1898_s30 = smov 4  }
  0x20   : > { %1766 = dma.hbm_to_vmem [thread:$0]  (!%p1942_p5), %s2849_s1, 128, %s127_s15, [#allocation3], %s1897_s29, %s1897_s29, %s1898_s30  }
  0x21   : > { %s1851_s8 = scalar_lea.hbm %s2850_s2, 64 }
  0x22   : > { %p1852_p6 = scmp.ne.s32.totalorder %s2850_s2, %s1851_s8  ;;  %p1858_p8 = scmp.lt.u32.totalorder %s1851_s8, %s2850_s2 }
  0x24   : > { %p1854_p2 = pnand %p1852_p6, %p1825_p7 }
  0x26   : > { %p1855_p3 = pneg %p1854_p2 }
  0x28   : > { %p1860_p9 = pnand %p1858_p8, %p1855_p3 }
  0x2a   : > { %1863 = shalt.err (!%p1860_p9)
}
  0x2b   : > { %s1864_s15 = scalar_lea.vmem %s1946_s19, 64  ;;  %p1872_p13 = scmp.lt.s32.totalorder %s1946_s19, %s1946_s19 }
  0x2c   : > { %p1865_p10 = scmp.ne.s32.totalorder %s1946_s19, %s1864_s15  ;;  %p1873_p0 = scmp.lt.s32.totalorder %s1864_s15, %s1864_s15 }
  0x2e   : > { %p1867_p11 = pnand %p1865_p10, %p1825_p7  ;;  %p1874_p1 = por %p1873_p0, %p1872_p13 }
  0x30   : > { %p1868_p12 = pneg %p1867_p11 }
  0x32   : > { %p1875_p4 = pnand %p1874_p1, %p1868_p12 }
  0x34   : > { %1878 = shalt.err (!%p1875_p4)
}
  0x35   : > { %1769 = dma.hbm_to_vmem [thread:$0]  (!%p1942_p5), %s2850_s2, 64, %s1946_s19, [#allocation5]  }
  0x36   : > { %p2858_p6 = scmp.ne.s32.totalorder %s2855_s16, 0 }
  0x37   : > { %p2859_p2 = scmp.ne.s32.totalorder (!%p2858_p6), %s2856_s17, 0 }
  0x38   : > { %162 = sbr.rel (%p2858_p6) target bundleno = 451 (0x1c3), region = 32 }
  0x3f   : > { %1884 = dma.done.wait (%p2859_p2), [#allocation3], 128  }
  0x40   : > { %1886 = vsyncadd (%p2859_p2), [#allocation3], 4294967168 }
  0x41   : > { %1888 = dma.done.wait (%p2859_p2), [#allocation5], 64  }
  0x42   : > { %1890 = vsyncadd (%p2859_p2), [#allocation5], 4294967232  ;;  %vm539_vm0 = vcmask 1043456   ;;  %s1580_s20 = sshll.u32 %s1571_s13, 6  ;;  %vm540_vm1 = vcmask 1044480   ;;  %v1899_v0 = vmov 65535   ;;  %v1227_v37 = vlaneseq }
  0x43   : > { %p191_p5 = scmp.lt.s32.totalorder %s1580_s20, 255  ;;  %v541_v1 = vsel %vm539_vm0, 4294967295, %v1899_v0  ;;  %vm442_vm2 = vcmask 72704   ;;  %v1787_v3 = vld [vmem:[#allocation2] sm:$0x1f]   ;;  %vm1428_vm3 = vcmask 523264  }
  0x44   : > { %v542_v2 = vsel %vm540_vm1, %v541_v1, 0  ;;  %v1228_v38 = vshrl.u32 %v1227_v37, 7  ;;  %v272_v39 = vld [vmem:[#allocation4 + $0x3] sm:$0x1]  ;;  %v2079_v41 = vld [vmem:[#allocation4] ss:$0 sm:$0xff] }
  0x45   : > { %s2861_s20 = smov (!%p191_p5, %s1580_s20), 255  ;;  %v544_v5 = vand.u32 %v1787_v3, %v542_v2  ;;  %v1295_v42 = vsub.f32 1.0, %v272_v39  ;;  %v2081_v43 = vld [vmem:[#allocation4 + $0x1] ss:$0 sm:$0xff]  ;;  %v2087_v51 = vld [vmem:[#allocation4 + $0x2] ss:$0 sm:$0xff] }
  0x46   : > { %s1581_s16 = sshll.u32 %s2861_s20, 2  ;;  %v1229_v40 = vsub.s32 0, %v1228_v38  ;;  %s1583_s13 = sshll.u32 %s2861_s20, 3 }
  0x47   : > { %s2013_s23 = scalar_lea.vmem %s2848_s0, %s1581_s16  ;;  %1687 = vmatprep.subr.bf16.mxu0 %v544_v5  ;;  %1753 = vmatprep.subr.bf16.mxu1 %v544_v5  ;;  %s2125_s25 = scalar_lea.vmem %s2851_s3, %s1583_s13 }
  0x48   : > { %v1788_v4 = vld [vmem:[%s2013_s23] sm:$0xff]   ;;  %v1790_v7 = vld [vmem:[%s2013_s23 + $0x8] sm:$0xff]   ;;  %1688 = vmatpush3.bf16.msra.mxu0 %v544_v5  ;;  %1754 = vmatpush3.bf16.msra.mxu1 %v544_v5  ;;  %v1792_v9 = vld [vmem:[%s2013_s23 + $0x10] sm:$0xff]   ;;  %v2084_v47 = vrot.slane %v272_v39, %v1229_v40  ;;  %v2089_v52 = vrot.slane %v1295_v42, %v1229_v40 }
  0x49   : > { %v1789_v6 = vld [vmem:[%s2013_s23 + $0x80] sm:$0xff]   ;;  %1689 = vmatprep.mubr.msk.bf16.mxu0 %vm442_vm2, %v1788_v4  ;;  %v1791_v8 = vld [vmem:[%s2013_s23 + $0x88] sm:$0xff]   ;;  %v1793_v10 = vld [vmem:[%s2013_s23 + $0x90] sm:$0xff]  }
  0x4a   : > { %1721 = vmatprep.mubr.msk.bf16.mxu1 %vm442_vm2, %v1789_v6  ;;  %v1794_v11 = vld [vmem:[%s2013_s23 + $0x18] sm:$0xff]   ;;  %v1796_v13 = vld [vmem:[%s2013_s23 + $0x20] sm:$0xff]   ;;  %v1798_v15 = vld [vmem:[%s2013_s23 + $0x28] sm:$0xff]  }
  0x4b   : > { %1690 = vmatmul.mubr.msk.bf16.vlgmr.msra.gmra.mrb[0].mxu0 %vm442_vm2, %v1790_v7  ;;  %1722 = vmatmul.mubr.msk.bf16.vlgmr.msra.gmra.mrb[0].mxu1 %vm442_vm2, %v1791_v8  ;;  %v1795_v12 = vld [vmem:[%s2013_s23 + $0x98] sm:$0xff]   ;;  %v1797_v14 = vld [vmem:[%s2013_s23 + $0xa0] sm:$0xff]   ;;  %v1799_v16 = vld [vmem:[%s2013_s23 + $0xa8] sm:$0xff]  }
  0x4c   : > { %1693 = vmatprep.mubr.msk.bf16.mxu0 %vm442_vm2, %v1792_v9  ;;  %1725 = vmatprep.mubr.msk.bf16.mxu1 %vm442_vm2, %v1793_v10  ;;  %v1800_v17 = vld [vmem:[%s2013_s23 + $0x30] sm:$0xff]   ;;  %v1802_v19 = vld [vmem:[%s2013_s23 + $0x38] sm:$0xff]   ;;  %v1804_v21 = vld [vmem:[%s2013_s23 + $0x40] sm:$0xff]  }
  0x4d   : > { %v1801_v18 = vld [vmem:[%s2013_s23 + $0xb0] sm:$0xff]   ;;  %v1803_v20 = vld [vmem:[%s2013_s23 + $0xb8] sm:$0xff]   ;;  %v1805_v22 = vld [vmem:[%s2013_s23 + $0xc0] sm:$0xff]  }
  0x4e   : > { %v1806_v23 = vld [vmem:[%s2013_s23 + $0x48] sm:$0xff]   ;;  %v1808_v25 = vld [vmem:[%s2013_s23 + $0x50] sm:$0xff]   ;;  %v1810_v27 = vld [vmem:[%s2013_s23 + $0x58] sm:$0xff]  }
  0x4f   : > { %v1807_v24 = vld [vmem:[%s2013_s23 + $0xc8] sm:$0xff]   ;;  %v1809_v26 = vld [vmem:[%s2013_s23 + $0xd0] sm:$0xff]   ;;  %v1811_v28 = vld [vmem:[%s2013_s23 + $0xd8] sm:$0xff]  }
  0x50   : > { %v1812_v29 = vld [vmem:[%s2013_s23 + $0x60] sm:$0xff]   ;;  %v1814_v31 = vld [vmem:[%s2013_s23 + $0x68] sm:$0xff]   ;;  %v1816_v33 = vld [vmem:[%s2013_s23 + $0x70] sm:$0xff]  }
  0x51   : > { %v1813_v30 = vld [vmem:[%s2013_s23 + $0xe0] sm:$0xff]   ;;  %v1815_v32 = vld [vmem:[%s2013_s23 + $0xe8] sm:$0xff]   ;;  %v1817_v34 = vld [vmem:[%s2013_s23 + $0xf0] sm:$0xff]  }
  0x52   : > { %v1818_v35 = vld [vmem:[%s2013_s23 + $0x78] sm:$0xff]  }
  0x53   : > { %1694 = vmatmul.mubr.msk.bf16.gmra.mrb[4].mxu0 %vm442_vm2, %v1794_v11  ;;  %1726 = vmatmul.mubr.msk.bf16.gmra.mrb[4].mxu1 %vm442_vm2, %v1795_v12  ;;  %v1819_v36 = vld [vmem:[%s2013_s23 + $0xf8] sm:$0xff]  }
  0x54   : > { %1697 = vmatprep.mubr.msk.bf16.mxu0 %vm442_vm2, %v1796_v13  ;;  %1729 = vmatprep.mubr.msk.bf16.mxu1 %vm442_vm2, %v1797_v14 }
  0x5b   : > { %1698 = vmatmul.mubr.msk.bf16.gmra.mrb[8].mxu0 %vm442_vm2, %v1798_v15  ;;  %1730 = vmatmul.mubr.msk.bf16.gmra.mrb[8].mxu1 %vm442_vm2, %v1799_v16 }
  0x5c   : > { %1701 = vmatprep.mubr.msk.bf16.mxu0 %vm442_vm2, %v1800_v17  ;;  %1733 = vmatprep.mubr.msk.bf16.mxu1 %vm442_vm2, %v1801_v18 }
  0x63   : > { %1702 = vmatmul.mubr.msk.bf16.gmra.mrb[12].mxu0 %vm442_vm2, %v1802_v19  ;;  %1734 = vmatmul.mubr.msk.bf16.gmra.mrb[12].mxu1 %vm442_vm2, %v1803_v20 }
  0x64   : > { %1705 = vmatprep.mubr.msk.bf16.mxu0 %vm442_vm2, %v1804_v21  ;;  %1737 = vmatprep.mubr.msk.bf16.mxu1 %vm442_vm2, %v1805_v22 }
  0x6b   : > { %1706 = vmatmul.mubr.msk.bf16.gmra.mrb[16].mxu0 %vm442_vm2, %v1806_v23  ;;  %1738 = vmatmul.mubr.msk.bf16.gmra.mrb[16].mxu1 %vm442_vm2, %v1807_v24 }
  0x6c   : > { %1709 = vmatprep.mubr.msk.bf16.mxu0 %vm442_vm2, %v1808_v25  ;;  %1741 = vmatprep.mubr.msk.bf16.mxu1 %vm442_vm2, %v1809_v26 }
  0x73   : > { %1710 = vmatmul.mubr.msk.bf16.gmra.mrb[20].mxu0 %vm442_vm2, %v1810_v27  ;;  %1742 = vmatmul.mubr.msk.bf16.gmra.mrb[20].mxu1 %vm442_vm2, %v1811_v28 }
  0x74   : > { %1713 = vmatprep.mubr.msk.bf16.mxu0 %vm442_vm2, %v1812_v29  ;;  %1745 = vmatprep.mubr.msk.bf16.mxu1 %vm442_vm2, %v1813_v30 }
  0x7b   : > { %1714 = vmatmul.mubr.msk.bf16.gmra.mrb[24].mxu0 %vm442_vm2, %v1814_v31  ;;  %1746 = vmatmul.mubr.msk.bf16.gmra.mrb[24].mxu1 %vm442_vm2, %v1815_v32 }
  0x7c   : > { %1717 = vmatprep.mubr.msk.bf16.mxu0 %vm442_vm2, %v1816_v33  ;;  %1749 = vmatprep.mubr.msk.bf16.mxu1 %vm442_vm2, %v1817_v34 }
  0x83   : > { %1718 = vmatmul.mubr.msk.bf16.gmra.mrb[28].mxu0 %vm442_vm2, %v1818_v35  ;;  %1750 = vmatmul.mubr.msk.bf16.gmra.mrb[28].mxu1 %vm442_vm2, %v1819_v36 }
 0x11e   : > { %v1691_v44 = vpop.f32.mrb[0].mxu0  ;;  %v1723_v45 = vpop.f32.mrb[0].mxu1 }
 0x11f   : > { %v589_v46 = vadd.f32 %v1691_v44, %v2079_v41  ;;  %v717_v48 = vadd.f32 %v1723_v45, %v2079_v41  ;;  %v580_v49 = vpop.f32.mrb[1].mxu0  ;;  %v708_v50 = vpop.f32.mrb[1].mxu1 }
 0x120   : > { %v581_v53 = vadd.f32 %v2079_v41, %v580_v49  ;;  %v709_v54 = vadd.f32 %v2079_v41, %v708_v50  ;;  %v1692_v55 = vpop.f32.mrb[2].mxu0  ;;  %v1724_v56 = vpop.f32.mrb[2].mxu1 }
 0x121   : > { %v841_v57 = vmul.f32 %v2081_v43, %v589_v46  ;;  %v1037_v58 = vmax.f32 %v589_v46, 0.0  ;;  %v873_v59 = vmul.f32 %v2081_v43, %v717_v48  ;;  %v1069_v60 = vmax.f32 %v717_v48, 0.0  ;;  %v583_v61 = vpop.f32.mrb[3].mxu0  ;;  %v711_v62 = vpop.f32.mrb[3].mxu1 }
 0x122   : > { %v839_v63 = vmul.f32 %v2081_v43, %v581_v53  ;;  %v1035_v0 = vmax.f32 %v581_v53, 0.0  ;;  %v871_v1 = vmul.f32 %v2081_v43, %v709_v54  ;;  %v1067_v2 = vmax.f32 %v709_v54, 0.0 }
 0x123   : > { %v909_v3 = vadd.f32 %v2087_v51, %v841_v57  ;;  %v1101_v4 = vmul.f32 %v2081_v43, %v1037_v58  ;;  %v941_v5 = vadd.f32 %v2087_v51, %v873_v59  ;;  %v1133_v6 = vmul.f32 %v2081_v43, %v1069_v60 }
 0x124   : > { %v907_v7 = vadd.f32 %v2087_v51, %v839_v63  ;;  %v1099_v8 = vmul.f32 %v2081_v43, %v1035_v0  ;;  %v939_v9 = vadd.f32 %v2087_v51, %v871_v1  ;;  %v1131_v10 = vmul.f32 %v2081_v43, %v1067_v2 }
 0x125   : > { %v973_v11 = vmax.f32 %v909_v3, 0.0  ;;  %v1165_v12 = vadd.f32 %v2087_v51, %v1101_v4  ;;  %v1005_v13 = vmax.f32 %v941_v5, 0.0  ;;  %v1197_v14 = vadd.f32 %v2087_v51, %v1133_v6 }
 0x126   : > { %v971_v15 = vmax.f32 %v907_v7, 0.0  ;;  %v1163_v16 = vadd.f32 %v2087_v51, %v1099_v8  ;;  %v1003_v17 = vmax.f32 %v939_v9, 0.0  ;;  %v1195_v18 = vadd.f32 %v2087_v51, %v1131_v10  ;;  %v2110_v19 = vpop.f32.mrb[4].mxu0  ;;  %v2112_v20 = vpop.f32.mrb[4].mxu1 }
 0x127   : > { %v1233_v21 = vmul.f32 %v2084_v47, %v973_v11  ;;  %v1302_v22 = vmul.f32 %v2089_v52, %v1165_v12  ;;  %v1265_v23 = vmul.f32 %v2084_v47, %v1005_v13  ;;  %v1334_v24 = vmul.f32 %v2089_v52, %v1197_v14  ;;  %v2118_v25 = vpop.f32.mrb[5].mxu0  ;;  %v2120_v26 = vpop.f32.mrb[5].mxu1 }
 0x128   : > { %v1231_v27 = vmul.f32 %v2084_v47, %v971_v15  ;;  %v1300_v28 = vmul.f32 %v2089_v52, %v1163_v16  ;;  %v1263_v29 = vmul.f32 %v2084_v47, %v1003_v17  ;;  %v1332_v30 = vmul.f32 %v2089_v52, %v1195_v18  ;;  %v2131_v31 = vpop.f32.mrb[6].mxu0  ;;  %v2133_v32 = vpop.f32.mrb[6].mxu1 }
 0x129   : > { %v1366_v33 = vadd.f32 %v1302_v22, %v1233_v21  ;;  %v1398_v34 = vadd.f32 %v1334_v24, %v1265_v23  ;;  %v592_v35 = vadd.f32 %v1692_v55, %v2079_v41  ;;  %v720_v36 = vadd.f32 %v1724_v56, %v2079_v41  ;;  %v2137_v37 = vpop.f32.mrb[7].mxu0  ;;  %v2139_v38 = vpop.f32.mrb[7].mxu1 }
 0x12a   : > { %v1364_v39 = vadd.f32 %v1300_v28, %v1231_v27  ;;  %v1396_v40 = vadd.f32 %v1332_v30, %v1263_v29  ;;  %v584_v42 = vadd.f32 %v2079_v41, %v583_v61  ;;  %v712_v44 = vadd.f32 %v2079_v41, %v711_v62 }
 0x12b   : > { %1431 = vst.msk [vmem:[%s2125_s25 + $0x10] sm:$0xff] %vm1428_vm3, %v1366_v33  ;;  %1463 = vst.msk [vmem:[%s2125_s25 + $0x110] sm:$0xff] %vm1428_vm3, %v1398_v34  ;;  %v842_v45 = vmul.f32 %v2081_v43, %v592_v35  ;;  %v1038_v46 = vmax.f32 %v592_v35, 0.0  ;;  %v874_v48 = vmul.f32 %v2081_v43, %v720_v36  ;;  %v1070_v49 = vmax.f32 %v720_v36, 0.0 }
 0x12c   : > { %1429 = vst.msk [vmem:[%s2125_s25] sm:$0xff] %vm1428_vm3, %v1364_v39  ;;  %1461 = vst.msk [vmem:[%s2125_s25 + $0x100] sm:$0xff] %vm1428_vm3, %v1396_v40  ;;  %v840_v50 = vmul.f32 %v2081_v43, %v584_v42  ;;  %v1036_v53 = vmax.f32 %v584_v42, 0.0  ;;  %v872_v54 = vmul.f32 %v2081_v43, %v712_v44  ;;  %v1068_v55 = vmax.f32 %v712_v44, 0.0 }
 0x12d   : > { %v910_v56 = vadd.f32 %v2087_v51, %v842_v45  ;;  %v1102_v57 = vmul.f32 %v2081_v43, %v1038_v46  ;;  %v942_v58 = vadd.f32 %v2087_v51, %v874_v48  ;;  %v1134_v59 = vmul.f32 %v2081_v43, %v1070_v49 }
 0x12e   : > { %v908_v60 = vadd.f32 %v2087_v51, %v840_v50  ;;  %v1100_v61 = vmul.f32 %v2081_v43, %v1036_v53  ;;  %v940_v62 = vadd.f32 %v2087_v51, %v872_v54  ;;  %v1132_v63 = vmul.f32 %v2081_v43, %v1068_v55  ;;  %v2163_v0 = vpop.f32.mrb[8].mxu0  ;;  %v2165_v1 = vpop.f32.mrb[8].mxu1 }
 0x12f   : > { %v974_v2 = vmax.f32 %v910_v56, 0.0  ;;  %v1166_v3 = vadd.f32 %v2087_v51, %v1102_v57  ;;  %v1006_v4 = vmax.f32 %v942_v58, 0.0  ;;  %v1198_v5 = vadd.f32 %v2087_v51, %v1134_v59  ;;  %v2169_v6 = vpop.f32.mrb[9].mxu0  ;;  %v2171_v7 = vpop.f32.mrb[9].mxu1 }
 0x130   : > { %v972_v8 = vmax.f32 %v908_v60, 0.0  ;;  %v1164_v9 = vadd.f32 %v2087_v51, %v1100_v61  ;;  %v1004_v10 = vmax.f32 %v940_v62, 0.0  ;;  %v1196_v11 = vadd.f32 %v2087_v51, %v1132_v63  ;;  %v2175_v12 = vpop.f32.mrb[10].mxu0  ;;  %v2177_v13 = vpop.f32.mrb[10].mxu1 }
 0x131   : > { %v1234_v14 = vmul.f32 %v2084_v47, %v974_v2  ;;  %v1303_v15 = vmul.f32 %v2089_v52, %v1166_v3  ;;  %v1266_v16 = vmul.f32 %v2084_v47, %v1006_v4  ;;  %v1335_v17 = vmul.f32 %v2089_v52, %v1198_v5  ;;  %v2183_v18 = vpop.f32.mrb[11].mxu0  ;;  %v2185_v21 = vpop.f32.mrb[11].mxu1 }
 0x132   : > { %v1232_v22 = vmul.f32 %v2084_v47, %v972_v8  ;;  %v1301_v23 = vmul.f32 %v2089_v52, %v1164_v9  ;;  %v1264_v24 = vmul.f32 %v2084_v47, %v1004_v10  ;;  %v1333_v27 = vmul.f32 %v2089_v52, %v1196_v11 }
 0x133   : > { %v1367_v28 = vadd.f32 %v1303_v15, %v1234_v14  ;;  %v1399_v29 = vadd.f32 %v1335_v17, %v1266_v16  ;;  %v605_v30 = vadd.f32 %v2110_v19, %v2079_v41  ;;  %v733_v33 = vadd.f32 %v2112_v20, %v2079_v41 }
 0x134   : > { %v1365_v34 = vadd.f32 %v1301_v23, %v1232_v22  ;;  %v1397_v35 = vadd.f32 %v1333_v27, %v1264_v24  ;;  %v597_v36 = vadd.f32 %v2079_v41, %v2118_v25  ;;  %v725_v39 = vadd.f32 %v2079_v41, %v2120_v26 }
 0x135   : > { %1432 = vst.msk [vmem:[%s2125_s25 + $0x18] sm:$0xff] %vm1428_vm3, %v1367_v28  ;;  %1464 = vst.msk [vmem:[%s2125_s25 + $0x118] sm:$0xff] %vm1428_vm3, %v1399_v29  ;;  %v845_v40 = vmul.f32 %v2081_v43, %v605_v30  ;;  %v1041_v42 = vmax.f32 %v605_v30, 0.0  ;;  %v877_v19 = vmul.f32 %v2081_v43, %v733_v33  ;;  %v1073_v44 = vmax.f32 %v733_v33, 0.0 }
 0x136   : > { %1430 = vst.msk [vmem:[%s2125_s25 + $0x8] sm:$0xff] %vm1428_vm3, %v1365_v34  ;;  %1462 = vst.msk [vmem:[%s2125_s25 + $0x108] sm:$0xff] %vm1428_vm3, %v1397_v35  ;;  %v843_v20 = vmul.f32 %v2081_v43, %v597_v36  ;;  %v1039_v25 = vmax.f32 %v597_v36, 0.0  ;;  %v875_v45 = vmul.f32 %v2081_v43, %v725_v39  ;;  %v1071_v26 = vmax.f32 %v725_v39, 0.0  ;;  %v2211_v46 = vpop.f32.mrb[12].mxu0  ;;  %v2213_v48 = vpop.f32.mrb[12].mxu1 }
 0x137   : > { %v913_v49 = vadd.f32 %v2087_v51, %v845_v40  ;;  %v1105_v50 = vmul.f32 %v2081_v43, %v1041_v42  ;;  %v945_v53 = vadd.f32 %v2087_v51, %v877_v19  ;;  %v1137_v54 = vmul.f32 %v2081_v43, %v1073_v44  ;;  %v2219_v55 = vpop.f32.mrb[13].mxu0  ;;  %v2221_v56 = vpop.f32.mrb[13].mxu1 }
 0x138   : > { %v911_v57 = vadd.f32 %v2087_v51, %v843_v20  ;;  %v1103_v58 = vmul.f32 %v2081_v43, %v1039_v25  ;;  %v943_v59 = vadd.f32 %v2087_v51, %v875_v45  ;;  %v1135_v60 = vmul.f32 %v2081_v43, %v1071_v26  ;;  %v2227_v61 = vpop.f32.mrb[14].mxu0  ;;  %v2229_v62 = vpop.f32.mrb[14].mxu1 }
 0x139   : > { %v977_v63 = vmax.f32 %v913_v49, 0.0  ;;  %v1169_v2 = vadd.f32 %v2087_v51, %v1105_v50  ;;  %v1009_v3 = vmax.f32 %v945_v53, 0.0  ;;  %v1201_v4 = vadd.f32 %v2087_v51, %v1137_v54  ;;  %v2233_v5 = vpop.f32.mrb[15].mxu0  ;;  %v2235_v8 = vpop.f32.mrb[15].mxu1 }
 0x13a   : > { %v975_v9 = vmax.f32 %v911_v57, 0.0  ;;  %v1167_v10 = vadd.f32 %v2087_v51, %v1103_v58  ;;  %v1007_v11 = vmax.f32 %v943_v59, 0.0  ;;  %v1199_v14 = vadd.f32 %v2087_v51, %v1135_v60 }
 0x13b   : > { %v1237_v15 = vmul.f32 %v2084_v47, %v977_v63  ;;  %v1306_v16 = vmul.f32 %v2089_v52, %v1169_v2  ;;  %v1269_v17 = vmul.f32 %v2084_v47, %v1009_v3  ;;  %v1338_v22 = vmul.f32 %v2089_v52, %v1201_v4 }
 0x13c   : > { %v1235_v23 = vmul.f32 %v2084_v47, %v975_v9  ;;  %v1304_v24 = vmul.f32 %v2089_v52, %v1167_v10  ;;  %v1267_v27 = vmul.f32 %v2084_v47, %v1007_v11  ;;  %v1336_v28 = vmul.f32 %v2089_v52, %v1199_v14 }
 0x13d   : > { %v1370_v29 = vadd.f32 %v1306_v16, %v1237_v15  ;;  %v1402_v30 = vadd.f32 %v1338_v22, %v1269_v17  ;;  %v608_v33 = vadd.f32 %v2131_v31, %v2079_v41  ;;  %v736_v34 = vadd.f32 %v2133_v32, %v2079_v41 }
 0x13e   : > { %v1368_v35 = vadd.f32 %v1304_v24, %v1235_v23  ;;  %v1400_v36 = vadd.f32 %v1336_v28, %v1267_v27  ;;  %v600_v39 = vadd.f32 %v2079_v41, %v2137_v37  ;;  %v728_v40 = vadd.f32 %v2079_v41, %v2139_v38  ;;  %v2255_v42 = vpop.f32.mrb[16].mxu0  ;;  %v2257_v19 = vpop.f32.mrb[16].mxu1 }
 0x13f   : > { %1435 = vst.msk [vmem:[%s2125_s25 + $0x30] sm:$0xff] %vm1428_vm3, %v1370_v29  ;;  %1467 = vst.msk [vmem:[%s2125_s25 + $0x130] sm:$0xff] %vm1428_vm3, %v1402_v30  ;;  %v846_v31 = vmul.f32 %v2081_v43, %v608_v33  ;;  %v1042_v32 = vmax.f32 %v608_v33, 0.0  ;;  %v878_v44 = vmul.f32 %v2081_v43, %v736_v34  ;;  %v1074_v20 = vmax.f32 %v736_v34, 0.0  ;;  %v2265_v25 = vpop.f32.mrb[17].mxu0  ;;  %v2267_v37 = vpop.f32.mrb[17].mxu1 }
 0x140   : > { %1433 = vst.msk [vmem:[%s2125_s25 + $0x20] sm:$0xff] %vm1428_vm3, %v1368_v35  ;;  %1465 = vst.msk [vmem:[%s2125_s25 + $0x120] sm:$0xff] %vm1428_vm3, %v1400_v36  ;;  %v844_v38 = vmul.f32 %v2081_v43, %v600_v39  ;;  %v1040_v45 = vmax.f32 %v600_v39, 0.0  ;;  %v876_v26 = vmul.f32 %v2081_v43, %v728_v40  ;;  %v1072_v49 = vmax.f32 %v728_v40, 0.0  ;;  %v2275_v50 = vpop.f32.mrb[18].mxu0  ;;  %v2277_v53 = vpop.f32.mrb[18].mxu1 }
 0x141   : > { %v914_v54 = vadd.f32 %v2087_v51, %v846_v31  ;;  %v1106_v57 = vmul.f32 %v2081_v43, %v1042_v32  ;;  %v946_v58 = vadd.f32 %v2087_v51, %v878_v44  ;;  %v1138_v59 = vmul.f32 %v2081_v43, %v1074_v20  ;;  %v2283_v60 = vpop.f32.mrb[19].mxu0  ;;  %v2285_v63 = vpop.f32.mrb[19].mxu1 }
 0x142   : > { %v912_v2 = vadd.f32 %v2087_v51, %v844_v38  ;;  %v1104_v3 = vmul.f32 %v2081_v43, %v1040_v45  ;;  %v944_v4 = vadd.f32 %v2087_v51, %v876_v26  ;;  %v1136_v9 = vmul.f32 %v2081_v43, %v1072_v49 }
 0x143   : > { %v978_v10 = vmax.f32 %v914_v54, 0.0  ;;  %v1170_v11 = vadd.f32 %v2087_v51, %v1106_v57  ;;  %v1010_v14 = vmax.f32 %v946_v58, 0.0  ;;  %v1202_v15 = vadd.f32 %v2087_v51, %v1138_v59 }
 0x144   : > { %v976_v16 = vmax.f32 %v912_v2, 0.0  ;;  %v1168_v17 = vadd.f32 %v2087_v51, %v1104_v3  ;;  %v1008_v22 = vmax.f32 %v944_v4, 0.0  ;;  %v1200_v23 = vadd.f32 %v2087_v51, %v1136_v9 }
 0x145   : > { %v1238_v24 = vmul.f32 %v2084_v47, %v978_v10  ;;  %v1307_v27 = vmul.f32 %v2089_v52, %v1170_v11  ;;  %v1270_v28 = vmul.f32 %v2084_v47, %v1010_v14  ;;  %v1339_v29 = vmul.f32 %v2089_v52, %v1202_v15 }
 0x146   : > { %v1236_v30 = vmul.f32 %v2084_v47, %v976_v16  ;;  %v1305_v33 = vmul.f32 %v2089_v52, %v1168_v17  ;;  %v1268_v34 = vmul.f32 %v2084_v47, %v1008_v22  ;;  %v1337_v35 = vmul.f32 %v2089_v52, %v1200_v23  ;;  %v2303_v36 = vpop.f32.mrb[20].mxu0  ;;  %v2305_v39 = vpop.f32.mrb[20].mxu1 }
 0x147   : > { %v1371_v40 = vadd.f32 %v1307_v27, %v1238_v24  ;;  %v1403_v31 = vadd.f32 %v1339_v29, %v1270_v28  ;;  %v621_v32 = vadd.f32 %v2163_v0, %v2079_v41  ;;  %v749_v44 = vadd.f32 %v2165_v1, %v2079_v41  ;;  %v2311_v20 = vpop.f32.mrb[21].mxu0  ;;  %v2313_v38 = vpop.f32.mrb[21].mxu1 }
 0x148   : > { %v1369_v45 = vadd.f32 %v1305_v33, %v1236_v30  ;;  %v1401_v26 = vadd.f32 %v1337_v35, %v1268_v34  ;;  %v613_v49 = vadd.f32 %v2079_v41, %v2169_v6  ;;  %v741_v54 = vadd.f32 %v2079_v41, %v2171_v7  ;;  %v2319_v57 = vpop.f32.mrb[22].mxu0  ;;  %v2321_v0 = vpop.f32.mrb[22].mxu1 }
 0x149   : > { %1436 = vst.msk [vmem:[%s2125_s25 + $0x38] sm:$0xff] %vm1428_vm3, %v1371_v40  ;;  %1468 = vst.msk [vmem:[%s2125_s25 + $0x138] sm:$0xff] %vm1428_vm3, %v1403_v31  ;;  %v849_v1 = vmul.f32 %v2081_v43, %v621_v32  ;;  %v1045_v58 = vmax.f32 %v621_v32, 0.0  ;;  %v881_v59 = vmul.f32 %v2081_v43, %v749_v44  ;;  %v1077_v2 = vmax.f32 %v749_v44, 0.0  ;;  %v2329_v3 = vpop.f32.mrb[23].mxu0  ;;  %v2331_v6 = vpop.f32.mrb[23].mxu1 }
 0x14a   : > { %1434 = vst.msk [vmem:[%s2125_s25 + $0x28] sm:$0xff] %vm1428_vm3, %v1369_v45  ;;  %1466 = vst.msk [vmem:[%s2125_s25 + $0x128] sm:$0xff] %vm1428_vm3, %v1401_v26  ;;  %v847_v7 = vmul.f32 %v2081_v43, %v613_v49  ;;  %v1043_v4 = vmax.f32 %v613_v49, 0.0  ;;  %v879_v9 = vmul.f32 %v2081_v43, %v741_v54  ;;  %v1075_v10 = vmax.f32 %v741_v54, 0.0 }
 0x14b   : > { %v917_v11 = vadd.f32 %v2087_v51, %v849_v1  ;;  %v1109_v14 = vmul.f32 %v2081_v43, %v1045_v58  ;;  %v949_v15 = vadd.f32 %v2087_v51, %v881_v59  ;;  %v1141_v16 = vmul.f32 %v2081_v43, %v1077_v2 }
 0x14c   : > { %v915_v17 = vadd.f32 %v2087_v51, %v847_v7  ;;  %v1107_v22 = vmul.f32 %v2081_v43, %v1043_v4  ;;  %v947_v23 = vadd.f32 %v2087_v51, %v879_v9  ;;  %v1139_v24 = vmul.f32 %v2081_v43, %v1075_v10 }
 0x14d   : > { %v981_v27 = vmax.f32 %v917_v11, 0.0  ;;  %v1173_v28 = vadd.f32 %v2087_v51, %v1109_v14  ;;  %v1013_v29 = vmax.f32 %v949_v15, 0.0  ;;  %v1205_v30 = vadd.f32 %v2087_v51, %v1141_v16 }
 0x14e   : > { %v979_v33 = vmax.f32 %v915_v17, 0.0  ;;  %v1171_v34 = vadd.f32 %v2087_v51, %v1107_v22  ;;  %v1011_v35 = vmax.f32 %v947_v23, 0.0  ;;  %v1203_v40 = vadd.f32 %v2087_v51, %v1139_v24  ;;  %v2351_v31 = vpop.f32.mrb[24].mxu0  ;;  %v2353_v32 = vpop.f32.mrb[24].mxu1 }
 0x14f   : > { %v1241_v44 = vmul.f32 %v2084_v47, %v981_v27  ;;  %v1310_v45 = vmul.f32 %v2089_v52, %v1173_v28  ;;  %v1273_v26 = vmul.f32 %v2084_v47, %v1013_v29  ;;  %v1342_v49 = vmul.f32 %v2089_v52, %v1205_v30  ;;  %v2359_v54 = vpop.f32.mrb[25].mxu0  ;;  %v2361_v1 = vpop.f32.mrb[25].mxu1 }
 0x150   : > { %v1239_v58 = vmul.f32 %v2084_v47, %v979_v33  ;;  %v1308_v59 = vmul.f32 %v2089_v52, %v1171_v34  ;;  %v1271_v2 = vmul.f32 %v2084_v47, %v1011_v35  ;;  %v1340_v7 = vmul.f32 %v2089_v52, %v1203_v40  ;;  %v2367_v4 = vpop.f32.mrb[26].mxu0  ;;  %v2369_v9 = vpop.f32.mrb[26].mxu1 }
 0x151   : > { %v1374_v10 = vadd.f32 %v1310_v45, %v1241_v44  ;;  %v1406_v11 = vadd.f32 %v1342_v49, %v1273_v26  ;;  %v624_v14 = vadd.f32 %v2175_v12, %v2079_v41  ;;  %v752_v15 = vadd.f32 %v2177_v13, %v2079_v41  ;;  %v2375_v16 = vpop.f32.mrb[27].mxu0  ;;  %v2377_v17 = vpop.f32.mrb[27].mxu1 }
 0x152   : > { %v1372_v22 = vadd.f32 %v1308_v59, %v1239_v58  ;;  %v1404_v23 = vadd.f32 %v1340_v7, %v1271_v2  ;;  %v616_v24 = vadd.f32 %v2079_v41, %v2183_v18  ;;  %v744_v27 = vadd.f32 %v2079_v41, %v2185_v21 }
 0x153   : > { %1439 = vst.msk [vmem:[%s2125_s25 + $0x50] sm:$0xff] %vm1428_vm3, %v1374_v10  ;;  %1471 = vst.msk [vmem:[%s2125_s25 + $0x150] sm:$0xff] %vm1428_vm3, %v1406_v11  ;;  %v850_v12 = vmul.f32 %v2081_v43, %v624_v14  ;;  %v1046_v28 = vmax.f32 %v624_v14, 0.0  ;;  %v882_v13 = vmul.f32 %v2081_v43, %v752_v15  ;;  %v1078_v29 = vmax.f32 %v752_v15, 0.0 }
 0x154   : > { %1437 = vst.msk [vmem:[%s2125_s25 + $0x40] sm:$0xff] %vm1428_vm3, %v1372_v22  ;;  %1469 = vst.msk [vmem:[%s2125_s25 + $0x140] sm:$0xff] %vm1428_vm3, %v1404_v23  ;;  %v848_v30 = vmul.f32 %v2081_v43, %v616_v24  ;;  %v1044_v18 = vmax.f32 %v616_v24, 0.0  ;;  %v880_v33 = vmul.f32 %v2081_v43, %v744_v27  ;;  %v1076_v21 = vmax.f32 %v744_v27, 0.0 }
 0x155   : > { %v918_v34 = vadd.f32 %v2087_v51, %v850_v12  ;;  %v1110_v35 = vmul.f32 %v2081_v43, %v1046_v28  ;;  %v950_v40 = vadd.f32 %v2087_v51, %v882_v13  ;;  %v1142_v44 = vmul.f32 %v2081_v43, %v1078_v29 }
 0x156   : > { %v916_v45 = vadd.f32 %v2087_v51, %v848_v30  ;;  %v1108_v26 = vmul.f32 %v2081_v43, %v1044_v18  ;;  %v948_v49 = vadd.f32 %v2087_v51, %v880_v33  ;;  %v1140_v58 = vmul.f32 %v2081_v43, %v1076_v21  ;;  %v2403_v59 = vpop.f32.mrb[28].mxu0  ;;  %v2405_v2 = vpop.f32.mrb[28].mxu1 }
 0x157   : > { %v982_v7 = vmax.f32 %v918_v34, 0.0  ;;  %v1174_v10 = vadd.f32 %v2087_v51, %v1110_v35  ;;  %v1014_v11 = vmax.f32 %v950_v40, 0.0  ;;  %v1206_v14 = vadd.f32 %v2087_v51, %v1142_v44  ;;  %v2409_v15 = vpop.f32.mrb[29].mxu0  ;;  %v2411_v22 = vpop.f32.mrb[29].mxu1 }
 0x158   : > { %v980_v23 = vmax.f32 %v916_v45, 0.0  ;;  %v1172_v24 = vadd.f32 %v2087_v51, %v1108_v26  ;;  %v1012_v27 = vmax.f32 %v948_v49, 0.0  ;;  %v1204_v12 = vadd.f32 %v2087_v51, %v1140_v58  ;;  %v2415_v28 = vpop.f32.mrb[30].mxu0  ;;  %v2417_v13 = vpop.f32.mrb[30].mxu1 }
 0x159   : > { %v1242_v29 = vmul.f32 %v2084_v47, %v982_v7  ;;  %v1311_v30 = vmul.f32 %v2089_v52, %v1174_v10  ;;  %v1274_v18 = vmul.f32 %v2084_v47, %v1014_v11  ;;  %v1343_v33 = vmul.f32 %v2089_v52, %v1206_v14  ;;  %v2423_v21 = vpop.f32.mrb[31].mxu0  ;;  %v2425_v34 = vpop.f32.mrb[31].mxu1 }
 0x15a   : > { %v1240_v35 = vmul.f32 %v2084_v47, %v980_v23  ;;  %v1309_v40 = vmul.f32 %v2089_v52, %v1172_v24  ;;  %v1272_v44 = vmul.f32 %v2084_v47, %v1012_v27  ;;  %v1341_v45 = vmul.f32 %v2089_v52, %v1204_v12 }
 0x15b   : > { %v1375_v26 = vadd.f32 %v1311_v30, %v1242_v29  ;;  %v1407_v49 = vadd.f32 %v1343_v33, %v1274_v18  ;;  %v637_v58 = vadd.f32 %v2211_v46, %v2079_v41  ;;  %v765_v7 = vadd.f32 %v2213_v48, %v2079_v41 }
 0x15c   : > { %v1373_v10 = vadd.f32 %v1309_v40, %v1240_v35  ;;  %v1405_v11 = vadd.f32 %v1341_v45, %v1272_v44  ;;  %v629_v14 = vadd.f32 %v2079_v41, %v2219_v55  ;;  %v757_v23 = vadd.f32 %v2079_v41, %v2221_v56 }
 0x15d   : > { %1440 = vst.msk [vmem:[%s2125_s25 + $0x58] sm:$0xff] %vm1428_vm3, %v1375_v26  ;;  %1472 = vst.msk [vmem:[%s2125_s25 + $0x158] sm:$0xff] %vm1428_vm3, %v1407_v49  ;;  %v853_v24 = vmul.f32 %v2081_v43, %v637_v58  ;;  %v1049_v27 = vmax.f32 %v637_v58, 0.0  ;;  %v885_v46 = vmul.f32 %v2081_v43, %v765_v7  ;;  %v1081_v12 = vmax.f32 %v765_v7, 0.0 }
 0x15e   : > { %1438 = vst.msk [vmem:[%s2125_s25 + $0x48] sm:$0xff] %vm1428_vm3, %v1373_v10  ;;  %1470 = vst.msk [vmem:[%s2125_s25 + $0x148] sm:$0xff] %vm1428_vm3, %v1405_v11  ;;  %v851_v48 = vmul.f32 %v2081_v43, %v629_v14  ;;  %v1047_v55 = vmax.f32 %v629_v14, 0.0  ;;  %v883_v29 = vmul.f32 %v2081_v43, %v757_v23  ;;  %v1079_v56 = vmax.f32 %v757_v23, 0.0 }
 0x15f   : > { %v921_v30 = vadd.f32 %v2087_v51, %v853_v24  ;;  %v1113_v18 = vmul.f32 %v2081_v43, %v1049_v27  ;;  %v953_v33 = vadd.f32 %v2087_v51, %v885_v46  ;;  %v1145_v35 = vmul.f32 %v2081_v43, %v1081_v12 }
 0x160   : > { %v919_v40 = vadd.f32 %v2087_v51, %v851_v48  ;;  %v1111_v44 = vmul.f32 %v2081_v43, %v1047_v55  ;;  %v951_v45 = vadd.f32 %v2087_v51, %v883_v29  ;;  %v1143_v26 = vmul.f32 %v2081_v43, %v1079_v56 }
 0x161   : > { %v985_v49 = vmax.f32 %v921_v30, 0.0  ;;  %v1177_v58 = vadd.f32 %v2087_v51, %v1113_v18  ;;  %v1017_v7 = vmax.f32 %v953_v33, 0.0  ;;  %v1209_v10 = vadd.f32 %v2087_v51, %v1145_v35 }
 0x162   : > { %v983_v11 = vmax.f32 %v919_v40, 0.0  ;;  %v1175_v14 = vadd.f32 %v2087_v51, %v1111_v44  ;;  %v1015_v23 = vmax.f32 %v951_v45, 0.0  ;;  %v1207_v24 = vadd.f32 %v2087_v51, %v1143_v26 }
 0x163   : > { %v1245_v27 = vmul.f32 %v2084_v47, %v985_v49  ;;  %v1314_v46 = vmul.f32 %v2089_v52, %v1177_v58  ;;  %v1277_v12 = vmul.f32 %v2084_v47, %v1017_v7  ;;  %v1346_v48 = vmul.f32 %v2089_v52, %v1209_v10 }
 0x164   : > { %v1243_v55 = vmul.f32 %v2084_v47, %v983_v11  ;;  %v1312_v29 = vmul.f32 %v2089_v52, %v1175_v14  ;;  %v1275_v56 = vmul.f32 %v2084_v47, %v1015_v23  ;;  %v1344_v30 = vmul.f32 %v2089_v52, %v1207_v24 }
 0x165   : > { %v1378_v18 = vadd.f32 %v1314_v46, %v1245_v27  ;;  %v1410_v33 = vadd.f32 %v1346_v48, %v1277_v12  ;;  %v640_v35 = vadd.f32 %v2227_v61, %v2079_v41  ;;  %v768_v40 = vadd.f32 %v2229_v62, %v2079_v41 }
 0x166   : > { %v1376_v44 = vadd.f32 %v1312_v29, %v1243_v55  ;;  %v1408_v45 = vadd.f32 %v1344_v30, %v1275_v56  ;;  %v632_v26 = vadd.f32 %v2079_v41, %v2233_v5  ;;  %v760_v49 = vadd.f32 %v2079_v41, %v2235_v8 }
 0x167   : > { %1443 = vst.msk [vmem:[%s2125_s25 + $0x70] sm:$0xff] %vm1428_vm3, %v1378_v18  ;;  %1475 = vst.msk [vmem:[%s2125_s25 + $0x170] sm:$0xff] %vm1428_vm3, %v1410_v33  ;;  %v854_v58 = vmul.f32 %v2081_v43, %v640_v35  ;;  %v1050_v7 = vmax.f32 %v640_v35, 0.0  ;;  %v886_v61 = vmul.f32 %v2081_v43, %v768_v40  ;;  %v1082_v10 = vmax.f32 %v768_v40, 0.0 }
 0x168   : > { %1441 = vst.msk [vmem:[%s2125_s25 + $0x60] sm:$0xff] %vm1428_vm3, %v1376_v44  ;;  %1473 = vst.msk [vmem:[%s2125_s25 + $0x160] sm:$0xff] %vm1428_vm3, %v1408_v45  ;;  %v852_v62 = vmul.f32 %v2081_v43, %v632_v26  ;;  %v1048_v5 = vmax.f32 %v632_v26, 0.0  ;;  %v884_v11 = vmul.f32 %v2081_v43, %v760_v49  ;;  %v1080_v8 = vmax.f32 %v760_v49, 0.0 }
 0x169   : > { %v922_v14 = vadd.f32 %v2087_v51, %v854_v58  ;;  %v1114_v23 = vmul.f32 %v2081_v43, %v1050_v7  ;;  %v954_v24 = vadd.f32 %v2087_v51, %v886_v61  ;;  %v1146_v27 = vmul.f32 %v2081_v43, %v1082_v10 }
 0x16a   : > { %v920_v46 = vadd.f32 %v2087_v51, %v852_v62  ;;  %v1112_v12 = vmul.f32 %v2081_v43, %v1048_v5  ;;  %v952_v48 = vadd.f32 %v2087_v51, %v884_v11  ;;  %v1144_v55 = vmul.f32 %v2081_v43, %v1080_v8 }
 0x16b   : > { %v986_v29 = vmax.f32 %v922_v14, 0.0  ;;  %v1178_v56 = vadd.f32 %v2087_v51, %v1114_v23  ;;  %v1018_v30 = vmax.f32 %v954_v24, 0.0  ;;  %v1210_v18 = vadd.f32 %v2087_v51, %v1146_v27 }
 0x16c   : > { %v984_v33 = vmax.f32 %v920_v46, 0.0  ;;  %v1176_v35 = vadd.f32 %v2087_v51, %v1112_v12  ;;  %v1016_v40 = vmax.f32 %v952_v48, 0.0  ;;  %v1208_v44 = vadd.f32 %v2087_v51, %v1144_v55 }
 0x16d   : > { %v1246_v45 = vmul.f32 %v2084_v47, %v986_v29  ;;  %v1315_v26 = vmul.f32 %v2089_v52, %v1178_v56  ;;  %v1278_v49 = vmul.f32 %v2084_v47, %v1018_v30  ;;  %v1347_v58 = vmul.f32 %v2089_v52, %v1210_v18 }
 0x16e   : > { %v1244_v7 = vmul.f32 %v2084_v47, %v984_v33  ;;  %v1313_v61 = vmul.f32 %v2089_v52, %v1176_v35  ;;  %v1276_v10 = vmul.f32 %v2084_v47, %v1016_v40  ;;  %v1345_v62 = vmul.f32 %v2089_v52, %v1208_v44 }
 0x16f   : > { %v1379_v5 = vadd.f32 %v1315_v26, %v1246_v45  ;;  %v1411_v11 = vadd.f32 %v1347_v58, %v1278_v49  ;;  %v653_v8 = vadd.f32 %v2255_v42, %v2079_v41  ;;  %v781_v14 = vadd.f32 %v2257_v19, %v2079_v41 }
 0x170   : > { %v1377_v23 = vadd.f32 %v1313_v61, %v1244_v7  ;;  %v1409_v24 = vadd.f32 %v1345_v62, %v1276_v10  ;;  %v645_v27 = vadd.f32 %v2079_v41, %v2265_v25  ;;  %v773_v46 = vadd.f32 %v2079_v41, %v2267_v37 }
 0x171   : > { %1444 = vst.msk [vmem:[%s2125_s25 + $0x78] sm:$0xff] %vm1428_vm3, %v1379_v5  ;;  %1476 = vst.msk [vmem:[%s2125_s25 + $0x178] sm:$0xff] %vm1428_vm3, %v1411_v11  ;;  %v857_v12 = vmul.f32 %v2081_v43, %v653_v8  ;;  %v1053_v48 = vmax.f32 %v653_v8, 0.0  ;;  %v889_v42 = vmul.f32 %v2081_v43, %v781_v14  ;;  %v1085_v55 = vmax.f32 %v781_v14, 0.0 }
 0x172   : > { %1442 = vst.msk [vmem:[%s2125_s25 + $0x68] sm:$0xff] %vm1428_vm3, %v1377_v23  ;;  %1474 = vst.msk [vmem:[%s2125_s25 + $0x168] sm:$0xff] %vm1428_vm3, %v1409_v24  ;;  %v855_v19 = vmul.f32 %v2081_v43, %v645_v27  ;;  %v1051_v25 = vmax.f32 %v645_v27, 0.0  ;;  %v887_v29 = vmul.f32 %v2081_v43, %v773_v46  ;;  %v1083_v37 = vmax.f32 %v773_v46, 0.0 }
 0x173   : > { %v925_v56 = vadd.f32 %v2087_v51, %v857_v12  ;;  %v1117_v30 = vmul.f32 %v2081_v43, %v1053_v48  ;;  %v957_v18 = vadd.f32 %v2087_v51, %v889_v42  ;;  %v1149_v33 = vmul.f32 %v2081_v43, %v1085_v55 }
 0x174   : > { %v923_v35 = vadd.f32 %v2087_v51, %v855_v19  ;;  %v1115_v40 = vmul.f32 %v2081_v43, %v1051_v25  ;;  %v955_v44 = vadd.f32 %v2087_v51, %v887_v29  ;;  %v1147_v45 = vmul.f32 %v2081_v43, %v1083_v37 }
 0x175   : > { %v989_v26 = vmax.f32 %v925_v56, 0.0  ;;  %v1181_v49 = vadd.f32 %v2087_v51, %v1117_v30  ;;  %v1021_v58 = vmax.f32 %v957_v18, 0.0  ;;  %v1213_v7 = vadd.f32 %v2087_v51, %v1149_v33 }
 0x176   : > { %v987_v61 = vmax.f32 %v923_v35, 0.0  ;;  %v1179_v10 = vadd.f32 %v2087_v51, %v1115_v40  ;;  %v1019_v62 = vmax.f32 %v955_v44, 0.0  ;;  %v1211_v5 = vadd.f32 %v2087_v51, %v1147_v45 }
 0x177   : > { %v1249_v11 = vmul.f32 %v2084_v47, %v989_v26  ;;  %v1318_v8 = vmul.f32 %v2089_v52, %v1181_v49  ;;  %v1281_v14 = vmul.f32 %v2084_v47, %v1021_v58  ;;  %v1350_v23 = vmul.f32 %v2089_v52, %v1213_v7 }
 0x178   : > { %v1247_v24 = vmul.f32 %v2084_v47, %v987_v61  ;;  %v1316_v27 = vmul.f32 %v2089_v52, %v1179_v10  ;;  %v1279_v46 = vmul.f32 %v2084_v47, %v1019_v62  ;;  %v1348_v12 = vmul.f32 %v2089_v52, %v1211_v5 }
 0x179   : > { %v1382_v48 = vadd.f32 %v1318_v8, %v1249_v11  ;;  %v1414_v42 = vadd.f32 %v1350_v23, %v1281_v14  ;;  %v656_v55 = vadd.f32 %v2275_v50, %v2079_v41  ;;  %v784_v19 = vadd.f32 %v2277_v53, %v2079_v41 }
 0x17a   : > { %v1380_v25 = vadd.f32 %v1316_v27, %v1247_v24  ;;  %v1412_v29 = vadd.f32 %v1348_v12, %v1279_v46  ;;  %v648_v37 = vadd.f32 %v2079_v41, %v2283_v60  ;;  %v776_v56 = vadd.f32 %v2079_v41, %v2285_v63 }
 0x17b   : > { %1447 = vst.msk [vmem:[%s2125_s25 + $0x90] sm:$0xff] %vm1428_vm3, %v1382_v48  ;;  %1479 = vst.msk [vmem:[%s2125_s25 + $0x190] sm:$0xff] %vm1428_vm3, %v1414_v42  ;;  %v858_v30 = vmul.f32 %v2081_v43, %v656_v55  ;;  %v1054_v18 = vmax.f32 %v656_v55, 0.0  ;;  %v890_v50 = vmul.f32 %v2081_v43, %v784_v19  ;;  %v1086_v33 = vmax.f32 %v784_v19, 0.0 }
 0x17c   : > { %1445 = vst.msk [vmem:[%s2125_s25 + $0x80] sm:$0xff] %vm1428_vm3, %v1380_v25  ;;  %1477 = vst.msk [vmem:[%s2125_s25 + $0x180] sm:$0xff] %vm1428_vm3, %v1412_v29  ;;  %v856_v53 = vmul.f32 %v2081_v43, %v648_v37  ;;  %v1052_v60 = vmax.f32 %v648_v37, 0.0  ;;  %v888_v35 = vmul.f32 %v2081_v43, %v776_v56  ;;  %v1084_v63 = vmax.f32 %v776_v56, 0.0 }
 0x17d   : > { %v926_v40 = vadd.f32 %v2087_v51, %v858_v30  ;;  %v1118_v44 = vmul.f32 %v2081_v43, %v1054_v18  ;;  %v958_v45 = vadd.f32 %v2087_v51, %v890_v50  ;;  %v1150_v26 = vmul.f32 %v2081_v43, %v1086_v33  ;;  %v2597_v50 = vld [vmem:[#allocation4] ss:$0 sm:$0xff] }
 0x17e   : > { %v924_v49 = vadd.f32 %v2087_v51, %v856_v53  ;;  %v1116_v58 = vmul.f32 %v2081_v43, %v1052_v60  ;;  %v956_v7 = vadd.f32 %v2087_v51, %v888_v35  ;;  %v1148_v61 = vmul.f32 %v2081_v43, %v1084_v63  ;;  %v2605_v53 = vld [vmem:[#allocation4 + $0x1] ss:$0 sm:$0xff] }
 0x17f   : > { %v990_v10 = vmax.f32 %v926_v40, 0.0  ;;  %v1182_v62 = vadd.f32 %v2087_v51, %v1118_v44  ;;  %v1022_v5 = vmax.f32 %v958_v45, 0.0  ;;  %v1214_v11 = vadd.f32 %v2087_v51, %v1150_v26  ;;  %v2615_v40 = vld [vmem:[#allocation4 + $0x2] ss:$0 sm:$0xff] }
 0x180   : > { %v988_v8 = vmax.f32 %v924_v49, 0.0  ;;  %v1180_v14 = vadd.f32 %v2087_v51, %v1116_v58  ;;  %v1020_v23 = vmax.f32 %v956_v7, 0.0  ;;  %v1212_v24 = vadd.f32 %v2087_v51, %v1148_v61 }
 0x181   : > { %v1250_v27 = vmul.f32 %v2084_v47, %v990_v10  ;;  %v1319_v46 = vmul.f32 %v2089_v52, %v1182_v62  ;;  %v1282_v12 = vmul.f32 %v2084_v47, %v1022_v5  ;;  %v1351_v43 = vmul.f32 %v2089_v52, %v1214_v11 }
 0x182   : > { %v1248_v48 = vmul.f32 %v2084_v47, %v988_v8  ;;  %v1317_v42 = vmul.f32 %v2089_v52, %v1180_v14  ;;  %v1280_v55 = vmul.f32 %v2084_v47, %v1020_v23  ;;  %v1349_v19 = vmul.f32 %v2089_v52, %v1212_v24 }
 0x183   : > { %v1383_v25 = vadd.f32 %v1319_v46, %v1250_v27  ;;  %v1415_v51 = vadd.f32 %v1351_v43, %v1282_v12  ;;  %v669_v29 = vadd.f32 %v2303_v36, %v2079_v41  ;;  %v797_v37 = vadd.f32 %v2305_v39, %v2079_v41 }
 0x184   : > { %v1381_v56 = vadd.f32 %v1317_v42, %v1248_v48  ;;  %v1413_v30 = vadd.f32 %v1349_v19, %v1280_v55  ;;  %v661_v18 = vadd.f32 %v2079_v41, %v2311_v20  ;;  %v789_v33 = vadd.f32 %v2597_v50, %v2313_v38 }
 0x185   : > { %1448 = vst.msk [vmem:[%s2125_s25 + $0x98] sm:$0xff] %vm1428_vm3, %v1383_v25  ;;  %1480 = vst.msk [vmem:[%s2125_s25 + $0x198] sm:$0xff] %vm1428_vm3, %v1415_v51  ;;  %v861_v36 = vmul.f32 %v2605_v53, %v669_v29  ;;  %v1057_v60 = vmax.f32 %v669_v29, 0.0  ;;  %v893_v39 = vmul.f32 %v2605_v53, %v797_v37  ;;  %v1089_v35 = vmax.f32 %v797_v37, 0.0 }
 0x186   : > { %1446 = vst.msk [vmem:[%s2125_s25 + $0x88] sm:$0xff] %vm1428_vm3, %v1381_v56  ;;  %1478 = vst.msk [vmem:[%s2125_s25 + $0x188] sm:$0xff] %vm1428_vm3, %v1413_v30  ;;  %v859_v41 = vmul.f32 %v2605_v53, %v661_v18  ;;  %v1055_v20 = vmax.f32 %v661_v18, 0.0  ;;  %v891_v38 = vmul.f32 %v2605_v53, %v789_v33  ;;  %v1087_v63 = vmax.f32 %v789_v33, 0.0 }
 0x187   : > { %v929_v44 = vadd.f32 %v2615_v40, %v861_v36  ;;  %v1121_v45 = vmul.f32 %v2605_v53, %v1057_v60  ;;  %v961_v26 = vadd.f32 %v2615_v40, %v893_v39  ;;  %v1153_v49 = vmul.f32 %v2605_v53, %v1089_v35 }
 0x188   : > { %v927_v58 = vadd.f32 %v2615_v40, %v859_v41  ;;  %v1119_v7 = vmul.f32 %v2605_v53, %v1055_v20  ;;  %v959_v61 = vadd.f32 %v2615_v40, %v891_v38  ;;  %v1151_v10 = vmul.f32 %v2605_v53, %v1087_v63 }
 0x189   : > { %v993_v62 = vmax.f32 %v929_v44, 0.0  ;;  %v1185_v5 = vadd.f32 %v2615_v40, %v1121_v45  ;;  %v1025_v11 = vmax.f32 %v961_v26, 0.0  ;;  %v1217_v8 = vadd.f32 %v2615_v40, %v1153_v49 }
 0x18a   : > { %v991_v14 = vmax.f32 %v927_v58, 0.0  ;;  %v1183_v23 = vadd.f32 %v2615_v40, %v1119_v7  ;;  %v1023_v24 = vmax.f32 %v959_v61, 0.0  ;;  %v1215_v27 = vadd.f32 %v2615_v40, %v1151_v10 }
 0x18b   : > { %v1253_v46 = vmul.f32 %v2084_v47, %v993_v62  ;;  %v1322_v12 = vmul.f32 %v2089_v52, %v1185_v5  ;;  %v1285_v43 = vmul.f32 %v2084_v47, %v1025_v11  ;;  %v1354_v48 = vmul.f32 %v2089_v52, %v1217_v8 }
 0x18c   : > { %v1251_v42 = vmul.f32 %v2084_v47, %v991_v14  ;;  %v1320_v55 = vmul.f32 %v2089_v52, %v1183_v23  ;;  %v1283_v19 = vmul.f32 %v2084_v47, %v1023_v24  ;;  %v1352_v25 = vmul.f32 %v2089_v52, %v1215_v27 }
 0x18d   : > { %v1386_v51 = vadd.f32 %v1322_v12, %v1253_v46  ;;  %v1418_v29 = vadd.f32 %v1354_v48, %v1285_v43  ;;  %v672_v37 = vadd.f32 %v2597_v50, %v2319_v57  ;;  %v800_v56 = vadd.f32 %v2597_v50, %v2321_v0 }
 0x18e   : > { %v1384_v30 = vadd.f32 %v1320_v55, %v1251_v42  ;;  %v1416_v18 = vadd.f32 %v1352_v25, %v1283_v19  ;;  %v664_v33 = vadd.f32 %v2597_v50, %v2329_v3  ;;  %v792_v36 = vadd.f32 %v2597_v50, %v2331_v6 }
 0x18f   : > { %1451 = vst.msk [vmem:[%s2125_s25 + $0xb0] sm:$0xff] %vm1428_vm3, %v1386_v51  ;;  %1483 = vst.msk [vmem:[%s2125_s25 + $0x1b0] sm:$0xff] %vm1428_vm3, %v1418_v29  ;;  %v862_v60 = vmul.f32 %v2605_v53, %v672_v37  ;;  %v1058_v39 = vmax.f32 %v672_v37, 0.0  ;;  %v894_v57 = vmul.f32 %v2605_v53, %v800_v56  ;;  %v1090_v35 = vmax.f32 %v800_v56, 0.0 }
 0x190   : > { %1449 = vst.msk [vmem:[%s2125_s25 + $0xa0] sm:$0xff] %vm1428_vm3, %v1384_v30  ;;  %1481 = vst.msk [vmem:[%s2125_s25 + $0x1a0] sm:$0xff] %vm1428_vm3, %v1416_v18  ;;  %v860_v0 = vmul.f32 %v2605_v53, %v664_v33  ;;  %v1056_v3 = vmax.f32 %v664_v33, 0.0  ;;  %v892_v41 = vmul.f32 %v2605_v53, %v792_v36  ;;  %v1088_v6 = vmax.f32 %v792_v36, 0.0 }
 0x191   : > { %v930_v20 = vadd.f32 %v2615_v40, %v862_v60  ;;  %v1122_v38 = vmul.f32 %v2605_v53, %v1058_v39  ;;  %v962_v63 = vadd.f32 %v2615_v40, %v894_v57  ;;  %v1154_v44 = vmul.f32 %v2605_v53, %v1090_v35 }
 0x192   : > { %v928_v45 = vadd.f32 %v2615_v40, %v860_v0  ;;  %v1120_v26 = vmul.f32 %v2605_v53, %v1056_v3  ;;  %v960_v49 = vadd.f32 %v2615_v40, %v892_v41  ;;  %v1152_v58 = vmul.f32 %v2605_v53, %v1088_v6 }
 0x193   : > { %v994_v7 = vmax.f32 %v930_v20, 0.0  ;;  %v1186_v61 = vadd.f32 %v2615_v40, %v1122_v38  ;;  %v1026_v10 = vmax.f32 %v962_v63, 0.0  ;;  %v1218_v62 = vadd.f32 %v2615_v40, %v1154_v44 }
 0x194   : > { %v992_v5 = vmax.f32 %v928_v45, 0.0  ;;  %v1184_v11 = vadd.f32 %v2615_v40, %v1120_v26  ;;  %v1024_v8 = vmax.f32 %v960_v49, 0.0  ;;  %v1216_v14 = vadd.f32 %v2615_v40, %v1152_v58 }
 0x195   : > { %v1254_v23 = vmul.f32 %v2084_v47, %v994_v7  ;;  %v1323_v24 = vmul.f32 %v2089_v52, %v1186_v61  ;;  %v1286_v27 = vmul.f32 %v2084_v47, %v1026_v10  ;;  %v1355_v46 = vmul.f32 %v2089_v52, %v1218_v62 }
 0x196   : > { %v1252_v12 = vmul.f32 %v2084_v47, %v992_v5  ;;  %v1321_v43 = vmul.f32 %v2089_v52, %v1184_v11  ;;  %v1284_v48 = vmul.f32 %v2084_v47, %v1024_v8  ;;  %v1353_v42 = vmul.f32 %v2089_v52, %v1216_v14 }
 0x197   : > { %v1387_v55 = vadd.f32 %v1323_v24, %v1254_v23  ;;  %v1419_v19 = vadd.f32 %v1355_v46, %v1286_v27  ;;  %v685_v25 = vadd.f32 %v2597_v50, %v2351_v31  ;;  %v813_v51 = vadd.f32 %v2597_v50, %v2353_v32 }
 0x198   : > { %v1385_v29 = vadd.f32 %v1321_v43, %v1252_v12  ;;  %v1417_v37 = vadd.f32 %v1353_v42, %v1284_v48  ;;  %v677_v56 = vadd.f32 %v2597_v50, %v2359_v54  ;;  %v805_v30 = vadd.f32 %v2597_v50, %v2361_v1 }
 0x199   : > { %1452 = vst.msk [vmem:[%s2125_s25 + $0xb8] sm:$0xff] %vm1428_vm3, %v1387_v55  ;;  %1484 = vst.msk [vmem:[%s2125_s25 + $0x1b8] sm:$0xff] %vm1428_vm3, %v1419_v19  ;;  %v865_v18 = vmul.f32 %v2605_v53, %v685_v25  ;;  %v1061_v33 = vmax.f32 %v685_v25, 0.0  ;;  %v897_v31 = vmul.f32 %v2605_v53, %v813_v51  ;;  %v1093_v36 = vmax.f32 %v813_v51, 0.0 }
 0x19a   : > { %1450 = vst.msk [vmem:[%s2125_s25 + $0xa8] sm:$0xff] %vm1428_vm3, %v1385_v29  ;;  %1482 = vst.msk [vmem:[%s2125_s25 + $0x1a8] sm:$0xff] %vm1428_vm3, %v1417_v37  ;;  %v863_v32 = vmul.f32 %v2605_v53, %v677_v56  ;;  %v1059_v54 = vmax.f32 %v677_v56, 0.0  ;;  %v895_v60 = vmul.f32 %v2605_v53, %v805_v30  ;;  %v1091_v1 = vmax.f32 %v805_v30, 0.0 }
 0x19b   : > { %v933_v39 = vadd.f32 %v2615_v40, %v865_v18  ;;  %v1125_v57 = vmul.f32 %v2605_v53, %v1061_v33  ;;  %v965_v35 = vadd.f32 %v2615_v40, %v897_v31  ;;  %v1157_v0 = vmul.f32 %v2605_v53, %v1093_v36 }
 0x19c   : > { %v931_v3 = vadd.f32 %v2615_v40, %v863_v32  ;;  %v1123_v41 = vmul.f32 %v2605_v53, %v1059_v54  ;;  %v963_v6 = vadd.f32 %v2615_v40, %v895_v60  ;;  %v1155_v20 = vmul.f32 %v2605_v53, %v1091_v1 }
 0x19d   : > { %v997_v38 = vmax.f32 %v933_v39, 0.0  ;;  %v1189_v63 = vadd.f32 %v2615_v40, %v1125_v57  ;;  %v1029_v44 = vmax.f32 %v965_v35, 0.0  ;;  %v1221_v45 = vadd.f32 %v2615_v40, %v1157_v0 }
 0x19e   : > { %v995_v26 = vmax.f32 %v931_v3, 0.0  ;;  %v1187_v49 = vadd.f32 %v2615_v40, %v1123_v41  ;;  %v1027_v58 = vmax.f32 %v963_v6, 0.0  ;;  %v1219_v7 = vadd.f32 %v2615_v40, %v1155_v20 }
 0x19f   : > { %v1257_v61 = vmul.f32 %v2084_v47, %v997_v38  ;;  %v1326_v10 = vmul.f32 %v2089_v52, %v1189_v63  ;;  %v1289_v62 = vmul.f32 %v2084_v47, %v1029_v44  ;;  %v1358_v5 = vmul.f32 %v2089_v52, %v1221_v45 }
 0x1a0   : > { %v1255_v11 = vmul.f32 %v2084_v47, %v995_v26  ;;  %v1324_v8 = vmul.f32 %v2089_v52, %v1187_v49  ;;  %v1287_v14 = vmul.f32 %v2084_v47, %v1027_v58  ;;  %v1356_v23 = vmul.f32 %v2089_v52, %v1219_v7 }
 0x1a1   : > { %v1390_v24 = vadd.f32 %v1326_v10, %v1257_v61  ;;  %v1422_v27 = vadd.f32 %v1358_v5, %v1289_v62  ;;  %v688_v46 = vadd.f32 %v2597_v50, %v2367_v4  ;;  %v816_v12 = vadd.f32 %v2597_v50, %v2369_v9 }
 0x1a2   : > { %v1388_v43 = vadd.f32 %v1324_v8, %v1255_v11  ;;  %v1420_v48 = vadd.f32 %v1356_v23, %v1287_v14  ;;  %v680_v42 = vadd.f32 %v2597_v50, %v2375_v16  ;;  %v808_v55 = vadd.f32 %v2597_v50, %v2377_v17 }
 0x1a3   : > { %1455 = vst.msk [vmem:[%s2125_s25 + $0xd0] sm:$0xff] %vm1428_vm3, %v1390_v24  ;;  %1487 = vst.msk [vmem:[%s2125_s25 + $0x1d0] sm:$0xff] %vm1428_vm3, %v1422_v27  ;;  %v866_v19 = vmul.f32 %v2605_v53, %v688_v46  ;;  %v1062_v25 = vmax.f32 %v688_v46, 0.0  ;;  %v898_v4 = vmul.f32 %v2605_v53, %v816_v12  ;;  %v1094_v51 = vmax.f32 %v816_v12, 0.0 }
 0x1a4   : > { %1453 = vst.msk [vmem:[%s2125_s25 + $0xc0] sm:$0xff] %vm1428_vm3, %v1388_v43  ;;  %1485 = vst.msk [vmem:[%s2125_s25 + $0x1c0] sm:$0xff] %vm1428_vm3, %v1420_v48  ;;  %v864_v9 = vmul.f32 %v2605_v53, %v680_v42  ;;  %v1060_v16 = vmax.f32 %v680_v42, 0.0  ;;  %v896_v29 = vmul.f32 %v2605_v53, %v808_v55  ;;  %v1092_v17 = vmax.f32 %v808_v55, 0.0 }
 0x1a5   : > { %v934_v37 = vadd.f32 %v2615_v40, %v866_v19  ;;  %v1126_v56 = vmul.f32 %v2605_v53, %v1062_v25  ;;  %v966_v30 = vadd.f32 %v2615_v40, %v898_v4  ;;  %v1158_v18 = vmul.f32 %v2605_v53, %v1094_v51 }
 0x1a6   : > { %v932_v33 = vadd.f32 %v2615_v40, %v864_v9  ;;  %v1124_v31 = vmul.f32 %v2605_v53, %v1060_v16  ;;  %v964_v36 = vadd.f32 %v2615_v40, %v896_v29  ;;  %v1156_v32 = vmul.f32 %v2605_v53, %v1092_v17 }
 0x1a7   : > { %v998_v54 = vmax.f32 %v934_v37, 0.0  ;;  %v1190_v60 = vadd.f32 %v2615_v40, %v1126_v56  ;;  %v1030_v1 = vmax.f32 %v966_v30, 0.0  ;;  %v1222_v39 = vadd.f32 %v2615_v40, %v1158_v18 }
 0x1a8   : > { %v996_v57 = vmax.f32 %v932_v33, 0.0  ;;  %v1188_v35 = vadd.f32 %v2615_v40, %v1124_v31  ;;  %v1028_v0 = vmax.f32 %v964_v36, 0.0  ;;  %v1220_v3 = vadd.f32 %v2615_v40, %v1156_v32 }
 0x1a9   : > { %v1258_v41 = vmul.f32 %v2084_v47, %v998_v54  ;;  %v1327_v6 = vmul.f32 %v2089_v52, %v1190_v60  ;;  %v1290_v20 = vmul.f32 %v2084_v47, %v1030_v1  ;;  %v1359_v38 = vmul.f32 %v2089_v52, %v1222_v39 }
 0x1aa   : > { %v1256_v63 = vmul.f32 %v2084_v47, %v996_v57  ;;  %v1325_v44 = vmul.f32 %v2089_v52, %v1188_v35  ;;  %v1288_v45 = vmul.f32 %v2084_v47, %v1028_v0  ;;  %v1357_v26 = vmul.f32 %v2089_v52, %v1220_v3 }
 0x1ab   : > { %v1391_v49 = vadd.f32 %v1327_v6, %v1258_v41  ;;  %v1423_v58 = vadd.f32 %v1359_v38, %v1290_v20  ;;  %v701_v7 = vadd.f32 %v2597_v50, %v2403_v59  ;;  %v829_v61 = vadd.f32 %v2597_v50, %v2405_v2 }
 0x1ac   : > { %v1389_v10 = vadd.f32 %v1325_v44, %v1256_v63  ;;  %v1421_v62 = vadd.f32 %v1357_v26, %v1288_v45  ;;  %v693_v5 = vadd.f32 %v2597_v50, %v2409_v15  ;;  %v821_v11 = vadd.f32 %v2597_v50, %v2411_v22 }
 0x1ad   : > { %1456 = vst.msk [vmem:[%s2125_s25 + $0xd8] sm:$0xff] %vm1428_vm3, %v1391_v49  ;;  %1488 = vst.msk [vmem:[%s2125_s25 + $0x1d8] sm:$0xff] %vm1428_vm3, %v1423_v58  ;;  %v869_v8 = vmul.f32 %v2605_v53, %v701_v7  ;;  %v1065_v14 = vmax.f32 %v701_v7, 0.0  ;;  %v901_v59 = vmul.f32 %v2605_v53, %v829_v61  ;;  %v1097_v23 = vmax.f32 %v829_v61, 0.0 }
 0x1ae   : > { %1454 = vst.msk [vmem:[%s2125_s25 + $0xc8] sm:$0xff] %vm1428_vm3, %v1389_v10  ;;  %1486 = vst.msk [vmem:[%s2125_s25 + $0x1c8] sm:$0xff] %vm1428_vm3, %v1421_v62  ;;  %v867_v2 = vmul.f32 %v2605_v53, %v693_v5  ;;  %v1063_v15 = vmax.f32 %v693_v5, 0.0  ;;  %v899_v24 = vmul.f32 %v2605_v53, %v821_v11  ;;  %v1095_v22 = vmax.f32 %v821_v11, 0.0 }
 0x1af   : > { %v937_v27 = vadd.f32 %v2615_v40, %v869_v8  ;;  %v1129_v46 = vmul.f32 %v2605_v53, %v1065_v14  ;;  %v969_v12 = vadd.f32 %v2615_v40, %v901_v59  ;;  %v1161_v43 = vmul.f32 %v2605_v53, %v1097_v23 }
 0x1b0   : > { %v935_v48 = vadd.f32 %v2615_v40, %v867_v2  ;;  %v1127_v42 = vmul.f32 %v2605_v53, %v1063_v15  ;;  %v967_v55 = vadd.f32 %v2615_v40, %v899_v24  ;;  %v1159_v19 = vmul.f32 %v2605_v53, %v1095_v22 }
 0x1b1   : > { %v1001_v25 = vmax.f32 %v937_v27, 0.0  ;;  %v1193_v4 = vadd.f32 %v2615_v40, %v1129_v46  ;;  %v1033_v51 = vmax.f32 %v969_v12, 0.0  ;;  %v1225_v9 = vadd.f32 %v2615_v40, %v1161_v43 }
 0x1b2   : > { %v999_v16 = vmax.f32 %v935_v48, 0.0  ;;  %v1191_v29 = vadd.f32 %v2615_v40, %v1127_v42  ;;  %v1031_v17 = vmax.f32 %v967_v55, 0.0  ;;  %v1223_v37 = vadd.f32 %v2615_v40, %v1159_v19 }
 0x1b3   : > { %v1261_v56 = vmul.f32 %v2084_v47, %v1001_v25  ;;  %v1330_v30 = vmul.f32 %v2089_v52, %v1193_v4  ;;  %v1293_v18 = vmul.f32 %v2084_v47, %v1033_v51  ;;  %v1362_v33 = vmul.f32 %v2089_v52, %v1225_v9 }
 0x1b4   : > { %v1259_v31 = vmul.f32 %v2084_v47, %v999_v16  ;;  %v1328_v36 = vmul.f32 %v2089_v52, %v1191_v29  ;;  %v1291_v32 = vmul.f32 %v2084_v47, %v1031_v17  ;;  %v1360_v54 = vmul.f32 %v2089_v52, %v1223_v37 }
 0x1b5   : > { %v1394_v60 = vadd.f32 %v1330_v30, %v1261_v56  ;;  %v1426_v1 = vadd.f32 %v1362_v33, %v1293_v18  ;;  %v704_v39 = vadd.f32 %v2597_v50, %v2415_v28  ;;  %v832_v57 = vadd.f32 %v2597_v50, %v2417_v13 }
 0x1b6   : > { %v1392_v35 = vadd.f32 %v1328_v36, %v1259_v31  ;;  %v1424_v0 = vadd.f32 %v1360_v54, %v1291_v32  ;;  %v696_v3 = vadd.f32 %v2597_v50, %v2423_v21  ;;  %v824_v41 = vadd.f32 %v2597_v50, %v2425_v34 }
 0x1b7   : > { %1459 = vst.msk [vmem:[%s2125_s25 + $0xf0] sm:$0xff] %vm1428_vm3, %v1394_v60  ;;  %1491 = vst.msk [vmem:[%s2125_s25 + $0x1f0] sm:$0xff] %vm1428_vm3, %v1426_v1  ;;  %v870_v6 = vmul.f32 %v2605_v53, %v704_v39  ;;  %v1066_v20 = vmax.f32 %v704_v39, 0.0  ;;  %v902_v28 = vmul.f32 %v2605_v53, %v832_v57  ;;  %v1098_v38 = vmax.f32 %v832_v57, 0.0 }
 0x1b8   : > { %1457 = vst.msk [vmem:[%s2125_s25 + $0xe0] sm:$0xff] %vm1428_vm3, %v1392_v35  ;;  %1489 = vst.msk [vmem:[%s2125_s25 + $0x1e0] sm:$0xff] %vm1428_vm3, %v1424_v0  ;;  %v868_v13 = vmul.f32 %v2605_v53, %v696_v3  ;;  %v1064_v21 = vmax.f32 %v696_v3, 0.0  ;;  %v900_v63 = vmul.f32 %v2605_v53, %v824_v41  ;;  %v1096_v34 = vmax.f32 %v824_v41, 0.0 }
 0x1b9   : > { %v938_v50 = vadd.f32 %v2615_v40, %v870_v6  ;;  %v1130_v44 = vmul.f32 %v2605_v53, %v1066_v20  ;;  %v970_v45 = vadd.f32 %v2615_v40, %v902_v28  ;;  %v1162_v26 = vmul.f32 %v2605_v53, %v1098_v38 }
 0x1ba   : > { %v936_v49 = vadd.f32 %v2615_v40, %v868_v13  ;;  %v1128_v58 = vmul.f32 %v2605_v53, %v1064_v21  ;;  %v968_v7 = vadd.f32 %v2615_v40, %v900_v63  ;;  %v1160_v61 = vmul.f32 %v2605_v53, %v1096_v34 }
 0x1bb   : > { %v1002_v10 = vmax.f32 %v938_v50, 0.0  ;;  %v1194_v62 = vadd.f32 %v2615_v40, %v1130_v44  ;;  %v1034_v5 = vmax.f32 %v970_v45, 0.0  ;;  %v1226_v11 = vadd.f32 %v2615_v40, %v1162_v26 }
 0x1bc   : > { %v1000_v8 = vmax.f32 %v936_v49, 0.0  ;;  %v1192_v14 = vadd.f32 %v2615_v40, %v1128_v58  ;;  %v1032_v59 = vmax.f32 %v968_v7, 0.0  ;;  %v1224_v23 = vadd.f32 %v2615_v40, %v1160_v61 }
 0x1bd   : > { %v1262_v2 = vmul.f32 %v2084_v47, %v1002_v10  ;;  %v1331_v53 = vmul.f32 %v2089_v52, %v1194_v62  ;;  %v1294_v15 = vmul.f32 %v2084_v47, %v1034_v5  ;;  %v1363_v24 = vmul.f32 %v2089_v52, %v1226_v11 }
 0x1be   : > { %v1260_v22 = vmul.f32 %v2084_v47, %v1000_v8  ;;  %v1329_v27 = vmul.f32 %v2089_v52, %v1192_v14  ;;  %v1292_v46 = vmul.f32 %v2084_v47, %v1032_v59  ;;  %v1361_v12 = vmul.f32 %v2089_v52, %v1224_v23 }
 0x1bf   : > { %v1395_v43 = vadd.f32 %v1331_v53, %v1262_v2  ;;  %v1427_v48 = vadd.f32 %v1363_v24, %v1294_v15 }
 0x1c0   : > { %v1393_v40 = vadd.f32 %v1329_v27, %v1260_v22  ;;  %v1425_v42 = vadd.f32 %v1361_v12, %v1292_v46 }
 0x1c1   : > { %1460 = vst.msk [vmem:[%s2125_s25 + $0xf8] sm:$0xff] %vm1428_vm3, %v1395_v43  ;;  %1492 = vst.msk [vmem:[%s2125_s25 + $0x1f8] sm:$0xff] %vm1428_vm3, %v1427_v48 }
 0x1c2   : > { %1458 = vst.msk [vmem:[%s2125_s25 + $0xe8] sm:$0xff] %vm1428_vm3, %v1393_v40  ;;  %1490 = vst.msk [vmem:[%s2125_s25 + $0x1e8] sm:$0xff] %vm1428_vm3, %v1425_v42 }
 0x1c3 PF: > { %s15_s12 = sadd.s32 1, %s1893_s12  }
 0x1c4   : > { %p12_p7 = scmp.ge.s32.totalorder %s15_s12, 6  }
 0x1c6   :  { %14 = sbr.rel (!%p12_p7) target bundleno = 2 (0x2), region = 71 }
 0x1cd   :  { %1515 = vsyncpa [#allocation3], 1 }
 0x1ce   :  { %1517 = vsyncpa [#allocation3 + $0x1], 1 }
 0x1cf   :  { %1518 = vsyncpa [#allocation5], 1 }

// kernel: mcnet_forward.19
= control target key start
LH: loop header
LB: loop body
LE: loop exit
PB: predicated region body
PF: predicated region fallthrough
CT: control target
= control target key end

     0   :  { %s3970_s12 = smov 0   ;;  %s5596_s0 = inlined_call_operand.vmem [shape: bf16[1024,576], index: 0, kind: input, shape index: {}]   ;;  %s5597_s1 = inlined_call_operand.vmem [shape: bf16[576,64], index: 1, kind: input, shape index: {}]   ;;  %s5598_s2 = inlined_call_operand.vmem [shape: f32[4,64], index: 2, kind: input, shape index: {}]   ;;  %s5599_s3 = inlined_call_operand.vmem [shape: f32[1024,64], index: 3, kind: output, shape index: {}]  }
   0x1 LB: > { %s3143_s13 = sadd.s32 4294967295, %s3947_s12   ;;  %p3147_p0 = scmp.ge.s32.totalorder %s3947_s12, 1  ;;  %s3947_s12 = sphi %s3970_s12, %s13_s12  }
   0x2   : > { %p139_p1 = scmp.lt.s32.totalorder %s3947_s12, 3 }
   0x4   : > { %p140_p2 = pnand %p3147_p0, %p139_p1 }
   0x6   : > { %143 = sbr.rel (%p140_p2) target bundleno = 656 (0x290), region = 32 }
   0xd   : > { %v3679_v0 = vld [vmem:[%s5597_s1] sm:$0xff]   ;;  %v3949_v1 = vmov 0   ;;  %s3148_s16 = sshll.u32 %s3143_s13, 6  ;;  %v3680_v2 = vld [vmem:[%s5597_s1 + $0x8] sm:$0xff]   ;;  %v3681_v3 = vld [vmem:[%s5597_s1 + $0x10] sm:$0xff]   ;;  %vm1466_vm0 = vcmask 523264  }
   0xe   : > { %1563 = vmatprep.subr.bf16.mxu0 %v3949_v1  ;;  %3493 = vmatprep.subr.bf16.mxu1 %v3949_v1  ;;  %p165_p3 = scmp.lt.s32.totalorder %s3148_s16, 127  ;;  %v3682_v4 = vld [vmem:[%s5597_s1 + $0x18] sm:$0xff]   ;;  %v3683_v5 = vld [vmem:[%s5597_s1 + $0x20] sm:$0xff]   ;;  %v3684_v7 = vld [vmem:[%s5597_s1 + $0x28] sm:$0xff]  }
   0xf   : > { %1564 = vmatpush1.bf16.msra.mxu0 %v3679_v0  ;;  %3509 = vmatpush1.bf16.msra.mxu1 %v3679_v0  ;;  %v3685_v9 = vld [vmem:[%s5597_s1 + $0x30] sm:$0xff]   ;;  %v3686_v10 = vld [vmem:[%s5597_s1 + $0x38] sm:$0xff]   ;;  %v3687_v11 = vld [vmem:[%s5597_s1 + $0x40] sm:$0xff]  }
  0x10   : > { %1565 = vmatprep.subr.bf16.mxu0 %v3949_v1  ;;  %3494 = vmatprep.subr.bf16.mxu1 %v3949_v1  ;;  %s5651_s16 = smov (!%p165_p3, %s3148_s16), 127  ;;  %v3688_v12 = vld [vmem:[%s5597_s1 + $0x48] sm:$0xff]   ;;  %v3689_v13 = vld [vmem:[%s5597_s1 + $0x50] sm:$0xff]   ;;  %v3690_v14 = vld [vmem:[%s5597_s1 + $0x58] sm:$0xff]  }
  0x11   : > { %s3669_s23 = smul.u32 20, %s5651_s16  ;;  %v3691_v15 = vld [vmem:[%s5597_s1 + $0x60] sm:$0xff]   ;;  %v3692_v16 = vld [vmem:[%s5597_s1 + $0x68] sm:$0xff]   ;;  %v3693_v17 = vld [vmem:[%s5597_s1 + $0x70] sm:$0xff]   ;;  %s3151_s25 = sshll.u32 %s5651_s16, 3 }
  0x12   : > { %v3694_v18 = vld [vmem:[%s5597_s1 + $0x78] sm:$0xff]   ;;  %v3702_v19 = vld [vmem:[%s5597_s1 + $0x100] sm:$0xff]   ;;  %v3751_v25 = vld [vmem:[%s5597_s1 + $0x108] sm:$0xff]   ;;  %s4759_s27 = scalar_lea.vmem %s5599_s3, %s3151_s25 }
  0x13   : > { %1566 = vmatpush1.bf16.msra.mxu0 %v3680_v2  ;;  %3510 = vmatpush1.bf16.msra.mxu1 %v3680_v2  ;;  %s4007_s28 = scalar_lea.vmem %s5596_s0, %s3669_s23  ;;  %v3701_v22 = vld [vmem:[%s5597_s1 + $0x80] sm:$0xff]   ;;  %v3703_v26 = vld [vmem:[%s5597_s1 + $0x88] sm:$0xff]   ;;  %v3710_v29 = vld [vmem:[%s5597_s1 + $0x90] sm:$0xff]  }
  0x14   : > { %1567 = vmatprep.subr.bf16.mxu0 %v3949_v1  ;;  %3495 = vmatprep.subr.bf16.mxu1 %v3949_v1  ;;  %v3697_v6 = vld [vmem:[%s4007_s28 + $0x4] ss:$20 sps:$4 sm:$0xff]   ;;  %v3695_v20 = vld [vmem:[%s4007_s28] ss:$20 sps:$4 sm:$0xff]   ;;  %v3708_v27 = vld [vmem:[%s4007_s28 + $0x28] ss:$20 sps:$4 sm:$0xff]  }
  0x15   : > { %v3700_v8 = vld [vmem:[%s4007_s28 + $0x144] ss:$20 sps:$4 sm:$0xff]   ;;  %1595 = vmatprep.mubr.bf16.mxu0 %v3697_v6  ;;  %v3698_v21 = vld [vmem:[%s4007_s28 + $0x140] ss:$20 sps:$4 sm:$0xff]   ;;  %v3709_v28 = vld [vmem:[%s4007_s28 + $0x168] ss:$20 sps:$4 sm:$0xff]  }
  0x16   : > { %1659 = vmatprep.mubr.bf16.mxu1 %v3700_v8  ;;  %v3704_v23 = vld [vmem:[%s4007_s28 + $0x2c] ss:$20 sps:$4 sm:$0xff]   ;;  %v3791_v30 = vld [vmem:[%s5597_s1 + $0x110] sm:$0xff]   ;;  %v3711_v33 = vld [vmem:[%s5597_s1 + $0x98] sm:$0xff]  }
  0x17   : > { %1568 = vmatpush1.bf16.msra.mxu0 %v3681_v3  ;;  %3511 = vmatpush1.bf16.msra.mxu1 %v3681_v3  ;;  %v3706_v24 = vld [vmem:[%s4007_s28 + $0x16c] ss:$20 sps:$4 sm:$0xff]   ;;  %v3712_v31 = vld [vmem:[%s4007_s28 + $0x54] ss:$20 sps:$4 sm:$0xff]   ;;  %v3716_v34 = vld [vmem:[%s4007_s28 + $0x50] ss:$20 sps:$4 sm:$0xff]  }
  0x18   : > { %1569 = vmatprep.subr.bf16.mxu0 %v3949_v1  ;;  %3496 = vmatprep.subr.bf16.mxu1 %v3949_v1  ;;  %v3714_v32 = vld [vmem:[%s4007_s28 + $0x194] ss:$20 sps:$4 sm:$0xff]   ;;  %v3717_v35 = vld [vmem:[%s4007_s28 + $0x190] ss:$20 sps:$4 sm:$0xff]   ;;  %v3724_v40 = vld [vmem:[%s4007_s28 + $0x78] ss:$20 sps:$4 sm:$0xff]  }
  0x19   : > { %v3718_v36 = vld [vmem:[%s5597_s1 + $0xa0] sm:$0xff]   ;;  %v3720_v37 = vld [vmem:[%s4007_s28 + $0x7c] ss:$20 sps:$4 sm:$0xff]   ;;  %v3719_v39 = vld [vmem:[%s5597_s1 + $0xa8] sm:$0xff]  }
  0x1a   : > { %v3722_v38 = vld [vmem:[%s4007_s28 + $0x1bc] ss:$20 sps:$4 sm:$0xff]   ;;  %v3725_v41 = vld [vmem:[%s4007_s28 + $0x1b8] ss:$20 sps:$4 sm:$0xff]   ;;  %v3732_v47 = vld [vmem:[%s4007_s28 + $0xa0] ss:$20 sps:$4 sm:$0xff]  }
  0x1b   : > { %1570 = vmatpush1.bf16.msra.mxu0 %v3682_v4  ;;  %3512 = vmatpush1.bf16.msra.mxu1 %v3682_v4  ;;  %v3726_v42 = vld [vmem:[%s5597_s1 + $0xb0] sm:$0xff]   ;;  %v3728_v43 = vld [vmem:[%s4007_s28 + $0xa4] ss:$20 sps:$4 sm:$0xff]   ;;  %v3736_v50 = vld [vmem:[%s4007_s28 + $0xcc] ss:$20 sps:$4 sm:$0xff]  }
  0x1c   : > { %1571 = vmatprep.subr.bf16.mxu0 %v3949_v1  ;;  %3497 = vmatprep.subr.bf16.mxu1 %v3949_v1  ;;  %v3828_v44 = vld [vmem:[%s5597_s1 + $0x118] sm:$0xff]   ;;  %v3733_v48 = vld [vmem:[%s4007_s28 + $0x1e0] ss:$20 sps:$4 sm:$0xff]   ;;  %v3735_v52 = vld [vmem:[%s5597_s1 + $0xc8] sm:$0xff]  }
  0x1d   : > { %v3730_v45 = vld [vmem:[%s4007_s28 + $0x1e4] ss:$20 sps:$4 sm:$0xff]   ;;  %v3738_v51 = vld [vmem:[%s4007_s28 + $0x20c] ss:$20 sps:$4 sm:$0xff]   ;;  %v3740_v53 = vld [vmem:[%s4007_s28 + $0xc8] ss:$20 sps:$4 sm:$0xff]  }
  0x1e   : > { %v3727_v46 = vld [vmem:[%s5597_s1 + $0xb8] sm:$0xff]   ;;  %v3734_v49 = vld [vmem:[%s5597_s1 + $0xc0] sm:$0xff]   ;;  %v3742_v55 = vld [vmem:[%s5597_s1 + $0xd0] sm:$0xff]  }
  0x1f   : > { %1572 = vmatpush1.bf16.msra.mxu0 %v3683_v5  ;;  %3513 = vmatpush1.bf16.msra.mxu1 %v3683_v5  ;;  %v3741_v54 = vld [vmem:[%s4007_s28 + $0x208] ss:$20 sps:$4 sm:$0xff]   ;;  %v3748_v59 = vld [vmem:[%s4007_s28 + $0xf0] ss:$20 sps:$4 sm:$0xff]   ;;  %v3757_v2 = vld [vmem:[%s4007_s28 + $0x118] ss:$20 sps:$4 sm:$0xff]  }
  0x20   : > { %1573 = vmatprep.subr.bf16.mxu0 %v3949_v1  ;;  %3498 = vmatprep.subr.bf16.mxu1 %v3949_v1  ;;  %v3744_v56 = vld [vmem:[%s4007_s28 + $0xf4] ss:$20 sps:$4 sm:$0xff]   ;;  %v3743_v58 = vld [vmem:[%s5597_s1 + $0xd8] sm:$0xff]   ;;  %v3749_v60 = vld [vmem:[%s4007_s28 + $0x230] ss:$20 sps:$4 sm:$0xff]  }
  0x21   : > { %v3746_v57 = vld [vmem:[%s4007_s28 + $0x234] ss:$20 sps:$4 sm:$0xff]   ;;  %v3750_v61 = vld [vmem:[%s5597_s1 + $0xe0] sm:$0xff]   ;;  %v3753_v62 = vld [vmem:[%s4007_s28 + $0x11c] ss:$20 sps:$4 sm:$0xff]  }
  0x22   : > { %v3755_v63 = vld [vmem:[%s4007_s28 + $0x25c] ss:$20 sps:$4 sm:$0xff]   ;;  %v3752_v0 = vld [vmem:[%s5597_s1 + $0xe8] sm:$0xff]   ;;  %v3761_v5 = vld [vmem:[%s4007_s28 + $0x284] ss:$20 sps:$4 sm:$0xff]  }
  0x23   : > { %1574 = vmatpush1.bf16.msra.mxu0 %v3684_v7  ;;  %3514 = vmatpush1.bf16.msra.mxu1 %v3684_v7  ;;  %v3758_v3 = vld [vmem:[%s4007_s28 + $0x258] ss:$20 sps:$4 sm:$0xff]   ;;  %v3759_v4 = vld [vmem:[%s5597_s1 + $0xf0] sm:$0xff]   ;;  %v3763_v8 = vld [vmem:[%s4007_s28 + $0x8] ss:$20 sps:$4 sm:$0xff]  }
  0x24   : > { %1575 = vmatprep.subr.bf16.mxu0 %v3949_v1  ;;  %3499 = vmatprep.subr.bf16.mxu1 %v3949_v1  ;;  %v3765_v6 = vld [vmem:[%s4007_s28 + $0xc] ss:$20 sps:$4 sm:$0xff]   ;;  %v3760_v7 = vld [vmem:[%s5597_s1 + $0xf8] sm:$0xff]  }
  0x27   : > { %1576 = vmatpush1.bf16.msra.mxu0 %v3685_v9  ;;  %3515 = vmatpush1.bf16.msra.mxu1 %v3685_v9  ;;  %v3766_v9 = vld [vmem:[%s4007_s28 + $0x280] ss:$20 sps:$4 sm:$0xff]  }
  0x28   : > { %1577 = vmatprep.subr.bf16.mxu0 %v3949_v1  ;;  %3500 = vmatprep.subr.bf16.mxu1 %v3949_v1 }
  0x2b   : > { %1578 = vmatpush1.bf16.msra.mxu0 %v3686_v10  ;;  %3516 = vmatpush1.bf16.msra.mxu1 %v3686_v10  ;;  %v3767_v10 = vld [vmem:[%s4007_s28 + $0x2ac] ss:$20 sps:$4 sm:$0xff]  }
  0x2c   : > { %1579 = vmatprep.subr.bf16.mxu0 %v3949_v1  ;;  %3501 = vmatprep.subr.bf16.mxu1 %v3949_v1 }
  0x2f   : > { %1580 = vmatpush1.bf16.msra.mxu0 %v3687_v11  ;;  %3517 = vmatpush1.bf16.msra.mxu1 %v3687_v11  ;;  %v3769_v11 = vld [vmem:[%s4007_s28 + $0x34] ss:$20 sps:$4 sm:$0xff]  }
  0x30   : > { %1581 = vmatprep.subr.bf16.mxu0 %v3949_v1  ;;  %3502 = vmatprep.subr.bf16.mxu1 %v3949_v1 }
  0x33   : > { %1582 = vmatpush1.bf16.msra.mxu0 %v3688_v12  ;;  %3518 = vmatpush1.bf16.msra.mxu1 %v3688_v12  ;;  %v3771_v12 = vld [vmem:[%s4007_s28 + $0x2a8] ss:$20 sps:$4 sm:$0xff]  }
  0x34   : > { %1583 = vmatprep.subr.bf16.mxu0 %v3949_v1  ;;  %3503 = vmatprep.subr.bf16.mxu1 %v3949_v1 }
  0x37   : > { %1584 = vmatpush1.bf16.msra.mxu0 %v3689_v13  ;;  %3519 = vmatpush1.bf16.msra.mxu1 %v3689_v13  ;;  %v3772_v13 = vld [vmem:[%s4007_s28 + $0x30] ss:$20 sps:$4 sm:$0xff]  }
  0x38   : > { %1585 = vmatprep.subr.bf16.mxu0 %v3949_v1  ;;  %3504 = vmatprep.subr.bf16.mxu1 %v3949_v1 }
  0x3b   : > { %1586 = vmatpush1.bf16.msra.mxu0 %v3690_v14  ;;  %3520 = vmatpush1.bf16.msra.mxu1 %v3690_v14  ;;  %v3773_v14 = vld [vmem:[%s4007_s28 + $0x2d4] ss:$20 sps:$4 sm:$0xff]  }
  0x3c   : > { %1587 = vmatprep.subr.bf16.mxu0 %v3949_v1  ;;  %3505 = vmatprep.subr.bf16.mxu1 %v3949_v1 }
  0x3f   : > { %1588 = vmatpush1.bf16.msra.mxu0 %v3691_v15  ;;  %3521 = vmatpush1.bf16.msra.mxu1 %v3691_v15  ;;  %v3777_v15 = vld [vmem:[%s4007_s28 + $0x2d0] ss:$20 sps:$4 sm:$0xff]  }
  0x40   : > { %1589 = vmatprep.subr.bf16.mxu0 %v3949_v1  ;;  %3506 = vmatprep.subr.bf16.mxu1 %v3949_v1 }
  0x43   : > { %1590 = vmatpush1.bf16.msra.mxu0 %v3692_v16  ;;  %3522 = vmatpush1.bf16.msra.mxu1 %v3692_v16  ;;  %v3778_v16 = vld [vmem:[%s4007_s28 + $0x58] ss:$20 sps:$4 sm:$0xff]  }
  0x44   : > { %1591 = vmatprep.subr.bf16.mxu0 %v3949_v1  ;;  %3507 = vmatprep.subr.bf16.mxu1 %v3949_v1 }
  0x47   : > { %1592 = vmatpush1.bf16.msra.mxu0 %v3693_v17  ;;  %3523 = vmatpush1.bf16.msra.mxu1 %v3693_v17  ;;  %v3779_v17 = vld [vmem:[%s4007_s28 + $0x2fc] ss:$20 sps:$4 sm:$0xff]  }
  0x48   : > { %1593 = vmatprep.subr.bf16.mxu0 %v3949_v1  ;;  %3508 = vmatprep.subr.bf16.mxu1 %v3949_v1 }
  0x4b   : > { %1594 = vmatpush1.bf16.msra.mxu0 %v3694_v18  ;;  %3524 = vmatpush1.bf16.msra.mxu1 %v3694_v18  ;;  %v3781_v18 = vld [vmem:[%s4007_s28 + $0x84] ss:$20 sps:$4 sm:$0xff]  }
  0x4c   : > { %1852 = vmatprep.subr.bf16.mxu0 %v3949_v1  ;;  %3421 = vmatprep.subr.bf16.mxu1 %v3702_v19 }
  0x4e   : > { %1596 = vmatmul.mubr.bf16.vlgmr.msra.gmra.mrb[0].mxu0 %v3695_v20  ;;  %1660 = vmatmul.mubr.bf16.vlgmr.msra.gmra.mrb[0].mxu1 %v3698_v21  ;;  %v3784_v20 = vld [vmem:[%s4007_s28 + $0x80] ss:$20 sps:$4 sm:$0xff]   ;;  %v3785_v21 = vld [vmem:[%s4007_s28 + $0x324] ss:$20 sps:$4 sm:$0xff]  }
  0x4f   : > { %1853 = vmatpush1.bf16.msra.mxu0 %v3701_v22  ;;  %3422 = vmatpush3.bf16.msra.mxu1 %v3702_v19  ;;  %v3783_v19 = vld [vmem:[%s4007_s28 + $0x2f8] ss:$20 sps:$4 sm:$0xff]  }
  0x50   : > { %1854 = vmatprep.subr.bf16.mxu0 %v3949_v1  ;;  %1603 = vmatprep.mubr.bf16.mxu0 %v3704_v23  ;;  %v3787_v22 = vld [vmem:[%s4007_s28 + $0xac] ss:$20 sps:$4 sm:$0xff]  }
  0x51   : > { %1667 = vmatprep.mubr.bf16.mxu1 %v3706_v24  ;;  %3423 = vmatprep.subr.bf16.mxu1 %v3751_v25  ;;  %v3789_v23 = vld [vmem:[%s4007_s28 + $0x320] ss:$20 sps:$4 sm:$0xff]   ;;  %v3790_v24 = vld [vmem:[%s4007_s28 + $0xa8] ss:$20 sps:$4 sm:$0xff]  }
  0x53   : > { %1855 = vmatpush1.bf16.msra.mxu0 %v3703_v26  ;;  %3424 = vmatpush3.bf16.msra.mxu1 %v3751_v25  ;;  %v3792_v25 = vld [vmem:[%s4007_s28 + $0x34c] ss:$20 sps:$4 sm:$0xff]   ;;  %v3794_v26 = vld [vmem:[%s4007_s28 + $0xd4] ss:$20 sps:$4 sm:$0xff]  }
  0x54   : > { %1856 = vmatprep.subr.bf16.mxu0 %v3949_v1  ;;  %3425 = vmatprep.subr.bf16.mxu1 %v3791_v30 }
  0x56   : > { %1604 = vmatmul.mubr.bf16.gmra.mrb[4].mxu0 %v3708_v27  ;;  %1668 = vmatmul.mubr.bf16.gmra.mrb[4].mxu1 %v3709_v28  ;;  %v3796_v27 = vld [vmem:[%s4007_s28 + $0x348] ss:$20 sps:$4 sm:$0xff]   ;;  %v3797_v28 = vld [vmem:[%s4007_s28 + $0xd0] ss:$20 sps:$4 sm:$0xff]  }
  0x57   : > { %1857 = vmatpush1.bf16.msra.mxu0 %v3710_v29  ;;  %1611 = vmatprep.mubr.bf16.mxu0 %v3712_v31  ;;  %v3798_v29 = vld [vmem:[%s4007_s28 + $0x374] ss:$20 sps:$4 sm:$0xff]   ;;  %v3802_v31 = vld [vmem:[%s4007_s28 + $0x370] ss:$20 sps:$4 sm:$0xff]  }
  0x58   : > { %1858 = vmatprep.subr.bf16.mxu0 %v3949_v1  ;;  %1675 = vmatprep.mubr.bf16.mxu1 %v3714_v32  ;;  %v3803_v32 = vld [vmem:[%s4007_s28 + $0xf8] ss:$20 sps:$4 sm:$0xff]  }
  0x59   : > { %3426 = vmatpush3.bf16.msra.mxu1 %v3791_v30  ;;  %v3800_v30 = vld [vmem:[%s4007_s28 + $0xfc] ss:$20 sps:$4 sm:$0xff]  }
  0x5a   : > { %3427 = vmatprep.subr.bf16.mxu1 %v3828_v44 }
  0x5b   : > { %1859 = vmatpush1.bf16.msra.mxu0 %v3711_v33  ;;  %v3804_v33 = vld [vmem:[%s4007_s28 + $0x39c] ss:$20 sps:$4 sm:$0xff]  }
  0x5c   : > { %1860 = vmatprep.subr.bf16.mxu0 %v3949_v1 }
  0x5d   : > { %3428 = vmatpush3.bf16.msra.mxu1 %v3828_v44  ;;  %v3821_v44 = vld [vmem:[%s4007_s28 + $0x170] ss:$20 sps:$4 sm:$0xff]  }
  0x5e   : > { %1612 = vmatmul.mubr.bf16.gmra.mrb[8].mxu0 %v3716_v34  ;;  %1676 = vmatmul.mubr.bf16.gmra.mrb[8].mxu1 %v3717_v35  ;;  %v3806_v34 = vld [vmem:[%s4007_s28 + $0x124] ss:$20 sps:$4 sm:$0xff]  }
  0x5f   : > { %1861 = vmatpush1.bf16.msra.mxu0 %v3718_v36  ;;  %1619 = vmatprep.mubr.bf16.mxu0 %v3720_v37  ;;  %v3808_v35 = vld [vmem:[%s4007_s28 + $0x398] ss:$20 sps:$4 sm:$0xff]   ;;  %v3809_v36 = vld [vmem:[%s4007_s28 + $0x120] ss:$20 sps:$4 sm:$0xff]  }
  0x60   : > { %1862 = vmatprep.subr.bf16.mxu0 %v3949_v1  ;;  %1683 = vmatprep.mubr.bf16.mxu1 %v3722_v38  ;;  %v3810_v37 = vld [vmem:[%s4007_s28 + $0x3c4] ss:$20 sps:$4 sm:$0xff]   ;;  %v3812_v38 = vld [vmem:[%s4007_s28 + $0x14c] ss:$20 sps:$4 sm:$0xff]  }
  0x63   : > { %1863 = vmatpush1.bf16.msra.mxu0 %v3719_v39  ;;  %v3814_v39 = vld [vmem:[%s4007_s28 + $0x3c0] ss:$20 sps:$4 sm:$0xff]  }
  0x64   : > { %1864 = vmatprep.subr.bf16.mxu0 %v3949_v1 }
  0x66   : > { %1620 = vmatmul.mubr.bf16.gmra.mrb[12].mxu0 %v3724_v40  ;;  %1684 = vmatmul.mubr.bf16.gmra.mrb[12].mxu1 %v3725_v41  ;;  %v3815_v40 = vld [vmem:[%s4007_s28 + $0x148] ss:$20 sps:$4 sm:$0xff]   ;;  %v3816_v41 = vld [vmem:[%s4007_s28 + $0x3ec] ss:$20 sps:$4 sm:$0xff]  }
  0x67   : > { %1865 = vmatpush1.bf16.msra.mxu0 %v3726_v42  ;;  %1627 = vmatprep.mubr.bf16.mxu0 %v3728_v43  ;;  %v3818_v42 = vld [vmem:[%s4007_s28 + $0x174] ss:$20 sps:$4 sm:$0xff]  }
  0x68   : > { %1866 = vmatprep.subr.bf16.mxu0 %v3949_v1  ;;  %1691 = vmatprep.mubr.bf16.mxu1 %v3730_v45  ;;  %v3820_v43 = vld [vmem:[%s4007_s28 + $0x3e8] ss:$20 sps:$4 sm:$0xff]  }
  0x69   : > { %v3822_v45 = vld [vmem:[%s4007_s28 + $0x414] ss:$20 sps:$4 sm:$0xff]  }
  0x6b   : > { %1867 = vmatpush1.bf16.msra.mxu0 %v3727_v46  ;;  %v3824_v46 = vld [vmem:[%s4007_s28 + $0x19c] ss:$20 sps:$4 sm:$0xff]  }
  0x6c   : > { %1868 = vmatprep.subr.bf16.mxu0 %v3949_v1 }
  0x6e   : > { %1628 = vmatmul.mubr.bf16.gmra.mrb[16].mxu0 %v3732_v47  ;;  %1692 = vmatmul.mubr.bf16.gmra.mrb[16].mxu1 %v3733_v48  ;;  %v3826_v47 = vld [vmem:[%s4007_s28 + $0x410] ss:$20 sps:$4 sm:$0xff]   ;;  %v3827_v48 = vld [vmem:[%s4007_s28 + $0x198] ss:$20 sps:$4 sm:$0xff]  }
  0x6f   : > { %1869 = vmatpush1.bf16.msra.mxu0 %v3734_v49  ;;  %1635 = vmatprep.mubr.bf16.mxu0 %v3736_v50  ;;  %v3829_v49 = vld [vmem:[%s4007_s28 + $0x43c] ss:$20 sps:$4 sm:$0xff]   ;;  %v3831_v50 = vld [vmem:[%s4007_s28 + $0x1c4] ss:$20 sps:$4 sm:$0xff]  }
  0x70   : > { %1870 = vmatprep.subr.bf16.mxu0 %v3949_v1  ;;  %1699 = vmatprep.mubr.bf16.mxu1 %v3738_v51  ;;  %v3833_v51 = vld [vmem:[%s4007_s28 + $0x438] ss:$20 sps:$4 sm:$0xff]  }
  0x73   : > { %1871 = vmatpush1.bf16.msra.mxu0 %v3735_v52  ;;  %v3834_v52 = vld [vmem:[%s4007_s28 + $0x1c0] ss:$20 sps:$4 sm:$0xff]  }
  0x74   : > { %1872 = vmatprep.subr.bf16.mxu0 %v3949_v1 }
  0x76   : > { %1636 = vmatmul.mubr.bf16.gmra.mrb[20].mxu0 %v3740_v53  ;;  %1700 = vmatmul.mubr.bf16.gmra.mrb[20].mxu1 %v3741_v54  ;;  %v3835_v53 = vld [vmem:[%s4007_s28 + $0x464] ss:$20 sps:$4 sm:$0xff]   ;;  %v3837_v54 = vld [vmem:[%s4007_s28 + $0x1ec] ss:$20 sps:$4 sm:$0xff]  }
  0x77   : > { %1873 = vmatpush1.bf16.msra.mxu0 %v3742_v55  ;;  %1643 = vmatprep.mubr.bf16.mxu0 %v3744_v56  ;;  %v3839_v55 = vld [vmem:[%s4007_s28 + $0x460] ss:$20 sps:$4 sm:$0xff]   ;;  %v3840_v56 = vld [vmem:[%s4007_s28 + $0x1e8] ss:$20 sps:$4 sm:$0xff]  }
  0x78   : > { %1874 = vmatprep.subr.bf16.mxu0 %v3949_v1  ;;  %1707 = vmatprep.mubr.bf16.mxu1 %v3746_v57  ;;  %v3841_v57 = vld [vmem:[%s4007_s28 + $0x48c] ss:$20 sps:$4 sm:$0xff]  }
  0x7b   : > { %1875 = vmatpush1.bf16.msra.mxu0 %v3743_v58  ;;  %v3843_v58 = vld [vmem:[%s4007_s28 + $0x214] ss:$20 sps:$4 sm:$0xff]  }
  0x7c   : > { %1876 = vmatprep.subr.bf16.mxu0 %v3949_v1 }
  0x7e   : > { %1644 = vmatmul.mubr.bf16.gmra.mrb[24].mxu0 %v3748_v59  ;;  %1708 = vmatmul.mubr.bf16.gmra.mrb[24].mxu1 %v3749_v60  ;;  %v3845_v59 = vld [vmem:[%s4007_s28 + $0x488] ss:$20 sps:$4 sm:$0xff]   ;;  %v3846_v60 = vld [vmem:[%s4007_s28 + $0x210] ss:$20 sps:$4 sm:$0xff]  }
  0x7f   : > { %1877 = vmatpush1.bf16.msra.mxu0 %v3750_v61  ;;  %1651 = vmatprep.mubr.bf16.mxu0 %v3753_v62  ;;  %v3847_v61 = vld [vmem:[%s4007_s28 + $0x4b4] ss:$20 sps:$4 sm:$0xff]   ;;  %v3849_v62 = vld [vmem:[%s4007_s28 + $0x23c] ss:$20 sps:$4 sm:$0xff]  }
  0x80   : > { %1878 = vmatprep.subr.bf16.mxu0 %v3949_v1  ;;  %1715 = vmatprep.mubr.bf16.mxu1 %v3755_v63  ;;  %v3851_v63 = vld [vmem:[%s4007_s28 + $0x4b0] ss:$20 sps:$4 sm:$0xff]  }
  0x83   : > { %1879 = vmatpush1.bf16.msra.mxu0 %v3752_v0  ;;  %v3852_v0 = vld [vmem:[%s4007_s28 + $0x238] ss:$20 sps:$4 sm:$0xff]  }
  0x84   : > { %1880 = vmatprep.subr.bf16.mxu0 %v3949_v1 }
  0x86   : > { %1652 = vmatmul.mubr.bf16.gmra.mrb[28].mxu0 %v3757_v2  ;;  %1716 = vmatmul.mubr.bf16.gmra.mrb[28].mxu1 %v3758_v3  ;;  %v3853_v2 = vld [vmem:[%s4007_s28 + $0x4dc] ss:$20 sps:$4 sm:$0xff]   ;;  %v3855_v3 = vld [vmem:[%s4007_s28 + $0x264] ss:$20 sps:$4 sm:$0xff]  }
  0x87   : > { %1881 = vmatpush1.bf16.msra.mxu0 %v3759_v4  ;;  %1723 = vmatprep.mubr.bf16.mxu1 %v3761_v5  ;;  %v3857_v4 = vld [vmem:[%s4007_s28 + $0x4d8] ss:$20 sps:$4 sm:$0xff]   ;;  %v3858_v5 = vld [vmem:[%s4007_s28 + $0x260] ss:$20 sps:$4 sm:$0xff]  }
  0x88   : > { %1882 = vmatprep.subr.bf16.mxu0 %v3949_v1  ;;  %1884 = vmatprep.mubr.bf16.mxu0 %v3765_v6  ;;  %v3775_v1 = vld [vmem:[%s4007_s28 + $0x5c] ss:$20 sps:$4 sm:$0xff]   ;;  %v3859_v6 = vld [vmem:[%s4007_s28 + $0x28c] ss:$20 sps:$4 sm:$0xff]  }
  0x8b   : > { %1883 = vmatpush1.bf16.msra.mxu0 %v3760_v7  ;;  %v3861_v7 = vld [vmem:[%s4007_s28 + $0x10] ss:$20 sps:$4 sm:$0xff]  }
  0x8e   : > { %1724 = vmatmul.mubr.bf16.gmra.mrb[32].mxu1 %v3766_v9  ;;  %1885 = vmatmul.mubr.bf16.vlgmr.msra.gmra.mrb[0].mxu0 %v3763_v8  ;;  %v3862_v8 = vld [vmem:[%s4007_s28 + $0x288] ss:$20 sps:$4 sm:$0xff]   ;;  %v3863_v9 = vld [vmem:[%s4007_s28 + $0x38] ss:$20 sps:$4 sm:$0xff]  }
  0x8f   : > { %1731 = vmatprep.mubr.bf16.mxu1 %v3767_v10  ;;  %1892 = vmatprep.mubr.bf16.mxu0 %v3769_v11  ;;  %v3864_v10 = vld [vmem:[%s4007_s28 + $0x2b4] ss:$20 sps:$4 sm:$0xff]  }
  0x90   : > { %v3866_v11 = vld [vmem:[%s4007_s28 + $0x60] ss:$20 sps:$4 sm:$0xff]  }
  0x96   : > { %1732 = vmatmul.mubr.bf16.gmra.mrb[36].mxu1 %v3771_v12  ;;  %1893 = vmatmul.mubr.bf16.gmra.mrb[4].mxu0 %v3772_v13  ;;  %v3867_v12 = vld [vmem:[%s4007_s28 + $0x2b0] ss:$20 sps:$4 sm:$0xff]   ;;  %v3868_v13 = vld [vmem:[%s4007_s28 + $0x88] ss:$20 sps:$4 sm:$0xff]  }
  0x97   : > { %1739 = vmatprep.mubr.bf16.mxu1 %v3773_v14  ;;  %1900 = vmatprep.mubr.bf16.mxu0 %v3775_v1  ;;  %v3869_v14 = vld [vmem:[%s4007_s28 + $0x2dc] ss:$20 sps:$4 sm:$0xff]  }
  0x98   : > { %v3871_v1 = vld [vmem:[%s4007_s28 + $0xb0] ss:$20 sps:$4 sm:$0xff]  }
  0x9e   : > { %1740 = vmatmul.mubr.bf16.gmra.mrb[40].mxu1 %v3777_v15  ;;  %1901 = vmatmul.mubr.bf16.gmra.mrb[8].mxu0 %v3778_v16  ;;  %v3872_v15 = vld [vmem:[%s4007_s28 + $0x2d8] ss:$20 sps:$4 sm:$0xff]  }
  0x9f   : > { %1747 = vmatprep.mubr.bf16.mxu1 %v3779_v17  ;;  %1908 = vmatprep.mubr.bf16.mxu0 %v3781_v18  ;;  %v3873_v16 = vld [vmem:[%s4007_s28 + $0xd8] ss:$20 sps:$4 sm:$0xff]   ;;  %v3876_v18 = vld [vmem:[%s4007_s28 + $0x100] ss:$20 sps:$4 sm:$0xff]  }
  0xa0   : > { %v3874_v17 = vld [vmem:[%s4007_s28 + $0x304] ss:$20 sps:$4 sm:$0xff]  }
  0xa6   : > { %1748 = vmatmul.mubr.bf16.gmra.mrb[44].mxu1 %v3783_v19  ;;  %1909 = vmatmul.mubr.bf16.gmra.mrb[12].mxu0 %v3784_v20 }
  0xa7   : > { %1755 = vmatprep.mubr.bf16.mxu1 %v3785_v21  ;;  %1916 = vmatprep.mubr.bf16.mxu0 %v3787_v22  ;;  %v3877_v21 = vld [vmem:[%s4007_s28 + $0x300] ss:$20 sps:$4 sm:$0xff]   ;;  %v3878_v22 = vld [vmem:[%s4007_s28 + $0x128] ss:$20 sps:$4 sm:$0xff]  }
  0xae   : > { %1756 = vmatmul.mubr.bf16.gmra.mrb[48].mxu1 %v3789_v23  ;;  %1917 = vmatmul.mubr.bf16.gmra.mrb[16].mxu0 %v3790_v24  ;;  %v3879_v24 = vld [vmem:[%s4007_s28 + $0x32c] ss:$20 sps:$4 sm:$0xff]  }
  0xaf   : > { %1763 = vmatprep.mubr.bf16.mxu1 %v3792_v25  ;;  %1924 = vmatprep.mubr.bf16.mxu0 %v3794_v26  ;;  %v3881_v25 = vld [vmem:[%s4007_s28 + $0x150] ss:$20 sps:$4 sm:$0xff]  }
  0xb6   : > { %1764 = vmatmul.mubr.bf16.gmra.mrb[52].mxu1 %v3796_v27  ;;  %1925 = vmatmul.mubr.bf16.gmra.mrb[20].mxu0 %v3797_v28 }
  0xb7   : > { %1771 = vmatprep.mubr.bf16.mxu1 %v3798_v29  ;;  %1932 = vmatprep.mubr.bf16.mxu0 %v3800_v30  ;;  %v3882_v29 = vld [vmem:[%s4007_s28 + $0x328] ss:$20 sps:$4 sm:$0xff]   ;;  %v3883_v30 = vld [vmem:[%s4007_s28 + $0x178] ss:$20 sps:$4 sm:$0xff]  }
  0xbe   : > { %1772 = vmatmul.mubr.bf16.gmra.mrb[56].mxu1 %v3802_v31  ;;  %1933 = vmatmul.mubr.bf16.gmra.mrb[24].mxu0 %v3803_v32  ;;  %v3884_v32 = vld [vmem:[%s4007_s28 + $0x354] ss:$20 sps:$4 sm:$0xff]  }
  0xbf   : > { %1779 = vmatprep.mubr.bf16.mxu1 %v3804_v33  ;;  %1940 = vmatprep.mubr.bf16.mxu0 %v3806_v34  ;;  %v3886_v33 = vld [vmem:[%s4007_s28 + $0x1a0] ss:$20 sps:$4 sm:$0xff]  }
  0xc6   : > { %1780 = vmatmul.mubr.bf16.gmra.mrb[60].mxu1 %v3808_v35  ;;  %1941 = vmatmul.mubr.bf16.gmra.mrb[28].mxu0 %v3809_v36 }
  0xc7   : > { %1787 = vmatprep.mubr.bf16.mxu1 %v3810_v37  ;;  %1948 = vmatprep.mubr.bf16.mxu0 %v3812_v38  ;;  %v3887_v37 = vld [vmem:[%s4007_s28 + $0x350] ss:$20 sps:$4 sm:$0xff]   ;;  %v3888_v38 = vld [vmem:[%s4007_s28 + $0x1c8] ss:$20 sps:$4 sm:$0xff]  }
  0xce   : > { %1788 = vmatmul.mubr.bf16.gmra.mrb[64].mxu1 %v3814_v39  ;;  %1949 = vmatmul.mubr.bf16.gmra.mrb[32].mxu0 %v3815_v40  ;;  %v3889_v40 = vld [vmem:[%s4007_s28 + $0x37c] ss:$20 sps:$4 sm:$0xff]  }
  0xcf   : > { %1795 = vmatprep.mubr.bf16.mxu1 %v3816_v41  ;;  %1956 = vmatprep.mubr.bf16.mxu0 %v3818_v42  ;;  %v3891_v41 = vld [vmem:[%s4007_s28 + $0x1f0] ss:$20 sps:$4 sm:$0xff]  }
  0xd6   : > { %1796 = vmatmul.mubr.bf16.gmra.mrb[68].mxu1 %v3820_v43  ;;  %1957 = vmatmul.mubr.bf16.gmra.mrb[36].mxu0 %v3821_v44 }
  0xd7   : > { %1803 = vmatprep.mubr.bf16.mxu1 %v3822_v45  ;;  %1964 = vmatprep.mubr.bf16.mxu0 %v3824_v46  ;;  %v3892_v45 = vld [vmem:[%s4007_s28 + $0x378] ss:$20 sps:$4 sm:$0xff]  }
  0xd8   : > { %v3893_v46 = vld [vmem:[%s4007_s28 + $0x218] ss:$20 sps:$4 sm:$0xff]  }
  0xde   : > { %1804 = vmatmul.mubr.bf16.gmra.mrb[72].mxu1 %v3826_v47  ;;  %1965 = vmatmul.mubr.bf16.gmra.mrb[40].mxu0 %v3827_v48  ;;  %v3894_v48 = vld [vmem:[%s4007_s28 + $0x3a4] ss:$20 sps:$4 sm:$0xff]  }
  0xdf   : > { %1811 = vmatprep.mubr.bf16.mxu1 %v3829_v49  ;;  %1972 = vmatprep.mubr.bf16.mxu0 %v3831_v50  ;;  %v3896_v49 = vld [vmem:[%s4007_s28 + $0x240] ss:$20 sps:$4 sm:$0xff]  }
  0xe6   : > { %1812 = vmatmul.mubr.bf16.gmra.mrb[76].mxu1 %v3833_v51  ;;  %1973 = vmatmul.mubr.bf16.gmra.mrb[44].mxu0 %v3834_v52 }
  0xe7   : > { %1819 = vmatprep.mubr.bf16.mxu1 %v3835_v53  ;;  %1980 = vmatprep.mubr.bf16.mxu0 %v3837_v54  ;;  %v3897_v53 = vld [vmem:[%s4007_s28 + $0x3a0] ss:$20 sps:$4 sm:$0xff]   ;;  %v3898_v54 = vld [vmem:[%s4007_s28 + $0x268] ss:$20 sps:$4 sm:$0xff]  }
  0xee   : > { %1820 = vmatmul.mubr.bf16.gmra.mrb[80].mxu1 %v3839_v55  ;;  %1981 = vmatmul.mubr.bf16.gmra.mrb[48].mxu0 %v3840_v56  ;;  %v3899_v56 = vld [vmem:[%s4007_s28 + $0x3cc] ss:$20 sps:$4 sm:$0xff]  }
  0xef   : > { %1827 = vmatprep.mubr.bf16.mxu1 %v3841_v57  ;;  %1988 = vmatprep.mubr.bf16.mxu0 %v3843_v58  ;;  %v3901_v57 = vld [vmem:[%s4007_s28 + $0x290] ss:$20 sps:$4 sm:$0xff]  }
  0xf6   : > { %1828 = vmatmul.mubr.bf16.gmra.mrb[84].mxu1 %v3845_v59  ;;  %1989 = vmatmul.mubr.bf16.gmra.mrb[52].mxu0 %v3846_v60 }
  0xf7   : > { %1835 = vmatprep.mubr.bf16.mxu1 %v3847_v61  ;;  %1996 = vmatprep.mubr.bf16.mxu0 %v3849_v62  ;;  %v3902_v61 = vld [vmem:[%s4007_s28 + $0x3c8] ss:$20 sps:$4 sm:$0xff]   ;;  %v3903_v62 = vld [vmem:[%s4007_s28 + $0x2b8] ss:$20 sps:$4 sm:$0xff]  }
  0xfe   : > { %1836 = vmatmul.mubr.bf16.gmra.mrb[88].mxu1 %v3851_v63  ;;  %1997 = vmatmul.mubr.bf16.gmra.mrb[56].mxu0 %v3852_v0  ;;  %v3904_v0 = vld [vmem:[%s4007_s28 + $0x3f4] ss:$20 sps:$4 sm:$0xff]  }
  0xff   : > { %1843 = vmatprep.mubr.bf16.mxu1 %v3853_v2  ;;  %2004 = vmatprep.mubr.bf16.mxu0 %v3855_v3  ;;  %v3906_v2 = vld [vmem:[%s4007_s28 + $0x2e0] ss:$20 sps:$4 sm:$0xff]  }
 0x106   : > { %1844 = vmatmul.mubr.bf16.gmra.mrb[92].mxu1 %v3857_v4  ;;  %2005 = vmatmul.mubr.bf16.gmra.mrb[60].mxu0 %v3858_v5 }
 0x107   : > { %2012 = vmatprep.mubr.bf16.mxu0 %v3859_v6  ;;  %3429 = vmatprep.mubr.msk.bf16.mxu1 %vm1466_vm0, %v3861_v7  ;;  %v3907_v6 = vld [vmem:[%s4007_s28 + $0x3f0] ss:$20 sps:$4 sm:$0xff]   ;;  %v3908_v7 = vld [vmem:[%s4007_s28 + $0x308] ss:$20 sps:$4 sm:$0xff]  }
 0x10e   : > { %2013 = vmatmul.mubr.bf16.gmra.mrb[64].mxu0 %v3862_v8  ;;  %3430 = vmatmul.mubr.msk.bf16.vlgmr.msra.gmra.mrb[96].mxu1 %vm1466_vm0, %v3863_v9  ;;  %v3909_v9 = vld [vmem:[%s4007_s28 + $0x41c] ss:$20 sps:$4 sm:$0xff]  }
 0x10f   : > { %2020 = vmatprep.mubr.bf16.mxu0 %v3864_v10  ;;  %3433 = vmatprep.mubr.msk.bf16.mxu1 %vm1466_vm0, %v3866_v11  ;;  %v3911_v10 = vld [vmem:[%s4007_s28 + $0x330] ss:$20 sps:$4 sm:$0xff]  }
 0x116   : > { %2021 = vmatmul.mubr.bf16.gmra.mrb[68].mxu0 %v3867_v12  ;;  %3434 = vmatmul.mubr.msk.bf16.gmra.mrb[100].mxu1 %vm1466_vm0, %v3868_v13 }
 0x117   : > { %2028 = vmatprep.mubr.bf16.mxu0 %v3869_v14  ;;  %3437 = vmatprep.mubr.msk.bf16.mxu1 %vm1466_vm0, %v3871_v1  ;;  %v3912_v14 = vld [vmem:[%s4007_s28 + $0x418] ss:$20 sps:$4 sm:$0xff]  }
 0x118   : > { %v3913_v1 = vld [vmem:[%s4007_s28 + $0x358] ss:$20 sps:$4 sm:$0xff]  }
 0x11e   : > { %2029 = vmatmul.mubr.bf16.gmra.mrb[72].mxu0 %v3872_v15  ;;  %3438 = vmatmul.mubr.msk.bf16.gmra.mrb[104].mxu1 %vm1466_vm0, %v3873_v16  ;;  %v3914_v16 = vld [vmem:[%s4007_s28 + $0x444] ss:$20 sps:$4 sm:$0xff]  }
 0x11f   : > { %2036 = vmatprep.mubr.bf16.mxu0 %v3874_v17  ;;  %3441 = vmatprep.mubr.msk.bf16.mxu1 %vm1466_vm0, %v3876_v18  ;;  %v3916_v17 = vld [vmem:[%s4007_s28 + $0x380] ss:$20 sps:$4 sm:$0xff]  }
 0x121   : > { %v4259_v19 = vpop.f32.mrb[0].mxu1 }
 0x122   : > { %v1663_v20 = vpop.f32.mrb[1].mxu1 }
 0x123   : > { %v4263_v23 = vpop.f32.mrb[2].mxu1 }
 0x124   : > { %v1666_v26 = vpop.f32.mrb[3].mxu1 }
 0x125   : > { %v3918_v26 = vld [vmem:[%s4007_s28 + $0x3a8] ss:$20 sps:$4 sm:$0xff]  }
 0x126   : > { %2037 = vmatmul.mubr.bf16.gmra.mrb[76].mxu0 %v3877_v21  ;;  %3442 = vmatmul.mubr.msk.bf16.gmra.mrb[108].mxu1 %vm1466_vm0, %v3878_v22 }
 0x127   : > { %2044 = vmatprep.mubr.bf16.mxu0 %v3879_v24  ;;  %3445 = vmatprep.mubr.msk.bf16.mxu1 %vm1466_vm0, %v3881_v25  ;;  %v3917_v25 = vld [vmem:[%s4007_s28 + $0x440] ss:$20 sps:$4 sm:$0xff]  }
 0x129   : > { %v4269_v27 = vpop.f32.mrb[4].mxu1 }
 0x12a   : > { %v1671_v28 = vpop.f32.mrb[5].mxu1 }
 0x12b   : > { %v4273_v31 = vpop.f32.mrb[6].mxu1 }
 0x12c   : > { %v1674_v34 = vpop.f32.mrb[7].mxu1 }
 0x12e   : > { %2045 = vmatmul.mubr.bf16.gmra.mrb[80].mxu0 %v3882_v29  ;;  %3446 = vmatmul.mubr.msk.bf16.gmra.mrb[112].mxu1 %vm1466_vm0, %v3883_v30  ;;  %v3919_v30 = vld [vmem:[%s4007_s28 + $0x46c] ss:$20 sps:$4 sm:$0xff]  }
 0x12f   : > { %2052 = vmatprep.mubr.bf16.mxu0 %v3884_v32  ;;  %3449 = vmatprep.mubr.msk.bf16.mxu1 %vm1466_vm0, %v3886_v33  ;;  %v3921_v32 = vld [vmem:[%s4007_s28 + $0x3d0] ss:$20 sps:$4 sm:$0xff]  }
 0x131   : > { %v4279_v35 = vpop.f32.mrb[8].mxu1 }
 0x132   : > { %v1679_v36 = vpop.f32.mrb[9].mxu1 }
 0x133   : > { %v4283_v39 = vpop.f32.mrb[10].mxu1 }
 0x134   : > { %v1682_v42 = vpop.f32.mrb[11].mxu1 }
 0x135   : > { %v3923_v42 = vld [vmem:[%s4007_s28 + $0x3f8] ss:$20 sps:$4 sm:$0xff]  }
 0x136   : > { %2053 = vmatmul.mubr.bf16.gmra.mrb[84].mxu0 %v3887_v37  ;;  %3450 = vmatmul.mubr.msk.bf16.gmra.mrb[116].mxu1 %vm1466_vm0, %v3888_v38 }
 0x137   : > { %2060 = vmatprep.mubr.bf16.mxu0 %v3889_v40  ;;  %3453 = vmatprep.mubr.msk.bf16.mxu1 %vm1466_vm0, %v3891_v41  ;;  %v3922_v41 = vld [vmem:[%s4007_s28 + $0x468] ss:$20 sps:$4 sm:$0xff]  }
 0x139   : > { %v4289_v43 = vpop.f32.mrb[12].mxu1 }
 0x13a   : > { %v1687_v44 = vpop.f32.mrb[13].mxu1 }
 0x13b   : > { %v4293_v47 = vpop.f32.mrb[14].mxu1 }
 0x13c   : > { %v1690_v50 = vpop.f32.mrb[15].mxu1 }
 0x13e   : > { %2061 = vmatmul.mubr.bf16.gmra.mrb[88].mxu0 %v3892_v45  ;;  %3454 = vmatmul.mubr.msk.bf16.gmra.mrb[120].mxu1 %vm1466_vm0, %v3893_v46  ;;  %v3924_v46 = vld [vmem:[%s4007_s28 + $0x494] ss:$20 sps:$4 sm:$0xff]  }
 0x13f   : > { %2068 = vmatprep.mubr.bf16.mxu0 %v3894_v48  ;;  %3457 = vmatprep.mubr.msk.bf16.mxu1 %vm1466_vm0, %v3896_v49  ;;  %v3926_v48 = vld [vmem:[%s4007_s28 + $0x420] ss:$20 sps:$4 sm:$0xff]  }
 0x141   : > { %v4299_v51 = vpop.f32.mrb[16].mxu1 }
 0x142   : > { %v1695_v52 = vpop.f32.mrb[17].mxu1 }
 0x143   : > { %v4303_v55 = vpop.f32.mrb[18].mxu1 }
 0x144   : > { %v1698_v58 = vpop.f32.mrb[19].mxu1 }
 0x145   : > { %v3928_v58 = vld [vmem:[%s4007_s28 + $0x448] ss:$20 sps:$4 sm:$0xff]  }
 0x146   : > { %2069 = vmatmul.mubr.bf16.gmra.mrb[92].mxu0 %v3897_v53  ;;  %3458 = vmatmul.mubr.msk.bf16.gmra.mrb[124].mxu1 %vm1466_vm0, %v3898_v54 }
 0x147   : > { %2076 = vmatprep.mubr.bf16.mxu0 %v3899_v56  ;;  %3461 = vmatprep.mubr.msk.bf16.mxu1 %vm1466_vm0, %v3901_v57  ;;  %v3927_v57 = vld [vmem:[%s4007_s28 + $0x490] ss:$20 sps:$4 sm:$0xff]  }
 0x149   : > { %v4309_v59 = vpop.f32.mrb[20].mxu1 }
 0x14a   : > { %v1703_v60 = vpop.f32.mrb[21].mxu1 }
 0x14b   : > { %v4313_v63 = vpop.f32.mrb[22].mxu1 }
 0x14c   : > { %v1706_v3 = vpop.f32.mrb[23].mxu1 }
 0x14e   : > { %2077 = vmatmul.mubr.bf16.gmra.mrb[96].mxu0 %v3902_v61  ;;  %3462 = vmatmul.mubr.msk.bf16.gmra.mrb[128].mxu1 %vm1466_vm0, %v3903_v62  ;;  %v3929_v62 = vld [vmem:[%s4007_s28 + $0x4bc] ss:$20 sps:$4 sm:$0xff]  }
 0x14f   : > { %2084 = vmatprep.mubr.bf16.mxu0 %v3904_v0  ;;  %3465 = vmatprep.mubr.msk.bf16.mxu1 %vm1466_vm0, %v3906_v2  ;;  %v3931_v0 = vld [vmem:[%s4007_s28 + $0x470] ss:$20 sps:$4 sm:$0xff]  }
 0x151   : > { %v4319_v4 = vpop.f32.mrb[24].mxu1 }
 0x152   : > { %v1711_v5 = vpop.f32.mrb[25].mxu1 }
 0x153   : > { %v4323_v8 = vpop.f32.mrb[26].mxu1 }
 0x154   : > { %v1714_v11 = vpop.f32.mrb[27].mxu1 }
 0x155   : > { %v3933_v11 = vld [vmem:[%s4007_s28 + $0x498] ss:$20 sps:$4 sm:$0xff]  }
 0x156   : > { %2085 = vmatmul.mubr.bf16.gmra.mrb[100].mxu0 %v3907_v6  ;;  %3466 = vmatmul.mubr.msk.bf16.gmra.mrb[132].mxu1 %vm1466_vm0, %v3908_v7 }
 0x157   : > { %2092 = vmatprep.mubr.bf16.mxu0 %v3909_v9  ;;  %3469 = vmatprep.mubr.msk.bf16.mxu1 %vm1466_vm0, %v3911_v10  ;;  %v3932_v10 = vld [vmem:[%s4007_s28 + $0x4b8] ss:$20 sps:$4 sm:$0xff]  }
 0x159   : > { %v4329_v12 = vpop.f32.mrb[28].mxu1 }
 0x15a   : > { %v1719_v13 = vpop.f32.mrb[29].mxu1 }
 0x15b   : > { %v4333_v15 = vpop.f32.mrb[30].mxu1 }
 0x15c   : > { %v1722_v18 = vpop.f32.mrb[31].mxu1 }
 0x15e   : > { %2093 = vmatmul.mubr.bf16.gmra.mrb[104].mxu0 %v3912_v14  ;;  %3470 = vmatmul.mubr.msk.bf16.gmra.mrb[136].mxu1 %vm1466_vm0, %v3913_v1  ;;  %v3934_v1 = vld [vmem:[%s4007_s28 + $0x4e4] ss:$20 sps:$4 sm:$0xff]  }
 0x15f   : > { %2100 = vmatprep.mubr.bf16.mxu0 %v3914_v16  ;;  %3473 = vmatprep.mubr.msk.bf16.mxu1 %vm1466_vm0, %v3916_v17  ;;  %v3936_v16 = vld [vmem:[%s4007_s28 + $0x4c0] ss:$20 sps:$4 sm:$0xff]  }
 0x161   : > { %v4339_v20 = vpop.f32.mrb[32].mxu1  ;;  %v4341_v21 = vpop.f32.mrb[0].mxu0 }
 0x162   : > { %v1727_v22 = vpop.f32.mrb[33].mxu1  ;;  %v1888_v24 = vpop.f32.mrb[1].mxu0 }
 0x163   : > { %v4345_v28 = vpop.f32.mrb[34].mxu1  ;;  %v4347_v29 = vpop.f32.mrb[2].mxu0 }
 0x164   : > { %v1730_v33 = vpop.f32.mrb[35].mxu1  ;;  %v1891_v34 = vpop.f32.mrb[3].mxu0 }
 0x166   : > { %2101 = vmatmul.mubr.bf16.gmra.mrb[108].mxu0 %v3917_v25  ;;  %3474 = vmatmul.mubr.msk.bf16.gmra.mrb[140].mxu1 %vm1466_vm0, %v3918_v26 }
 0x167   : > { %2108 = vmatprep.mubr.bf16.mxu0 %v3919_v30  ;;  %3477 = vmatprep.mubr.msk.bf16.mxu1 %vm1466_vm0, %v3921_v32  ;;  %v3937_v30 = vld [vmem:[%s4007_s28 + $0x4e0] ss:$20 sps:$4 sm:$0xff]   ;;  %v3938_v32 = vld [vmem:[%s4007_s28 + $0x4e8] ss:$20 sps:$4 sm:$0xff]  }
 0x169   : > { %v4353_v36 = vpop.f32.mrb[36].mxu1  ;;  %v4355_v37 = vpop.f32.mrb[4].mxu0 }
 0x16a   : > { %v1735_v38 = vpop.f32.mrb[37].mxu1  ;;  %v1896_v40 = vpop.f32.mrb[5].mxu0 }
 0x16b   : > { %v4359_v44 = vpop.f32.mrb[38].mxu1  ;;  %v4361_v45 = vpop.f32.mrb[6].mxu0 }
 0x16c   : > { %v1738_v49 = vpop.f32.mrb[39].mxu1  ;;  %v1899_v50 = vpop.f32.mrb[7].mxu0 }
 0x16e   : > { %2109 = vmatmul.mubr.bf16.gmra.mrb[112].mxu0 %v3922_v41  ;;  %3478 = vmatmul.mubr.msk.bf16.gmra.mrb[144].mxu1 %vm1466_vm0, %v3923_v42 }
 0x16f   : > { %2116 = vmatprep.mubr.bf16.mxu0 %v3924_v46  ;;  %3481 = vmatprep.mubr.msk.bf16.mxu1 %vm1466_vm0, %v3926_v48 }
 0x171   : > { %v4367_v52 = vpop.f32.mrb[40].mxu1  ;;  %v4369_v53 = vpop.f32.mrb[8].mxu0 }
 0x172   : > { %v1743_v54 = vpop.f32.mrb[41].mxu1  ;;  %v1904_v56 = vpop.f32.mrb[9].mxu0 }
 0x173   : > { %v4373_v60 = vpop.f32.mrb[42].mxu1  ;;  %v4375_v61 = vpop.f32.mrb[10].mxu0 }
 0x174   : > { %v1746_v2 = vpop.f32.mrb[43].mxu1  ;;  %v1907_v3 = vpop.f32.mrb[11].mxu0 }
 0x176   : > { %2117 = vmatmul.mubr.bf16.gmra.mrb[116].mxu0 %v3927_v57  ;;  %3482 = vmatmul.mubr.msk.bf16.gmra.mrb[148].mxu1 %vm1466_vm0, %v3928_v58 }
 0x177   : > { %2124 = vmatprep.mubr.bf16.mxu0 %v3929_v62  ;;  %3485 = vmatprep.mubr.msk.bf16.mxu1 %vm1466_vm0, %v3931_v0 }
 0x179   : > { %v4381_v5 = vpop.f32.mrb[44].mxu1  ;;  %v4383_v6 = vpop.f32.mrb[12].mxu0 }
 0x17a   : > { %v1751_v7 = vpop.f32.mrb[45].mxu1  ;;  %v1912_v9 = vpop.f32.mrb[13].mxu0 }
 0x17b   : > { %v4387_v13 = vpop.f32.mrb[46].mxu1  ;;  %v4389_v14 = vpop.f32.mrb[14].mxu0 }
 0x17c   : > { %v1754_v17 = vpop.f32.mrb[47].mxu1  ;;  %v1915_v18 = vpop.f32.mrb[15].mxu0 }
 0x17e   : > { %2125 = vmatmul.mubr.bf16.gmra.mrb[120].mxu0 %v3932_v10  ;;  %3486 = vmatmul.mubr.msk.bf16.gmra.mrb[152].mxu1 %vm1466_vm0, %v3933_v11 }
 0x17f   : > { %2132 = vmatprep.mubr.bf16.mxu0 %v3934_v1  ;;  %3489 = vmatprep.mubr.msk.bf16.mxu1 %vm1466_vm0, %v3936_v16 }
 0x181   : > { %v4395_v22 = vpop.f32.mrb[48].mxu1  ;;  %v4397_v24 = vpop.f32.mrb[16].mxu0 }
 0x182   : > { %v1759_v25 = vpop.f32.mrb[49].mxu1  ;;  %v1920_v26 = vpop.f32.mrb[17].mxu0 }
 0x183   : > { %v4401_v33 = vpop.f32.mrb[50].mxu1  ;;  %v4403_v34 = vpop.f32.mrb[18].mxu0 }
 0x184   : > { %v1762_v38 = vpop.f32.mrb[51].mxu1  ;;  %v1923_v40 = vpop.f32.mrb[19].mxu0 }
 0x186   : > { %2133 = vmatmul.mubr.bf16.gmra.mrb[124].mxu0 %v3937_v30  ;;  %3490 = vmatmul.mubr.msk.bf16.gmra.mrb[156].mxu1 %vm1466_vm0, %v3938_v32  ;;  %v4433_v30 = vld [vmem:[%s5598_s2] ss:$0 sm:$0xff] }
 0x187   : > { %v1662_v32 = vadd.f32 %v4433_v30, %v4259_v19  ;;  %v1670_v19 = vadd.f32 %v4433_v30, %v4269_v27  ;;  %v1678_v27 = vadd.f32 %v4433_v30, %v4279_v35  ;;  %v1686_v35 = vadd.f32 %v4433_v30, %v4289_v43 }
 0x188   : > { %v1694_v43 = vadd.f32 %v4433_v30, %v4299_v51  ;;  %v1702_v51 = vadd.f32 %v4433_v30, %v4309_v59  ;;  %v1710_v59 = vadd.f32 %v4433_v30, %v4319_v4 }
 0x189   : > { %v4406_v41 = vpop.f32.mrb[52].mxu1  ;;  %v4408_v42 = vpop.f32.mrb[20].mxu0 }
 0x18a   : > { %v1767_v46 = vpop.f32.mrb[53].mxu1  ;;  %v1928_v48 = vpop.f32.mrb[21].mxu0 }
 0x18b   : > { %v4410_v49 = vpop.f32.mrb[54].mxu1  ;;  %v4412_v50 = vpop.f32.mrb[22].mxu0  ;;  %v1665_v46 = vadd.f32 %v4433_v30, %v4263_v23  ;;  %v1673_v23 = vadd.f32 %v4433_v30, %v4273_v31  ;;  %v1681_v31 = vadd.f32 %v4433_v30, %v4283_v39  ;;  %v1689_v39 = vadd.f32 %v4433_v30, %v4293_v47 }
 0x18c   : > { %v1770_v54 = vpop.f32.mrb[55].mxu1  ;;  %v1931_v56 = vpop.f32.mrb[23].mxu0  ;;  %v1697_v47 = vadd.f32 %v4433_v30, %v4303_v55  ;;  %v1705_v55 = vadd.f32 %v4433_v30, %v4313_v63  ;;  %v445_v63 = vld [vmem:[%s5598_s2 + $0x3] sm:$0x1] }
 0x191   : > { %v4414_v57 = vpop.f32.mrb[56].mxu1  ;;  %v4416_v58 = vpop.f32.mrb[24].mxu0 }
 0x192   : > { %v1775_v62 = vpop.f32.mrb[57].mxu1  ;;  %v1936_v0 = vpop.f32.mrb[25].mxu0 }
 0x193   : > { %v4418_v2 = vpop.f32.mrb[58].mxu1  ;;  %v4420_v3 = vpop.f32.mrb[26].mxu0 }
 0x194   : > { %v1778_v7 = vpop.f32.mrb[59].mxu1  ;;  %v1939_v9 = vpop.f32.mrb[27].mxu0 }
 0x199   : > { %v4422_v10 = vpop.f32.mrb[60].mxu1  ;;  %v4424_v11 = vpop.f32.mrb[28].mxu0 }
 0x19a   : > { %v1783_v1 = vpop.f32.mrb[61].mxu1  ;;  %v1944_v16 = vpop.f32.mrb[29].mxu0 }
 0x19b   : > { %v4426_v17 = vpop.f32.mrb[62].mxu1  ;;  %v4428_v18 = vpop.f32.mrb[30].mxu0 }
 0x19c   : > { %v1786_v25 = vpop.f32.mrb[63].mxu1  ;;  %v1947_v26 = vpop.f32.mrb[31].mxu0 }
 0x1a1   : > { %v4437_v38 = vpop.f32.mrb[64].mxu1  ;;  %v1950_v40 = vpop.f32.mrb[32].mxu0 }
 0x1a2   : > { %v4441_v48 = vadd.f32 %v1950_v40, %v1662_v32  ;;  %v1791_v54 = vpop.f32.mrb[65].mxu1  ;;  %v1952_v56 = vpop.f32.mrb[33].mxu0 }
 0x1a3   : > { %v4443_v62 = vpop.f32.mrb[66].mxu1  ;;  %v1953_v0 = vpop.f32.mrb[34].mxu0 }
 0x1a4   : > { %5600 = vst [vmem:[#allocation2_spill] sm:$0xff] %v4441_v48  ;;  %v4445_v7 = vadd.f32 %v1953_v0, %v1665_v46  ;;  %v1794_v9 = vpop.f32.mrb[67].mxu1  ;;  %v1955_v1 = vpop.f32.mrb[35].mxu0 }
 0x1a6   : > { %5601 = vst [vmem:[#allocation3_spill] sm:$0xff] %v4445_v7 }
 0x1a9   : > { %v4449_v16 = vpop.f32.mrb[68].mxu1  ;;  %v1958_v25 = vpop.f32.mrb[36].mxu0 }
 0x1aa   : > { %v4453_v26 = vadd.f32 %v1958_v25, %v1670_v19  ;;  %v1799_v32 = vpop.f32.mrb[69].mxu1  ;;  %v1960_v40 = vpop.f32.mrb[37].mxu0 }
 0x1ab   : > { %v4455_v54 = vpop.f32.mrb[70].mxu1  ;;  %v1961_v56 = vpop.f32.mrb[38].mxu0 }
 0x1ac   : > { %5602 = vst [vmem:[#allocation4_spill] sm:$0xff] %v4453_v26  ;;  %v4457_v46 = vadd.f32 %v1961_v56, %v1673_v23  ;;  %v1802_v0 = vpop.f32.mrb[71].mxu1  ;;  %v1963_v9 = vpop.f32.mrb[39].mxu0 }
 0x1ae   : > { %5603 = vst [vmem:[#allocation5_spill] sm:$0xff] %v4457_v46 }
 0x1b1   : > { %v4461_v1 = vpop.f32.mrb[72].mxu1  ;;  %v1966_v7 = vpop.f32.mrb[40].mxu0 }
 0x1b2   : > { %v4465_v19 = vadd.f32 %v1966_v7, %v1678_v27  ;;  %v1807_v25 = vpop.f32.mrb[73].mxu1  ;;  %v1968_v32 = vpop.f32.mrb[41].mxu0 }
 0x1b3   : > { %v4467_v40 = vpop.f32.mrb[74].mxu1  ;;  %v1969_v48 = vpop.f32.mrb[42].mxu0 }
 0x1b4   : > { %5604 = vst [vmem:[#allocation6_spill] sm:$0xff] %v4465_v19  ;;  %v4469_v23 = vadd.f32 %v1969_v48, %v1681_v31  ;;  %v1810_v56 = vpop.f32.mrb[75].mxu1  ;;  %v1971_v0 = vpop.f32.mrb[43].mxu0 }
 0x1b6   : > { %5605 = vst [vmem:[#allocation7_spill] sm:$0xff] %v4469_v23 }
 0x1b9   : > { %v4473_v9 = vpop.f32.mrb[76].mxu1  ;;  %v1974_v46 = vpop.f32.mrb[44].mxu0 }
 0x1ba   : > { %v4477_v7 = vadd.f32 %v1974_v46, %v1686_v35  ;;  %v1815_v27 = vpop.f32.mrb[77].mxu1  ;;  %v1976_v25 = vpop.f32.mrb[45].mxu0 }
 0x1bb   : > { %v4479_v32 = vpop.f32.mrb[78].mxu1  ;;  %v1977_v19 = vpop.f32.mrb[46].mxu0 }
 0x1bc   : > { %5606 = vst [vmem:[#allocation8_spill] sm:$0xff] %v4477_v7  ;;  %v4481_v48 = vadd.f32 %v1977_v19, %v1689_v39  ;;  %v1818_v31 = vpop.f32.mrb[79].mxu1  ;;  %v1979_v56 = vpop.f32.mrb[47].mxu0 }
 0x1be   : > { %5607 = vst [vmem:[#allocation9_spill] sm:$0xff] %v4481_v48 }
 0x1c1   : > { %v4485_v0 = vpop.f32.mrb[80].mxu1  ;;  %v1982_v23 = vpop.f32.mrb[48].mxu0 }
 0x1c2   : > { %v4489_v46 = vadd.f32 %v1982_v23, %v1694_v43  ;;  %v1823_v35 = vpop.f32.mrb[81].mxu1  ;;  %v1984_v27 = vpop.f32.mrb[49].mxu0 }
 0x1c3   : > { %v4491_v25 = vpop.f32.mrb[82].mxu1  ;;  %v1985_v7 = vpop.f32.mrb[50].mxu0 }
 0x1c4   : > { %5608 = vst [vmem:[#allocation10_spill] sm:$0xff] %v4489_v46  ;;  %v4493_v19 = vadd.f32 %v1985_v7, %v1697_v47  ;;  %v1826_v39 = vpop.f32.mrb[83].mxu1  ;;  %v1987_v31 = vpop.f32.mrb[51].mxu0  ;;  %v2822_v7 = vlaneseq }
 0x1c6   : > { %5609 = vst [vmem:[#allocation11_spill] sm:$0xff] %v4493_v19  ;;  %v2823_v19 = vshrl.u32 %v2822_v7, 7 }
 0x1c9   : > { %v4497_v56 = vpop.f32.mrb[84].mxu1  ;;  %v1990_v48 = vpop.f32.mrb[52].mxu0 }
 0x1ca   : > { %v4501_v23 = vadd.f32 %v1990_v48, %v1702_v51  ;;  %v1831_v43 = vpop.f32.mrb[85].mxu1  ;;  %v1992_v35 = vpop.f32.mrb[53].mxu0 }
 0x1cb   : > { %v4503_v27 = vpop.f32.mrb[86].mxu1  ;;  %v1993_v46 = vpop.f32.mrb[54].mxu0  ;;  %v1713_v43 = vadd.f32 %v4433_v30, %v4323_v8  ;;  %v1726_v8 = vadd.f32 %v4433_v30, %v4339_v20  ;;  %v3527_v20 = vadd.f32 %v4433_v30, %v4355_v37  ;;  %v4572_v37 = vadd.f32 %v4433_v30, %v4375_v61 }
 0x1cc   : > { %5610 = vst [vmem:[#allocation12_spill] sm:$0xff] %v4501_v23  ;;  %5611 = vst [vmem:[#allocation13_spill] sm:$0xff] %v4503_v27  ;;  %v4505_v47 = vadd.f32 %v1993_v46, %v1705_v55  ;;  %v1834_v39 = vpop.f32.mrb[87].mxu1  ;;  %v1995_v31 = vpop.f32.mrb[55].mxu0  ;;  %v1721_v27 = vadd.f32 %v4433_v30, %v4333_v15  ;;  %v4546_v15 = vadd.f32 %v4433_v30, %v4353_v36 }
 0x1cd   : > { %v2824_v31 = vsub.s32 0, %v2823_v19  ;;  %v4534_v19 = vadd.f32 %v4433_v30, %v4345_v28  ;;  %v4556_v28 = vadd.f32 %v4433_v30, %v4361_v45  ;;  %v4568_v36 = vadd.f32 %v4433_v30, %v4373_v60 }
 0x1ce   : > { %5612 = vst [vmem:[#allocation14_spill] sm:$0xff] %v4505_v47  ;;  %v2890_v47 = vsub.f32 1.0, %v445_v63  ;;  %v4576_v45 = vadd.f32 %v4433_v30, %v4381_v5  ;;  %v4590_v61 = vadd.f32 %v4433_v30, %v4389_v14  ;;  %v4594_v5 = vadd.f32 %v4433_v30, %v4395_v22 }
 0x1cf   : > { %v4610_v14 = vadd.f32 %v4433_v30, %v4406_v41  ;;  %v4614_v22 = vadd.f32 %v4433_v30, %v4408_v42  ;;  %v4628_v41 = vadd.f32 %v4433_v30, %v4414_v57  ;;  %v4632_v42 = vadd.f32 %v4433_v30, %v4416_v58 }
 0x1d0   : > { %v4648_v57 = vadd.f32 %v4433_v30, %v4424_v11  ;;  %v4652_v58 = vadd.f32 %v4433_v30, %v4426_v17  ;;  %v4668_v11 = vadd.f32 %v4433_v30, %v4449_v16  ;;  %v4672_v17 = vadd.f32 %v4433_v30, %v4455_v54 }
 0x1d1   : > { %v4512_v48 = vpop.f32.mrb[88].mxu1  ;;  %v1998_v51 = vpop.f32.mrb[56].mxu0  ;;  %v4688_v16 = vadd.f32 %v4433_v30, %v4479_v32  ;;  %v4692_v54 = vadd.f32 %v4433_v30, %v4485_v0 }
 0x1d2   : > { %5613 = vst [vmem:[#allocation15_spill] sm:$0xff] %v4512_v48  ;;  %v4516_v35 = vadd.f32 %v1998_v51, %v1710_v59  ;;  %v1839_v46 = vpop.f32.mrb[89].mxu1  ;;  %v2000_v55 = vpop.f32.mrb[57].mxu0  ;;  %v1718_v48 = vadd.f32 %v4433_v30, %v4329_v12  ;;  %v4530_v59 = vadd.f32 %v4433_v30, %v4341_v21  ;;  %v4542_v12 = vrot.slane %v2890_v47, %v2824_v31 }
 0x1d3   : > { %v4518_v39 = vpop.f32.mrb[90].mxu1  ;;  %v2001_v7 = vpop.f32.mrb[58].mxu0  ;;  %v4552_v21 = vadd.f32 %v4433_v30, %v4359_v44  ;;  %v4564_v47 = vadd.f32 %v4433_v30, %v4369_v53  ;;  %v4584_v53 = vadd.f32 %v4433_v30, %v4387_v13  ;;  %v4602_v13 = vadd.f32 %v4433_v30, %v4401_v33  ;;  %5616 = vst [vmem:[#allocation18_spill] sm:$0xff] %v4688_v16  ;;  %v5620_v32 = vld [vmem:[#allocation13_spill] sm:$0xff] }
 0x1d4   : > { %v4520_v4 = vadd.f32 %v2001_v7, %v1713_v43  ;;  %v1842_v23 = vpop.f32.mrb[91].mxu1  ;;  %v2003_v26 = vpop.f32.mrb[59].mxu0  ;;  %v4606_v55 = vadd.f32 %v4433_v30, %v4403_v34  ;;  %v4620_v33 = vadd.f32 %v4433_v30, %v4410_v49  ;;  %v4624_v34 = vadd.f32 %v4433_v30, %v4412_v50  ;;  %5617 = vst [vmem:[#allocation19_spill] sm:$0xff] %v4692_v54 }
 0x1d5   : > { %v4538_v26 = vadd.f32 %v4433_v30, %v4347_v29  ;;  %v4540_v23 = vrot.slane %v445_v63, %v2824_v31  ;;  %v4560_v29 = vadd.f32 %v4433_v30, %v4367_v52  ;;  %v4580_v52 = vadd.f32 %v4433_v30, %v4383_v6 }
 0x1d6   : > { %v4598_v6 = vadd.f32 %v4433_v30, %v4397_v24  ;;  %v4640_v49 = vadd.f32 %v4433_v30, %v4420_v3  ;;  %v4644_v50 = vadd.f32 %v4433_v30, %v4422_v10  ;;  %v4660_v3 = vadd.f32 %v4433_v30, %v4437_v38 }
 0x1d7   : > { %v4664_v10 = vadd.f32 %v4433_v30, %v4443_v62  ;;  %v4680_v38 = vadd.f32 %v4433_v30, %v4467_v40  ;;  %v4684_v62 = vadd.f32 %v4433_v30, %v4473_v9  ;;  %v4701_v40 = vld [vmem:[%s5598_s2 + $0x1] ss:$0 sm:$0xff]  ;;  %v4719_v54 = vadd.f32 %v4433_v30, %v4518_v39 }
 0x1d9   : > { %v1845_v44 = vpop.f32.mrb[92].mxu1  ;;  %v2006_v63 = vpop.f32.mrb[60].mxu0  ;;  %5614 = vst [vmem:[#allocation16_spill] sm:$0xff] %v4680_v38  ;;  %5615 = vst [vmem:[#allocation17_spill] sm:$0xff] %v4684_v62 }
 0x1da   : > { %v4586_v60 = vadd.f32 %v2006_v63, %v1718_v48  ;;  %v1847_v51 = vpop.f32.mrb[93].mxu1  ;;  %v2008_v43 = vpop.f32.mrb[61].mxu0  ;;  %5624 = vst [vmem:[#allocation22_spill] sm:$0xff] %v4719_v54 }
 0x1db   : > { %v1848_v48 = vpop.f32.mrb[94].mxu1  ;;  %v2009_v46 = vpop.f32.mrb[62].mxu0  ;;  %v4705_v51 = vadd.f32 %v4433_v30, %v4497_v56  ;;  %v4709_v43 = vadd.f32 %v4433_v30, %v5620_v32  ;;  %v4722_v56 = vadd.f32 %v4433_v30, %v1845_v44  ;;  %v4727_v32 = vld [vmem:[%s5598_s2 + $0x2] ss:$0 sm:$0xff] }
 0x1dc   : > { %v4616_v24 = vadd.f32 %v2009_v46, %v1721_v27  ;;  %v1850_v7 = vpop.f32.mrb[95].mxu1  ;;  %v2011_v31 = vpop.f32.mrb[63].mxu0  ;;  %v4636_v27 = vadd.f32 %v4433_v30, %v4418_v2  ;;  %v4656_v2 = vadd.f32 %v4433_v30, %v4428_v18  ;;  %v4676_v18 = vadd.f32 %v4433_v30, %v4461_v1 }
 0x1dd   : > { %v4696_v1 = vadd.f32 %v4433_v30, %v4491_v25  ;;  %5619 = vst [vmem:[#allocation21_spill] sm:$0xff] %v4705_v51  ;;  %5621 = vst [vmem:[#allocation13_spill] sm:$0xff] %v4709_v43  ;;  %v5622_v31 = vld [vmem:[#allocation15_spill] sm:$0xff]  ;;  %v4736_v54 = vadd.f32 %v4433_v30, %v1848_v48 }
 0x1de   : > { %5625 = vst [vmem:[#allocation23_spill] sm:$0xff] %v4722_v56 }
 0x1df   : > { %5618 = vst [vmem:[#allocation20_spill] sm:$0xff] %v4696_v1  ;;  %v4715_v1 = vadd.f32 %v4433_v30, %v5622_v31  ;;  %5626 = vst [vmem:[#allocation24_spill] sm:$0xff] %v4736_v54 }
 0x1e1   : > { %v2014_v63 = vpop.f32.mrb[64].mxu0  ;;  %v3431_v9 = vpop.f32.mrb[96].mxu1  ;;  %5623 = vst [vmem:[#allocation15_spill] sm:$0xff] %v4715_v1 }
 0x1e2   : > { %v4711_v0 = vadd.f32 %v2014_v63, %v1726_v8  ;;  %v2184_v46 = vadd.f32 %v3527_v20, %v3431_v9  ;;  %v2016_v25 = vpop.f32.mrb[65].mxu0  ;;  %v2175_v7 = vpop.f32.mrb[97].mxu1 }
 0x1e3   : > { %v2176_v8 = vadd.f32 %v4530_v59, %v2175_v7  ;;  %v2017_v20 = vpop.f32.mrb[66].mxu0  ;;  %v3432_v63 = vpop.f32.mrb[98].mxu1 }
 0x1e4   : > { %v2436_v9 = vmul.f32 %v4701_v40, %v2184_v46  ;;  %v2632_v25 = vmax.f32 %v2184_v46, 0.0  ;;  %v4732_v31 = vadd.f32 %v2017_v20, %v4534_v19  ;;  %v2187_v39 = vadd.f32 %v4556_v28, %v3432_v63  ;;  %v2019_v44 = vpop.f32.mrb[67].mxu0  ;;  %v2178_v56 = vpop.f32.mrb[99].mxu1 }
 0x1e5   : > { %v2434_v1 = vmul.f32 %v4701_v40, %v2176_v8  ;;  %v2630_v43 = vmax.f32 %v2176_v8, 0.0  ;;  %v2179_v59 = vadd.f32 %v4538_v26, %v2178_v56 }
 0x1e6   : > { %v2504_v7 = vadd.f32 %v4727_v32, %v2436_v9  ;;  %v2696_v46 = vmul.f32 %v4701_v40, %v2632_v25  ;;  %v2437_v19 = vmul.f32 %v4701_v40, %v2187_v39  ;;  %v2633_v20 = vmax.f32 %v2187_v39, 0.0 }
 0x1e7   : > { %v2502_v51 = vadd.f32 %v4727_v32, %v2434_v1  ;;  %v2694_v28 = vmul.f32 %v4701_v40, %v2630_v43  ;;  %v2435_v63 = vmul.f32 %v4701_v40, %v2179_v59  ;;  %v2631_v30 = vmax.f32 %v2179_v59, 0.0 }
 0x1e8   : > { %v2568_v48 = vmax.f32 %v2504_v7, 0.0  ;;  %v2760_v8 = vadd.f32 %v4727_v32, %v2696_v46  ;;  %v2505_v26 = vadd.f32 %v4727_v32, %v2437_v19  ;;  %v2697_v56 = vmul.f32 %v4701_v40, %v2633_v20 }
 0x1e9   : > { %v2566_v9 = vmax.f32 %v2502_v51, 0.0  ;;  %v2758_v25 = vadd.f32 %v4727_v32, %v2694_v28  ;;  %v2503_v39 = vadd.f32 %v4727_v32, %v2435_v63  ;;  %v2695_v1 = vmul.f32 %v4701_v40, %v2631_v30  ;;  %v2022_v44 = vpop.f32.mrb[68].mxu0  ;;  %v3435_v43 = vpop.f32.mrb[100].mxu1 }
 0x1ea   : > { %v2828_v54 = vmul.f32 %v4540_v23, %v2568_v48  ;;  %v2897_v59 = vmul.f32 %v4542_v12, %v2760_v8  ;;  %v2569_v7 = vmax.f32 %v2505_v26, 0.0  ;;  %v2761_v46 = vadd.f32 %v4727_v32, %v2697_v56  ;;  %v2024_v16 = vpop.f32.mrb[69].mxu0  ;;  %v2191_v19 = vpop.f32.mrb[101].mxu1 }
 0x1eb   : > { %v2826_v51 = vmul.f32 %v4540_v23, %v2566_v9  ;;  %v2895_v20 = vmul.f32 %v4542_v12, %v2758_v25  ;;  %v2567_v28 = vmax.f32 %v2503_v39, 0.0  ;;  %v2759_v63 = vadd.f32 %v4727_v32, %v2695_v1  ;;  %v2025_v30 = vpop.f32.mrb[70].mxu0  ;;  %v3436_v48 = vpop.f32.mrb[102].mxu1 }
 0x1ec   : > { %v2961_v8 = vadd.f32 %v2897_v59, %v2828_v54  ;;  %v2829_v16 = vmul.f32 %v4540_v23, %v2569_v7  ;;  %v2898_v26 = vmul.f32 %v4542_v12, %v2761_v46  ;;  %v4767_v56 = vadd.f32 %v2022_v44, %v4546_v15  ;;  %v2027_v62 = vpop.f32.mrb[71].mxu0  ;;  %v2194_v9 = vpop.f32.mrb[103].mxu1 }
 0x1ed   : > { %v2959_v38 = vadd.f32 %v2895_v20, %v2826_v51  ;;  %v2827_v25 = vmul.f32 %v4540_v23, %v2567_v28  ;;  %v2896_v39 = vmul.f32 %v4542_v12, %v2759_v63  ;;  %v2200_v1 = vadd.f32 %v4580_v52, %v3435_v43 }
 0x1ee   : > { %3025 = vst.msk [vmem:[%s4759_s27 + $0x10] sm:$0xff] %vm1466_vm0, %v2961_v8  ;;  %v2962_v54 = vadd.f32 %v2898_v26, %v2829_v16  ;;  %v2192_v59 = vadd.f32 %v4564_v47, %v2191_v19  ;;  %v4776_v7 = vadd.f32 %v2025_v30, %v4552_v21  ;;  %v2203_v15 = vadd.f32 %v4590_v61, %v3436_v48 }
 0x1ef   : > { %3023 = vst.msk [vmem:[%s4759_s27] sm:$0xff] %vm1466_vm0, %v2959_v38  ;;  %v2960_v62 = vadd.f32 %v2896_v39, %v2827_v25  ;;  %v2440_v44 = vmul.f32 %v4701_v40, %v2200_v1  ;;  %v2636_v46 = vmax.f32 %v2200_v1, 0.0  ;;  %v2195_v51 = vadd.f32 %v4572_v37, %v2194_v9 }
 0x1f0   : > { %3026 = vst.msk [vmem:[%s4759_s27 + $0x18] sm:$0xff] %vm1466_vm0, %v2962_v54  ;;  %v2438_v52 = vmul.f32 %v4701_v40, %v2192_v59  ;;  %v2634_v43 = vmax.f32 %v2192_v59, 0.0  ;;  %v2441_v47 = vmul.f32 %v4701_v40, %v2203_v15  ;;  %v2637_v19 = vmax.f32 %v2203_v15, 0.0 }
 0x1f1   : > { %3024 = vst.msk [vmem:[%s4759_s27 + $0x8] sm:$0xff] %vm1466_vm0, %v2960_v62  ;;  %v2508_v21 = vadd.f32 %v4727_v32, %v2440_v44  ;;  %v2700_v61 = vmul.f32 %v4701_v40, %v2636_v46  ;;  %v2439_v38 = vmul.f32 %v4701_v40, %v2195_v51  ;;  %v2635_v20 = vmax.f32 %v2195_v51, 0.0  ;;  %v2030_v28 = vpop.f32.mrb[72].mxu0  ;;  %v3439_v63 = vpop.f32.mrb[104].mxu1 }
 0x1f2   : > { %v2506_v37 = vadd.f32 %v4727_v32, %v2438_v52  ;;  %v2698_v30 = vmul.f32 %v4701_v40, %v2634_v43  ;;  %v2509_v48 = vadd.f32 %v4727_v32, %v2441_v47  ;;  %v2701_v8 = vmul.f32 %v4701_v40, %v2637_v19  ;;  %v2032_v16 = vpop.f32.mrb[73].mxu0  ;;  %v2207_v26 = vpop.f32.mrb[105].mxu1 }
 0x1f3   : > { %v2572_v9 = vmax.f32 %v2508_v21, 0.0  ;;  %v2764_v25 = vadd.f32 %v4727_v32, %v2700_v61  ;;  %v2507_v39 = vadd.f32 %v4727_v32, %v2439_v38  ;;  %v2699_v1 = vmul.f32 %v4701_v40, %v2635_v20  ;;  %v2033_v54 = vpop.f32.mrb[74].mxu0  ;;  %v3440_v59 = vpop.f32.mrb[106].mxu1 }
 0x1f4   : > { %v2570_v15 = vmax.f32 %v2506_v37, 0.0  ;;  %v2762_v62 = vadd.f32 %v4727_v32, %v2698_v30  ;;  %v2573_v44 = vmax.f32 %v2509_v48, 0.0  ;;  %v2765_v46 = vadd.f32 %v4727_v32, %v2701_v8  ;;  %v2035_v51 = vpop.f32.mrb[75].mxu0  ;;  %v2210_v52 = vpop.f32.mrb[107].mxu1 }
 0x1f5   : > { %v2832_v43 = vmul.f32 %v4540_v23, %v2572_v9  ;;  %v2901_v47 = vmul.f32 %v4542_v12, %v2764_v25  ;;  %v2571_v19 = vmax.f32 %v2507_v39, 0.0  ;;  %v2763_v21 = vadd.f32 %v4727_v32, %v2699_v1 }
 0x1f6   : > { %v2830_v61 = vmul.f32 %v4540_v23, %v2570_v15  ;;  %v2899_v38 = vmul.f32 %v4542_v12, %v2762_v62  ;;  %v2833_v20 = vmul.f32 %v4540_v23, %v2573_v44  ;;  %v2902_v37 = vmul.f32 %v4542_v12, %v2765_v46 }
 0x1f7   : > { %v2965_v30 = vadd.f32 %v2901_v47, %v2832_v43  ;;  %v2831_v48 = vmul.f32 %v4540_v23, %v2571_v19  ;;  %v2900_v8 = vmul.f32 %v4542_v12, %v2763_v21  ;;  %v4811_v16 = vadd.f32 %v2030_v28, %v4560_v29 }
 0x1f8   : > { %v2963_v9 = vadd.f32 %v2899_v38, %v2830_v61  ;;  %v2966_v25 = vadd.f32 %v2902_v37, %v2833_v20  ;;  %v2216_v39 = vadd.f32 %v4614_v22, %v3439_v63  ;;  %v2208_v1 = vadd.f32 %v4598_v6, %v2207_v26 }
 0x1f9   : > { %3029 = vst.msk [vmem:[%s4759_s27 + $0x30] sm:$0xff] %vm1466_vm0, %v2965_v30  ;;  %v2964_v15 = vadd.f32 %v2900_v8, %v2831_v48  ;;  %v4818_v62 = vadd.f32 %v2033_v54, %v4568_v36  ;;  %v2219_v44 = vadd.f32 %v4624_v34, %v3440_v59  ;;  %v2211_v46 = vadd.f32 %v4606_v55, %v2210_v52  ;;  %v2038_v51 = vpop.f32.mrb[76].mxu0  ;;  %v3443_v29 = vpop.f32.mrb[108].mxu1 }
 0x1fa   : > { %3027 = vst.msk [vmem:[%s4759_s27 + $0x20] sm:$0xff] %vm1466_vm0, %v2963_v9  ;;  %3030 = vst.msk [vmem:[%s4759_s27 + $0x38] sm:$0xff] %vm1466_vm0, %v2966_v25  ;;  %v2444_v22 = vmul.f32 %v4701_v40, %v2216_v39  ;;  %v2640_v6 = vmax.f32 %v2216_v39, 0.0  ;;  %v2442_v28 = vmul.f32 %v4701_v40, %v2208_v1  ;;  %v2638_v63 = vmax.f32 %v2208_v1, 0.0  ;;  %v2040_v26 = vpop.f32.mrb[77].mxu0  ;;  %v2223_v43 = vpop.f32.mrb[109].mxu1 }
 0x1fb   : > { %3028 = vst.msk [vmem:[%s4759_s27 + $0x28] sm:$0xff] %vm1466_vm0, %v2964_v15  ;;  %v2445_v36 = vmul.f32 %v4701_v40, %v2219_v44  ;;  %v2641_v34 = vmax.f32 %v2219_v44, 0.0  ;;  %v2443_v55 = vmul.f32 %v4701_v40, %v2211_v46  ;;  %v2639_v54 = vmax.f32 %v2211_v46, 0.0  ;;  %v2041_v59 = vpop.f32.mrb[78].mxu0  ;;  %v3444_v52 = vpop.f32.mrb[110].mxu1 }
 0x1fc   : > { %v2512_v47 = vadd.f32 %v4727_v32, %v2444_v22  ;;  %v2704_v19 = vmul.f32 %v4701_v40, %v2640_v6  ;;  %v2510_v21 = vadd.f32 %v4727_v32, %v2442_v28  ;;  %v2702_v61 = vmul.f32 %v4701_v40, %v2638_v63  ;;  %v2043_v38 = vpop.f32.mrb[79].mxu0  ;;  %v2226_v20 = vpop.f32.mrb[111].mxu1 }
 0x1fd   : > { %v2513_v37 = vadd.f32 %v4727_v32, %v2445_v36  ;;  %v2705_v30 = vmul.f32 %v4701_v40, %v2641_v34  ;;  %v2511_v48 = vadd.f32 %v4727_v32, %v2443_v55  ;;  %v2703_v8 = vmul.f32 %v4701_v40, %v2639_v54 }
 0x1fe   : > { %v2576_v9 = vmax.f32 %v2512_v47, 0.0  ;;  %v2768_v25 = vadd.f32 %v4727_v32, %v2704_v19  ;;  %v2574_v39 = vmax.f32 %v2510_v21, 0.0  ;;  %v2766_v1 = vadd.f32 %v4727_v32, %v2702_v61 }
 0x1ff   : > { %v2577_v15 = vmax.f32 %v2513_v37, 0.0  ;;  %v2769_v44 = vadd.f32 %v4727_v32, %v2705_v30  ;;  %v2575_v46 = vmax.f32 %v2511_v48, 0.0  ;;  %v2767_v22 = vadd.f32 %v4727_v32, %v2703_v8 }
 0x200   : > { %v2836_v6 = vmul.f32 %v4540_v23, %v2576_v9  ;;  %v2905_v28 = vmul.f32 %v4542_v12, %v2768_v25  ;;  %v2834_v63 = vmul.f32 %v4540_v23, %v2574_v39  ;;  %v2903_v26 = vmul.f32 %v4542_v12, %v2766_v1 }
 0x201   : > { %v2837_v36 = vmul.f32 %v4540_v23, %v2577_v15  ;;  %v2906_v34 = vmul.f32 %v4542_v12, %v2769_v44  ;;  %v2835_v55 = vmul.f32 %v4540_v23, %v2575_v46  ;;  %v2904_v54 = vmul.f32 %v4542_v12, %v2767_v22  ;;  %v2046_v47 = vpop.f32.mrb[80].mxu0  ;;  %v3447_v19 = vpop.f32.mrb[112].mxu1 }
 0x202   : > { %v2969_v21 = vadd.f32 %v2905_v28, %v2836_v6  ;;  %v2967_v61 = vadd.f32 %v2903_v26, %v2834_v63  ;;  %v4853_v38 = vadd.f32 %v2038_v51, %v4576_v45  ;;  %v2232_v37 = vadd.f32 %v4648_v57, %v3443_v29  ;;  %v2048_v30 = vpop.f32.mrb[81].mxu0  ;;  %v4856_v48 = vpop.f32.mrb[113].mxu1 }
 0x203   : > { %v2970_v8 = vadd.f32 %v2906_v34, %v2837_v36  ;;  %v2968_v9 = vadd.f32 %v2904_v54, %v2835_v55  ;;  %v2224_v25 = vadd.f32 %v4632_v42, %v2223_v43  ;;  %v4860_v39 = vadd.f32 %v2041_v59, %v4584_v53  ;;  %v2049_v1 = vpop.f32.mrb[82].mxu0  ;;  %v4862_v15 = vpop.f32.mrb[114].mxu1  ;;  %v5627_v59 = vld [vmem:[#allocation4_spill] sm:$0xff] }
 0x204   : > { %3033 = vst.msk [vmem:[%s4759_s27 + $0x50] sm:$0xff] %vm1466_vm0, %v2969_v21  ;;  %3031 = vst.msk [vmem:[%s4759_s27 + $0x40] sm:$0xff] %vm1466_vm0, %v2967_v61  ;;  %v2448_v45 = vmul.f32 %v4701_v40, %v2232_v37  ;;  %v2644_v57 = vmax.f32 %v2232_v37, 0.0  ;;  %v2235_v51 = vadd.f32 %v4656_v2, %v3444_v52  ;;  %v2227_v29 = vadd.f32 %v4640_v49, %v2226_v20  ;;  %v2051_v44 = vpop.f32.mrb[83].mxu0  ;;  %v2242_v46 = vpop.f32.mrb[115].mxu1 }
 0x205   : > { %3034 = vst.msk [vmem:[%s4759_s27 + $0x58] sm:$0xff] %vm1466_vm0, %v2970_v8  ;;  %3032 = vst.msk [vmem:[%s4759_s27 + $0x48] sm:$0xff] %vm1466_vm0, %v2968_v9  ;;  %v2446_v53 = vmul.f32 %v4701_v40, %v2224_v25  ;;  %v2642_v42 = vmax.f32 %v2224_v25, 0.0  ;;  %v4877_v43 = vadd.f32 %v2046_v47, %v4594_v5  ;;  %v2248_v22 = vadd.f32 %v3447_v19, %v5627_v59 }
 0x206   : > { %v2516_v6 = vadd.f32 %v4727_v32, %v2448_v45  ;;  %v2708_v2 = vmul.f32 %v4701_v40, %v2644_v57  ;;  %v2449_v49 = vmul.f32 %v4701_v40, %v2235_v51  ;;  %v2645_v52 = vmax.f32 %v2235_v51, 0.0 }
 0x207   : > { %v2514_v20 = vadd.f32 %v4727_v32, %v2446_v53  ;;  %v2706_v28 = vmul.f32 %v4701_v40, %v2642_v42  ;;  %v2447_v63 = vmul.f32 %v4701_v40, %v2227_v29  ;;  %v2643_v26 = vmax.f32 %v2227_v29, 0.0 }
 0x208   : > { %v2580_v36 = vmax.f32 %v2516_v6, 0.0  ;;  %v2772_v5 = vadd.f32 %v4727_v32, %v2708_v2  ;;  %v2517_v34 = vadd.f32 %v4727_v32, %v2449_v49  ;;  %v2709_v55 = vmul.f32 %v4701_v40, %v2645_v52 }
 0x209   : > { %v2578_v54 = vmax.f32 %v2514_v20, 0.0  ;;  %v2770_v47 = vadd.f32 %v4727_v32, %v2706_v28  ;;  %v2515_v19 = vadd.f32 %v4727_v32, %v2447_v63  ;;  %v2707_v21 = vmul.f32 %v4701_v40, %v2643_v26  ;;  %v2054_v61 = vpop.f32.mrb[84].mxu0  ;;  %v3451_v37 = vpop.f32.mrb[116].mxu1 }
 0x20a   : > { %v2840_v30 = vmul.f32 %v4540_v23, %v2580_v36  ;;  %v2909_v8 = vmul.f32 %v4542_v12, %v2772_v5  ;;  %v2581_v9 = vmax.f32 %v2517_v34, 0.0  ;;  %v2773_v25 = vadd.f32 %v4727_v32, %v2709_v55  ;;  %v2056_v45 = vpop.f32.mrb[85].mxu0  ;;  %v4895_v57 = vpop.f32.mrb[117].mxu1 }
 0x20b   : > { %v2838_v51 = vmul.f32 %v4540_v23, %v2578_v54  ;;  %v2907_v29 = vmul.f32 %v4542_v12, %v2770_v47  ;;  %v2579_v44 = vmax.f32 %v2515_v19, 0.0  ;;  %v2771_v53 = vadd.f32 %v4727_v32, %v2707_v21  ;;  %v4900_v42 = vpop.f32.mrb[86].mxu0  ;;  %v4902_v59 = vpop.f32.mrb[118].mxu1  ;;  %v5628_v54 = vld [vmem:[#allocation2_spill] sm:$0xff] }
 0x20c   : > { %v2973_v6 = vadd.f32 %v2909_v8, %v2840_v30  ;;  %v2841_v2 = vmul.f32 %v4540_v23, %v2581_v9  ;;  %v2910_v49 = vmul.f32 %v4542_v12, %v2773_v25  ;;  %v2452_v52 = vmul.f32 %v4701_v40, %v2248_v22  ;;  %v2059_v20 = vpop.f32.mrb[87].mxu0  ;;  %v4907_v28 = vpop.f32.mrb[119].mxu1  ;;  %v5629_v8 = vld [vmem:[#allocation5_spill] sm:$0xff]  ;;  %v5630_v9 = vld [vmem:[#allocation3_spill] sm:$0xff] }
 0x20d   : > { %v2971_v63 = vadd.f32 %v2907_v29, %v2838_v51  ;;  %v2839_v26 = vmul.f32 %v4540_v23, %v2579_v44  ;;  %v2908_v36 = vmul.f32 %v4542_v12, %v2771_v53  ;;  %v2648_v5 = vmax.f32 %v2248_v22, 0.0 }
 0x20e   : > { %3037 = vst.msk [vmem:[%s4759_s27 + $0x70] sm:$0xff] %vm1466_vm0, %v2973_v6  ;;  %v2974_v34 = vadd.f32 %v2910_v49, %v2841_v2  ;;  %v2520_v55 = vadd.f32 %v4727_v32, %v2452_v52  ;;  %v2240_v47 = vadd.f32 %v4856_v48, %v5628_v54  ;;  %v4917_v19 = vadd.f32 %v2049_v1, %v4602_v13 }
 0x20f   : > { %3035 = vst.msk [vmem:[%s4759_s27 + $0x60] sm:$0xff] %vm1466_vm0, %v2971_v63  ;;  %v2972_v21 = vadd.f32 %v2908_v36, %v2839_v26  ;;  %v2712_v30 = vmul.f32 %v4701_v40, %v2648_v5  ;;  %v2251_v22 = vadd.f32 %v4862_v15, %v5629_v8  ;;  %v2243_v25 = vadd.f32 %v2242_v46, %v5630_v9 }
 0x210   : > { %3038 = vst.msk [vmem:[%s4759_s27 + $0x78] sm:$0xff] %vm1466_vm0, %v2974_v34  ;;  %v2584_v45 = vmax.f32 %v2520_v55, 0.0  ;;  %v2450_v51 = vmul.f32 %v4701_v40, %v2240_v47  ;;  %v2646_v29 = vmax.f32 %v2240_v47, 0.0  ;;  %v4929_v48 = vadd.f32 %v2054_v61, %v4610_v14 }
 0x211   : > { %3036 = vst.msk [vmem:[%s4759_s27 + $0x68] sm:$0xff] %vm1466_vm0, %v2972_v21  ;;  %v2776_v13 = vadd.f32 %v4727_v32, %v2712_v30  ;;  %v2453_v1 = vmul.f32 %v4701_v40, %v2251_v22  ;;  %v2649_v44 = vmax.f32 %v2251_v22, 0.0  ;;  %v2451_v15 = vmul.f32 %v4701_v40, %v2243_v25  ;;  %v2062_v53 = vpop.f32.mrb[88].mxu0  ;;  %v4936_v46 = vpop.f32.mrb[120].mxu1  ;;  %v5631_v21 = vld [vmem:[#allocation8_spill] sm:$0xff] }
 0x212   : > { %v2844_v6 = vmul.f32 %v4540_v23, %v2584_v45  ;;  %v2518_v2 = vadd.f32 %v4727_v32, %v2450_v51  ;;  %v2710_v49 = vmul.f32 %v4701_v40, %v2646_v29  ;;  %v2647_v14 = vmax.f32 %v2243_v25, 0.0  ;;  %v2064_v61 = vpop.f32.mrb[89].mxu0  ;;  %v4941_v52 = vpop.f32.mrb[121].mxu1 }
 0x213   : > { %v2913_v20 = vmul.f32 %v4542_v12, %v2776_v13  ;;  %v2521_v63 = vadd.f32 %v4727_v32, %v2453_v1  ;;  %v2713_v26 = vmul.f32 %v4701_v40, %v2649_v44  ;;  %v2519_v36 = vadd.f32 %v4727_v32, %v2451_v15  ;;  %v4947_v5 = vpop.f32.mrb[90].mxu0  ;;  %v4949_v34 = vpop.f32.mrb[122].mxu1 }
 0x214   : > { %v2582_v55 = vmax.f32 %v2518_v2, 0.0  ;;  %v2774_v54 = vadd.f32 %v4727_v32, %v2710_v49  ;;  %v2711_v47 = vmul.f32 %v4701_v40, %v2647_v14  ;;  %v2264_v30 = vadd.f32 %v3451_v37, %v5631_v21  ;;  %v2067_v8 = vpop.f32.mrb[91].mxu0  ;;  %v4954_v22 = vpop.f32.mrb[123].mxu1 }
 0x215   : > { %v2977_v9 = vadd.f32 %v2913_v20, %v2844_v6  ;;  %v2585_v25 = vmax.f32 %v2521_v63, 0.0  ;;  %v2777_v45 = vadd.f32 %v4727_v32, %v2713_v26  ;;  %v2583_v51 = vmax.f32 %v2519_v36, 0.0  ;;  %v5632_v20 = vld [vmem:[#allocation6_spill] sm:$0xff] }
 0x216   : > { %v2842_v29 = vmul.f32 %v4540_v23, %v2582_v55  ;;  %v2911_v13 = vmul.f32 %v4542_v12, %v2774_v54  ;;  %v2775_v1 = vadd.f32 %v4727_v32, %v2711_v47  ;;  %v2456_v44 = vmul.f32 %v4701_v40, %v2264_v30  ;;  %v5633_v54 = vld [vmem:[#allocation9_spill] sm:$0xff] }
 0x217   : > { %3041 = vst.msk [vmem:[%s4759_s27 + $0x90] sm:$0xff] %vm1466_vm0, %v2977_v9  ;;  %v2845_v37 = vmul.f32 %v4540_v23, %v2585_v25  ;;  %v2914_v15 = vmul.f32 %v4542_v12, %v2777_v45  ;;  %v2843_v6 = vmul.f32 %v4540_v23, %v2583_v51  ;;  %v2652_v2 = vmax.f32 %v2264_v30, 0.0 }
 0x218   : > { %v2975_v49 = vadd.f32 %v2911_v13, %v2842_v29  ;;  %v2912_v14 = vmul.f32 %v4542_v12, %v2775_v1  ;;  %v2524_v61 = vadd.f32 %v4727_v32, %v2456_v44  ;;  %v2256_v63 = vadd.f32 %v4895_v57, %v5632_v20  ;;  %v5634_v29 = vld [vmem:[#allocation7_spill] sm:$0xff] }
 0x219   : > { %v2978_v26 = vadd.f32 %v2914_v15, %v2845_v37  ;;  %v2716_v36 = vmul.f32 %v4701_v40, %v2652_v2  ;;  %v4973_v55 = vadd.f32 %v4900_v42, %v4620_v33  ;;  %v2267_v47 = vadd.f32 %v4902_v59, %v5633_v54  ;;  %v4977_v21 = vpop.f32.mrb[92].mxu0  ;;  %v4979_v30 = vpop.f32.mrb[124].mxu1 }
 0x21a   : > { %3039 = vst.msk [vmem:[%s4759_s27 + $0x80] sm:$0xff] %vm1466_vm0, %v2975_v49  ;;  %v2976_v8 = vadd.f32 %v2912_v14, %v2843_v6  ;;  %v2588_v9 = vmax.f32 %v2524_v61, 0.0  ;;  %v2454_v57 = vmul.f32 %v4701_v40, %v2256_v63  ;;  %v2650_v25 = vmax.f32 %v2256_v63, 0.0  ;;  %v2072_v45 = vpop.f32.mrb[93].mxu0  ;;  %v4984_v51 = vpop.f32.mrb[125].mxu1 }
 0x21b   : > { %3042 = vst.msk [vmem:[%s4759_s27 + $0x98] sm:$0xff] %vm1466_vm0, %v2978_v26  ;;  %v2780_v33 = vadd.f32 %v4727_v32, %v2716_v36  ;;  %v2457_v42 = vmul.f32 %v4701_v40, %v2267_v47  ;;  %v2653_v59 = vmax.f32 %v2267_v47, 0.0  ;;  %v2259_v13 = vadd.f32 %v4907_v28, %v5634_v29  ;;  %v4992_v1 = vpop.f32.mrb[94].mxu0  ;;  %v4994_v44 = vpop.f32.mrb[126].mxu1  ;;  %v5635_v47 = vld [vmem:[#allocation12_spill] sm:$0xff] }
 0x21c   : > { %3040 = vst.msk [vmem:[%s4759_s27 + $0x88] sm:$0xff] %vm1466_vm0, %v2976_v8  ;;  %v2848_v37 = vmul.f32 %v4540_v23, %v2588_v9  ;;  %v2522_v15 = vadd.f32 %v4727_v32, %v2454_v57  ;;  %v2714_v6 = vmul.f32 %v4701_v40, %v2650_v25  ;;  %v5002_v2 = vadd.f32 %v2062_v53, %v4628_v41  ;;  %v2075_v49 = vpop.f32.mrb[95].mxu0  ;;  %v5004_v14 = vpop.f32.mrb[127].mxu1 }
 0x21d   : > { %v2917_v28 = vmul.f32 %v4542_v12, %v2780_v33  ;;  %v2525_v61 = vadd.f32 %v4727_v32, %v2457_v42  ;;  %v2717_v20 = vmul.f32 %v4701_v40, %v2653_v59  ;;  %v2455_v63 = vmul.f32 %v4701_v40, %v2259_v13 }
 0x21e   : > { %v2586_v26 = vmax.f32 %v2522_v15, 0.0  ;;  %v2778_v36 = vadd.f32 %v4727_v32, %v2714_v6  ;;  %v2651_v54 = vmax.f32 %v2259_v13, 0.0  ;;  %v2280_v41 = vadd.f32 %v4936_v46, %v5635_v47 }
 0x21f   : > { %v2981_v53 = vadd.f32 %v2917_v28, %v2848_v37  ;;  %v2589_v8 = vmax.f32 %v2525_v61, 0.0  ;;  %v2781_v9 = vadd.f32 %v4727_v32, %v2717_v20  ;;  %v2523_v57 = vadd.f32 %v4727_v32, %v2455_v63  ;;  %v5636_v61 = vld [vmem:[#allocation10_spill] sm:$0xff] }
 0x220   : > { %v2846_v25 = vmul.f32 %v4540_v23, %v2586_v26  ;;  %v2915_v45 = vmul.f32 %v4542_v12, %v2778_v36  ;;  %v2715_v33 = vmul.f32 %v4701_v40, %v2651_v54  ;;  %v2460_v42 = vmul.f32 %v4701_v40, %v2280_v41 }
 0x221   : > { %3045 = vst.msk [vmem:[%s4759_s27 + $0xb0] sm:$0xff] %vm1466_vm0, %v2981_v53  ;;  %v2849_v59 = vmul.f32 %v4540_v23, %v2589_v8  ;;  %v2918_v46 = vmul.f32 %v4542_v12, %v2781_v9  ;;  %v2587_v29 = vmax.f32 %v2523_v57, 0.0  ;;  %v2656_v13 = vmax.f32 %v2280_v41, 0.0  ;;  %v5023_v37 = vpop.f32.mrb[96].mxu0  ;;  %v5025_v15 = vpop.f32.mrb[128].mxu1 }
 0x222   : > { %v2979_v6 = vadd.f32 %v2915_v45, %v2846_v25  ;;  %v2779_v49 = vadd.f32 %v4727_v32, %v2715_v33  ;;  %v2528_v28 = vadd.f32 %v4727_v32, %v2460_v42  ;;  %v2272_v20 = vadd.f32 %v4941_v52, %v5636_v61  ;;  %v2080_v63 = vpop.f32.mrb[97].mxu0  ;;  %v5031_v26 = vpop.f32.mrb[129].mxu1 }
 0x223   : > { %v2982_v36 = vadd.f32 %v2918_v46, %v2849_v59  ;;  %v2847_v54 = vmul.f32 %v4540_v23, %v2587_v29  ;;  %v2720_v47 = vmul.f32 %v4701_v40, %v2656_v13  ;;  %v5037_v41 = vadd.f32 %v4947_v5, %v4636_v27  ;;  %v5039_v53 = vpop.f32.mrb[98].mxu0  ;;  %v5041_v8 = vpop.f32.mrb[130].mxu1  ;;  %v5637_v5 = vld [vmem:[#allocation14_spill] sm:$0xff]  ;;  %v5638_v59 = vld [vmem:[#allocation11_spill] sm:$0xff] }
 0x224   : > { %3043 = vst.msk [vmem:[%s4759_s27 + $0xa0] sm:$0xff] %vm1466_vm0, %v2979_v6  ;;  %v2916_v52 = vmul.f32 %v4542_v12, %v2779_v49  ;;  %v2592_v9 = vmax.f32 %v2528_v28, 0.0  ;;  %v2458_v57 = vmul.f32 %v4701_v40, %v2272_v20  ;;  %v2654_v25 = vmax.f32 %v2272_v20, 0.0  ;;  %v2083_v45 = vpop.f32.mrb[99].mxu0  ;;  %v5047_v33 = vpop.f32.mrb[131].mxu1 }
 0x225   : > { %3046 = vst.msk [vmem:[%s4759_s27 + $0xb8] sm:$0xff] %vm1466_vm0, %v2982_v36  ;;  %v2784_v27 = vadd.f32 %v4727_v32, %v2720_v47  ;;  %v2283_v42 = vadd.f32 %v4949_v34, %v5637_v5  ;;  %v2275_v46 = vadd.f32 %v4954_v22, %v5638_v59  ;;  %v5058_v29 = vadd.f32 %v4977_v21, %v4644_v50 }
 0x226   : > { %v2980_v13 = vadd.f32 %v2916_v52, %v2847_v54  ;;  %v2852_v6 = vmul.f32 %v4540_v23, %v2592_v9  ;;  %v2526_v49 = vadd.f32 %v4727_v32, %v2458_v57  ;;  %v2718_v28 = vmul.f32 %v4701_v40, %v2654_v25 }
 0x227   : > { %v2921_v61 = vmul.f32 %v4542_v12, %v2784_v27  ;;  %v2461_v20 = vmul.f32 %v4701_v40, %v2283_v42  ;;  %v2657_v63 = vmax.f32 %v2283_v42, 0.0  ;;  %v2459_v34 = vmul.f32 %v4701_v40, %v2275_v46 }
 0x228   : > { %3044 = vst.msk [vmem:[%s4759_s27 + $0xa8] sm:$0xff] %vm1466_vm0, %v2980_v13  ;;  %v2590_v22 = vmax.f32 %v2526_v49, 0.0  ;;  %v2782_v50 = vadd.f32 %v4727_v32, %v2718_v28  ;;  %v2655_v21 = vmax.f32 %v2275_v46, 0.0  ;;  %v2296_v36 = vadd.f32 %v4979_v30, %v4586_v60 }
 0x229   : > { %v2985_v54 = vadd.f32 %v2921_v61, %v2852_v6  ;;  %v2529_v47 = vadd.f32 %v4727_v32, %v2461_v20  ;;  %v2721_v52 = vmul.f32 %v4701_v40, %v2657_v63  ;;  %v2527_v9 = vadd.f32 %v4727_v32, %v2459_v34  ;;  %v5074_v57 = vpop.f32.mrb[100].mxu0  ;;  %v5076_v25 = vpop.f32.mrb[132].mxu1 }
 0x22a   : > { %v2850_v45 = vmul.f32 %v4540_v23, %v2590_v22  ;;  %v2919_v27 = vmul.f32 %v4542_v12, %v2782_v50  ;;  %v2719_v5 = vmul.f32 %v4701_v40, %v2655_v21  ;;  %v2464_v42 = vmul.f32 %v4701_v40, %v2296_v36  ;;  %v2088_v60 = vpop.f32.mrb[101].mxu0  ;;  %v5082_v30 = vpop.f32.mrb[133].mxu1 }
 0x22b   : > { %3049 = vst.msk [vmem:[%s4759_s27 + $0xd0] sm:$0xff] %vm1466_vm0, %v2985_v54  ;;  %v2593_v59 = vmax.f32 %v2529_v47, 0.0  ;;  %v2785_v46 = vadd.f32 %v4727_v32, %v2721_v52  ;;  %v2591_v13 = vmax.f32 %v2527_v9, 0.0  ;;  %v2660_v6 = vmax.f32 %v2296_v36, 0.0  ;;  %v5087_v49 = vpop.f32.mrb[102].mxu0  ;;  %v5089_v28 = vpop.f32.mrb[134].mxu1 }
 0x22c   : > { %v2983_v61 = vadd.f32 %v2919_v27, %v2850_v45  ;;  %v2783_v20 = vadd.f32 %v4727_v32, %v2719_v5  ;;  %v2532_v63 = vadd.f32 %v4727_v32, %v2464_v42  ;;  %v2288_v34 = vadd.f32 %v4984_v51, %v4516_v35  ;;  %v2091_v22 = vpop.f32.mrb[103].mxu0  ;;  %v5095_v50 = vpop.f32.mrb[135].mxu1 }
 0x22d   : > { %v2853_v21 = vmul.f32 %v4540_v23, %v2593_v59  ;;  %v2922_v54 = vmul.f32 %v4542_v12, %v2785_v46  ;;  %v2851_v36 = vmul.f32 %v4540_v23, %v2591_v13  ;;  %v2724_v47 = vmul.f32 %v4701_v40, %v2660_v6 }
 0x22e   : > { %3047 = vst.msk [vmem:[%s4759_s27 + $0xc0] sm:$0xff] %vm1466_vm0, %v2983_v61  ;;  %v2920_v52 = vmul.f32 %v4542_v12, %v2783_v20  ;;  %v2596_v9 = vmax.f32 %v2532_v63, 0.0  ;;  %v2462_v45 = vmul.f32 %v4701_v40, %v2288_v34  ;;  %v2658_v35 = vmax.f32 %v2288_v34, 0.0 }
 0x22f   : > { %v2986_v51 = vadd.f32 %v2922_v54, %v2853_v21  ;;  %v2788_v27 = vadd.f32 %v4727_v32, %v2724_v47  ;;  %v5108_v5 = vadd.f32 %v4992_v1, %v4652_v58  ;;  %v2299_v42 = vadd.f32 %v4994_v44, %v4616_v24 }
 0x230   : > { %v2984_v60 = vadd.f32 %v2920_v52, %v2851_v36  ;;  %v2856_v59 = vmul.f32 %v4540_v23, %v2596_v9  ;;  %v2530_v46 = vadd.f32 %v4727_v32, %v2462_v45  ;;  %v2722_v13 = vmul.f32 %v4701_v40, %v2658_v35 }
 0x231   : > { %3050 = vst.msk [vmem:[%s4759_s27 + $0xd8] sm:$0xff] %vm1466_vm0, %v2986_v51  ;;  %v2925_v6 = vmul.f32 %v4542_v12, %v2788_v27  ;;  %v2465_v61 = vmul.f32 %v4701_v40, %v2299_v42  ;;  %v2661_v20 = vmax.f32 %v2299_v42, 0.0  ;;  %v2291_v58 = vadd.f32 %v5004_v14, %v4520_v4  ;;  %v5121_v1 = vpop.f32.mrb[104].mxu0  ;;  %v5123_v24 = vpop.f32.mrb[136].mxu1 }
 0x232   : > { %3048 = vst.msk [vmem:[%s4759_s27 + $0xc8] sm:$0xff] %vm1466_vm0, %v2984_v60  ;;  %v2594_v44 = vmax.f32 %v2530_v46, 0.0  ;;  %v2786_v63 = vadd.f32 %v4727_v32, %v2722_v13  ;;  %v5130_v34 = vadd.f32 %v5023_v37, %v4660_v3  ;;  %v2312_v22 = vadd.f32 %v5025_v15, %v4767_v56  ;;  %v2096_v21 = vpop.f32.mrb[105].mxu0  ;;  %v5134_v54 = vpop.f32.mrb[137].mxu1 }
 0x233   : > { %v2989_v4 = vadd.f32 %v2925_v6, %v2856_v59  ;;  %v2533_v14 = vadd.f32 %v4727_v32, %v2465_v61  ;;  %v2725_v36 = vmul.f32 %v4701_v40, %v2661_v20  ;;  %v2463_v47 = vmul.f32 %v4701_v40, %v2291_v58  ;;  %v5139_v52 = vpop.f32.mrb[106].mxu0  ;;  %v5141_v9 = vpop.f32.mrb[138].mxu1 }
 0x234   : > { %v2854_v3 = vmul.f32 %v4540_v23, %v2594_v44  ;;  %v2923_v37 = vmul.f32 %v4542_v12, %v2786_v63  ;;  %v2659_v45 = vmax.f32 %v2291_v58, 0.0  ;;  %v2468_v56 = vmul.f32 %v4701_v40, %v2312_v22  ;;  %v2099_v15 = vpop.f32.mrb[107].mxu0  ;;  %v5146_v35 = vpop.f32.mrb[139].mxu1 }
 0x235   : > { %3053 = vst.msk [vmem:[%s4759_s27 + $0xf0] sm:$0xff] %vm1466_vm0, %v2989_v4  ;;  %v2597_v51 = vmax.f32 %v2533_v14, 0.0  ;;  %v2789_v27 = vadd.f32 %v4727_v32, %v2725_v36  ;;  %v2531_v42 = vadd.f32 %v4727_v32, %v2463_v47  ;;  %v2664_v60 = vmax.f32 %v2312_v22, 0.0 }
 0x236   : > { %v2987_v59 = vadd.f32 %v2923_v37, %v2854_v3  ;;  %v2723_v46 = vmul.f32 %v4701_v40, %v2659_v45  ;;  %v2536_v13 = vadd.f32 %v4727_v32, %v2468_v56  ;;  %v2304_v6 = vadd.f32 %v5031_v26, %v4711_v0 }
 0x237   : > { %v2857_v61 = vmul.f32 %v4540_v23, %v2597_v51  ;;  %v2926_v20 = vmul.f32 %v4542_v12, %v2789_v27  ;;  %v2595_v58 = vmax.f32 %v2531_v42, 0.0  ;;  %v2728_v44 = vmul.f32 %v4701_v40, %v2664_v60 }
 0x238   : > { %3051 = vst.msk [vmem:[%s4759_s27 + $0xe0] sm:$0xff] %vm1466_vm0, %v2987_v59  ;;  %v2787_v63 = vadd.f32 %v4727_v32, %v2723_v46  ;;  %v2600_v22 = vmax.f32 %v2536_v13, 0.0  ;;  %v2466_v21 = vmul.f32 %v4701_v40, %v2304_v6  ;;  %v2662_v4 = vmax.f32 %v2304_v6, 0.0 }
 0x239   : > { %v2990_v14 = vadd.f32 %v2926_v20, %v2857_v61  ;;  %v2855_v36 = vmul.f32 %v4540_v23, %v2595_v58  ;;  %v2792_v0 = vadd.f32 %v4727_v32, %v2728_v44  ;;  %v5167_v26 = vadd.f32 %v5039_v53, %v4664_v10  ;;  %v5169_v47 = vpop.f32.mrb[108].mxu0  ;;  %v5171_v3 = vpop.f32.mrb[140].mxu1 }
 0x23a   : > { %v2924_v37 = vmul.f32 %v4542_v12, %v2787_v63  ;;  %v2860_v45 = vmul.f32 %v4540_v23, %v2600_v22  ;;  %v2534_v56 = vadd.f32 %v4727_v32, %v2466_v21  ;;  %v2726_v15 = vmul.f32 %v4701_v40, %v2662_v4  ;;  %v2104_v51 = vpop.f32.mrb[109].mxu0  ;;  %v5177_v27 = vpop.f32.mrb[141].mxu1 }
 0x23b   : > { %3054 = vst.msk [vmem:[%s4759_s27 + $0xf8] sm:$0xff] %vm1466_vm0, %v2990_v14  ;;  %v2929_v10 = vmul.f32 %v4542_v12, %v2792_v0  ;;  %v2315_v53 = vadd.f32 %v5041_v8, %v4776_v7  ;;  %v2307_v42 = vadd.f32 %v5047_v33, %v4732_v31  ;;  %v5188_v60 = vadd.f32 %v5074_v57, %v4668_v11  ;;  %v5190_v59 = vpop.f32.mrb[110].mxu0  ;;  %v5192_v46 = vpop.f32.mrb[142].mxu1  ;;  %v5219_v51 = vld [vmem:[%s5598_s2 + $0x1] ss:$0 sm:$0xff] }
 0x23c   : > { %v2988_v13 = vadd.f32 %v2924_v37, %v2855_v36  ;;  %v2598_v6 = vmax.f32 %v2534_v56, 0.0  ;;  %v2790_v61 = vadd.f32 %v4727_v32, %v2726_v15  ;;  %v2328_v20 = vadd.f32 %v5076_v25, %v4853_v38  ;;  %v2107_v7 = vpop.f32.mrb[111].mxu0  ;;  %v5197_v8 = vpop.f32.mrb[143].mxu1 }
 0x23d   : > { %v2993_v31 = vadd.f32 %v2929_v10, %v2860_v45  ;;  %v2469_v33 = vmul.f32 %v4701_v40, %v2315_v53  ;;  %v2665_v11 = vmax.f32 %v2315_v53, 0.0  ;;  %v2467_v57 = vmul.f32 %v4701_v40, %v2307_v42 }
 0x23e   : > { %3052 = vst.msk [vmem:[%s4759_s27 + $0xe8] sm:$0xff] %vm1466_vm0, %v2988_v13  ;;  %v2858_v58 = vmul.f32 %v4540_v23, %v2598_v6  ;;  %v2927_v44 = vmul.f32 %v4542_v12, %v2790_v61  ;;  %v2663_v63 = vmax.f32 %v2307_v42, 0.0  ;;  %v2472_v22 = vmul.f32 %v4701_v40, %v2328_v20 }
 0x23f   : > { %3057 = vst.msk [vmem:[%s4759_s27 + $0x110] sm:$0xff] %vm1466_vm0, %v2993_v31  ;;  %v2537_v38 = vadd.f32 %v4727_v32, %v2469_v33  ;;  %v2729_v25 = vmul.f32 %v4701_v40, %v2665_v11  ;;  %v2535_v21 = vadd.f32 %v4727_v32, %v2467_v57  ;;  %v2668_v4 = vmax.f32 %v2328_v20, 0.0  ;;  %v5238_v33 = vld [vmem:[%s5598_s2 + $0x2] ss:$0 sm:$0xff] }
 0x240   : > { %v2991_v14 = vadd.f32 %v2927_v44, %v2858_v58  ;;  %v2727_v36 = vmul.f32 %v4701_v40, %v2663_v63  ;;  %v2540_v0 = vadd.f32 %v4727_v32, %v2472_v22  ;;  %v2320_v37 = vadd.f32 %v5082_v30, %v4811_v16 }
 0x241   : > { %v2601_v45 = vmax.f32 %v2537_v38, 0.0  ;;  %v2793_v56 = vadd.f32 %v4727_v32, %v2729_v25  ;;  %v2599_v15 = vmax.f32 %v2535_v21, 0.0  ;;  %v2732_v10 = vmul.f32 %v5219_v51, %v2668_v4  ;;  %v5222_v53 = vpop.f32.mrb[112].mxu0  ;;  %v5224_v42 = vpop.f32.mrb[144].mxu1 }
 0x242   : > { %3055 = vst.msk [vmem:[%s4759_s27 + $0x100] sm:$0xff] %vm1466_vm0, %v2991_v14  ;;  %v2791_v40 = vadd.f32 %v4727_v32, %v2727_v36  ;;  %v2604_v16 = vmax.f32 %v2540_v0, 0.0  ;;  %v2470_v30 = vmul.f32 %v5219_v51, %v2320_v37  ;;  %v2666_v13 = vmax.f32 %v2320_v37, 0.0  ;;  %v2112_v6 = vpop.f32.mrb[113].mxu0  ;;  %v5230_v61 = vpop.f32.mrb[145].mxu1 }
 0x243   : > { %v2861_v20 = vmul.f32 %v4540_v23, %v2601_v45  ;;  %v2930_v7 = vmul.f32 %v4542_v12, %v2793_v56  ;;  %v2859_v31 = vmul.f32 %v4540_v23, %v2599_v15  ;;  %v2796_v32 = vadd.f32 %v5238_v33, %v2732_v10  ;;  %v5241_v11 = vpop.f32.mrb[114].mxu0  ;;  %v5243_v57 = vpop.f32.mrb[146].mxu1 }
 0x244   : > { %v2928_v58 = vmul.f32 %v4542_v12, %v2791_v40  ;;  %v2864_v44 = vmul.f32 %v4540_v23, %v2604_v16  ;;  %v2538_v63 = vadd.f32 %v5238_v33, %v2470_v30  ;;  %v2730_v22 = vmul.f32 %v5219_v51, %v2666_v13  ;;  %v2115_v38 = vpop.f32.mrb[115].mxu0  ;;  %v5249_v25 = vpop.f32.mrb[147].mxu1 }
 0x245   : > { %v2994_v21 = vadd.f32 %v2930_v7, %v2861_v20  ;;  %v2933_v4 = vmul.f32 %v4542_v12, %v2796_v32  ;;  %v5254_v14 = vadd.f32 %v5087_v49, %v4672_v17  ;;  %v2331_v36 = vadd.f32 %v5089_v28, %v4860_v39 }
 0x246   : > { %v2992_v0 = vadd.f32 %v2928_v58, %v2859_v31  ;;  %v2602_v37 = vmax.f32 %v2538_v63, 0.0  ;;  %v2794_v45 = vadd.f32 %v5238_v33, %v2730_v22  ;;  %v2323_v56 = vadd.f32 %v5095_v50, %v4818_v62  ;;  %v5639_v31 = vld [vmem:[#allocation16_spill] sm:$0xff] }
 0x247   : > { %3058 = vst.msk [vmem:[%s4759_s27 + $0x118] sm:$0xff] %vm1466_vm0, %v2994_v21  ;;  %v2997_v15 = vadd.f32 %v2933_v4, %v2864_v44  ;;  %v2473_v10 = vmul.f32 %v5219_v51, %v2331_v36  ;;  %v2669_v40 = vmax.f32 %v2331_v36, 0.0  ;;  %v5266_v17 = vadd.f32 %v5121_v1, %v4676_v18 }
 0x248   : > { %3056 = vst.msk [vmem:[%s4759_s27 + $0x108] sm:$0xff] %vm1466_vm0, %v2992_v0  ;;  %v2862_v39 = vmul.f32 %v4540_v23, %v2602_v37  ;;  %v2931_v49 = vmul.f32 %v4542_v12, %v2794_v45  ;;  %v2471_v28 = vmul.f32 %v5219_v51, %v2323_v56  ;;  %v2667_v16 = vmax.f32 %v2323_v56, 0.0 }
 0x249   : > { %3061 = vst.msk [vmem:[%s4759_s27 + $0x130] sm:$0xff] %vm1466_vm0, %v2997_v15  ;;  %v2541_v62 = vadd.f32 %v5238_v33, %v2473_v10  ;;  %v2733_v50 = vmul.f32 %v5219_v51, %v2669_v40  ;;  %v2344_v30 = vadd.f32 %v5123_v24, %v4929_v48  ;;  %v2336_v18 = vadd.f32 %v5134_v54, %v4877_v43  ;;  %v5281_v1 = vpop.f32.mrb[116].mxu0  ;;  %v5283_v13 = vpop.f32.mrb[148].mxu1 }
 0x24a   : > { %v2995_v6 = vadd.f32 %v2931_v49, %v2862_v39  ;;  %v2539_v20 = vadd.f32 %v5238_v33, %v2471_v28  ;;  %v2731_v7 = vmul.f32 %v5219_v51, %v2667_v16  ;;  %v5289_v32 = vadd.f32 %v5139_v52, %v5639_v31  ;;  %v2120_v58 = vpop.f32.mrb[117].mxu0  ;;  %v5291_v44 = vpop.f32.mrb[149].mxu1 }
 0x24b   : > { %v2605_v48 = vmax.f32 %v2541_v62, 0.0  ;;  %v2797_v24 = vadd.f32 %v5238_v33, %v2733_v50  ;;  %v2476_v43 = vmul.f32 %v5219_v51, %v2344_v30  ;;  %v2672_v54 = vmax.f32 %v2344_v30, 0.0  ;;  %v5295_v63 = vpop.f32.mrb[118].mxu0  ;;  %v5297_v22 = vpop.f32.mrb[150].mxu1 }
 0x24c   : > { %3059 = vst.msk [vmem:[%s4759_s27 + $0x120] sm:$0xff] %vm1466_vm0, %v2995_v6  ;;  %v2603_v38 = vmax.f32 %v2539_v20, 0.0  ;;  %v2795_v21 = vadd.f32 %v5238_v33, %v2731_v7  ;;  %v2474_v52 = vmul.f32 %v5219_v51, %v2336_v18  ;;  %v2670_v4 = vmax.f32 %v2336_v18, 0.0  ;;  %v2123_v36 = vpop.f32.mrb[119].mxu0  ;;  %v5303_v0 = vpop.f32.mrb[151].mxu1 }
 0x24d   : > { %v2865_v37 = vmul.f32 %v4540_v23, %v2605_v48  ;;  %v2934_v45 = vmul.f32 %v4542_v12, %v2797_v24  ;;  %v2544_v56 = vadd.f32 %v5238_v33, %v2476_v43  ;;  %v2736_v15 = vmul.f32 %v5219_v51, %v2672_v54  ;;  %v5640_v36 = vld [vmem:[#allocation17_spill] sm:$0xff] }
 0x24e   : > { %v2863_v10 = vmul.f32 %v4540_v23, %v2603_v38  ;;  %v2932_v40 = vmul.f32 %v4542_v12, %v2795_v21  ;;  %v2542_v39 = vadd.f32 %v5238_v33, %v2474_v52  ;;  %v2734_v49 = vmul.f32 %v5219_v51, %v2670_v4 }
 0x24f   : > { %v2998_v28 = vadd.f32 %v2934_v45, %v2865_v37  ;;  %v2608_v16 = vmax.f32 %v2544_v56, 0.0  ;;  %v2800_v62 = vadd.f32 %v5238_v33, %v2736_v15  ;;  %v2347_v50 = vadd.f32 %v5141_v9, %v4973_v55 }
 0x250   : > { %v2996_v30 = vadd.f32 %v2932_v40, %v2863_v10  ;;  %v2606_v18 = vmax.f32 %v2542_v39, 0.0  ;;  %v2798_v6 = vadd.f32 %v5238_v33, %v2734_v49  ;;  %v2339_v20 = vadd.f32 %v5146_v35, %v4917_v19 }
 0x251   : > { %3062 = vst.msk [vmem:[%s4759_s27 + $0x138] sm:$0xff] %vm1466_vm0, %v2998_v28  ;;  %v2868_v7 = vmul.f32 %v4540_v23, %v2608_v16  ;;  %v2937_v31 = vmul.f32 %v4542_v12, %v2800_v62  ;;  %v2477_v58 = vmul.f32 %v5219_v51, %v2347_v50  ;;  %v2673_v48 = vmax.f32 %v2347_v50, 0.0  ;;  %v5324_v24 = vpop.f32.mrb[120].mxu0  ;;  %v5326_v43 = vpop.f32.mrb[152].mxu1  ;;  %v5641_v50 = vld [vmem:[#allocation18_spill] sm:$0xff] }
 0x252   : > { %3060 = vst.msk [vmem:[%s4759_s27 + $0x128] sm:$0xff] %vm1466_vm0, %v2996_v30  ;;  %v2866_v55 = vmul.f32 %v4540_v23, %v2606_v18  ;;  %v2935_v9 = vmul.f32 %v4542_v12, %v2798_v6  ;;  %v2475_v19 = vmul.f32 %v5219_v51, %v2339_v20  ;;  %v2671_v35 = vmax.f32 %v2339_v20, 0.0  ;;  %v2128_v54 = vpop.f32.mrb[121].mxu0  ;;  %v5333_v38 = vpop.f32.mrb[153].mxu1 }
 0x253   : > { %v3001_v21 = vadd.f32 %v2937_v31, %v2868_v7  ;;  %v2545_v52 = vadd.f32 %v5238_v33, %v2477_v58  ;;  %v2737_v4 = vmul.f32 %v5219_v51, %v2673_v48  ;;  %v5339_v37 = vadd.f32 %v5169_v47, %v5640_v36  ;;  %v5341_v45 = vpop.f32.mrb[122].mxu0  ;;  %v5343_v56 = vpop.f32.mrb[154].mxu1 }
 0x254   : > { %v2999_v15 = vadd.f32 %v2935_v9, %v2866_v55  ;;  %v2543_v10 = vadd.f32 %v5238_v33, %v2475_v19  ;;  %v2735_v40 = vmul.f32 %v5219_v51, %v2671_v35  ;;  %v2360_v39 = vadd.f32 %v5171_v3, %v5058_v29  ;;  %v2131_v49 = vpop.f32.mrb[123].mxu0  ;;  %v5349_v28 = vpop.f32.mrb[155].mxu1 }
 0x255   : > { %3065 = vst.msk [vmem:[%s4759_s27 + $0x150] sm:$0xff] %vm1466_vm0, %v3001_v21  ;;  %v2609_v16 = vmax.f32 %v2545_v52, 0.0  ;;  %v2801_v47 = vadd.f32 %v5238_v33, %v2737_v4  ;;  %v2352_v62 = vadd.f32 %v5177_v27, %v5002_v2  ;;  %v5358_v30 = vadd.f32 %v5190_v59, %v5641_v50 }
 0x256   : > { %3063 = vst.msk [vmem:[%s4759_s27 + $0x140] sm:$0xff] %vm1466_vm0, %v2999_v15  ;;  %v2607_v18 = vmax.f32 %v2543_v10, 0.0  ;;  %v2799_v29 = vadd.f32 %v5238_v33, %v2735_v40  ;;  %v2480_v3 = vmul.f32 %v5219_v51, %v2360_v39  ;;  %v2676_v6 = vmax.f32 %v2360_v39, 0.0 }
 0x257   : > { %v2869_v20 = vmul.f32 %v4540_v23, %v2609_v16  ;;  %v2938_v7 = vmul.f32 %v4542_v12, %v2801_v47  ;;  %v2478_v31 = vmul.f32 %v5219_v51, %v2352_v62  ;;  %v2674_v58 = vmax.f32 %v2352_v62, 0.0 }
 0x258   : > { %v2867_v2 = vmul.f32 %v4540_v23, %v2607_v18  ;;  %v2936_v27 = vmul.f32 %v4542_v12, %v2799_v29  ;;  %v2548_v59 = vadd.f32 %v5238_v33, %v2480_v3  ;;  %v2740_v48 = vmul.f32 %v5219_v51, %v2676_v6 }
 0x259   : > { %v3002_v55 = vadd.f32 %v2938_v7, %v2869_v20  ;;  %v2546_v9 = vadd.f32 %v5238_v33, %v2478_v31  ;;  %v2738_v19 = vmul.f32 %v5219_v51, %v2674_v58  ;;  %v2363_v35 = vadd.f32 %v5192_v46, %v5108_v5  ;;  %v5375_v54 = vpop.f32.mrb[124].mxu0  ;;  %v5377_v21 = vpop.f32.mrb[156].mxu1 }
 0x25a   : > { %v3000_v52 = vadd.f32 %v2936_v27, %v2867_v2  ;;  %v2612_v4 = vmax.f32 %v2548_v59, 0.0  ;;  %v2804_v36 = vadd.f32 %v5238_v33, %v2740_v48  ;;  %v2355_v15 = vadd.f32 %v5197_v8, %v5037_v41  ;;  %v2136_v10 = vpop.f32.mrb[125].mxu0  ;;  %v5382_v40 = vpop.f32.mrb[157].mxu1  ;;  %v5642_v27 = vld [vmem:[#allocation19_spill] sm:$0xff] }
 0x25b   : > { %3066 = vst.msk [vmem:[%s4759_s27 + $0x158] sm:$0xff] %vm1466_vm0, %v3002_v55  ;;  %v2610_v39 = vmax.f32 %v2546_v9, 0.0  ;;  %v2802_v5 = vadd.f32 %v5238_v33, %v2738_v19  ;;  %v2481_v46 = vmul.f32 %v5219_v51, %v2363_v35  ;;  %v2677_v49 = vmax.f32 %v2363_v35, 0.0  ;;  %v5388_v16 = vpop.f32.mrb[126].mxu0  ;;  %v5390_v47 = vpop.f32.mrb[158].mxu1 }
 0x25c   : > { %3064 = vst.msk [vmem:[%s4759_s27 + $0x148] sm:$0xff] %vm1466_vm0, %v3000_v52  ;;  %v2872_v62 = vmul.f32 %v4540_v23, %v2612_v4  ;;  %v2941_v41 = vmul.f32 %v4542_v12, %v2804_v36  ;;  %v2479_v8 = vmul.f32 %v5219_v51, %v2355_v15  ;;  %v2675_v50 = vmax.f32 %v2355_v15, 0.0  ;;  %v2139_v18 = vpop.f32.mrb[127].mxu0  ;;  %v5397_v29 = vpop.f32.mrb[159].mxu1  ;;  %v5643_v36 = vld [vmem:[#allocation20_spill] sm:$0xff] }
 0x25d   : > { %v2870_v3 = vmul.f32 %v4540_v23, %v2610_v39  ;;  %v2939_v6 = vmul.f32 %v4542_v12, %v2802_v5  ;;  %v2549_v20 = vadd.f32 %v5238_v33, %v2481_v46  ;;  %v2741_v7 = vmul.f32 %v5219_v51, %v2677_v49 }
 0x25e   : > { %v3005_v31 = vadd.f32 %v2941_v41, %v2872_v62  ;;  %v2547_v58 = vadd.f32 %v5238_v33, %v2479_v8  ;;  %v2739_v2 = vmul.f32 %v5219_v51, %v2675_v50  ;;  %v5407_v59 = vadd.f32 %v5222_v53, %v5642_v27 }
 0x25f   : > { %v3003_v48 = vadd.f32 %v2939_v6, %v2870_v3  ;;  %v2613_v55 = vmax.f32 %v2549_v20, 0.0  ;;  %v2805_v9 = vadd.f32 %v5238_v33, %v2741_v7  ;;  %v2376_v19 = vadd.f32 %v5224_v42, %v5188_v60 }
 0x260   : > { %3069 = vst.msk [vmem:[%s4759_s27 + $0x170] sm:$0xff] %vm1466_vm0, %v3005_v31  ;;  %v2611_v35 = vmax.f32 %v2547_v58, 0.0  ;;  %v2803_v52 = vadd.f32 %v5238_v33, %v2739_v2  ;;  %v2368_v4 = vadd.f32 %v5230_v61, %v5130_v34  ;;  %v5419_v15 = vadd.f32 %v5241_v11, %v5643_v36  ;;  %v5644_v36 = vld [vmem:[#allocation21_spill] sm:$0xff] }
 0x261   : > { %3067 = vst.msk [vmem:[%s4759_s27 + $0x160] sm:$0xff] %vm1466_vm0, %v3003_v48  ;;  %v2873_v53 = vmul.f32 %v4540_v23, %v2613_v55  ;;  %v2942_v10 = vmul.f32 %v4542_v12, %v2805_v9  ;;  %v2484_v60 = vmul.f32 %v5219_v51, %v2376_v19  ;;  %v2680_v42 = vmax.f32 %v2376_v19, 0.0 }
 0x262   : > { %v2871_v39 = vmul.f32 %v4540_v23, %v2611_v35  ;;  %v2940_v5 = vmul.f32 %v4542_v12, %v2803_v52  ;;  %v2482_v34 = vmul.f32 %v5219_v51, %v2368_v4  ;;  %v2678_v61 = vmax.f32 %v2368_v4, 0.0 }
 0x263   : > { %v3006_v11 = vadd.f32 %v2942_v10, %v2873_v53  ;;  %v2552_v46 = vadd.f32 %v5238_v33, %v2484_v60  ;;  %v2744_v49 = vmul.f32 %v5219_v51, %v2680_v42  ;;  %v2379_v62 = vadd.f32 %v5243_v57, %v5254_v14 }
 0x264   : > { %v3004_v41 = vadd.f32 %v2940_v5, %v2871_v39  ;;  %v2550_v8 = vadd.f32 %v5238_v33, %v2482_v34  ;;  %v2742_v50 = vmul.f32 %v5219_v51, %v2678_v61  ;;  %v2371_v18 = vadd.f32 %v5249_v25, %v5167_v26 }
 0x265   : > { %3070 = vst.msk [vmem:[%s4759_s27 + $0x178] sm:$0xff] %vm1466_vm0, %v3006_v11  ;;  %v2616_v3 = vmax.f32 %v2552_v46, 0.0  ;;  %v2808_v6 = vadd.f32 %v5238_v33, %v2744_v49  ;;  %v2485_v20 = vmul.f32 %v5219_v51, %v2379_v62  ;;  %v2681_v7 = vmax.f32 %v2379_v62, 0.0  ;;  %v5645_v11 = vld [vmem:[#allocation13_spill] sm:$0xff] }
 0x266   : > { %3068 = vst.msk [vmem:[%s4759_s27 + $0x168] sm:$0xff] %vm1466_vm0, %v3004_v41  ;;  %v2614_v31 = vmax.f32 %v2550_v8, 0.0  ;;  %v2806_v57 = vadd.f32 %v5238_v33, %v2742_v50  ;;  %v2483_v14 = vmul.f32 %v5219_v51, %v2371_v18  ;;  %v2679_v58 = vmax.f32 %v2371_v18, 0.0 }
 0x267   : > { %v2876_v2 = vmul.f32 %v4540_v23, %v2616_v3  ;;  %v2945_v26 = vmul.f32 %v4542_v12, %v2808_v6  ;;  %v2553_v25 = vadd.f32 %v5238_v33, %v2485_v20  ;;  %v2745_v27 = vmul.f32 %v5219_v51, %v2681_v7 }
 0x268   : > { %v2874_v48 = vmul.f32 %v4540_v23, %v2614_v31  ;;  %v2943_v55 = vmul.f32 %v4542_v12, %v2806_v57  ;;  %v2551_v9 = vadd.f32 %v5238_v33, %v2483_v14  ;;  %v2743_v19 = vmul.f32 %v5219_v51, %v2679_v58 }
 0x269   : > { %v3009_v35 = vadd.f32 %v2945_v26, %v2876_v2  ;;  %v2617_v52 = vmax.f32 %v2553_v25, 0.0  ;;  %v2809_v4 = vadd.f32 %v5238_v33, %v2745_v27  ;;  %v2119_v53 = vadd.f32 %v5281_v1, %v5644_v36  ;;  %v5646_v36 = vld [vmem:[#allocation15_spill] sm:$0xff] }
 0x26a   : > { %v3007_v10 = vadd.f32 %v2943_v55, %v2874_v48  ;;  %v2615_v60 = vmax.f32 %v2551_v9, 0.0  ;;  %v2807_v42 = vadd.f32 %v5238_v33, %v2743_v19  ;;  %v2392_v39 = vadd.f32 %v5283_v13, %v5339_v37 }
 0x26b   : > { %3073 = vst.msk [vmem:[%s4759_s27 + $0x190] sm:$0xff] %vm1466_vm0, %v3009_v35  ;;  %v2877_v5 = vmul.f32 %v4540_v23, %v2617_v52  ;;  %v2946_v34 = vmul.f32 %v4542_v12, %v2809_v4  ;;  %v2384_v61 = vadd.f32 %v5291_v44, %v5266_v17  ;;  %v2122_v1 = vadd.f32 %v5295_v63, %v5645_v11 }
 0x26c   : > { %3071 = vst.msk [vmem:[%s4759_s27 + $0x180] sm:$0xff] %vm1466_vm0, %v3007_v10  ;;  %v2875_v46 = vmul.f32 %v4540_v23, %v2615_v60  ;;  %v2944_v49 = vmul.f32 %v4542_v12, %v2807_v42  ;;  %v2488_v13 = vmul.f32 %v5219_v51, %v2392_v39  ;;  %v2684_v37 = vmax.f32 %v2392_v39, 0.0 }
 0x26d   : > { %v3010_v62 = vadd.f32 %v2946_v34, %v2877_v5  ;;  %v2486_v41 = vmul.f32 %v5219_v51, %v2384_v61  ;;  %v2682_v8 = vmax.f32 %v2384_v61, 0.0  ;;  %v2395_v17 = vadd.f32 %v5297_v22, %v5358_v30 }
 0x26e   : > { %v3008_v44 = vadd.f32 %v2944_v49, %v2875_v46  ;;  %v2556_v63 = vadd.f32 %v5238_v33, %v2488_v13  ;;  %v2748_v50 = vmul.f32 %v5219_v51, %v2684_v37  ;;  %v2387_v18 = vadd.f32 %v5303_v0, %v5289_v32  ;;  %v5647_v46 = vld [vmem:[#allocation22_spill] sm:$0xff] }
 0x26f   : > { %3074 = vst.msk [vmem:[%s4759_s27 + $0x198] sm:$0xff] %vm1466_vm0, %v3010_v62  ;;  %v2554_v3 = vadd.f32 %v5238_v33, %v2486_v41  ;;  %v2746_v6 = vmul.f32 %v5219_v51, %v2682_v8  ;;  %v2489_v20 = vmul.f32 %v5219_v51, %v2395_v17  ;;  %v2685_v7 = vmax.f32 %v2395_v17, 0.0 }
 0x270   : > { %3072 = vst.msk [vmem:[%s4759_s27 + $0x188] sm:$0xff] %vm1466_vm0, %v3008_v44  ;;  %v2620_v22 = vmax.f32 %v2556_v63, 0.0  ;;  %v2812_v30 = vadd.f32 %v5238_v33, %v2748_v50  ;;  %v2487_v31 = vmul.f32 %v5219_v51, %v2387_v18  ;;  %v2683_v57 = vmax.f32 %v2387_v18, 0.0 }
 0x271   : > { %v2618_v14 = vmax.f32 %v2554_v3, 0.0  ;;  %v2810_v32 = vadd.f32 %v5238_v33, %v2746_v6  ;;  %v2557_v0 = vadd.f32 %v5238_v33, %v2489_v20  ;;  %v2749_v58 = vmul.f32 %v5219_v51, %v2685_v7 }
 0x272   : > { %v2880_v2 = vmul.f32 %v4540_v23, %v2620_v22  ;;  %v2949_v26 = vmul.f32 %v4542_v12, %v2812_v30  ;;  %v2555_v25 = vadd.f32 %v5238_v33, %v2487_v31  ;;  %v2747_v27 = vmul.f32 %v5219_v51, %v2683_v57 }
 0x273   : > { %v2878_v48 = vmul.f32 %v4540_v23, %v2618_v14  ;;  %v2947_v55 = vmul.f32 %v4542_v12, %v2810_v32  ;;  %v2621_v9 = vmax.f32 %v2557_v0, 0.0  ;;  %v2813_v19 = vadd.f32 %v5238_v33, %v2749_v58 }
 0x274   : > { %v3013_v35 = vadd.f32 %v2949_v26, %v2880_v2  ;;  %v2619_v52 = vmax.f32 %v2555_v25, 0.0  ;;  %v2811_v4 = vadd.f32 %v5238_v33, %v2747_v27  ;;  %v2127_v10 = vadd.f32 %v5324_v24, %v5646_v36  ;;  %v5648_v27 = vld [vmem:[#allocation23_spill] sm:$0xff]  ;;  %v5649_v36 = vld [vmem:[#allocation24_spill] sm:$0xff] }
 0x275   : > { %v3011_v60 = vadd.f32 %v2947_v55, %v2878_v48  ;;  %v2881_v42 = vmul.f32 %v4540_v23, %v2621_v9  ;;  %v2950_v39 = vmul.f32 %v4542_v12, %v2813_v19  ;;  %v2408_v5 = vadd.f32 %v5326_v43, %v2119_v53 }
 0x276   : > { %3077 = vst.msk [vmem:[%s4759_s27 + $0x1b0] sm:$0xff] %vm1466_vm0, %v3013_v35  ;;  %v2879_v34 = vmul.f32 %v4540_v23, %v2619_v52  ;;  %v2948_v61 = vmul.f32 %v4542_v12, %v2811_v4  ;;  %v2400_v11 = vadd.f32 %v5333_v38, %v5407_v59  ;;  %v2130_v24 = vadd.f32 %v5341_v45, %v5647_v46 }
 0x277   : > { %3075 = vst.msk [vmem:[%s4759_s27 + $0x1a0] sm:$0xff] %vm1466_vm0, %v3011_v60  ;;  %v3014_v49 = vadd.f32 %v2950_v39, %v2881_v42  ;;  %v2492_v13 = vmul.f32 %v5219_v51, %v2408_v5  ;;  %v2688_v37 = vmax.f32 %v2408_v5, 0.0  ;;  %v2411_v43 = vadd.f32 %v5343_v56, %v2122_v1 }
 0x278   : > { %v3012_v53 = vadd.f32 %v2948_v61, %v2879_v34  ;;  %v2490_v62 = vmul.f32 %v5219_v51, %v2400_v11  ;;  %v2686_v41 = vmax.f32 %v2400_v11, 0.0  ;;  %v2403_v8 = vadd.f32 %v5349_v28, %v5419_v15 }
 0x279   : > { %3078 = vst.msk [vmem:[%s4759_s27 + $0x1b8] sm:$0xff] %vm1466_vm0, %v3014_v49  ;;  %v2560_v38 = vadd.f32 %v5238_v33, %v2492_v13  ;;  %v2752_v45 = vmul.f32 %v5219_v51, %v2688_v37  ;;  %v2493_v59 = vmul.f32 %v5219_v51, %v2411_v43  ;;  %v2689_v17 = vmax.f32 %v2411_v43, 0.0 }
 0x27a   : > { %3076 = vst.msk [vmem:[%s4759_s27 + $0x1a8] sm:$0xff] %vm1466_vm0, %v3012_v53  ;;  %v2558_v56 = vadd.f32 %v5238_v33, %v2490_v62  ;;  %v2750_v1 = vmul.f32 %v5219_v51, %v2686_v41  ;;  %v2491_v44 = vmul.f32 %v5219_v51, %v2403_v8  ;;  %v2687_v63 = vmax.f32 %v2403_v8, 0.0 }
 0x27b   : > { %v2624_v50 = vmax.f32 %v2560_v38, 0.0  ;;  %v2816_v28 = vadd.f32 %v5238_v33, %v2752_v45  ;;  %v2561_v15 = vadd.f32 %v5238_v33, %v2493_v59  ;;  %v2753_v18 = vmul.f32 %v5219_v51, %v2689_v17 }
 0x27c   : > { %v2622_v3 = vmax.f32 %v2558_v56, 0.0  ;;  %v2814_v6 = vadd.f32 %v5238_v33, %v2750_v1  ;;  %v2559_v20 = vadd.f32 %v5238_v33, %v2491_v44  ;;  %v2751_v7 = vmul.f32 %v5219_v51, %v2687_v63 }
 0x27d   : > { %v2884_v22 = vmul.f32 %v4540_v23, %v2624_v50  ;;  %v2953_v30 = vmul.f32 %v4542_v12, %v2816_v28  ;;  %v2625_v31 = vmax.f32 %v2561_v15, 0.0  ;;  %v2817_v57 = vadd.f32 %v5238_v33, %v2753_v18 }
 0x27e   : > { %v2882_v14 = vmul.f32 %v4540_v23, %v2622_v3  ;;  %v2951_v32 = vmul.f32 %v4542_v12, %v2814_v6  ;;  %v2623_v0 = vmax.f32 %v2559_v20, 0.0  ;;  %v2815_v58 = vadd.f32 %v5238_v33, %v2751_v7 }
 0x27f   : > { %v3017_v2 = vadd.f32 %v2953_v30, %v2884_v22  ;;  %v2885_v26 = vmul.f32 %v4540_v23, %v2625_v31  ;;  %v2954_v25 = vmul.f32 %v4542_v12, %v2817_v57  ;;  %v2135_v48 = vadd.f32 %v5375_v54, %v5648_v27 }
 0x280   : > { %v3015_v55 = vadd.f32 %v2951_v32, %v2882_v14  ;;  %v2883_v9 = vmul.f32 %v4540_v23, %v2623_v0  ;;  %v2952_v19 = vmul.f32 %v4542_v12, %v2815_v58  ;;  %v2416_v35 = vadd.f32 %v5382_v40, %v2127_v10 }
 0x281   : > { %3081 = vst.msk [vmem:[%s4759_s27 + $0x1d0] sm:$0xff] %vm1466_vm0, %v3017_v2  ;;  %v3018_v52 = vadd.f32 %v2954_v25, %v2885_v26  ;;  %v2424_v4 = vadd.f32 %v5377_v21, %v2135_v48  ;;  %v2138_v60 = vadd.f32 %v5388_v16, %v5649_v36  ;;  %v2419_v42 = vadd.f32 %v5397_v29, %v2130_v24 }
 0x282   : > { %3079 = vst.msk [vmem:[%s4759_s27 + $0x1c0] sm:$0xff] %vm1466_vm0, %v3015_v55  ;;  %v3016_v54 = vadd.f32 %v2952_v19, %v2883_v9  ;;  %v2494_v39 = vmul.f32 %v5219_v51, %v2416_v35  ;;  %v2690_v5 = vmax.f32 %v2416_v35, 0.0 }
 0x283   : > { %3082 = vst.msk [vmem:[%s4759_s27 + $0x1d8] sm:$0xff] %vm1466_vm0, %v3018_v52  ;;  %v2496_v40 = vmul.f32 %v5219_v51, %v2424_v4  ;;  %v2692_v10 = vmax.f32 %v2424_v4, 0.0  ;;  %v2427_v34 = vadd.f32 %v5390_v47, %v2138_v60  ;;  %v2495_v21 = vmul.f32 %v5219_v51, %v2419_v42 }
 0x284   : > { %3080 = vst.msk [vmem:[%s4759_s27 + $0x1c8] sm:$0xff] %vm1466_vm0, %v3016_v54  ;;  %v2562_v16 = vadd.f32 %v5238_v33, %v2494_v39  ;;  %v2754_v29 = vmul.f32 %v5219_v51, %v2690_v5  ;;  %v2691_v61 = vmax.f32 %v2419_v42, 0.0 }
 0x285   : > { %v2564_v11 = vadd.f32 %v5238_v33, %v2496_v40  ;;  %v2756_v46 = vmul.f32 %v5219_v51, %v2692_v10  ;;  %v2497_v24 = vmul.f32 %v5219_v51, %v2427_v34  ;;  %v2693_v49 = vmax.f32 %v2427_v34, 0.0 }
 0x286   : > { %v2626_v13 = vmax.f32 %v2562_v16, 0.0  ;;  %v2818_v37 = vadd.f32 %v5238_v33, %v2754_v29  ;;  %v2563_v47 = vadd.f32 %v5238_v33, %v2495_v21  ;;  %v2755_v43 = vmul.f32 %v5219_v51, %v2691_v61 }
 0x287   : > { %v2628_v53 = vmax.f32 %v2564_v11, 0.0  ;;  %v2820_v62 = vadd.f32 %v5238_v33, %v2756_v46  ;;  %v2565_v41 = vadd.f32 %v5238_v33, %v2497_v24  ;;  %v2757_v8 = vmul.f32 %v5219_v51, %v2693_v49 }
 0x288   : > { %v2886_v38 = vmul.f32 %v4540_v23, %v2626_v13  ;;  %v2955_v45 = vmul.f32 %v4542_v12, %v2818_v37  ;;  %v2627_v59 = vmax.f32 %v2563_v47, 0.0  ;;  %v2819_v17 = vadd.f32 %v5238_v33, %v2755_v43 }
 0x289   : > { %v2888_v56 = vmul.f32 %v4540_v23, %v2628_v53  ;;  %v2957_v1 = vmul.f32 %v4542_v12, %v2820_v62  ;;  %v2629_v44 = vmax.f32 %v2565_v41, 0.0  ;;  %v2821_v63 = vadd.f32 %v5238_v33, %v2757_v8 }
 0x28a   : > { %v3019_v50 = vadd.f32 %v2955_v45, %v2886_v38  ;;  %v2887_v51 = vmul.f32 %v4540_v23, %v2627_v59  ;;  %v2956_v28 = vmul.f32 %v4542_v12, %v2819_v17 }
 0x28b   : > { %v3021_v15 = vadd.f32 %v2957_v1, %v2888_v56  ;;  %v2889_v18 = vmul.f32 %v4540_v23, %v2629_v44  ;;  %v2958_v3 = vmul.f32 %v4542_v12, %v2821_v63 }
 0x28c   : > { %3083 = vst.msk [vmem:[%s4759_s27 + $0x1e0] sm:$0xff] %vm1466_vm0, %v3019_v50  ;;  %v3020_v6 = vadd.f32 %v2956_v28, %v2887_v51 }
 0x28d   : > { %3085 = vst.msk [vmem:[%s4759_s27 + $0x1f0] sm:$0xff] %vm1466_vm0, %v3021_v15  ;;  %v3022_v20 = vadd.f32 %v2958_v3, %v2889_v18 }
 0x28e   : > { %3084 = vst.msk [vmem:[%s4759_s27 + $0x1e8] sm:$0xff] %vm1466_vm0, %v3020_v6 }
 0x28f   : > { %3086 = vst.msk [vmem:[%s4759_s27 + $0x1f8] sm:$0xff] %vm1466_vm0, %v3022_v20 }
 0x290 PF: > { %s13_s12 = sadd.s32 1, %s3947_s12  }
 0x291   : > { %p10_p4 = scmp.ge.s32.totalorder %s13_s12, 4  }
 0x293   :  { %12 = sbr.rel (!%p10_p4) target bundleno = 1 (0x1), region = 62 }

// kernel: mcnet_forward.20
= control target key start
LH: loop header
LB: loop body
LE: loop exit
PB: predicated region body
PF: predicated region fallthrough
CT: control target
= control target key end

     0   :  { %s4641_s12 = smov 0   ;;  %s5961_s0 = inlined_call_operand.vmem [shape: bf16[512,1344], index: 0, kind: input, shape index: {}]   ;;  %s5962_s1 = inlined_call_operand.vmem [shape: bf16[1344,64], index: 1, kind: input, shape index: {}]   ;;  %s5963_s2 = inlined_call_operand.vmem [shape: f32[4,64], index: 2, kind: input, shape index: {}]   ;;  %s5964_s3 = inlined_call_operand.vmem [shape: f32[512,64], index: 3, kind: output, shape index: {}]  }
   0x1 LB: > { %s3338_s13 = sadd.s32 4294967295, %s4619_s12   ;;  %p3342_p0 = scmp.ge.s32.totalorder %s4619_s12, 1  ;;  %s4619_s12 = sphi %s4641_s12, %s13_s12  }
   0x2   : > { %p139_p1 = scmp.lt.s32.totalorder %s4619_s12, 3 }
   0x4   : > { %p140_p2 = pnand %p3342_p0, %p139_p1 }
   0x5   : > { %v4273_v0 = vld [vmem:[%s5962_s1 + $0x40] sm:$0xff] (!%p140_p2)   ;;  %s3343_s16 = sshll.u32 (!%p140_p2), %s3338_s13, 5  ;;  %v4275_v2 = vld [vmem:[%s5962_s1 + $0x48] sm:$0xff] (!%p140_p2)   ;;  %v4277_v4 = vld [vmem:[%s5962_s1 + $0x50] sm:$0xff] (!%p140_p2)   ;;  %vm1930_vm0 = vcmask (!%p140_p2), 523264  }
   0x6   : > { %143 = sbr.rel (%p140_p2) target bundleno = 636 (0x27c), region = 32  ;;  %v4274_v1 = vld [vmem:[%s5962_s1] sm:$0xff] (!%p140_p2)   ;;  %3628 = vmatprep.subr.bf16.mxu0 (!%p140_p2), %v4273_v0  ;;  %4248 = vmatprep.subr.bf16.mxu1 (!%p140_p2), %v4273_v0  ;;  %p165_p3 = scmp.lt.s32.totalorder (!%p140_p2), %s3343_s16, 63  ;;  %v4276_v3 = vld [vmem:[%s5962_s1 + $0x8] sm:$0xff] (!%p140_p2)   ;;  %v4278_v5 = vld [vmem:[%s5962_s1 + $0x10] sm:$0xff] (!%p140_p2)  }
   0x7   : > { %3629 = vmatpush3.bf16.msra.mxu0 (!%p140_p2), %v4274_v1  ;;  %4256 = vmatpush3.bf16.msra.mxu1 (!%p140_p2), %v4274_v1  ;;  %v4279_v6 = vld [vmem:[%s5962_s1 + $0x58] sm:$0xff] (!%p140_p2)   ;;  %v4281_v8 = vld [vmem:[%s5962_s1 + $0x60] sm:$0xff] (!%p140_p2)   ;;  %v4283_v10 = vld [vmem:[%s5962_s1 + $0x68] sm:$0xff] (!%p140_p2)  }
   0x8   : > { %3630 = vmatprep.subr.bf16.mxu0 (!%p140_p2), %v4275_v2  ;;  %4249 = vmatprep.subr.bf16.mxu1 (!%p140_p2), %v4275_v2  ;;  %v4280_v7 = vld [vmem:[%s5962_s1 + $0x18] sm:$0xff] (!%p140_p2)   ;;  %v4282_v9 = vld [vmem:[%s5962_s1 + $0x20] sm:$0xff] (!%p140_p2)   ;;  %v4284_v13 = vld [vmem:[%s5962_s1 + $0x28] sm:$0xff] (!%p140_p2)  }
   0x9   : > { %v4285_v14 = vld [vmem:[%s5962_s1 + $0x70] sm:$0xff] (!%p140_p2)   ;;  %v4287_v16 = vld [vmem:[%s5962_s1 + $0x78] sm:$0xff] (!%p140_p2)   ;;  %v4295_v18 = vld [vmem:[%s5962_s1 + $0xc0] sm:$0xff] (!%p140_p2)  }
   0xa   : > { %v4286_v15 = vld [vmem:[%s5962_s1 + $0x30] sm:$0xff] (!%p140_p2)   ;;  %v4288_v17 = vld [vmem:[%s5962_s1 + $0x38] sm:$0xff] (!%p140_p2)   ;;  %v4296_v21 = vld [vmem:[%s5962_s1 + $0x140] sm:$0xff] (!%p140_p2)  }
   0xb   : > { %3631 = vmatpush3.bf16.msra.mxu0 (!%p140_p2), %v4276_v3  ;;  %4257 = vmatpush3.bf16.msra.mxu1 (!%p140_p2), %v4276_v3  ;;  %v4297_v22 = vld [vmem:[%s5962_s1 + $0x80] sm:$0xff] (!%p140_p2)   ;;  %v4299_v24 = vld [vmem:[%s5962_s1 + $0xc8] sm:$0xff] (!%p140_p2)   ;;  %v4307_v32 = vld [vmem:[%s5962_s1 + $0xd0] sm:$0xff] (!%p140_p2)  }
   0xc   : > { %3632 = vmatprep.subr.bf16.mxu0 (!%p140_p2), %v4277_v4  ;;  %4250 = vmatprep.subr.bf16.mxu1 (!%p140_p2), %v4277_v4  ;;  %v4298_v23 = vld [vmem:[%s5962_s1 + $0x100] sm:$0xff] (!%p140_p2)   ;;  %v4310_v27 = vld [vmem:[%s5962_s1 + $0x148] sm:$0xff] (!%p140_p2)   ;;  %v4308_v33 = vld [vmem:[%s5962_s1 + $0x90] sm:$0xff] (!%p140_p2)  }
   0xd   : > { %s5966_s16 = smov (!%p165_p3, %s3343_s16), 63  ;;  %v4300_v28 = vld [vmem:[%s5962_s1 + $0x88] sm:$0xff]   ;;  %v4309_v34 = vld [vmem:[%s5962_s1 + $0xd8] sm:$0xff]   ;;  %v4319_v38 = vld [vmem:[%s5962_s1 + $0xe0] sm:$0xff]  }
   0xe   : > { %s4264_s29 = smul.u32 44, %s5966_s16  ;;  %v4312_v29 = vld [vmem:[%s5962_s1 + $0x108] sm:$0xff]   ;;  %v4311_v37 = vld [vmem:[%s5962_s1 + $0x98] sm:$0xff]   ;;  %v4330_v41 = vld [vmem:[%s5962_s1 + $0x150] sm:$0xff]   ;;  %s3346_s25 = sshll.u32 %s5966_s16, 3 }
   0xf   : > { %3633 = vmatpush3.bf16.msra.mxu0 %v4278_v5  ;;  %4258 = vmatpush3.bf16.msra.mxu1 %v4278_v5  ;;  %v4320_v42 = vld [vmem:[%s5962_s1 + $0xa0] sm:$0xff]   ;;  %v4321_v43 = vld [vmem:[%s5962_s1 + $0xe8] sm:$0xff]   ;;  %v4332_v44 = vld [vmem:[%s5962_s1 + $0x110] sm:$0xff]   ;;  %s5588_s27 = scalar_lea.vmem %s5964_s3, %s3346_s25 }
  0x10   : > { %3634 = vmatprep.subr.bf16.mxu0 %v4279_v6  ;;  %4251 = vmatprep.subr.bf16.mxu1 %v4279_v6  ;;  %s4682_s9 = scalar_lea.vmem %s5961_s0, %s4264_s29  ;;  %v4322_v47 = vld [vmem:[%s5962_s1 + $0xa8] sm:$0xff]   ;;  %v4329_v48 = vld [vmem:[%s5962_s1 + $0xf0] sm:$0xff]   ;;  %v4341_v51 = vld [vmem:[%s5962_s1 + $0x158] sm:$0xff]  }
  0x11   : > { %v4291_v11 = vld [vmem:[%s4682_s9 + $0x4] ss:$44 sps:$4 sm:$0xff]   ;;  %v4289_v19 = vld [vmem:[%s4682_s9] ss:$44 sps:$4 sm:$0xff]   ;;  %v4301_v25 = vld [vmem:[%s4682_s9 + $0x5c] ss:$44 sps:$4 sm:$0xff]  }
  0x12   : > { %v4294_v12 = vld [vmem:[%s4682_s9 + $0x424] ss:$44 sps:$4 sm:$0xff]   ;;  %2011 = vmatprep.mubr.bf16.mxu0 %v4291_v11  ;;  %v4292_v20 = vld [vmem:[%s4682_s9 + $0x420] ss:$44 sps:$4 sm:$0xff]   ;;  %v4303_v26 = vld [vmem:[%s4682_s9 + $0x47c] ss:$44 sps:$4 sm:$0xff]  }
  0x13   : > { %3635 = vmatpush3.bf16.msra.mxu0 %v4280_v7  ;;  %4259 = vmatpush3.bf16.msra.mxu1 %v4280_v7  ;;  %v4305_v30 = vld [vmem:[%s4682_s9 + $0x58] ss:$44 sps:$4 sm:$0xff]   ;;  %v4313_v35 = vld [vmem:[%s4682_s9 + $0xb4] ss:$44 sps:$4 sm:$0xff]   ;;  %v4317_v39 = vld [vmem:[%s4682_s9 + $0xb0] ss:$44 sps:$4 sm:$0xff]  }
  0x14   : > { %3636 = vmatprep.subr.bf16.mxu0 %v4281_v8  ;;  %4252 = vmatprep.subr.bf16.mxu1 %v4281_v8  ;;  %v4306_v31 = vld [vmem:[%s4682_s9 + $0x478] ss:$44 sps:$4 sm:$0xff]   ;;  %v4315_v36 = vld [vmem:[%s4682_s9 + $0x4d4] ss:$44 sps:$4 sm:$0xff]   ;;  %v4318_v40 = vld [vmem:[%s4682_s9 + $0x4d0] ss:$44 sps:$4 sm:$0xff]  }
  0x15   : > { %2107 = vmatprep.mubr.bf16.mxu1 %v4294_v12  ;;  %v4323_v45 = vld [vmem:[%s4682_s9 + $0x10c] ss:$44 sps:$4 sm:$0xff]   ;;  %v4327_v49 = vld [vmem:[%s4682_s9 + $0x108] ss:$44 sps:$4 sm:$0xff]   ;;  %v4335_v55 = vld [vmem:[%s4682_s9 + $0x164] ss:$44 sps:$4 sm:$0xff]  }
  0x16   : > { %v4325_v46 = vld [vmem:[%s4682_s9 + $0x52c] ss:$44 sps:$4 sm:$0xff]   ;;  %v4328_v50 = vld [vmem:[%s4682_s9 + $0x528] ss:$44 sps:$4 sm:$0xff]   ;;  %v4342_v60 = vld [vmem:[%s5962_s1 + $0x1c0] sm:$0xff]  }
  0x17   : > { %3637 = vmatpush3.bf16.msra.mxu0 %v4282_v9  ;;  %4260 = vmatpush3.bf16.msra.mxu1 %v4282_v9  ;;  %v4331_v52 = vld [vmem:[%s5962_s1 + $0xb0] sm:$0xff]   ;;  %v4333_v53 = vld [vmem:[%s5962_s1 + $0xf8] sm:$0xff]   ;;  %v4340_v59 = vld [vmem:[%s4682_s9 + $0x160] ss:$44 sps:$4 sm:$0xff]  }
  0x18   : > { %3638 = vmatprep.subr.bf16.mxu0 %v4283_v10  ;;  %4253 = vmatprep.subr.bf16.mxu1 %v4283_v10  ;;  %v4343_v54 = vld [vmem:[%s5962_s1 + $0x118] sm:$0xff]   ;;  %v4337_v58 = vld [vmem:[%s4682_s9 + $0x8] ss:$44 sps:$4 sm:$0xff]   ;;  %v4344_v61 = vld [vmem:[%s5962_s1 + $0x180] sm:$0xff]  }
  0x19   : > { %v4339_v56 = vld [vmem:[%s4682_s9 + $0xc] ss:$44 sps:$4 sm:$0xff]   ;;  %v4345_v62 = vld [vmem:[%s4682_s9 + $0x1bc] ss:$44 sps:$4 sm:$0xff]   ;;  %v4357_v63 = vld [vmem:[%s5962_s1 + $0x160] sm:$0xff]  }
  0x1a   : > { %v4334_v57 = vld [vmem:[%s5962_s1 + $0xb8] sm:$0xff]   ;;  %v4358_v0 = vld [vmem:[%s5962_s1 + $0x120] sm:$0xff]   ;;  %v4359_v2 = vld [vmem:[%s5962_s1 + $0x1c8] sm:$0xff]  }
  0x1b   : > { %3639 = vmatpush3.bf16.msra.mxu0 %v4284_v13  ;;  %4261 = vmatpush3.bf16.msra.mxu1 %v4284_v13  ;;  %v4347_v1 = vld [vmem:[%s4682_s9 + $0x64] ss:$44 sps:$4 sm:$0xff]   ;;  %v4360_v3 = vld [vmem:[%s5962_s1 + $0x188] sm:$0xff]   ;;  %v4351_v8 = vld [vmem:[%s4682_s9 + $0x214] ss:$44 sps:$4 sm:$0xff]  }
  0x1c   : > { %3640 = vmatprep.subr.bf16.mxu0 %v4285_v14  ;;  %4254 = vmatprep.subr.bf16.mxu1 %v4285_v14  ;;  %v4349_v4 = vld [vmem:[%s4682_s9 + $0x1b8] ss:$44 sps:$4 sm:$0xff]   ;;  %v4367_v5 = vld [vmem:[%s5962_s1 + $0x168] sm:$0xff]   ;;  %v4375_v10 = vld [vmem:[%s5962_s1 + $0x1d0] sm:$0xff]  }
  0x1d   : > { %v4368_v6 = vld [vmem:[%s5962_s1 + $0x128] sm:$0xff]   ;;  %v4376_v11 = vld [vmem:[%s5962_s1 + $0x190] sm:$0xff]   ;;  %v4356_v13 = vld [vmem:[%s4682_s9 + $0xb8] ss:$44 sps:$4 sm:$0xff]  }
  0x1e   : > { %v4350_v7 = vld [vmem:[%s4682_s9 + $0x60] ss:$44 sps:$4 sm:$0xff]   ;;  %v4353_v9 = vld [vmem:[%s4682_s9 + $0xbc] ss:$44 sps:$4 sm:$0xff]  }
  0x1f   : > { %3641 = vmatpush3.bf16.msra.mxu0 %v4286_v15  ;;  %4262 = vmatpush3.bf16.msra.mxu1 %v4286_v15  ;;  %v4355_v12 = vld [vmem:[%s4682_s9 + $0x210] ss:$44 sps:$4 sm:$0xff]   ;;  %v4361_v14 = vld [vmem:[%s4682_s9 + $0x26c] ss:$44 sps:$4 sm:$0xff]  }
  0x20   : > { %3642 = vmatprep.subr.bf16.mxu0 %v4287_v16  ;;  %4255 = vmatprep.subr.bf16.mxu1 %v4287_v16  ;;  %v4383_v15 = vld [vmem:[%s5962_s1 + $0x170] sm:$0xff]  }
  0x21   : > { %v4384_v16 = vld [vmem:[%s5962_s1 + $0x130] sm:$0xff]  }
  0x23   : > { %3643 = vmatpush3.bf16.msra.mxu0 %v4288_v17  ;;  %4263 = vmatpush3.bf16.msra.mxu1 %v4288_v17  ;;  %v4363_v17 = vld [vmem:[%s4682_s9 + $0x114] ss:$44 sps:$4 sm:$0xff]  }
  0x24   : > { %3740 = vmatprep.subr.bf16.mxu1 %v4295_v18  ;;  %3852 = vmatprep.subr.bf16.mxu0 %v4296_v21  ;;  %v4391_v18 = vld [vmem:[%s5962_s1 + $0x178] sm:$0xff]  }
  0x25   : > { %v4393_v21 = vld [vmem:[%s5962_s1 + $0x138] sm:$0xff]  }
  0x26   : > { %2012 = vmatmul.mubr.bf16.vlgmr.msra.gmra.mrb[0].mxu0 %v4289_v19  ;;  %2108 = vmatmul.mubr.bf16.vlgmr.msra.gmra.mrb[0].mxu1 %v4292_v20  ;;  %v4392_v19 = vld [vmem:[%s5962_s1 + $0x1d8] sm:$0xff]   ;;  %v4365_v20 = vld [vmem:[%s4682_s9 + $0x268] ss:$44 sps:$4 sm:$0xff]  }
  0x27   : > { %3741 = vmatpush3.bf16.msra.mxu1 %v4297_v22  ;;  %3853 = vmatpush3.bf16.msra.mxu0 %v4298_v23  ;;  %v4394_v22 = vld [vmem:[%s5962_s1 + $0x198] sm:$0xff]  }
  0x28   : > { %3742 = vmatprep.subr.bf16.mxu1 %v4299_v24  ;;  %2019 = vmatprep.mubr.bf16.mxu0 %v4301_v25  ;;  %v4366_v23 = vld [vmem:[%s4682_s9 + $0x110] ss:$44 sps:$4 sm:$0xff]   ;;  %v4371_v25 = vld [vmem:[%s4682_s9 + $0x16c] ss:$44 sps:$4 sm:$0xff]  }
  0x29   : > { %2115 = vmatprep.mubr.bf16.mxu1 %v4303_v26  ;;  %3854 = vmatprep.subr.bf16.mxu0 %v4310_v27  ;;  %v4369_v24 = vld [vmem:[%s4682_s9 + $0x2c4] ss:$44 sps:$4 sm:$0xff]   ;;  %v4373_v27 = vld [vmem:[%s4682_s9 + $0x2c0] ss:$44 sps:$4 sm:$0xff]  }
  0x2a   : > { %v4407_v26 = vld [vmem:[%s5962_s1 + $0x240] sm:$0xff]  }
  0x2b   : > { %3743 = vmatpush3.bf16.msra.mxu1 %v4300_v28  ;;  %3855 = vmatpush3.bf16.msra.mxu0 %v4312_v29  ;;  %v4374_v28 = vld [vmem:[%s4682_s9 + $0x168] ss:$44 sps:$4 sm:$0xff]  }
  0x2c   : > { %3744 = vmatprep.subr.bf16.mxu1 %v4307_v32  ;;  %3856 = vmatprep.subr.bf16.mxu0 %v4330_v41  ;;  %v4377_v29 = vld [vmem:[%s4682_s9 + $0x31c] ss:$44 sps:$4 sm:$0xff]   ;;  %v4379_v32 = vld [vmem:[%s4682_s9 + $0x1c4] ss:$44 sps:$4 sm:$0xff]   ;;  %v4395_v41 = vld [vmem:[%s4682_s9 + $0x3cc] ss:$44 sps:$4 sm:$0xff]  }
  0x2e   : > { %2020 = vmatmul.mubr.bf16.gmra.mrb[4].mxu0 %v4305_v30  ;;  %2116 = vmatmul.mubr.bf16.gmra.mrb[4].mxu1 %v4306_v31  ;;  %v4409_v30 = vld [vmem:[%s5962_s1 + $0x1e0] sm:$0xff]  }
  0x2f   : > { %3745 = vmatpush3.bf16.msra.mxu1 %v4308_v33  ;;  %2027 = vmatprep.mubr.bf16.mxu0 %v4313_v35  ;;  %v4410_v31 = vld [vmem:[%s5962_s1 + $0x1a0] sm:$0xff]  }
  0x30   : > { %3746 = vmatprep.subr.bf16.mxu1 %v4309_v34  ;;  %2123 = vmatprep.mubr.bf16.mxu1 %v4315_v36  ;;  %v4381_v33 = vld [vmem:[%s4682_s9 + $0x318] ss:$44 sps:$4 sm:$0xff]   ;;  %v4382_v34 = vld [vmem:[%s4682_s9 + $0x1c0] ss:$44 sps:$4 sm:$0xff]   ;;  %v4387_v36 = vld [vmem:[%s4682_s9 + $0x21c] ss:$44 sps:$4 sm:$0xff]  }
  0x31   : > { %3857 = vmatpush3.bf16.msra.mxu0 %v4332_v44  ;;  %v4385_v35 = vld [vmem:[%s4682_s9 + $0x374] ss:$44 sps:$4 sm:$0xff]  }
  0x32   : > { %3858 = vmatprep.subr.bf16.mxu0 %v4341_v51  ;;  %v4442_v44 = vld [vmem:[%s5962_s1 + $0x1b0] sm:$0xff]  }
  0x33   : > { %3747 = vmatpush3.bf16.msra.mxu1 %v4311_v37  ;;  %v4425_v37 = vld [vmem:[%s5962_s1 + $0x1e8] sm:$0xff]   ;;  %v4403_v51 = vld [vmem:[%s4682_s9 + $0x10] ss:$44 sps:$4 sm:$0xff]  }
  0x34   : > { %3748 = vmatprep.subr.bf16.mxu1 %v4319_v38  ;;  %v4426_v38 = vld [vmem:[%s5962_s1 + $0x1a8] sm:$0xff]  }
  0x35   : > { %3859 = vmatpush3.bf16.msra.mxu0 %v4343_v54  ;;  %v4411_v54 = vld [vmem:[%s4682_s9 + $0x324] ss:$44 sps:$4 sm:$0xff]  }
  0x36   : > { %2028 = vmatmul.mubr.bf16.gmra.mrb[8].mxu0 %v4317_v39  ;;  %2124 = vmatmul.mubr.bf16.gmra.mrb[8].mxu1 %v4318_v40  ;;  %v4389_v39 = vld [vmem:[%s4682_s9 + $0x370] ss:$44 sps:$4 sm:$0xff]   ;;  %v4390_v40 = vld [vmem:[%s4682_s9 + $0x218] ss:$44 sps:$4 sm:$0xff]  }
  0x37   : > { %3749 = vmatpush3.bf16.msra.mxu1 %v4320_v42  ;;  %2035 = vmatprep.mubr.bf16.mxu0 %v4323_v45  ;;  %v4397_v42 = vld [vmem:[%s4682_s9 + $0x274] ss:$44 sps:$4 sm:$0xff]  }
  0x38   : > { %3750 = vmatprep.subr.bf16.mxu1 %v4321_v43  ;;  %2131 = vmatprep.mubr.bf16.mxu1 %v4325_v46  ;;  %v4441_v43 = vld [vmem:[%s5962_s1 + $0x1f0] sm:$0xff]  }
  0x39   : > { %3860 = vmatprep.subr.bf16.mxu0 %v4357_v63  ;;  %v4399_v45 = vld [vmem:[%s4682_s9 + $0x3c8] ss:$44 sps:$4 sm:$0xff]   ;;  %v4400_v46 = vld [vmem:[%s4682_s9 + $0x270] ss:$44 sps:$4 sm:$0xff]  }
  0x3a   : > { %3861 = vmatpush3.bf16.msra.mxu0 %v4358_v0  ;;  %v4419_v63 = vld [vmem:[%s4682_s9 + $0xc4] ss:$44 sps:$4 sm:$0xff]  }
  0x3b   : > { %3751 = vmatpush3.bf16.msra.mxu1 %v4322_v47  ;;  %3862 = vmatprep.subr.bf16.mxu0 %v4367_v5  ;;  %v4401_v47 = vld [vmem:[%s4682_s9 + $0x2cc] ss:$44 sps:$4 sm:$0xff]   ;;  %v4440_v0 = vld [vmem:[%s5962_s1 + $0x210] sm:$0xff]  }
  0x3c   : > { %3752 = vmatprep.subr.bf16.mxu1 %v4329_v48  ;;  %v4405_v48 = vld [vmem:[%s4682_s9 + $0x14] ss:$44 sps:$4 sm:$0xff]  }
  0x3d   : > { %v4422_v5 = vld [vmem:[%s4682_s9 + $0xc0] ss:$44 sps:$4 sm:$0xff]  }
  0x3e   : > { %2036 = vmatmul.mubr.bf16.gmra.mrb[12].mxu0 %v4327_v49  ;;  %2132 = vmatmul.mubr.bf16.gmra.mrb[12].mxu1 %v4328_v50  ;;  %v4457_v49 = vld [vmem:[%s5962_s1 + $0x1f8] sm:$0xff]  }
  0x3f   : > { %3753 = vmatpush3.bf16.msra.mxu1 %v4331_v52  ;;  %2043 = vmatprep.mubr.bf16.mxu0 %v4335_v55  ;;  %v4458_v50 = vld [vmem:[%s5962_s1 + $0x1b8] sm:$0xff]   ;;  %v4406_v52 = vld [vmem:[%s4682_s9 + $0x2c8] ss:$44 sps:$4 sm:$0xff]  }
  0x40   : > { %3754 = vmatprep.subr.bf16.mxu1 %v4333_v53  ;;  %2172 = vmatprep.mubr.bf16.mxu1 %v4339_v56  ;;  %v4408_v53 = vld [vmem:[%s5962_s1 + $0x200] sm:$0xff]   ;;  %v4413_v55 = vld [vmem:[%s4682_s9 + $0x6c] ss:$44 sps:$4 sm:$0xff]  }
  0x41   : > { %3863 = vmatpush3.bf16.msra.mxu0 %v4368_v6  ;;  %v4423_v56 = vld [vmem:[%s5962_s1 + $0x248] sm:$0xff]   ;;  %v4427_v6 = vld [vmem:[%s4682_s9 + $0x3d4] ss:$44 sps:$4 sm:$0xff]  }
  0x42   : > { %3864 = vmatprep.subr.bf16.mxu0 %v4383_v15  ;;  %v4435_v15 = vld [vmem:[%s4682_s9 + $0x174] ss:$44 sps:$4 sm:$0xff]  }
  0x43   : > { %3755 = vmatpush3.bf16.msra.mxu1 %v4334_v57  ;;  %v4915_v57 = vld [vmem:[%s5962_s1 + $0x280] sm:$0xff]  }
  0x44   : > { %3964 = vmatprep.subr.bf16.mxu1 %v4342_v60  ;;  %v4415_v60 = vld [vmem:[%s4682_s9 + $0x320] ss:$44 sps:$4 sm:$0xff]  }
  0x45   : > { %3865 = vmatpush3.bf16.msra.mxu0 %v4384_v16  ;;  %v4501_v16 = vld [vmem:[%s5962_s1 + $0x230] sm:$0xff]  }
  0x46   : > { %2044 = vmatmul.mubr.bf16.gmra.mrb[16].mxu0 %v4340_v59  ;;  %2173 = vmatmul.mubr.bf16.vlgmr.msra.gmra.mrb[16].mxu1 %v4337_v58  ;;  %v4424_v58 = vld [vmem:[%s5962_s1 + $0x208] sm:$0xff]   ;;  %v4439_v59 = vld [vmem:[%s5962_s1 + $0x250] sm:$0xff]  }
  0x47   : > { %3965 = vmatpush3.bf16.msra.mxu1 %v4344_v61  ;;  %2051 = vmatprep.mubr.bf16.mxu0 %v4345_v62  ;;  %v4416_v61 = vld [vmem:[%s4682_s9 + $0x68] ss:$44 sps:$4 sm:$0xff]  }
  0x48   : > { %2180 = vmatprep.mubr.bf16.mxu1 %v4347_v1  ;;  %3966 = vmatprep.subr.bf16.mxu1 %v4359_v2  ;;  %v4417_v62 = vld [vmem:[%s4682_s9 + $0x37c] ss:$44 sps:$4 sm:$0xff]   ;;  %v4421_v2 = vld [vmem:[%s4682_s9 + $0x378] ss:$44 sps:$4 sm:$0xff]  }
  0x49   : > { %3866 = vmatprep.subr.bf16.mxu0 %v4391_v18  ;;  %v4455_v1 = vld [vmem:[%s5962_s1 + $0x258] sm:$0xff]  }
  0x4a   : > { %3867 = vmatpush3.bf16.msra.mxu0 %v4393_v21  ;;  %v4516_v18 = vld [vmem:[%s5962_s1 + $0x238] sm:$0xff]   ;;  %v4443_v21 = vld [vmem:[%s4682_s9 + $0x484] ss:$44 sps:$4 sm:$0xff]  }
  0x4b   : > { %3967 = vmatpush3.bf16.msra.mxu1 %v4360_v3  ;;  %4076 = vmatprep.subr.bf16.mxu0 %v4407_v26  ;;  %v4456_v3 = vld [vmem:[%s5962_s1 + $0x218] sm:$0xff]   ;;  %v4451_v26 = vld [vmem:[%s4682_s9 + $0x224] ss:$44 sps:$4 sm:$0xff]  }
  0x4c   : > { %3968 = vmatprep.subr.bf16.mxu1 %v4375_v10  ;;  %v4431_v10 = vld [vmem:[%s4682_s9 + $0x3d0] ss:$44 sps:$4 sm:$0xff]  }
  0x4e   : > { %2052 = vmatmul.mubr.bf16.gmra.mrb[20].mxu0 %v4349_v4  ;;  %2181 = vmatmul.mubr.bf16.gmra.mrb[20].mxu1 %v4350_v7  ;;  %v4471_v4 = vld [vmem:[%s5962_s1 + $0x260] sm:$0xff]   ;;  %v4429_v7 = vld [vmem:[%s4682_s9 + $0x11c] ss:$44 sps:$4 sm:$0xff]  }
  0x4f   : > { %2059 = vmatprep.mubr.bf16.mxu0 %v4351_v8  ;;  %2188 = vmatprep.mubr.bf16.mxu1 %v4353_v9  ;;  %v4472_v8 = vld [vmem:[%s5962_s1 + $0x220] sm:$0xff]   ;;  %v4486_v9 = vld [vmem:[%s5962_s1 + $0x268] sm:$0xff]  }
  0x50   : > { %3969 = vmatpush3.bf16.msra.mxu1 %v4376_v11  ;;  %v4487_v11 = vld [vmem:[%s5962_s1 + $0x228] sm:$0xff]  }
  0x51   : > { %3970 = vmatprep.subr.bf16.mxu1 %v4392_v19  ;;  %v4437_v19 = vld [vmem:[%s4682_s9 + $0x428] ss:$44 sps:$4 sm:$0xff]  }
  0x54   : > { %3971 = vmatpush3.bf16.msra.mxu1 %v4394_v22  ;;  %v4445_v22 = vld [vmem:[%s4682_s9 + $0x1cc] ss:$44 sps:$4 sm:$0xff]  }
  0x55   : > { %3972 = vmatprep.subr.bf16.mxu1 %v4409_v30  ;;  %v4461_v30 = vld [vmem:[%s4682_s9 + $0x27c] ss:$44 sps:$4 sm:$0xff]  }
  0x56   : > { %2060 = vmatmul.mubr.bf16.gmra.mrb[24].mxu0 %v4355_v12  ;;  %2189 = vmatmul.mubr.bf16.gmra.mrb[24].mxu1 %v4356_v13  ;;  %v4500_v12 = vld [vmem:[%s5962_s1 + $0x270] sm:$0xff]   ;;  %v4432_v13 = vld [vmem:[%s4682_s9 + $0x118] ss:$44 sps:$4 sm:$0xff]  }
  0x57   : > { %2067 = vmatprep.mubr.bf16.mxu0 %v4361_v14  ;;  %2196 = vmatprep.mubr.bf16.mxu1 %v4363_v17  ;;  %v4433_v14 = vld [vmem:[%s4682_s9 + $0x42c] ss:$44 sps:$4 sm:$0xff]  }
  0x58   : > { %3973 = vmatpush3.bf16.msra.mxu1 %v4410_v31  ;;  %v4515_v17 = vld [vmem:[%s5962_s1 + $0x278] sm:$0xff]  }
  0x59   : > { %3974 = vmatprep.subr.bf16.mxu1 %v4425_v37  ;;  %v4463_v31 = vld [vmem:[%s4682_s9 + $0x530] ss:$44 sps:$4 sm:$0xff]   ;;  %v4474_v37 = vld [vmem:[%s4682_s9 + $0x32c] ss:$44 sps:$4 sm:$0xff]  }
  0x5c   : > { %3975 = vmatpush3.bf16.msra.mxu1 %v4426_v38  ;;  %v4476_v38 = vld [vmem:[%s4682_s9 + $0x74] ss:$44 sps:$4 sm:$0xff]  }
  0x5d   : > { %3976 = vmatprep.subr.bf16.mxu1 %v4441_v43  ;;  %v4480_v43 = vld [vmem:[%s4682_s9 + $0x384] ss:$44 sps:$4 sm:$0xff]  }
  0x5e   : > { %2068 = vmatmul.mubr.bf16.gmra.mrb[28].mxu0 %v4365_v20  ;;  %2197 = vmatmul.mubr.bf16.gmra.mrb[28].mxu1 %v4366_v23  ;;  %v4438_v20 = vld [vmem:[%s4682_s9 + $0x170] ss:$44 sps:$4 sm:$0xff]   ;;  %v4447_v23 = vld [vmem:[%s4682_s9 + $0x480] ss:$44 sps:$4 sm:$0xff]  }
  0x5f   : > { %2075 = vmatprep.mubr.bf16.mxu0 %v4369_v24  ;;  %2204 = vmatprep.mubr.bf16.mxu1 %v4371_v25  ;;  %v4448_v24 = vld [vmem:[%s4682_s9 + $0x1c8] ss:$44 sps:$4 sm:$0xff]  }
  0x60   : > { %3977 = vmatpush3.bf16.msra.mxu1 %v4442_v44  ;;  %v4449_v25 = vld [vmem:[%s4682_s9 + $0x4dc] ss:$44 sps:$4 sm:$0xff]   ;;  %v4482_v44 = vld [vmem:[%s4682_s9 + $0xcc] ss:$44 sps:$4 sm:$0xff]  }
  0x61   : > { %3978 = vmatprep.subr.bf16.mxu1 %v4457_v49  ;;  %v4490_v49 = vld [vmem:[%s4682_s9 + $0x124] ss:$44 sps:$4 sm:$0xff]  }
  0x64   : > { %3979 = vmatpush3.bf16.msra.mxu1 %v4458_v50  ;;  %v4492_v50 = vld [vmem:[%s4682_s9 + $0x3d8] ss:$44 sps:$4 sm:$0xff]  }
  0x65   : > { %4208 = vmatprep.subr.bf16.mxu1 %v4915_v57 }
  0x66   : > { %2076 = vmatmul.mubr.bf16.gmra.mrb[32].mxu0 %v4373_v27  ;;  %2205 = vmatmul.mubr.bf16.gmra.mrb[32].mxu1 %v4374_v28  ;;  %v4453_v27 = vld [vmem:[%s4682_s9 + $0x4d8] ss:$44 sps:$4 sm:$0xff]   ;;  %v4454_v28 = vld [vmem:[%s4682_s9 + $0x220] ss:$44 sps:$4 sm:$0xff]  }
  0x67   : > { %2083 = vmatprep.mubr.bf16.mxu0 %v4377_v29  ;;  %2212 = vmatprep.mubr.bf16.mxu1 %v4379_v32  ;;  %v4459_v29 = vld [vmem:[%s4682_s9 + $0x534] ss:$44 sps:$4 sm:$0xff]   ;;  %v4464_v32 = vld [vmem:[%s4682_s9 + $0x278] ss:$44 sps:$4 sm:$0xff]  }
  0x6e   : > { %2084 = vmatmul.mubr.bf16.gmra.mrb[36].mxu0 %v4381_v33  ;;  %2213 = vmatmul.mubr.bf16.gmra.mrb[36].mxu1 %v4382_v34  ;;  %v4465_v33 = vld [vmem:[%s4682_s9 + $0x2d4] ss:$44 sps:$4 sm:$0xff]   ;;  %v4469_v34 = vld [vmem:[%s4682_s9 + $0x1c] ss:$44 sps:$4 sm:$0xff]  }
  0x6f   : > { %2091 = vmatprep.mubr.bf16.mxu0 %v4385_v35  ;;  %2220 = vmatprep.mubr.bf16.mxu1 %v4387_v36  ;;  %v4467_v35 = vld [vmem:[%s4682_s9 + $0x18] ss:$44 sps:$4 sm:$0xff]   ;;  %v4470_v36 = vld [vmem:[%s4682_s9 + $0x2d0] ss:$44 sps:$4 sm:$0xff]  }
  0x76   : > { %2092 = vmatmul.mubr.bf16.gmra.mrb[40].mxu0 %v4389_v39  ;;  %2221 = vmatmul.mubr.bf16.gmra.mrb[40].mxu1 %v4390_v40  ;;  %v4502_v39 = vld [vmem:[%s5962_s1 + $0x288] sm:$0xff]   ;;  %v4529_v40 = vld [vmem:[%s5962_s1 + $0x290] sm:$0xff]  }
  0x77   : > { %2099 = vmatprep.mubr.bf16.mxu0 %v4395_v41  ;;  %2228 = vmatprep.mubr.bf16.mxu1 %v4397_v42  ;;  %v4478_v41 = vld [vmem:[%s4682_s9 + $0x328] ss:$44 sps:$4 sm:$0xff]   ;;  %v4479_v42 = vld [vmem:[%s4682_s9 + $0x70] ss:$44 sps:$4 sm:$0xff]  }
  0x7e   : > { %2100 = vmatmul.mubr.bf16.gmra.mrb[44].mxu0 %v4399_v45  ;;  %2229 = vmatmul.mubr.bf16.gmra.mrb[44].mxu1 %v4400_v46  ;;  %v4554_v45 = vld [vmem:[%s5962_s1 + $0x298] sm:$0xff]   ;;  %v4484_v46 = vld [vmem:[%s4682_s9 + $0x380] ss:$44 sps:$4 sm:$0xff]  }
  0x7f   : > { %2236 = vmatprep.mubr.bf16.mxu1 %v4401_v47  ;;  %2333 = vmatprep.mubr.bf16.mxu0 %v4405_v48  ;;  %v4485_v47 = vld [vmem:[%s4682_s9 + $0xc8] ss:$44 sps:$4 sm:$0xff]  }
  0x80   : > { %v4488_v48 = vld [vmem:[%s4682_s9 + $0x3dc] ss:$44 sps:$4 sm:$0xff]  }
  0x86   : > { %2237 = vmatmul.mubr.bf16.gmra.mrb[48].mxu1 %v4406_v52  ;;  %2334 = vmatmul.mubr.bf16.vlgmr.msra.gmra.mrb[48].mxu0 %v4403_v51  ;;  %v4493_v51 = vld [vmem:[%s4682_s9 + $0x120] ss:$44 sps:$4 sm:$0xff]  }
  0x87   : > { %4077 = vmatpush3.bf16.msra.mxu0 %v4408_v53  ;;  %2244 = vmatprep.mubr.bf16.mxu1 %v4411_v54  ;;  %v4494_v52 = vld [vmem:[%s4682_s9 + $0x434] ss:$44 sps:$4 sm:$0xff]   ;;  %v4496_v53 = vld [vmem:[%s4682_s9 + $0x17c] ss:$44 sps:$4 sm:$0xff]  }
  0x88   : > { %2341 = vmatprep.mubr.bf16.mxu0 %v4413_v55  ;;  %4078 = vmatprep.subr.bf16.mxu0 %v4423_v56  ;;  %v4498_v54 = vld [vmem:[%s4682_s9 + $0x430] ss:$44 sps:$4 sm:$0xff]   ;;  %v4499_v55 = vld [vmem:[%s4682_s9 + $0x178] ss:$44 sps:$4 sm:$0xff]  }
  0x89   : > { %v4503_v56 = vld [vmem:[%s4682_s9 + $0x48c] ss:$44 sps:$4 sm:$0xff]  }
  0x8b   : > { %4079 = vmatpush3.bf16.msra.mxu0 %v4424_v58  ;;  %v4507_v58 = vld [vmem:[%s4682_s9 + $0x488] ss:$44 sps:$4 sm:$0xff]  }
  0x8c   : > { %4080 = vmatprep.subr.bf16.mxu0 %v4439_v59  ;;  %v4508_v59 = vld [vmem:[%s4682_s9 + $0x1d0] ss:$44 sps:$4 sm:$0xff]  }
  0x8e   : > { %2245 = vmatmul.mubr.bf16.gmra.mrb[52].mxu1 %v4415_v60  ;;  %2342 = vmatmul.mubr.bf16.gmra.mrb[52].mxu0 %v4416_v61  ;;  %v4509_v60 = vld [vmem:[%s4682_s9 + $0x4e4] ss:$44 sps:$4 sm:$0xff]   ;;  %v4511_v61 = vld [vmem:[%s4682_s9 + $0x22c] ss:$44 sps:$4 sm:$0xff]  }
  0x8f   : > { %2252 = vmatprep.mubr.bf16.mxu1 %v4417_v62  ;;  %2349 = vmatprep.mubr.bf16.mxu0 %v4419_v63  ;;  %v4513_v62 = vld [vmem:[%s4682_s9 + $0x4e0] ss:$44 sps:$4 sm:$0xff]   ;;  %v4514_v63 = vld [vmem:[%s4682_s9 + $0x228] ss:$44 sps:$4 sm:$0xff]  }
  0x90   : > { %4081 = vmatpush3.bf16.msra.mxu0 %v4440_v0  ;;  %v4517_v0 = vld [vmem:[%s4682_s9 + $0x53c] ss:$44 sps:$4 sm:$0xff]  }
  0x91   : > { %4082 = vmatprep.subr.bf16.mxu0 %v4455_v1  ;;  %v4519_v1 = vld [vmem:[%s4682_s9 + $0x284] ss:$44 sps:$4 sm:$0xff]  }
  0x94   : > { %4083 = vmatpush3.bf16.msra.mxu0 %v4456_v3 }
  0x95   : > { %4084 = vmatprep.subr.bf16.mxu0 %v4471_v4 }
  0x96   : > { %2253 = vmatmul.mubr.bf16.gmra.mrb[56].mxu1 %v4421_v2  ;;  %2350 = vmatmul.mubr.bf16.gmra.mrb[56].mxu0 %v4422_v5 }
  0x97   : > { %2260 = vmatprep.mubr.bf16.mxu1 %v4427_v6  ;;  %2357 = vmatprep.mubr.bf16.mxu0 %v4429_v7  ;;  %v4521_v6 = vld [vmem:[%s4682_s9 + $0x538] ss:$44 sps:$4 sm:$0xff]   ;;  %v4522_v7 = vld [vmem:[%s4682_s9 + $0x280] ss:$44 sps:$4 sm:$0xff]  }
  0x98   : > { %4085 = vmatpush3.bf16.msra.mxu0 %v4472_v8 }
  0x99   : > { %4086 = vmatprep.subr.bf16.mxu0 %v4486_v9 }
  0x9c   : > { %4087 = vmatpush3.bf16.msra.mxu0 %v4487_v11 }
  0x9d   : > { %4088 = vmatprep.subr.bf16.mxu0 %v4500_v12  ;;  %v4523_v12 = vld [vmem:[%s4682_s9 + $0x2dc] ss:$44 sps:$4 sm:$0xff]  }
  0x9e   : > { %2261 = vmatmul.mubr.bf16.gmra.mrb[60].mxu1 %v4431_v10  ;;  %2358 = vmatmul.mubr.bf16.gmra.mrb[60].mxu0 %v4432_v13  ;;  %v4527_v13 = vld [vmem:[%s4682_s9 + $0x24] ss:$44 sps:$4 sm:$0xff]  }
  0x9f   : > { %2268 = vmatprep.mubr.bf16.mxu1 %v4433_v14  ;;  %2365 = vmatprep.mubr.bf16.mxu0 %v4435_v15 }
  0xa0   : > { %4089 = vmatpush3.bf16.msra.mxu0 %v4501_v16 }
  0xa1   : > { %4090 = vmatprep.subr.bf16.mxu0 %v4515_v17 }
  0xa4   : > { %4091 = vmatpush3.bf16.msra.mxu0 %v4516_v18 }
  0xa6   : > { %2269 = vmatmul.mubr.bf16.gmra.mrb[64].mxu1 %v4437_v19  ;;  %2366 = vmatmul.mubr.bf16.gmra.mrb[64].mxu0 %v4438_v20 }
  0xa7   : > { %2276 = vmatprep.mubr.bf16.mxu1 %v4443_v21  ;;  %2373 = vmatprep.mubr.bf16.mxu0 %v4445_v22  ;;  %v4525_v22 = vld [vmem:[%s4682_s9 + $0x20] ss:$44 sps:$4 sm:$0xff]  }
  0xae   : > { %2277 = vmatmul.mubr.bf16.gmra.mrb[68].mxu1 %v4447_v23  ;;  %2374 = vmatmul.mubr.bf16.gmra.mrb[68].mxu0 %v4448_v24  ;;  %v4528_v23 = vld [vmem:[%s4682_s9 + $0x2d8] ss:$44 sps:$4 sm:$0xff]  }
  0xaf   : > { %2284 = vmatprep.mubr.bf16.mxu1 %v4449_v25  ;;  %2381 = vmatprep.mubr.bf16.mxu0 %v4451_v26 }
  0xb6   : > { %2285 = vmatmul.mubr.bf16.gmra.mrb[72].mxu1 %v4453_v27  ;;  %2382 = vmatmul.mubr.bf16.gmra.mrb[72].mxu0 %v4454_v28  ;;  %v4530_v28 = vld [vmem:[%s4682_s9 + $0x334] ss:$44 sps:$4 sm:$0xff]  }
  0xb7   : > { %2292 = vmatprep.mubr.bf16.mxu1 %v4459_v29  ;;  %2389 = vmatprep.mubr.bf16.mxu0 %v4461_v30  ;;  %v4532_v29 = vld [vmem:[%s4682_s9 + $0x7c] ss:$44 sps:$4 sm:$0xff]  }
  0xbe   : > { %2293 = vmatmul.mubr.bf16.gmra.mrb[76].mxu1 %v4463_v31  ;;  %2390 = vmatmul.mubr.bf16.gmra.mrb[76].mxu0 %v4464_v32 }
  0xbf   : > { %2397 = vmatprep.mubr.bf16.mxu0 %v4465_v33  ;;  %2494 = vmatprep.mubr.bf16.mxu1 %v4469_v34 }
  0xc6   : > { %2398 = vmatmul.mubr.bf16.gmra.mrb[80].mxu0 %v4470_v36  ;;  %2495 = vmatmul.mubr.bf16.vlgmr.msra.gmra.mrb[80].mxu1 %v4467_v35 }
  0xc7   : > { %4209 = vmatpush3.bf16.msra.mxu1 %v4915_v57  ;;  %2405 = vmatprep.mubr.bf16.mxu0 %v4474_v37  ;;  %v4505_v57 = vld [vmem:[%s4682_s9 + $0x1d4] ss:$44 sps:$4 sm:$0xff]  }
  0xc8   : > { %2502 = vmatprep.mubr.bf16.mxu1 %v4476_v38  ;;  %4210 = vmatprep.subr.bf16.mxu1 %v4502_v39  ;;  %v4534_v38 = vld [vmem:[%s4682_s9 + $0x330] ss:$44 sps:$4 sm:$0xff]  }
  0xcb   : > { %4211 = vmatpush3.bf16.msra.mxu1 %v4502_v39  ;;  %v4535_v39 = vld [vmem:[%s4682_s9 + $0x78] ss:$44 sps:$4 sm:$0xff]  }
  0xcc   : > { %4212 = vmatprep.subr.bf16.mxu1 %v4529_v40 }
  0xce   : > { %2406 = vmatmul.mubr.bf16.gmra.mrb[84].mxu0 %v4478_v41  ;;  %2503 = vmatmul.mubr.bf16.gmra.mrb[84].mxu1 %v4479_v42 }
  0xcf   : > { %2413 = vmatprep.mubr.bf16.mxu0 %v4480_v43  ;;  %2510 = vmatprep.mubr.bf16.mxu1 %v4482_v44  ;;  %v4536_v44 = vld [vmem:[%s4682_s9 + $0x38c] ss:$44 sps:$4 sm:$0xff]  }
  0xd0   : > { %4213 = vmatpush3.bf16.msra.mxu1 %v4529_v40 }
  0xd1   : > { %4214 = vmatprep.subr.bf16.mxu1 %v4554_v45 }
  0xd4   : > { %4215 = vmatpush3.bf16.msra.mxu1 %v4554_v45  ;;  %v4538_v45 = vld [vmem:[%s4682_s9 + $0xd4] ss:$44 sps:$4 sm:$0xff]  }
  0xd6   : > { %2414 = vmatmul.mubr.bf16.gmra.mrb[88].mxu0 %v4484_v46  ;;  %2511 = vmatmul.mubr.bf16.gmra.mrb[88].mxu1 %v4485_v47 }
  0xd7   : > { %2421 = vmatprep.mubr.bf16.mxu0 %v4488_v48  ;;  %2518 = vmatprep.mubr.bf16.mxu1 %v4490_v49 }
  0xde   : > { %2422 = vmatmul.mubr.bf16.gmra.mrb[92].mxu0 %v4492_v50  ;;  %2519 = vmatmul.mubr.bf16.gmra.mrb[92].mxu1 %v4493_v51 }
  0xdf   : > { %2429 = vmatprep.mubr.bf16.mxu0 %v4494_v52  ;;  %2526 = vmatprep.mubr.bf16.mxu1 %v4496_v53 }
  0xe6   : > { %2430 = vmatmul.mubr.bf16.gmra.mrb[96].mxu0 %v4498_v54  ;;  %2527 = vmatmul.mubr.bf16.gmra.mrb[96].mxu1 %v4499_v55  ;;  %v4540_v54 = vld [vmem:[%s4682_s9 + $0x388] ss:$44 sps:$4 sm:$0xff]   ;;  %v4541_v55 = vld [vmem:[%s4682_s9 + $0xd0] ss:$44 sps:$4 sm:$0xff]  }
  0xe7   : > { %2437 = vmatprep.mubr.bf16.mxu0 %v4503_v56  ;;  %2534 = vmatprep.mubr.bf16.mxu1 %v4505_v57 }
  0xee   : > { %2438 = vmatmul.mubr.bf16.gmra.mrb[100].mxu0 %v4507_v58  ;;  %2535 = vmatmul.mubr.bf16.gmra.mrb[100].mxu1 %v4508_v59 }
  0xef   : > { %2445 = vmatprep.mubr.bf16.mxu0 %v4509_v60  ;;  %2542 = vmatprep.mubr.bf16.mxu1 %v4511_v61  ;;  %v4542_v60 = vld [vmem:[%s4682_s9 + $0x3e4] ss:$44 sps:$4 sm:$0xff]   ;;  %v4544_v61 = vld [vmem:[%s4682_s9 + $0x12c] ss:$44 sps:$4 sm:$0xff]  }
  0xf6   : > { %2446 = vmatmul.mubr.bf16.gmra.mrb[104].mxu0 %v4513_v62  ;;  %2543 = vmatmul.mubr.bf16.gmra.mrb[104].mxu1 %v4514_v63 }
  0xf7   : > { %2453 = vmatprep.mubr.bf16.mxu0 %v4517_v0  ;;  %2550 = vmatprep.mubr.bf16.mxu1 %v4519_v1 }
  0xf9   : > { %v3644_v2 = vpop.f32.mrb[0].mxu0  ;;  %v3716_v3 = vpop.f32.mrb[0].mxu1 }
  0xfa   : > { %v3645_v4 = vpop.f32.mrb[1].mxu0  ;;  %v3717_v5 = vpop.f32.mrb[1].mxu1 }
  0xfb   : > { %v5025_v8 = vadd.f32 %v3645_v4, %v3644_v2  ;;  %v3647_v9 = vpop.f32.mrb[2].mxu0  ;;  %v5027_v10 = vadd.f32 %v3717_v5, %v3716_v3  ;;  %v3719_v11 = vpop.f32.mrb[2].mxu1  ;;  %v5074_v2 = vld [vmem:[%s5963_s2] ss:$0 sm:$0xff] }
  0xfc   : > { %v3648_v14 = vpop.f32.mrb[3].mxu0  ;;  %v3720_v15 = vpop.f32.mrb[3].mxu1 }
  0xfd   : > { %v5031_v16 = vadd.f32 %v3648_v14, %v3647_v9  ;;  %v5033_v17 = vadd.f32 %v3720_v15, %v3719_v11  ;;  %v4547_v9 = vld [vmem:[%s4682_s9 + $0x128] ss:$44 sps:$4 sm:$0xff]   ;;  %v2014_v11 = vadd.f32 %v5025_v8, %v5074_v2 }
  0xfe   : > { %2454 = vmatmul.mubr.bf16.gmra.mrb[108].mxu0 %v4521_v6  ;;  %2551 = vmatmul.mubr.bf16.gmra.mrb[108].mxu1 %v4522_v7  ;;  %v4546_v7 = vld [vmem:[%s4682_s9 + $0x3e0] ss:$44 sps:$4 sm:$0xff]  }
  0xff   : > { %2558 = vmatprep.mubr.bf16.mxu1 %v4523_v12  ;;  %2655 = vmatprep.mubr.bf16.mxu0 %v4527_v13 }
 0x101   : > { %v3650_v18 = vpop.f32.mrb[4].mxu0  ;;  %v3722_v19 = vpop.f32.mrb[4].mxu1 }
 0x102   : > { %v3651_v20 = vpop.f32.mrb[5].mxu0  ;;  %v3723_v21 = vpop.f32.mrb[5].mxu1 }
 0x103   : > { %v5037_v24 = vadd.f32 %v3651_v20, %v3650_v18  ;;  %v3653_v25 = vpop.f32.mrb[6].mxu0  ;;  %v5039_v26 = vadd.f32 %v3723_v21, %v3722_v19  ;;  %v3725_v27 = vpop.f32.mrb[6].mxu1  ;;  %v4548_v18 = vld [vmem:[%s4682_s9 + $0x43c] ss:$44 sps:$4 sm:$0xff]   ;;  %v4550_v19 = vld [vmem:[%s4682_s9 + $0x184] ss:$44 sps:$4 sm:$0xff]  }
 0x104   : > { %v3654_v30 = vpop.f32.mrb[7].mxu0  ;;  %v3726_v31 = vpop.f32.mrb[7].mxu1 }
 0x105   : > { %v5043_v32 = vadd.f32 %v3654_v30, %v3653_v25  ;;  %v5045_v33 = vadd.f32 %v3726_v31, %v3725_v27 }
 0x106   : > { %2559 = vmatmul.mubr.bf16.gmra.mrb[112].mxu1 %v4528_v23  ;;  %2656 = vmatmul.mubr.bf16.vlgmr.msra.gmra.mrb[112].mxu0 %v4525_v22  ;;  %v2017_v22 = vadd.f32 %v5031_v16, %v5074_v2  ;;  %v2022_v16 = vadd.f32 %v5037_v24, %v5074_v2 }
 0x107   : > { %2566 = vmatprep.mubr.bf16.mxu1 %v4530_v28  ;;  %2663 = vmatprep.mubr.bf16.mxu0 %v4532_v29 }
 0x109   : > { %v3656_v34 = vpop.f32.mrb[8].mxu0  ;;  %v3728_v35 = vpop.f32.mrb[8].mxu1 }
 0x10a   : > { %v3657_v36 = vpop.f32.mrb[9].mxu0  ;;  %v3729_v37 = vpop.f32.mrb[9].mxu1 }
 0x10b   : > { %v5049_v40 = vadd.f32 %v3657_v36, %v3656_v34  ;;  %v3659_v41 = vpop.f32.mrb[10].mxu0  ;;  %v5051_v42 = vadd.f32 %v3729_v37, %v3728_v35  ;;  %v3731_v43 = vpop.f32.mrb[10].mxu1  ;;  %v4552_v34 = vld [vmem:[%s4682_s9 + $0x438] ss:$44 sps:$4 sm:$0xff]   ;;  %v4553_v35 = vld [vmem:[%s4682_s9 + $0x180] ss:$44 sps:$4 sm:$0xff]  }
 0x10c   : > { %v3660_v46 = vpop.f32.mrb[11].mxu0  ;;  %v3732_v47 = vpop.f32.mrb[11].mxu1 }
 0x10d   : > { %v5055_v48 = vadd.f32 %v3660_v46, %v3659_v41  ;;  %v5057_v49 = vadd.f32 %v3732_v47, %v3731_v43  ;;  %v4555_v41 = vld [vmem:[%s4682_s9 + $0x494] ss:$44 sps:$4 sm:$0xff]   ;;  %v4557_v43 = vld [vmem:[%s4682_s9 + $0x1dc] ss:$44 sps:$4 sm:$0xff]   ;;  %v2025_v46 = vadd.f32 %v5043_v32, %v5074_v2  ;;  %v2030_v32 = vadd.f32 %v5049_v40, %v5074_v2 }
 0x10e   : > { %2567 = vmatmul.mubr.bf16.gmra.mrb[116].mxu1 %v4534_v38  ;;  %2664 = vmatmul.mubr.bf16.gmra.mrb[116].mxu0 %v4535_v39 }
 0x10f   : > { %2574 = vmatprep.mubr.bf16.mxu1 %v4536_v44  ;;  %2671 = vmatprep.mubr.bf16.mxu0 %v4538_v45 }
 0x111   : > { %v3662_v50 = vpop.f32.mrb[12].mxu0  ;;  %v3734_v51 = vpop.f32.mrb[12].mxu1 }
 0x112   : > { %v3663_v52 = vpop.f32.mrb[13].mxu0  ;;  %v3735_v53 = vpop.f32.mrb[13].mxu1 }
 0x113   : > { %v5061_v56 = vadd.f32 %v3663_v52, %v3662_v50  ;;  %v3665_v57 = vpop.f32.mrb[14].mxu0  ;;  %v5063_v58 = vadd.f32 %v3735_v53, %v3734_v51  ;;  %v3737_v59 = vpop.f32.mrb[14].mxu1 }
 0x114   : > { %v3666_v62 = vpop.f32.mrb[15].mxu0  ;;  %v3738_v63 = vpop.f32.mrb[15].mxu1 }
 0x115   : > { %v5067_v0 = vadd.f32 %v3666_v62, %v3665_v57  ;;  %v5069_v1 = vadd.f32 %v3738_v63, %v3737_v59  ;;  %v4559_v57 = vld [vmem:[%s4682_s9 + $0x490] ss:$44 sps:$4 sm:$0xff]   ;;  %v4560_v59 = vld [vmem:[%s4682_s9 + $0x1d8] ss:$44 sps:$4 sm:$0xff]  }
 0x116   : > { %2575 = vmatmul.mubr.bf16.gmra.mrb[120].mxu1 %v4540_v54  ;;  %2672 = vmatmul.mubr.bf16.gmra.mrb[120].mxu0 %v4541_v55 }
 0x117   : > { %2582 = vmatprep.mubr.bf16.mxu1 %v4542_v60  ;;  %2679 = vmatprep.mubr.bf16.mxu0 %v4544_v61 }
 0x119   : > { %v3668_v3 = vpop.f32.mrb[16].mxu0  ;;  %v3756_v4 = vpop.f32.mrb[16].mxu1 }
 0x11a   : > { %v3669_v5 = vpop.f32.mrb[17].mxu0  ;;  %v3757_v6 = vpop.f32.mrb[17].mxu1 }
 0x11b   : > { %v5080_v12 = vadd.f32 %v3669_v5, %v3668_v3  ;;  %v3758_v13 = vadd.f32 %v3757_v6, %v3756_v4  ;;  %v3671_v14 = vpop.f32.mrb[18].mxu0  ;;  %v3759_v15 = vpop.f32.mrb[18].mxu1  ;;  %v4561_v3 = vld [vmem:[%s4682_s9 + $0x4ec] ss:$44 sps:$4 sm:$0xff]   ;;  %v4563_v4 = vld [vmem:[%s4682_s9 + $0x234] ss:$44 sps:$4 sm:$0xff]  }
 0x11c   : > { %v3672_v20 = vpop.f32.mrb[19].mxu0  ;;  %v3760_v21 = vpop.f32.mrb[19].mxu1 }
 0x11d   : > { %v5086_v23 = vadd.f32 %v3758_v13, %v2014_v11  ;;  %v5088_v25 = vadd.f32 %v3672_v20, %v3671_v14  ;;  %v3761_v27 = vadd.f32 %v3760_v21, %v3759_v15  ;;  %v4565_v20 = vld [vmem:[%s4682_s9 + $0x4e8] ss:$44 sps:$4 sm:$0xff]   ;;  %v4566_v21 = vld [vmem:[%s4682_s9 + $0x230] ss:$44 sps:$4 sm:$0xff]  }
 0x11e   : > { %2583 = vmatmul.mubr.bf16.gmra.mrb[124].mxu1 %v4546_v7  ;;  %2680 = vmatmul.mubr.bf16.gmra.mrb[124].mxu0 %v4547_v9  ;;  %v2033_v7 = vadd.f32 %v5055_v48, %v5074_v2  ;;  %v2038_v48 = vadd.f32 %v5061_v56, %v5074_v2 }
 0x11f   : > { %v5090_v8 = vadd.f32 %v3761_v27, %v2017_v22  ;;  %2590 = vmatprep.mubr.bf16.mxu1 %v4548_v18  ;;  %2687 = vmatprep.mubr.bf16.mxu0 %v4550_v19 }
 0x121   : > { %v3674_v28 = vpop.f32.mrb[20].mxu0  ;;  %v3762_v29 = vpop.f32.mrb[20].mxu1 }
 0x122   : > { %v3675_v30 = vpop.f32.mrb[21].mxu0  ;;  %v3763_v31 = vpop.f32.mrb[21].mxu1 }
 0x123   : > { %v5096_v36 = vadd.f32 %v3675_v30, %v3674_v28  ;;  %v3764_v37 = vadd.f32 %v3763_v31, %v3762_v29  ;;  %v3677_v38 = vpop.f32.mrb[22].mxu0  ;;  %v3765_v39 = vpop.f32.mrb[22].mxu1  ;;  %v4567_v30 = vld [vmem:[%s4682_s9 + $0x544] ss:$44 sps:$4 sm:$0xff]   ;;  %v4569_v31 = vld [vmem:[%s4682_s9 + $0x28c] ss:$44 sps:$4 sm:$0xff]  }
 0x124   : > { %v3678_v44 = vpop.f32.mrb[23].mxu0  ;;  %v3766_v45 = vpop.f32.mrb[23].mxu1 }
 0x125   : > { %v5102_v47 = vadd.f32 %v3764_v37, %v2022_v16  ;;  %v5104_v50 = vadd.f32 %v3678_v44, %v3677_v38  ;;  %v3767_v51 = vadd.f32 %v3766_v45, %v3765_v39  ;;  %v2041_v16 = vadd.f32 %v5067_v0, %v5074_v2 }
 0x126   : > { %2591 = vmatmul.mubr.bf16.gmra.mrb[128].mxu1 %v4552_v34  ;;  %2688 = vmatmul.mubr.bf16.gmra.mrb[128].mxu0 %v4553_v35  ;;  %v2046_v0 = vadd.f32 %v5080_v12, %v5074_v2 }
 0x127   : > { %v5106_v24 = vadd.f32 %v3767_v51, %v2025_v46  ;;  %2598 = vmatprep.mubr.bf16.mxu1 %v4555_v41  ;;  %2695 = vmatprep.mubr.bf16.mxu0 %v4557_v43  ;;  %v4571_v46 = vld [vmem:[%s4682_s9 + $0x540] ss:$44 sps:$4 sm:$0xff]   ;;  %v4572_v51 = vld [vmem:[%s4682_s9 + $0x288] ss:$44 sps:$4 sm:$0xff]  }
 0x129   : > { %v3680_v52 = vpop.f32.mrb[24].mxu0  ;;  %v3768_v53 = vpop.f32.mrb[24].mxu1 }
 0x12a   : > { %v3681_v54 = vpop.f32.mrb[25].mxu0  ;;  %v3769_v55 = vpop.f32.mrb[25].mxu1 }
 0x12b   : > { %v5112_v60 = vadd.f32 %v3681_v54, %v3680_v52  ;;  %v3770_v61 = vadd.f32 %v3769_v55, %v3768_v53  ;;  %v3683_v62 = vpop.f32.mrb[26].mxu0  ;;  %v3771_v63 = vpop.f32.mrb[26].mxu1 }
 0x12c   : > { %v3684_v5 = vpop.f32.mrb[27].mxu0  ;;  %v3772_v6 = vpop.f32.mrb[27].mxu1 }
 0x12d   : > { %v5118_v9 = vadd.f32 %v3770_v61, %v2030_v32  ;;  %v5120_v11 = vadd.f32 %v3684_v5, %v3683_v62  ;;  %v3773_v13 = vadd.f32 %v3772_v6, %v3771_v63  ;;  %v2049_v62 = vadd.f32 %v5088_v25, %v5074_v2  ;;  %v4577_v25 = vld [vmem:[%s4682_s9 + $0x80] ss:$44 sps:$4 sm:$0xff]  }
 0x12e   : > { %2599 = vmatmul.mubr.bf16.gmra.mrb[132].mxu1 %v4559_v57  ;;  %2696 = vmatmul.mubr.bf16.gmra.mrb[132].mxu0 %v4560_v59  ;;  %v4573_v57 = vld [vmem:[%s4682_s9 + $0x2e4] ss:$44 sps:$4 sm:$0xff]   ;;  %v4575_v59 = vld [vmem:[%s4682_s9 + $0x28] ss:$44 sps:$4 sm:$0xff]  }
 0x12f   : > { %v5122_v40 = vadd.f32 %v3773_v13, %v2033_v7  ;;  %2606 = vmatprep.mubr.bf16.mxu1 %v4561_v3  ;;  %2703 = vmatprep.mubr.bf16.mxu0 %v4563_v4 }
 0x131   : > { %v3686_v14 = vpop.f32.mrb[28].mxu0  ;;  %v3774_v15 = vpop.f32.mrb[28].mxu1 }
 0x132   : > { %v3687_v18 = vpop.f32.mrb[29].mxu0  ;;  %v3775_v19 = vpop.f32.mrb[29].mxu1 }
 0x133   : > { %v5128_v22 = vadd.f32 %v3687_v18, %v3686_v14  ;;  %v3776_v27 = vadd.f32 %v3775_v19, %v3774_v15  ;;  %v3689_v28 = vpop.f32.mrb[30].mxu0  ;;  %v3777_v29 = vpop.f32.mrb[30].mxu1  ;;  %v4576_v14 = vld [vmem:[%s4682_s9 + $0x2e0] ss:$44 sps:$4 sm:$0xff]   ;;  %v2054_v15 = vadd.f32 %v5096_v36, %v5074_v2 }
 0x134   : > { %v3690_v34 = vpop.f32.mrb[31].mxu0  ;;  %v3778_v35 = vpop.f32.mrb[31].mxu1 }
 0x135   : > { %v5134_v37 = vadd.f32 %v3776_v27, %v2038_v48  ;;  %v5136_v38 = vadd.f32 %v3690_v34, %v3689_v28  ;;  %v3779_v39 = vadd.f32 %v3778_v35, %v3777_v29  ;;  %v4578_v48 = vld [vmem:[%s4682_s9 + $0x33c] ss:$44 sps:$4 sm:$0xff]   ;;  %v4580_v27 = vld [vmem:[%s4682_s9 + $0xd8] ss:$44 sps:$4 sm:$0xff]  }
 0x136   : > { %2607 = vmatmul.mubr.bf16.gmra.mrb[136].mxu1 %v4565_v20  ;;  %2704 = vmatmul.mubr.bf16.gmra.mrb[136].mxu0 %v4566_v21 }
 0x137   : > { %v5138_v56 = vadd.f32 %v3779_v39, %v2041_v16  ;;  %2614 = vmatprep.mubr.bf16.mxu1 %v4567_v30  ;;  %2711 = vmatprep.mubr.bf16.mxu0 %v4569_v31  ;;  %v2057_v30 = vadd.f32 %v5104_v50, %v5074_v2  ;;  %v4581_v50 = vld [vmem:[%s4682_s9 + $0x338] ss:$44 sps:$4 sm:$0xff]  }
 0x139   : > { %v3692_v41 = vpop.f32.mrb[32].mxu0  ;;  %v3780_v43 = vpop.f32.mrb[32].mxu1 }
 0x13a   : > { %v3693_v44 = vpop.f32.mrb[33].mxu0  ;;  %v3781_v45 = vpop.f32.mrb[33].mxu1 }
 0x13b   : > { %v5144_v52 = vadd.f32 %v3693_v44, %v3692_v41  ;;  %v3782_v53 = vadd.f32 %v3781_v45, %v3780_v43  ;;  %v3695_v54 = vpop.f32.mrb[34].mxu0  ;;  %v3783_v55 = vpop.f32.mrb[34].mxu1  ;;  %v4582_v44 = vld [vmem:[%s4682_s9 + $0x130] ss:$44 sps:$4 sm:$0xff]   ;;  %v2062_v45 = vadd.f32 %v5112_v60, %v5074_v2 }
 0x13c   : > { %v3696_v32 = vpop.f32.mrb[35].mxu0  ;;  %v3784_v61 = vpop.f32.mrb[35].mxu1 }
 0x13d   : > { %v5150_v63 = vadd.f32 %v3782_v53, %v2046_v0  ;;  %v5152_v3 = vadd.f32 %v3696_v32, %v3695_v54  ;;  %v3785_v12 = vadd.f32 %v3784_v61, %v3783_v55  ;;  %v4583_v54 = vld [vmem:[%s4682_s9 + $0x394] ss:$44 sps:$4 sm:$0xff]   ;;  %v2065_v32 = vadd.f32 %v5120_v11, %v5074_v2  ;;  %v4586_v11 = vld [vmem:[%s4682_s9 + $0x390] ss:$44 sps:$4 sm:$0xff]  }
 0x13e   : > { %2615 = vmatmul.mubr.bf16.gmra.mrb[140].mxu1 %v4571_v46  ;;  %2712 = vmatmul.mubr.bf16.gmra.mrb[140].mxu0 %v4572_v51  ;;  %v4585_v55 = vld [vmem:[%s4682_s9 + $0x188] ss:$44 sps:$4 sm:$0xff]  }
 0x13f   : > { %v5154_v4 = vadd.f32 %v3785_v12, %v2049_v62  ;;  %2719 = vmatprep.mubr.bf16.mxu0 %v4573_v57  ;;  %4216 = vmatprep.mubr.msk.bf16.mxu1 %vm1930_vm0, %v4575_v59 }
 0x141   : > { %v3698_v5 = vpop.f32.mrb[36].mxu0  ;;  %v3786_v6 = vpop.f32.mrb[36].mxu1 }
 0x142   : > { %v3699_v7 = vpop.f32.mrb[37].mxu0  ;;  %v3787_v13 = vpop.f32.mrb[37].mxu1 }
 0x143   : > { %v5161_v18 = vadd.f32 %v3699_v7, %v3698_v5  ;;  %v3788_v19 = vadd.f32 %v3787_v13, %v3786_v6  ;;  %v3701_v20 = vpop.f32.mrb[38].mxu0  ;;  %v3789_v21 = vpop.f32.mrb[38].mxu1 }
 0x144   : > { %v3702_v28 = vpop.f32.mrb[39].mxu0  ;;  %v3790_v29 = vpop.f32.mrb[39].mxu1 }
 0x145   : > { %v5167_v31 = vadd.f32 %v3788_v19, %v2054_v15  ;;  %v5169_v34 = vadd.f32 %v3702_v28, %v3701_v20  ;;  %v3791_v35 = vadd.f32 %v3790_v29, %v3789_v21 }
 0x146   : > { %2720 = vmatmul.mubr.bf16.gmra.mrb[144].mxu0 %v4576_v14  ;;  %4217 = vmatmul.mubr.msk.bf16.vlgmr.msra.gmra.mrb[144].mxu1 %vm1930_vm0, %v4577_v25  ;;  %v4587_v14 = vld [vmem:[%s4682_s9 + $0x1e0] ss:$44 sps:$4 sm:$0xff]   ;;  %v2070_v25 = vadd.f32 %v5128_v22, %v5074_v2 }
 0x147   : > { %v5172_v36 = vadd.f32 %v3791_v35, %v2057_v30  ;;  %2727 = vmatprep.mubr.bf16.mxu0 %v4578_v48  ;;  %4220 = vmatprep.mubr.msk.bf16.mxu1 %vm1930_vm0, %v4580_v27  ;;  %v4588_v48 = vld [vmem:[%s4682_s9 + $0x3ec] ss:$44 sps:$4 sm:$0xff]   ;;  %v2073_v30 = vadd.f32 %v5136_v38, %v5074_v2  ;;  %v4591_v38 = vld [vmem:[%s4682_s9 + $0x3e8] ss:$44 sps:$4 sm:$0xff]  }
 0x148   : > { %v4590_v27 = vld [vmem:[%s4682_s9 + $0x238] ss:$44 sps:$4 sm:$0xff]  }
 0x149   : > { %v3704_v16 = vpop.f32.mrb[40].mxu0  ;;  %v3792_v39 = vpop.f32.mrb[40].mxu1 }
 0x14a   : > { %v3705_v41 = vpop.f32.mrb[41].mxu0  ;;  %v3793_v43 = vpop.f32.mrb[41].mxu1 }
 0x14b   : > { %v5179_v46 = vadd.f32 %v3705_v41, %v3704_v16  ;;  %v3794_v51 = vadd.f32 %v3793_v43, %v3792_v39  ;;  %v3707_v0 = vpop.f32.mrb[42].mxu0  ;;  %v3795_v53 = vpop.f32.mrb[42].mxu1 }
 0x14c   : > { %v3708_v57 = vpop.f32.mrb[43].mxu0  ;;  %v3796_v59 = vpop.f32.mrb[43].mxu1 }
 0x14d   : > { %v5185_v61 = vadd.f32 %v3794_v51, %v2062_v45  ;;  %v5187_v62 = vadd.f32 %v3708_v57, %v3707_v0  ;;  %v3797_v12 = vadd.f32 %v3796_v59, %v3795_v53  ;;  %v4592_v45 = vld [vmem:[%s4682_s9 + $0x290] ss:$44 sps:$4 sm:$0xff]   ;;  %v2078_v51 = vadd.f32 %v5144_v52, %v5074_v2  ;;  %v4595_v59 = vld [vmem:[%s4682_s9 + $0x2e8] ss:$44 sps:$4 sm:$0xff]  }
 0x14e   : > { %2728 = vmatmul.mubr.bf16.gmra.mrb[148].mxu0 %v4581_v50  ;;  %4221 = vmatmul.mubr.msk.bf16.gmra.mrb[148].mxu1 %vm1930_vm0, %v4582_v44  ;;  %v4593_v57 = vld [vmem:[%s4682_s9 + $0x444] ss:$44 sps:$4 sm:$0xff]  }
 0x14f   : > { %v5190_v60 = vadd.f32 %v3797_v12, %v2065_v32  ;;  %2735 = vmatprep.mubr.bf16.mxu0 %v4583_v54  ;;  %4224 = vmatprep.mubr.msk.bf16.mxu1 %vm1930_vm0, %v4585_v55  ;;  %v2081_v32 = vadd.f32 %v5152_v3, %v5074_v2 }
 0x151   : > { %v3710_v5 = vpop.f32.mrb[44].mxu0  ;;  %v3798_v6 = vpop.f32.mrb[44].mxu1 }
 0x152   : > { %v3711_v7 = vpop.f32.mrb[45].mxu0  ;;  %v3799_v13 = vpop.f32.mrb[45].mxu1 }
 0x153   : > { %v5197_v15 = vadd.f32 %v3711_v7, %v3710_v5  ;;  %v3800_v19 = vadd.f32 %v3799_v13, %v3798_v6  ;;  %v3713_v20 = vpop.f32.mrb[46].mxu0  ;;  %v3801_v21 = vpop.f32.mrb[46].mxu1 }
 0x154   : > { %v3714_v28 = vpop.f32.mrb[47].mxu0  ;;  %v3802_v29 = vpop.f32.mrb[47].mxu1 }
 0x155   : > { %v5203_v35 = vadd.f32 %v3800_v19, %v2070_v25  ;;  %v5205_v16 = vadd.f32 %v3714_v28, %v3713_v20  ;;  %v3803_v39 = vadd.f32 %v3802_v29, %v3801_v21  ;;  %v4596_v20 = vld [vmem:[%s4682_s9 + $0x440] ss:$44 sps:$4 sm:$0xff]  }
 0x156   : > { %2736 = vmatmul.mubr.bf16.gmra.mrb[152].mxu0 %v4586_v11  ;;  %4225 = vmatmul.mubr.msk.bf16.gmra.mrb[152].mxu1 %vm1930_vm0, %v4587_v14  ;;  %v4597_v21 = vld [vmem:[%s4682_s9 + $0x340] ss:$44 sps:$4 sm:$0xff]  }
 0x157   : > { %v5208_v22 = vadd.f32 %v3803_v39, %v2073_v30  ;;  %2743 = vmatprep.mubr.bf16.mxu0 %v4588_v48  ;;  %4228 = vmatprep.mubr.msk.bf16.mxu1 %vm1930_vm0, %v4590_v27  ;;  %v2086_v48 = vadd.f32 %v5161_v18, %v5074_v2  ;;  %v4598_v39 = vld [vmem:[%s4682_s9 + $0x49c] ss:$44 sps:$4 sm:$0xff]  }
 0x159   : > { %v3804_v41 = vpop.f32.mrb[48].mxu1  ;;  %v3868_v43 = vpop.f32.mrb[48].mxu0 }
 0x15a   : > { %v3805_v50 = vpop.f32.mrb[49].mxu1  ;;  %v3869_v44 = vpop.f32.mrb[49].mxu0 }
 0x15b   : > { %v3806_v0 = vadd.f32 %v3805_v50, %v3804_v41  ;;  %v3870_v53 = vadd.f32 %v3869_v44, %v3868_v43  ;;  %v3807_v54 = vpop.f32.mrb[50].mxu1  ;;  %v3871_v55 = vpop.f32.mrb[50].mxu0  ;;  %v4600_v41 = vld [vmem:[%s4682_s9 + $0x398] ss:$44 sps:$4 sm:$0xff]  }
 0x15c   : > { %v3808_v12 = vpop.f32.mrb[51].mxu1  ;;  %v3872_v5 = vpop.f32.mrb[51].mxu0 }
 0x15d   : > { %v5219_v6 = vadd.f32 %v3806_v0, %v2078_v51  ;;  %v5222_v7 = vadd.f32 %v3870_v53, %v5086_v23  ;;  %v3809_v13 = vadd.f32 %v3808_v12, %v3807_v54  ;;  %v3873_v52 = vadd.f32 %v3872_v5, %v3871_v55  ;;  %v4601_v55 = vld [vmem:[%s4682_s9 + $0x498] ss:$44 sps:$4 sm:$0xff]  }
 0x15e   : > { %2744 = vmatmul.mubr.bf16.gmra.mrb[156].mxu0 %v4591_v38  ;;  %4229 = vmatmul.mubr.msk.bf16.gmra.mrb[156].mxu1 %vm1930_vm0, %v4592_v45 }
 0x15f   : > { %v5225_v11 = vadd.f32 %v3809_v13, %v2081_v32  ;;  %v5228_v3 = vadd.f32 %v3873_v52, %v5090_v8  ;;  %2751 = vmatprep.mubr.bf16.mxu0 %v4593_v57  ;;  %4232 = vmatprep.mubr.msk.bf16.mxu1 %vm1930_vm0, %v4595_v59  ;;  %v2089_v8 = vadd.f32 %v5169_v34, %v5074_v2  ;;  %v4602_v57 = vld [vmem:[%s4682_s9 + $0x3f0] ss:$44 sps:$4 sm:$0xff]   ;;  %v4603_v52 = vld [vmem:[%s4682_s9 + $0x4f4] ss:$44 sps:$4 sm:$0xff]  }
 0x160   : > { %v2094_v59 = vadd.f32 %v5179_v46, %v5074_v2 }
 0x161   : > { %v3810_v14 = vpop.f32.mrb[52].mxu1  ;;  %v3874_v25 = vpop.f32.mrb[52].mxu0 }
 0x162   : > { %v3811_v19 = vpop.f32.mrb[53].mxu1  ;;  %v3875_v23 = vpop.f32.mrb[53].mxu0 }
 0x163   : > { %v3812_v27 = vadd.f32 %v3811_v19, %v3810_v14  ;;  %v3876_v28 = vadd.f32 %v3875_v23, %v3874_v25  ;;  %v3813_v29 = vpop.f32.mrb[54].mxu1  ;;  %v3877_v30 = vpop.f32.mrb[54].mxu0  ;;  %v4605_v14 = vld [vmem:[%s4682_s9 + $0x448] ss:$44 sps:$4 sm:$0xff]  }
 0x164   : > { %v3814_v43 = vpop.f32.mrb[55].mxu1  ;;  %v3878_v50 = vpop.f32.mrb[55].mxu0 }
 0x165   : > { %v5239_v44 = vadd.f32 %v3812_v27, %v2086_v48  ;;  %v5242_v38 = vadd.f32 %v3876_v28, %v5102_v47  ;;  %v3815_v45 = vadd.f32 %v3814_v43, %v3813_v29  ;;  %v3879_v18 = vadd.f32 %v3878_v50, %v3877_v30  ;;  %v4606_v30 = vld [vmem:[%s4682_s9 + $0x4f0] ss:$44 sps:$4 sm:$0xff]  }
 0x166   : > { %2752 = vmatmul.mubr.bf16.gmra.mrb[160].mxu0 %v4596_v20  ;;  %4233 = vmatmul.mubr.msk.bf16.gmra.mrb[160].mxu1 %vm1930_vm0, %v4597_v21 }
 0x167   : > { %v5245_v51 = vadd.f32 %v3815_v45, %v2089_v8  ;;  %v5248_v34 = vadd.f32 %v3879_v18, %v5106_v24  ;;  %2759 = vmatprep.mubr.bf16.mxu0 %v4598_v39  ;;  %4236 = vmatprep.mubr.msk.bf16.mxu1 %vm1930_vm0, %v4600_v41  ;;  %v2097_v24 = vadd.f32 %v5187_v62, %v5074_v2  ;;  %v4607_v39 = vld [vmem:[%s4682_s9 + $0x4a0] ss:$44 sps:$4 sm:$0xff]  }
 0x168   : > { %v2102_v41 = vadd.f32 %v5197_v15, %v5074_v2  ;;  %v4608_v18 = vld [vmem:[%s4682_s9 + $0x54c] ss:$44 sps:$4 sm:$0xff]  }
 0x169   : > { %v3816_v0 = vpop.f32.mrb[56].mxu1  ;;  %v3880_v53 = vpop.f32.mrb[56].mxu0 }
 0x16a   : > { %v3817_v54 = vpop.f32.mrb[57].mxu1  ;;  %v3881_v47 = vpop.f32.mrb[57].mxu0 }
 0x16b   : > { %v3818_v32 = vadd.f32 %v3817_v54, %v3816_v0  ;;  %v3882_v12 = vadd.f32 %v3881_v47, %v3880_v53  ;;  %v3819_v5 = vpop.f32.mrb[58].mxu1  ;;  %v3883_v13 = vpop.f32.mrb[58].mxu0  ;;  %v4610_v0 = vld [vmem:[%s4682_s9 + $0x4f8] ss:$44 sps:$4 sm:$0xff]  }
 0x16c   : > { %v3820_v25 = vpop.f32.mrb[59].mxu1  ;;  %v3884_v19 = vpop.f32.mrb[59].mxu0 }
 0x16d   : > { %v5259_v23 = vadd.f32 %v3818_v32, %v2094_v59  ;;  %v5262_v20 = vadd.f32 %v3882_v12, %v5118_v9  ;;  %v3821_v21 = vadd.f32 %v3820_v25, %v3819_v5  ;;  %v3885_v46 = vadd.f32 %v3884_v19, %v3883_v13 }
 0x16e   : > { %2760 = vmatmul.mubr.bf16.gmra.mrb[164].mxu0 %v4601_v55  ;;  %4237 = vmatmul.mubr.msk.bf16.gmra.mrb[164].mxu1 %vm1930_vm0, %v4602_v57 }
 0x16f   : > { %v5265_v48 = vadd.f32 %v3821_v21, %v2097_v24  ;;  %v5268_v62 = vadd.f32 %v3885_v46, %v5122_v40  ;;  %2767 = vmatprep.mubr.bf16.mxu0 %v4603_v52  ;;  %4240 = vmatprep.mubr.msk.bf16.mxu1 %vm1930_vm0, %v4605_v14  ;;  %v2105_v40 = vadd.f32 %v5205_v16, %v5074_v2  ;;  %v4611_v52 = vld [vmem:[%s4682_s9 + $0x548] ss:$44 sps:$4 sm:$0xff]  }
 0x170   : > { %v2110_v14 = vadd.f32 %v5027_v10, %v5074_v2 }
 0x171   : > { %v3822_v27 = vpop.f32.mrb[60].mxu1  ;;  %v3886_v28 = vpop.f32.mrb[60].mxu0 }
 0x172   : > { %v3823_v29 = vpop.f32.mrb[61].mxu1  ;;  %v3887_v9 = vpop.f32.mrb[61].mxu0 }
 0x173   : > { %v3824_v8 = vadd.f32 %v3823_v29, %v3822_v27  ;;  %v3888_v43 = vadd.f32 %v3887_v9, %v3886_v28  ;;  %v3825_v50 = vpop.f32.mrb[62].mxu1  ;;  %v3889_v45 = vpop.f32.mrb[62].mxu0 }
 0x174   : > { %v3826_v53 = vpop.f32.mrb[63].mxu1  ;;  %v3890_v54 = vpop.f32.mrb[63].mxu0 }
 0x175   : > { %v5279_v47 = vadd.f32 %v3824_v8, %v2102_v41  ;;  %v5282_v55 = vadd.f32 %v3888_v43, %v5134_v37  ;;  %v3827_v57 = vadd.f32 %v3826_v53, %v3825_v50  ;;  %v3891_v15 = vadd.f32 %v3890_v54, %v3889_v45  ;;  %v4612_v37 = vld [vmem:[%s4682_s9 + $0x550] ss:$44 sps:$4 sm:$0xff]  }
 0x176   : > { %2768 = vmatmul.mubr.bf16.gmra.mrb[168].mxu0 %v4606_v30  ;;  %4241 = vmatmul.mubr.msk.bf16.gmra.mrb[168].mxu1 %vm1930_vm0, %v4607_v39  ;;  %v2118_v50 = vadd.f32 %v5039_v26, %v5074_v2 }
 0x177   : > { %v5285_v59 = vadd.f32 %v3827_v57, %v2105_v40  ;;  %v5288_v32 = vadd.f32 %v3891_v15, %v5138_v56  ;;  %2775 = vmatprep.mubr.bf16.mxu0 %v4608_v18  ;;  %4244 = vmatprep.mubr.msk.bf16.mxu1 %vm1930_vm0, %v4610_v0  ;;  %v2113_v56 = vadd.f32 %v5033_v17, %v5074_v2 }
 0x178   : > { %v2121_v40 = vadd.f32 %v5045_v33, %v5074_v2  ;;  %v2126_v33 = vadd.f32 %v5051_v42, %v5074_v2 }
 0x179   : > { %v3828_v16 = vpop.f32.mrb[64].mxu1  ;;  %v3892_v12 = vpop.f32.mrb[64].mxu0 }
 0x17a   : > { %v3829_v5 = vpop.f32.mrb[65].mxu1  ;;  %v3893_v13 = vpop.f32.mrb[65].mxu0 }
 0x17b   : > { %v3830_v24 = vadd.f32 %v3829_v5, %v3828_v16  ;;  %v3894_v25 = vadd.f32 %v3893_v13, %v3892_v12  ;;  %v3831_v19 = vpop.f32.mrb[66].mxu1  ;;  %v3895_v21 = vpop.f32.mrb[66].mxu0 }
 0x17c   : > { %v3832_v46 = vpop.f32.mrb[67].mxu1  ;;  %v3896_v27 = vpop.f32.mrb[67].mxu0 }
 0x17d   : > { %v5297_v28 = vadd.f32 %v3830_v24, %v2110_v14  ;;  %v5300_v29 = vadd.f32 %v3894_v25, %v5150_v63  ;;  %v3833_v9 = vadd.f32 %v3832_v46, %v3831_v19  ;;  %v3897_v30 = vadd.f32 %v3896_v27, %v3895_v21 }
 0x17e   : > { %2776 = vmatmul.mubr.bf16.gmra.mrb[172].mxu0 %v4611_v52  ;;  %4245 = vmatmul.mubr.msk.bf16.gmra.mrb[172].mxu1 %vm1930_vm0, %v4612_v37 }
 0x17f   : > { %v5303_v10 = vadd.f32 %v3833_v9, %v2113_v56  ;;  %v5306_v39 = vadd.f32 %v3897_v30, %v5154_v4 }
 0x181   : > { %v3834_v41 = vpop.f32.mrb[68].mxu1  ;;  %v3898_v8 = vpop.f32.mrb[68].mxu0 }
 0x182   : > { %v3835_v17 = vpop.f32.mrb[69].mxu1  ;;  %v3899_v43 = vpop.f32.mrb[69].mxu0 }
 0x183   : > { %v3836_v45 = vadd.f32 %v3835_v17, %v3834_v41  ;;  %v3900_v63 = vadd.f32 %v3899_v43, %v3898_v8  ;;  %v3837_v18 = vpop.f32.mrb[70].mxu1  ;;  %v3901_v0 = vpop.f32.mrb[70].mxu0 }
 0x184   : > { %v3838_v53 = vpop.f32.mrb[71].mxu1  ;;  %v3902_v54 = vpop.f32.mrb[71].mxu0 }
 0x185   : > { %v5312_v57 = vadd.f32 %v3836_v45, %v2118_v50  ;;  %v5315_v4 = vadd.f32 %v3900_v63, %v5167_v31  ;;  %v3839_v15 = vadd.f32 %v3838_v53, %v3837_v18  ;;  %v3903_v16 = vadd.f32 %v3902_v54, %v3901_v0 }
 0x186   : > { %v2129_v31 = vadd.f32 %v5057_v49, %v5074_v2  ;;  %v2134_v49 = vadd.f32 %v5063_v58, %v5074_v2 }
 0x187   : > { %v5317_v12 = vadd.f32 %v3839_v15, %v2121_v40  ;;  %v5320_v26 = vadd.f32 %v3903_v16, %v5172_v36 }
 0x189   : > { %v3840_v5 = vpop.f32.mrb[72].mxu1  ;;  %v3904_v13 = vpop.f32.mrb[72].mxu0 }
 0x18a   : > { %v3841_v52 = vpop.f32.mrb[73].mxu1  ;;  %v3905_v37 = vpop.f32.mrb[73].mxu0 }
 0x18b   : > { %v3842_v14 = vadd.f32 %v3841_v52, %v3840_v5  ;;  %v3906_v24 = vadd.f32 %v3905_v37, %v3904_v13  ;;  %v3843_v25 = vpop.f32.mrb[74].mxu1  ;;  %v3907_v19 = vpop.f32.mrb[74].mxu0 }
 0x18c   : > { %v3844_v21 = vpop.f32.mrb[75].mxu1  ;;  %v3908_v56 = vpop.f32.mrb[75].mxu0 }
 0x18d   : > { %v5326_v46 = vadd.f32 %v3842_v14, %v2126_v33  ;;  %v5329_v36 = vadd.f32 %v3906_v24, %v5185_v61  ;;  %v3845_v27 = vadd.f32 %v3844_v21, %v3843_v25  ;;  %v3909_v9 = vadd.f32 %v3908_v56, %v3907_v19 }
 0x18e   : > { %v2137_v61 = vadd.f32 %v5069_v1, %v5074_v2 }
 0x18f   : > { %v5331_v30 = vadd.f32 %v3845_v27, %v2129_v31  ;;  %v5334_v42 = vadd.f32 %v3909_v9, %v5190_v60 }
 0x191   : > { %v3846_v41 = vpop.f32.mrb[76].mxu1  ;;  %v3910_v8 = vpop.f32.mrb[76].mxu0 }
 0x192   : > { %v3847_v17 = vpop.f32.mrb[77].mxu1  ;;  %v3911_v43 = vpop.f32.mrb[77].mxu0 }
 0x193   : > { %v3848_v50 = vadd.f32 %v3847_v17, %v3846_v41  ;;  %v3912_v45 = vadd.f32 %v3911_v43, %v3910_v8  ;;  %v3849_v63 = vpop.f32.mrb[78].mxu1  ;;  %v3913_v18 = vpop.f32.mrb[78].mxu0 }
 0x194   : > { %v3850_v0 = vpop.f32.mrb[79].mxu1  ;;  %v3914_v40 = vpop.f32.mrb[79].mxu0 }
 0x195   : > { %v5340_v53 = vadd.f32 %v3848_v50, %v2134_v49  ;;  %v5343_v60 = vadd.f32 %v3912_v45, %v5203_v35  ;;  %v3851_v54 = vadd.f32 %v3850_v0, %v3849_v63  ;;  %v3915_v15 = vadd.f32 %v3914_v40, %v3913_v18 }
 0x197   : > { %v5345_v16 = vadd.f32 %v3851_v54, %v2137_v61  ;;  %v5348_v58 = vadd.f32 %v3915_v15, %v5208_v22 }
 0x199   : > { %v3916_v5 = vpop.f32.mrb[80].mxu0  ;;  %v3980_v13 = vpop.f32.mrb[80].mxu1 }
 0x19a   : > { %v3917_v52 = vpop.f32.mrb[81].mxu0  ;;  %v3981_v37 = vpop.f32.mrb[81].mxu1 }
 0x19b   : > { %v3918_v33 = vadd.f32 %v3917_v52, %v3916_v5  ;;  %v3982_v1 = vadd.f32 %v3981_v37, %v3980_v13  ;;  %v3919_v2 = vpop.f32.mrb[82].mxu0  ;;  %v3983_v14 = vpop.f32.mrb[82].mxu1 }
 0x19c   : > { %v3920_v24 = vpop.f32.mrb[83].mxu0  ;;  %v3984_v25 = vpop.f32.mrb[83].mxu1 }
 0x19d   : > { %v5351_v35 = vadd.f32 %v3918_v33, %v5219_v6  ;;  %v5354_v19 = vadd.f32 %v3982_v1, %v5222_v7  ;;  %v3921_v31 = vadd.f32 %v3920_v24, %v3919_v2  ;;  %v3985_v21 = vadd.f32 %v3984_v25, %v3983_v14 }
 0x19f   : > { %v5357_v22 = vadd.f32 %v3921_v31, %v5225_v11  ;;  %v5360_v56 = vadd.f32 %v3985_v21, %v5228_v3 }
 0x1a1   : > { %v3922_v27 = vpop.f32.mrb[84].mxu0  ;;  %v3986_v9 = vpop.f32.mrb[84].mxu1 }
 0x1a2   : > { %v3923_v41 = vpop.f32.mrb[85].mxu0  ;;  %v3987_v8 = vpop.f32.mrb[85].mxu1 }
 0x1a3   : > { %v3924_v17 = vadd.f32 %v3923_v41, %v3922_v27  ;;  %v3988_v43 = vadd.f32 %v3987_v8, %v3986_v9  ;;  %v3925_v49 = vpop.f32.mrb[86].mxu0  ;;  %v3989_v6 = vpop.f32.mrb[86].mxu1 }
 0x1a4   : > { %v3926_v50 = vpop.f32.mrb[87].mxu0  ;;  %v3990_v45 = vpop.f32.mrb[87].mxu1 }
 0x1a5   : > { %v5363_v7 = vadd.f32 %v3924_v17, %v5239_v44  ;;  %v5366_v63 = vadd.f32 %v3988_v43, %v5242_v38  ;;  %v3927_v11 = vadd.f32 %v3926_v50, %v3925_v49  ;;  %v3991_v18 = vadd.f32 %v3990_v45, %v3989_v6 }
 0x1a7   : > { %v5369_v3 = vadd.f32 %v3927_v11, %v5245_v51  ;;  %v5372_v61 = vadd.f32 %v3991_v18, %v5248_v34 }
 0x1a9   : > { %v3928_v0 = vpop.f32.mrb[88].mxu0  ;;  %v3992_v40 = vpop.f32.mrb[88].mxu1 }
 0x1aa   : > { %v3929_v54 = vpop.f32.mrb[89].mxu0  ;;  %v3993_v15 = vpop.f32.mrb[89].mxu1 }
 0x1ab   : > { %v3930_v5 = vadd.f32 %v3929_v54, %v3928_v0  ;;  %v3994_v13 = vadd.f32 %v3993_v15, %v3992_v40  ;;  %v3931_v52 = vpop.f32.mrb[90].mxu0  ;;  %v3995_v44 = vpop.f32.mrb[90].mxu1 }
 0x1ac   : > { %v3932_v37 = vpop.f32.mrb[91].mxu0  ;;  %v3996_v33 = vpop.f32.mrb[91].mxu1 }
 0x1ad   : > { %v5375_v38 = vadd.f32 %v3930_v5, %v5259_v23  ;;  %v5378_v1 = vadd.f32 %v3994_v13, %v5262_v20  ;;  %v3933_v51 = vadd.f32 %v3932_v37, %v3931_v52  ;;  %v3997_v2 = vadd.f32 %v3996_v33, %v3995_v44 }
 0x1af   : > { %v5381_v34 = vadd.f32 %v3933_v51, %v5265_v48  ;;  %v5384_v14 = vadd.f32 %v3997_v2, %v5268_v62 }
 0x1b1   : > { %v3934_v24 = vpop.f32.mrb[92].mxu0  ;;  %v3998_v25 = vpop.f32.mrb[92].mxu1 }
 0x1b2   : > { %v3935_v31 = vpop.f32.mrb[93].mxu0  ;;  %v3999_v21 = vpop.f32.mrb[93].mxu1 }
 0x1b3   : > { %v3936_v27 = vadd.f32 %v3935_v31, %v3934_v24  ;;  %v4000_v9 = vadd.f32 %v3999_v21, %v3998_v25  ;;  %v3937_v41 = vpop.f32.mrb[94].mxu0  ;;  %v4001_v23 = vpop.f32.mrb[94].mxu1 }
 0x1b4   : > { %v3938_v8 = vpop.f32.mrb[95].mxu0  ;;  %v4002_v17 = vpop.f32.mrb[95].mxu1 }
 0x1b5   : > { %v5387_v20 = vadd.f32 %v3936_v27, %v5279_v47  ;;  %v5390_v43 = vadd.f32 %v4000_v9, %v5282_v55  ;;  %v3939_v48 = vadd.f32 %v3938_v8, %v3937_v41  ;;  %v4003_v49 = vadd.f32 %v4002_v17, %v4001_v23 }
 0x1b7   : > { %v5393_v62 = vadd.f32 %v3939_v48, %v5285_v59  ;;  %v5396_v6 = vadd.f32 %v4003_v49, %v5288_v32 }
 0x1b9   : > { %v3940_v50 = vpop.f32.mrb[96].mxu0  ;;  %v4004_v45 = vpop.f32.mrb[96].mxu1 }
 0x1ba   : > { %v3941_v11 = vpop.f32.mrb[97].mxu0  ;;  %v4005_v18 = vpop.f32.mrb[97].mxu1 }
 0x1bb   : > { %v3942_v0 = vadd.f32 %v3941_v11, %v3940_v50  ;;  %v4006_v40 = vadd.f32 %v4005_v18, %v4004_v45  ;;  %v3943_v54 = vpop.f32.mrb[98].mxu0  ;;  %v4007_v47 = vpop.f32.mrb[98].mxu1 }
 0x1bc   : > { %v3944_v15 = vpop.f32.mrb[99].mxu0  ;;  %v4008_v5 = vpop.f32.mrb[99].mxu1 }
 0x1bd   : > { %v5399_v55 = vadd.f32 %v3942_v0, %v5297_v28  ;;  %v5402_v13 = vadd.f32 %v4006_v40, %v5300_v29  ;;  %v3945_v59 = vadd.f32 %v3944_v15, %v3943_v54  ;;  %v4009_v52 = vadd.f32 %v4008_v5, %v4007_v47 }
 0x1bf   : > { %v5405_v32 = vadd.f32 %v3945_v59, %v5303_v10  ;;  %v5408_v44 = vadd.f32 %v4009_v52, %v5306_v39 }
 0x1c1   : > { %v3946_v37 = vpop.f32.mrb[100].mxu0  ;;  %v4010_v33 = vpop.f32.mrb[100].mxu1 }
 0x1c2   : > { %v3947_v51 = vpop.f32.mrb[101].mxu0  ;;  %v4011_v2 = vpop.f32.mrb[101].mxu1 }
 0x1c3   : > { %v3948_v24 = vadd.f32 %v3947_v51, %v3946_v37  ;;  %v4012_v25 = vadd.f32 %v4011_v2, %v4010_v33  ;;  %v3949_v31 = vpop.f32.mrb[102].mxu0  ;;  %v4013_v28 = vpop.f32.mrb[102].mxu1 }
 0x1c4   : > { %v3950_v21 = vpop.f32.mrb[103].mxu0  ;;  %v4014_v27 = vpop.f32.mrb[103].mxu1 }
 0x1c5   : > { %v5411_v29 = vadd.f32 %v3948_v24, %v5312_v57  ;;  %v5414_v9 = vadd.f32 %v4012_v25, %v5315_v4  ;;  %v3951_v10 = vadd.f32 %v3950_v21, %v3949_v31  ;;  %v4015_v41 = vadd.f32 %v4014_v27, %v4013_v28 }
 0x1c7   : > { %v5417_v39 = vadd.f32 %v3951_v10, %v5317_v12  ;;  %v5420_v23 = vadd.f32 %v4015_v41, %v5320_v26 }
 0x1c9   : > { %v3952_v8 = vpop.f32.mrb[104].mxu0  ;;  %v4016_v17 = vpop.f32.mrb[104].mxu1 }
 0x1ca   : > { %v3953_v48 = vpop.f32.mrb[105].mxu0  ;;  %v4017_v49 = vpop.f32.mrb[105].mxu1 }
 0x1cb   : > { %v3954_v50 = vadd.f32 %v3953_v48, %v3952_v8  ;;  %v4018_v45 = vadd.f32 %v4017_v49, %v4016_v17  ;;  %v3955_v11 = vpop.f32.mrb[106].mxu0  ;;  %v4019_v57 = vpop.f32.mrb[106].mxu1 }
 0x1cc   : > { %v3956_v18 = vpop.f32.mrb[107].mxu0  ;;  %v4020_v0 = vpop.f32.mrb[107].mxu1 }
 0x1cd   : > { %v5423_v4 = vadd.f32 %v3954_v50, %v5326_v46  ;;  %v5426_v40 = vadd.f32 %v4018_v45, %v5329_v36  ;;  %v3957_v12 = vadd.f32 %v3956_v18, %v3955_v11  ;;  %v4021_v54 = vadd.f32 %v4020_v0, %v4019_v57 }
 0x1cf   : > { %v5429_v26 = vadd.f32 %v3957_v12, %v5331_v30  ;;  %v5432_v47 = vadd.f32 %v4021_v54, %v5334_v42 }
 0x1d1   : > { %v3958_v15 = vpop.f32.mrb[108].mxu0  ;;  %v4022_v5 = vpop.f32.mrb[108].mxu1 }
 0x1d2   : > { %v3959_v59 = vpop.f32.mrb[109].mxu0  ;;  %v4023_v52 = vpop.f32.mrb[109].mxu1 }
 0x1d3   : > { %v3960_v37 = vadd.f32 %v3959_v59, %v3958_v15  ;;  %v4024_v33 = vadd.f32 %v4023_v52, %v4022_v5  ;;  %v3961_v51 = vpop.f32.mrb[110].mxu0  ;;  %v4025_v46 = vpop.f32.mrb[110].mxu1 }
 0x1d4   : > { %v3962_v2 = vpop.f32.mrb[111].mxu0  ;;  %v4026_v24 = vpop.f32.mrb[111].mxu1 }
 0x1d5   : > { %v5435_v36 = vadd.f32 %v3960_v37, %v5340_v53  ;;  %v5438_v25 = vadd.f32 %v4024_v33, %v5343_v60  ;;  %v3963_v30 = vadd.f32 %v3962_v2, %v3961_v51  ;;  %v4027_v31 = vadd.f32 %v4026_v24, %v4025_v46 }
 0x1d7   : > { %v5441_v42 = vadd.f32 %v3963_v30, %v5345_v16  ;;  %v5444_v28 = vadd.f32 %v4027_v31, %v5348_v58 }
 0x1d9   : > { %v4028_v21 = vpop.f32.mrb[112].mxu1  ;;  %v4092_v27 = vpop.f32.mrb[112].mxu0 }
 0x1da   : > { %v4029_v10 = vpop.f32.mrb[113].mxu1  ;;  %v4093_v41 = vpop.f32.mrb[113].mxu0 }
 0x1db   : > { %v4030_v8 = vadd.f32 %v4029_v10, %v4028_v21  ;;  %v4094_v17 = vadd.f32 %v4093_v41, %v4092_v27  ;;  %v4031_v48 = vpop.f32.mrb[114].mxu1  ;;  %v4095_v53 = vpop.f32.mrb[114].mxu0 }
 0x1dc   : > { %v4032_v49 = vpop.f32.mrb[115].mxu1  ;;  %v4096_v50 = vpop.f32.mrb[115].mxu0 }
 0x1dd   : > { %v5447_v60 = vadd.f32 %v4030_v8, %v5351_v35  ;;  %v4033_v45 = vadd.f32 %v4032_v49, %v4031_v48  ;;  %v4097_v11 = vadd.f32 %v4096_v50, %v4095_v53  ;;  %v5450_v16 = vadd.f32 %v4094_v17, %v5354_v19 }
 0x1df   : > { %v5453_v58 = vadd.f32 %v4033_v45, %v5357_v22  ;;  %v5456_v57 = vadd.f32 %v4097_v11, %v5360_v56 }
 0x1e1   : > { %v4034_v18 = vpop.f32.mrb[116].mxu1  ;;  %v4098_v0 = vpop.f32.mrb[116].mxu0 }
 0x1e2   : > { %v4035_v12 = vpop.f32.mrb[117].mxu1  ;;  %v4099_v54 = vpop.f32.mrb[117].mxu0 }
 0x1e3   : > { %v4036_v15 = vadd.f32 %v4035_v12, %v4034_v18  ;;  %v4100_v5 = vadd.f32 %v4099_v54, %v4098_v0  ;;  %v4037_v59 = vpop.f32.mrb[118].mxu1  ;;  %v4101_v35 = vpop.f32.mrb[118].mxu0 }
 0x1e4   : > { %v4038_v52 = vpop.f32.mrb[119].mxu1  ;;  %v4102_v37 = vpop.f32.mrb[119].mxu0 }
 0x1e5   : > { %v5459_v33 = vadd.f32 %v4036_v15, %v5363_v7  ;;  %v4039_v19 = vadd.f32 %v4038_v52, %v4037_v59  ;;  %v4103_v51 = vadd.f32 %v4102_v37, %v4101_v35  ;;  %v5462_v22 = vadd.f32 %v4100_v5, %v5366_v63 }
 0x1e7   : > { %v5465_v56 = vadd.f32 %v4039_v19, %v5369_v3  ;;  %v5468_v46 = vadd.f32 %v4103_v51, %v5372_v61 }
 0x1e9   : > { %v4040_v2 = vpop.f32.mrb[120].mxu1  ;;  %v4104_v24 = vpop.f32.mrb[120].mxu0 }
 0x1ea   : > { %v4041_v30 = vpop.f32.mrb[121].mxu1  ;;  %v4105_v31 = vpop.f32.mrb[121].mxu0 }
 0x1eb   : > { %v4042_v21 = vadd.f32 %v4041_v30, %v4040_v2  ;;  %v4106_v27 = vadd.f32 %v4105_v31, %v4104_v24  ;;  %v4043_v10 = vpop.f32.mrb[122].mxu1  ;;  %v4107_v7 = vpop.f32.mrb[122].mxu0 }
 0x1ec   : > { %v4044_v41 = vpop.f32.mrb[123].mxu1  ;;  %v4108_v8 = vpop.f32.mrb[123].mxu0 }
 0x1ed   : > { %v5471_v17 = vadd.f32 %v4042_v21, %v5375_v38  ;;  %v4045_v63 = vadd.f32 %v4044_v41, %v4043_v10  ;;  %v4109_v48 = vadd.f32 %v4108_v8, %v4107_v7  ;;  %v5474_v3 = vadd.f32 %v4106_v27, %v5378_v1 }
 0x1ef   : > { %v5477_v61 = vadd.f32 %v4045_v63, %v5381_v34  ;;  %v5480_v53 = vadd.f32 %v4109_v48, %v5384_v14 }
 0x1f1   : > { %v4046_v49 = vpop.f32.mrb[124].mxu1  ;;  %v4110_v50 = vpop.f32.mrb[124].mxu0 }
 0x1f2   : > { %v4047_v45 = vpop.f32.mrb[125].mxu1  ;;  %v4111_v11 = vpop.f32.mrb[125].mxu0 }
 0x1f3   : > { %v4048_v18 = vadd.f32 %v4047_v45, %v4046_v49  ;;  %v4112_v0 = vadd.f32 %v4111_v11, %v4110_v50  ;;  %v4049_v12 = vpop.f32.mrb[126].mxu1  ;;  %v4113_v38 = vpop.f32.mrb[126].mxu0 }
 0x1f4   : > { %v4050_v54 = vpop.f32.mrb[127].mxu1  ;;  %v4114_v15 = vpop.f32.mrb[127].mxu0 }
 0x1f5   : > { %v5483_v5 = vadd.f32 %v4048_v18, %v5387_v20  ;;  %v4051_v1 = vadd.f32 %v4050_v54, %v4049_v12  ;;  %v4115_v59 = vadd.f32 %v4114_v15, %v4113_v38  ;;  %v5486_v34 = vadd.f32 %v4112_v0, %v5390_v43 }
 0x1f7   : > { %v5489_v14 = vadd.f32 %v4051_v1, %v5393_v62  ;;  %v5492_v35 = vadd.f32 %v4115_v59, %v5396_v6 }
 0x1f9   : > { %v4052_v52 = vpop.f32.mrb[128].mxu1  ;;  %v4116_v37 = vpop.f32.mrb[128].mxu0 }
 0x1fa   : > { %v4053_v19 = vpop.f32.mrb[129].mxu1  ;;  %v4117_v51 = vpop.f32.mrb[129].mxu0 }
 0x1fb   : > { %v4054_v2 = vadd.f32 %v4053_v19, %v4052_v52  ;;  %v4118_v24 = vadd.f32 %v4117_v51, %v4116_v37  ;;  %v4055_v30 = vpop.f32.mrb[130].mxu1  ;;  %v4119_v20 = vpop.f32.mrb[130].mxu0 }
 0x1fc   : > { %v4056_v31 = vpop.f32.mrb[131].mxu1  ;;  %v4120_v21 = vpop.f32.mrb[131].mxu0 }
 0x1fd   : > { %v5495_v27 = vadd.f32 %v4054_v2, %v5399_v55  ;;  %v4057_v43 = vadd.f32 %v4056_v31, %v4055_v30  ;;  %v4121_v10 = vadd.f32 %v4120_v21, %v4119_v20  ;;  %v5498_v62 = vadd.f32 %v4118_v24, %v5402_v13 }
 0x1fe   : > { %v3145_v20 = vlaneseq }
 0x1ff   : > { %v5501_v6 = vadd.f32 %v4057_v43, %v5405_v32  ;;  %v5504_v7 = vadd.f32 %v4121_v10, %v5408_v44 }
 0x201   : > { %v4058_v41 = vpop.f32.mrb[132].mxu1  ;;  %v4122_v8 = vpop.f32.mrb[132].mxu0 }
 0x202   : > { %v4059_v63 = vpop.f32.mrb[133].mxu1  ;;  %v4123_v48 = vpop.f32.mrb[133].mxu0 }
 0x203   : > { %v4060_v49 = vadd.f32 %v4059_v63, %v4058_v41  ;;  %v4124_v50 = vadd.f32 %v4123_v48, %v4122_v8  ;;  %v4061_v45 = vpop.f32.mrb[134].mxu1  ;;  %v4125_v55 = vpop.f32.mrb[134].mxu0 }
 0x204   : > { %v4062_v11 = vpop.f32.mrb[135].mxu1  ;;  %v4126_v18 = vpop.f32.mrb[135].mxu0 }
 0x205   : > { %v5507_v0 = vadd.f32 %v4060_v49, %v5411_v29  ;;  %v4063_v13 = vadd.f32 %v4062_v11, %v4061_v45  ;;  %v4127_v12 = vadd.f32 %v4126_v18, %v4125_v55  ;;  %v5510_v32 = vadd.f32 %v4124_v50, %v5414_v9 }
 0x206   : > { %v3146_v49 = vshrl.u32 %v3145_v20, 7 }
 0x207   : > { %v5513_v44 = vadd.f32 %v4063_v13, %v5417_v39  ;;  %v5516_v38 = vadd.f32 %v4127_v12, %v5420_v23 }
 0x208   : > { %v3147_v13 = vsub.s32 0, %v3146_v49 }
 0x209   : > { %v4064_v54 = vpop.f32.mrb[136].mxu1  ;;  %v4128_v15 = vpop.f32.mrb[136].mxu0 }
 0x20a   : > { %v4065_v1 = vpop.f32.mrb[137].mxu1  ;;  %v4129_v59 = vpop.f32.mrb[137].mxu0 }
 0x20b   : > { %v4066_v52 = vadd.f32 %v4065_v1, %v4064_v54  ;;  %v4130_v37 = vadd.f32 %v4129_v59, %v4128_v15  ;;  %v4067_v19 = vpop.f32.mrb[138].mxu1  ;;  %v4131_v29 = vpop.f32.mrb[138].mxu0 }
 0x20c   : > { %v4068_v51 = vpop.f32.mrb[139].mxu1  ;;  %v4132_v2 = vpop.f32.mrb[139].mxu0 }
 0x20d   : > { %v5519_v24 = vadd.f32 %v4066_v52, %v5423_v4  ;;  %v4069_v9 = vadd.f32 %v4068_v51, %v4067_v19  ;;  %v4133_v30 = vadd.f32 %v4132_v2, %v4131_v29  ;;  %v5522_v39 = vadd.f32 %v4130_v37, %v5426_v40 }
 0x20f   : > { %v5525_v23 = vadd.f32 %v4069_v9, %v5429_v26  ;;  %v5528_v31 = vadd.f32 %v4133_v30, %v5432_v47  ;;  %v541_v47 = vld [vmem:[%s5963_s2 + $0x3] sm:$0x1] }
 0x210   : > { %v3181_v54 = vsub.f32 1.0, %v541_v47  ;;  %v5556_v37 = vrot.slane %v541_v47, %v3147_v13 }
 0x211   : > { %v4070_v21 = vpop.f32.mrb[140].mxu1  ;;  %v4134_v43 = vpop.f32.mrb[140].mxu0 }
 0x212   : > { %v4071_v10 = vpop.f32.mrb[141].mxu1  ;;  %v4135_v41 = vpop.f32.mrb[141].mxu0  ;;  %v5562_v30 = vrot.slane %v3181_v54, %v3147_v13 }
 0x213   : > { %v4072_v8 = vadd.f32 %v4071_v10, %v4070_v21  ;;  %v4136_v63 = vadd.f32 %v4135_v41, %v4134_v43  ;;  %v4073_v4 = vpop.f32.mrb[142].mxu1  ;;  %v4137_v48 = vpop.f32.mrb[142].mxu0 }
 0x214   : > { %v4074_v50 = vpop.f32.mrb[143].mxu1  ;;  %v4138_v45 = vpop.f32.mrb[143].mxu0 }
 0x215   : > { %v5531_v40 = vadd.f32 %v4072_v8, %v5435_v36  ;;  %v4075_v26 = vadd.f32 %v4074_v50, %v4073_v4  ;;  %v4139_v55 = vadd.f32 %v4138_v45, %v4137_v48  ;;  %v5537_v11 = vadd.f32 %v4136_v63, %v5438_v25  ;;  %v5548_v36 = vld [vmem:[%s5963_s2 + $0x1] ss:$0 sm:$0xff] }
 0x217   : > { %v5540_v18 = vadd.f32 %v4075_v26, %v5441_v42  ;;  %v5543_v12 = vadd.f32 %v4139_v55, %v5444_v28  ;;  %v5554_v42 = vld [vmem:[%s5963_s2 + $0x2] ss:$0 sm:$0xff] }
 0x219   : > { %v4140_v15 = vpop.f32.mrb[144].mxu0  ;;  %v4218_v1 = vpop.f32.mrb[144].mxu1 }
 0x21a   : > { %v2827_v59 = vadd.f32 %v4218_v1, %v5462_v22  ;;  %v4141_v52 = vpop.f32.mrb[145].mxu0  ;;  %v2818_v25 = vpop.f32.mrb[145].mxu1 }
 0x21b   : > { %v5558_v28 = vadd.f32 %v4141_v52, %v4140_v15  ;;  %v2819_v19 = vadd.f32 %v2818_v25, %v5450_v16  ;;  %v4143_v29 = vpop.f32.mrb[146].mxu0  ;;  %v4219_v51 = vpop.f32.mrb[146].mxu1 }
 0x21c   : > { %v2951_v2 = vmul.f32 %v5548_v36, %v2827_v59  ;;  %v3051_v9 = vmax.f32 %v2827_v59, 0.0  ;;  %v2830_v22 = vadd.f32 %v4219_v51, %v5468_v46  ;;  %v4144_v20 = vpop.f32.mrb[147].mxu0  ;;  %v2821_v21 = vpop.f32.mrb[147].mxu1 }
 0x21d   : > { %v2949_v43 = vmul.f32 %v5548_v36, %v2819_v19  ;;  %v3049_v10 = vmax.f32 %v2819_v19, 0.0  ;;  %v5566_v41 = vadd.f32 %v4144_v20, %v4143_v29  ;;  %v2822_v8 = vadd.f32 %v2821_v21, %v5456_v57 }
 0x21e   : > { %v2987_v16 = vadd.f32 %v5554_v42, %v2951_v2  ;;  %v3083_v63 = vmul.f32 %v5548_v36, %v3051_v9  ;;  %v2952_v4 = vmul.f32 %v5548_v36, %v2830_v22  ;;  %v3052_v48 = vmax.f32 %v2830_v22, 0.0 }
 0x21f   : > { %v2985_v49 = vadd.f32 %v5554_v42, %v2949_v43  ;;  %v3081_v46 = vmul.f32 %v5548_v36, %v3049_v10  ;;  %v2950_v50 = vmul.f32 %v5548_v36, %v2822_v8  ;;  %v3050_v45 = vmax.f32 %v2822_v8, 0.0 }
 0x220   : > { %v3019_v26 = vmax.f32 %v2987_v16, 0.0  ;;  %v3115_v55 = vadd.f32 %v5554_v42, %v3083_v63  ;;  %v2988_v57 = vadd.f32 %v5554_v42, %v2952_v4  ;;  %v3084_v47 = vmul.f32 %v5548_v36, %v3052_v48 }
 0x221   : > { %v3017_v13 = vmax.f32 %v2985_v49, 0.0  ;;  %v3113_v54 = vadd.f32 %v5554_v42, %v3081_v46  ;;  %v2986_v15 = vadd.f32 %v5554_v42, %v2950_v50  ;;  %v3082_v1 = vmul.f32 %v5548_v36, %v3050_v45  ;;  %v4146_v59 = vpop.f32.mrb[148].mxu0  ;;  %v4222_v52 = vpop.f32.mrb[148].mxu1 }
 0x222   : > { %v3151_v25 = vmul.f32 %v5556_v37, %v3019_v26  ;;  %v3188_v19 = vmul.f32 %v5562_v30, %v3115_v55  ;;  %v3020_v29 = vmax.f32 %v2988_v57, 0.0  ;;  %v3116_v51 = vadd.f32 %v5554_v42, %v3084_v47  ;;  %v4147_v2 = vpop.f32.mrb[149].mxu0  ;;  %v2834_v9 = vpop.f32.mrb[149].mxu1 }
 0x223   : > { %v3149_v22 = vmul.f32 %v5556_v37, %v3017_v13  ;;  %v3186_v20 = vmul.f32 %v5562_v30, %v3113_v54  ;;  %v3018_v21 = vmax.f32 %v2986_v15, 0.0  ;;  %v3114_v43 = vadd.f32 %v5554_v42, %v3082_v1  ;;  %v4149_v10 = vpop.f32.mrb[150].mxu0  ;;  %v4223_v8 = vpop.f32.mrb[150].mxu1 }
 0x224   : > { %v3220_v16 = vadd.f32 %v3188_v19, %v3151_v25  ;;  %v3152_v63 = vmul.f32 %v5556_v37, %v3020_v29  ;;  %v3189_v4 = vmul.f32 %v5562_v30, %v3116_v51  ;;  %v2843_v48 = vadd.f32 %v4222_v52, %v5486_v34  ;;  %v4150_v49 = vpop.f32.mrb[151].mxu0  ;;  %v2837_v46 = vpop.f32.mrb[151].mxu1 }
 0x225   : > { %v3218_v50 = vadd.f32 %v3186_v20, %v3149_v22  ;;  %v3150_v45 = vmul.f32 %v5556_v37, %v3018_v21  ;;  %v3187_v26 = vmul.f32 %v5562_v30, %v3114_v43  ;;  %v5598_v55 = vadd.f32 %v4147_v2, %v4146_v59 }
 0x226   : > { %3252 = vst.msk [vmem:[%s5588_s27 + $0x10] sm:$0xff] %vm1930_vm0, %v3220_v16  ;;  %v3221_v57 = vadd.f32 %v3189_v4, %v3152_v63  ;;  %v2955_v47 = vmul.f32 %v5548_v36, %v2843_v48  ;;  %v3055_v13 = vmax.f32 %v2843_v48, 0.0  ;;  %v2835_v54 = vadd.f32 %v2834_v9, %v5474_v3 }
 0x227   : > { %3250 = vst.msk [vmem:[%s5588_s27] sm:$0xff] %vm1930_vm0, %v3218_v50  ;;  %v3219_v34 = vadd.f32 %v3187_v26, %v3150_v45  ;;  %v2846_v15 = vadd.f32 %v4223_v8, %v5492_v35  ;;  %v5607_v1 = vadd.f32 %v4150_v49, %v4149_v10  ;;  %v2838_v52 = vadd.f32 %v2837_v46, %v5480_v53 }
 0x228   : > { %3253 = vst.msk [vmem:[%s5588_s27 + $0x18] sm:$0xff] %vm1930_vm0, %v3221_v57  ;;  %v2991_v59 = vadd.f32 %v5554_v42, %v2955_v47  ;;  %v3087_v25 = vmul.f32 %v5548_v36, %v3055_v13  ;;  %v2953_v19 = vmul.f32 %v5548_v36, %v2835_v54  ;;  %v3053_v29 = vmax.f32 %v2835_v54, 0.0 }
 0x229   : > { %3251 = vst.msk [vmem:[%s5588_s27 + $0x8] sm:$0xff] %vm1930_vm0, %v3219_v34  ;;  %v2956_v3 = vmul.f32 %v5548_v36, %v2846_v15  ;;  %v3056_v51 = vmax.f32 %v2846_v15, 0.0  ;;  %v2954_v35 = vmul.f32 %v5548_v36, %v2838_v52  ;;  %v3054_v2 = vmax.f32 %v2838_v52, 0.0  ;;  %v4152_v9 = vpop.f32.mrb[152].mxu0  ;;  %v4226_v22 = vpop.f32.mrb[152].mxu1 }
 0x22a   : > { %v3023_v53 = vmax.f32 %v2991_v59, 0.0  ;;  %v3119_v20 = vadd.f32 %v5554_v42, %v3087_v25  ;;  %v2989_v21 = vadd.f32 %v5554_v42, %v2953_v19  ;;  %v3085_v43 = vmul.f32 %v5548_v36, %v3053_v29  ;;  %v4153_v10 = vpop.f32.mrb[153].mxu0  ;;  %v2850_v8 = vpop.f32.mrb[153].mxu1 }
 0x22b   : > { %v2992_v16 = vadd.f32 %v5554_v42, %v2956_v3  ;;  %v3088_v63 = vmul.f32 %v5548_v36, %v3056_v51  ;;  %v2990_v4 = vadd.f32 %v5554_v42, %v2954_v35  ;;  %v3086_v48 = vmul.f32 %v5548_v36, %v3054_v2  ;;  %v4155_v49 = vpop.f32.mrb[154].mxu0  ;;  %v4227_v46 = vpop.f32.mrb[154].mxu1 }
 0x22c   : > { %v3155_v50 = vmul.f32 %v5556_v37, %v3023_v53  ;;  %v3192_v45 = vmul.f32 %v5562_v30, %v3119_v20  ;;  %v3021_v26 = vmax.f32 %v2989_v21, 0.0  ;;  %v3117_v57 = vadd.f32 %v5554_v42, %v3085_v43  ;;  %v4156_v47 = vpop.f32.mrb[155].mxu0  ;;  %v2853_v13 = vpop.f32.mrb[155].mxu1 }
 0x22d   : > { %v3024_v54 = vmax.f32 %v2992_v16, 0.0  ;;  %v3120_v34 = vadd.f32 %v5554_v42, %v3088_v63  ;;  %v3022_v15 = vmax.f32 %v2990_v4, 0.0  ;;  %v3118_v52 = vadd.f32 %v5554_v42, %v3086_v48 }
 0x22e   : > { %v3224_v59 = vadd.f32 %v3192_v45, %v3155_v50  ;;  %v3153_v25 = vmul.f32 %v5556_v37, %v3021_v26  ;;  %v3190_v19 = vmul.f32 %v5562_v30, %v3117_v57  ;;  %v2859_v29 = vadd.f32 %v4226_v22, %v5510_v32 }
 0x22f   : > { %v3156_v3 = vmul.f32 %v5556_v37, %v3024_v54  ;;  %v3193_v51 = vmul.f32 %v5562_v30, %v3120_v34  ;;  %v3154_v35 = vmul.f32 %v5556_v37, %v3022_v15  ;;  %v3191_v2 = vmul.f32 %v5562_v30, %v3118_v52 }
 0x230   : > { %3256 = vst.msk [vmem:[%s5588_s27 + $0x30] sm:$0xff] %vm1930_vm0, %v3224_v59  ;;  %v3222_v53 = vadd.f32 %v3190_v19, %v3153_v25  ;;  %v2959_v20 = vmul.f32 %v5548_v36, %v2859_v29  ;;  %v3059_v21 = vmax.f32 %v2859_v29, 0.0  ;;  %v5641_v43 = vadd.f32 %v4153_v10, %v4152_v9 }
 0x231   : > { %v3225_v32 = vadd.f32 %v3193_v51, %v3156_v3  ;;  %v3223_v22 = vadd.f32 %v3191_v2, %v3154_v35  ;;  %v2851_v16 = vadd.f32 %v2850_v8, %v5498_v62  ;;  %v2862_v63 = vadd.f32 %v4227_v46, %v5516_v38  ;;  %v4158_v4 = vpop.f32.mrb[156].mxu0  ;;  %v4230_v48 = vpop.f32.mrb[156].mxu1 }
 0x232   : > { %3254 = vst.msk [vmem:[%s5588_s27 + $0x20] sm:$0xff] %vm1930_vm0, %v3222_v53  ;;  %v2995_v50 = vadd.f32 %v5554_v42, %v2959_v20  ;;  %v3091_v45 = vmul.f32 %v5548_v36, %v3059_v21  ;;  %v5649_v26 = vadd.f32 %v4156_v47, %v4155_v49  ;;  %v2854_v57 = vadd.f32 %v2853_v13, %v5504_v7  ;;  %v4159_v9 = vpop.f32.mrb[157].mxu0  ;;  %v2866_v10 = vpop.f32.mrb[157].mxu1 }
 0x233   : > { %3257 = vst.msk [vmem:[%s5588_s27 + $0x38] sm:$0xff] %vm1930_vm0, %v3225_v32  ;;  %3255 = vst.msk [vmem:[%s5588_s27 + $0x28] sm:$0xff] %vm1930_vm0, %v3223_v22  ;;  %v2957_v62 = vmul.f32 %v5548_v36, %v2851_v16  ;;  %v3057_v38 = vmax.f32 %v2851_v16, 0.0  ;;  %v2960_v8 = vmul.f32 %v5548_v36, %v2862_v63  ;;  %v3060_v46 = vmax.f32 %v2862_v63, 0.0  ;;  %v4161_v54 = vpop.f32.mrb[158].mxu0  ;;  %v4231_v34 = vpop.f32.mrb[158].mxu1 }
 0x234   : > { %v3027_v15 = vmax.f32 %v2995_v50, 0.0  ;;  %v3123_v49 = vadd.f32 %v5554_v42, %v3091_v45  ;;  %v2958_v47 = vmul.f32 %v5548_v36, %v2854_v57  ;;  %v3058_v7 = vmax.f32 %v2854_v57, 0.0  ;;  %v4162_v13 = vpop.f32.mrb[159].mxu0  ;;  %v2869_v52 = vpop.f32.mrb[159].mxu1 }
 0x235   : > { %v2993_v59 = vadd.f32 %v5554_v42, %v2957_v62  ;;  %v3089_v25 = vmul.f32 %v5548_v36, %v3057_v38  ;;  %v2996_v19 = vadd.f32 %v5554_v42, %v2960_v8  ;;  %v3092_v29 = vmul.f32 %v5548_v36, %v3060_v46 }
 0x236   : > { %v3159_v3 = vmul.f32 %v5556_v37, %v3027_v15  ;;  %v3196_v51 = vmul.f32 %v5562_v30, %v3123_v49  ;;  %v2994_v35 = vadd.f32 %v5554_v42, %v2958_v47  ;;  %v3090_v2 = vmul.f32 %v5548_v36, %v3058_v7 }
 0x237   : > { %v3025_v53 = vmax.f32 %v2993_v59, 0.0  ;;  %v3121_v20 = vadd.f32 %v5554_v42, %v3089_v25  ;;  %v3028_v21 = vmax.f32 %v2996_v19, 0.0  ;;  %v3124_v32 = vadd.f32 %v5554_v42, %v3092_v29 }
 0x238   : > { %v3228_v22 = vadd.f32 %v3196_v51, %v3159_v3  ;;  %v3026_v16 = vmax.f32 %v2994_v35, 0.0  ;;  %v3122_v63 = vadd.f32 %v5554_v42, %v3090_v2  ;;  %v2875_v50 = vadd.f32 %v4230_v48, %v5537_v11 }
 0x239   : > { %v3157_v45 = vmul.f32 %v5556_v37, %v3025_v53  ;;  %v3194_v57 = vmul.f32 %v5562_v30, %v3121_v20  ;;  %v3160_v62 = vmul.f32 %v5556_v37, %v3028_v21  ;;  %v3197_v38 = vmul.f32 %v5562_v30, %v3124_v32  ;;  %v4164_v8 = vpop.f32.mrb[160].mxu0  ;;  %v4234_v46 = vpop.f32.mrb[160].mxu1 }
 0x23a   : > { %3260 = vst.msk [vmem:[%s5588_s27 + $0x50] sm:$0xff] %vm1930_vm0, %v3228_v22  ;;  %v3158_v15 = vmul.f32 %v5556_v37, %v3026_v16  ;;  %v3195_v49 = vmul.f32 %v5562_v30, %v3122_v63  ;;  %v2963_v47 = vmul.f32 %v5548_v36, %v2875_v50  ;;  %v3063_v11 = vmax.f32 %v2875_v50, 0.0  ;;  %v4165_v48 = vpop.f32.mrb[161].mxu0  ;;  %v5681_v7 = vpop.f32.mrb[161].mxu1 }
 0x23b   : > { %v3226_v59 = vadd.f32 %v3194_v57, %v3157_v45  ;;  %v3229_v25 = vadd.f32 %v3197_v38, %v3160_v62  ;;  %v5683_v19 = vadd.f32 %v4159_v9, %v4158_v4  ;;  %v2867_v29 = vadd.f32 %v2866_v10, %v5522_v39  ;;  %v5686_v3 = vpop.f32.mrb[162].mxu0  ;;  %v5688_v51 = vpop.f32.mrb[162].mxu1 }
 0x23c   : > { %v3227_v35 = vadd.f32 %v3195_v49, %v3158_v15  ;;  %v2999_v2 = vadd.f32 %v5554_v42, %v2963_v47  ;;  %v3095_v53 = vmul.f32 %v5548_v36, %v3063_v11  ;;  %v2878_v20 = vadd.f32 %v4231_v34, %v5543_v12  ;;  %v4168_v21 = vpop.f32.mrb[163].mxu0  ;;  %v5693_v32 = vpop.f32.mrb[163].mxu1 }
 0x23d   : > { %3258 = vst.msk [vmem:[%s5588_s27 + $0x40] sm:$0xff] %vm1930_vm0, %v3226_v59  ;;  %3261 = vst.msk [vmem:[%s5588_s27 + $0x58] sm:$0xff] %vm1930_vm0, %v3229_v25  ;;  %v2961_v39 = vmul.f32 %v5548_v36, %v2867_v29  ;;  %v3061_v4 = vmax.f32 %v2867_v29, 0.0  ;;  %v5700_v9 = vadd.f32 %v4162_v13, %v4161_v54  ;;  %v2870_v10 = vadd.f32 %v2869_v52, %v5528_v31 }
 0x23e   : > { %3259 = vst.msk [vmem:[%s5588_s27 + $0x48] sm:$0xff] %vm1930_vm0, %v3227_v35  ;;  %v3031_v22 = vmax.f32 %v2999_v2, 0.0  ;;  %v3127_v16 = vadd.f32 %v5554_v42, %v3095_v53  ;;  %v2964_v12 = vmul.f32 %v5548_v36, %v2878_v20  ;;  %v3064_v34 = vmax.f32 %v2878_v20, 0.0 }
 0x23f   : > { %v2997_v63 = vadd.f32 %v5554_v42, %v2961_v39  ;;  %v3093_v50 = vmul.f32 %v5548_v36, %v3061_v4  ;;  %v2962_v45 = vmul.f32 %v5548_v36, %v2870_v10  ;;  %v3062_v57 = vmax.f32 %v2870_v10, 0.0 }
 0x240   : > { %v3163_v54 = vmul.f32 %v5556_v37, %v3031_v22  ;;  %v3200_v13 = vmul.f32 %v5562_v30, %v3127_v16  ;;  %v3000_v31 = vadd.f32 %v5554_v42, %v2964_v12  ;;  %v3096_v52 = vmul.f32 %v5548_v36, %v3064_v34 }
 0x241   : > { %v3029_v62 = vmax.f32 %v2997_v63, 0.0  ;;  %v3125_v38 = vadd.f32 %v5554_v42, %v3093_v50  ;;  %v2998_v15 = vadd.f32 %v5554_v42, %v2962_v45  ;;  %v3094_v49 = vmul.f32 %v5548_v36, %v3062_v57  ;;  %v4170_v47 = vpop.f32.mrb[164].mxu0  ;;  %v5717_v11 = vpop.f32.mrb[164].mxu1 }
 0x242   : > { %v3232_v59 = vadd.f32 %v3200_v13, %v3163_v54  ;;  %v3032_v25 = vmax.f32 %v3000_v31, 0.0  ;;  %v3128_v29 = vadd.f32 %v5554_v42, %v3096_v52  ;;  %v2730_v35 = vadd.f32 %v5598_v55, %v5459_v33  ;;  %v4171_v2 = vpop.f32.mrb[165].mxu0  ;;  %v5722_v53 = vpop.f32.mrb[165].mxu1 }
 0x243   : > { %v3161_v20 = vmul.f32 %v5556_v37, %v3029_v62  ;;  %v3198_v39 = vmul.f32 %v5562_v30, %v3125_v38  ;;  %v3030_v4 = vmax.f32 %v2998_v15, 0.0  ;;  %v3126_v10 = vadd.f32 %v5554_v42, %v3094_v49  ;;  %v5727_v22 = vpop.f32.mrb[166].mxu0  ;;  %v5729_v16 = vpop.f32.mrb[166].mxu1 }
 0x244   : > { %3264 = vst.msk [vmem:[%s5588_s27 + $0x70] sm:$0xff] %vm1930_vm0, %v3232_v59  ;;  %v3164_v12 = vmul.f32 %v5556_v37, %v3032_v25  ;;  %v3201_v33 = vmul.f32 %v5562_v30, %v3128_v29  ;;  %v2891_v55 = vadd.f32 %v4234_v46, %v2730_v35  ;;  %v5735_v34 = vadd.f32 %v4165_v48, %v4164_v8  ;;  %v5737_v63 = vpop.f32.mrb[167].mxu0  ;;  %v5739_v50 = vpop.f32.mrb[167].mxu1 }
 0x245   : > { %v3230_v45 = vadd.f32 %v3198_v39, %v3161_v20  ;;  %v3162_v57 = vmul.f32 %v5556_v37, %v3030_v4  ;;  %v3199_v54 = vmul.f32 %v5562_v30, %v3126_v10  ;;  %v2722_v13 = vadd.f32 %v5558_v28, %v5447_v60 }
 0x246   : > { %v3233_v31 = vadd.f32 %v3201_v33, %v3164_v12  ;;  %v2967_v52 = vmul.f32 %v5548_v36, %v2891_v55  ;;  %v3067_v46 = vmax.f32 %v2891_v55, 0.0  ;;  %v2733_v8 = vadd.f32 %v5607_v1, %v5465_v56 }
 0x247   : > { %3262 = vst.msk [vmem:[%s5588_s27 + $0x60] sm:$0xff] %vm1930_vm0, %v3230_v45  ;;  %v3231_v48 = vadd.f32 %v3199_v54, %v3162_v57  ;;  %v2883_v62 = vadd.f32 %v5681_v7, %v2722_v13  ;;  %v5752_v38 = vadd.f32 %v4168_v21, %v5686_v3  ;;  %v2725_v15 = vadd.f32 %v5566_v41, %v5453_v58 }
 0x248   : > { %3265 = vst.msk [vmem:[%s5588_s27 + $0x78] sm:$0xff] %vm1930_vm0, %v3233_v31  ;;  %v3003_v60 = vadd.f32 %v5554_v42, %v2967_v52  ;;  %v3099_v28 = vmul.f32 %v5548_v36, %v3067_v46  ;;  %v2894_v49 = vadd.f32 %v5688_v51, %v2733_v8  ;;  %v2746_v56 = vadd.f32 %v5683_v19, %v5483_v5 }
 0x249   : > { %3263 = vst.msk [vmem:[%s5588_s27 + $0x68] sm:$0xff] %vm1930_vm0, %v3231_v48  ;;  %v2965_v1 = vmul.f32 %v5548_v36, %v2883_v62  ;;  %v3065_v7 = vmax.f32 %v2883_v62, 0.0  ;;  %v2886_v3 = vadd.f32 %v5693_v32, %v2725_v15  ;;  %v4172_v21 = vadd.f32 %v4171_v2, %v4170_v47  ;;  %v5767_v58 = vpop.f32.mrb[168].mxu0  ;;  %v5769_v41 = vpop.f32.mrb[168].mxu1 }
 0x24a   : > { %v3035_v59 = vmax.f32 %v3003_v60, 0.0  ;;  %v3131_v25 = vadd.f32 %v5554_v42, %v3099_v28  ;;  %v2968_v51 = vmul.f32 %v5548_v36, %v2894_v49  ;;  %v3068_v29 = vmax.f32 %v2894_v49, 0.0  ;;  %v4177_v35 = vpop.f32.mrb[169].mxu0  ;;  %v5773_v5 = vpop.f32.mrb[169].mxu1 }
 0x24b   : > { %v3001_v19 = vadd.f32 %v5554_v42, %v2965_v1  ;;  %v3097_v20 = vmul.f32 %v5548_v36, %v3065_v7  ;;  %v2966_v32 = vmul.f32 %v5548_v36, %v2886_v3  ;;  %v3066_v47 = vmax.f32 %v2886_v3, 0.0  ;;  %v5778_v2 = vpop.f32.mrb[170].mxu0  ;;  %v5780_v39 = vpop.f32.mrb[170].mxu1 }
 0x24c   : > { %v3167_v4 = vmul.f32 %v5556_v37, %v3035_v59  ;;  %v3204_v10 = vmul.f32 %v5562_v30, %v3131_v25  ;;  %v3004_v12 = vadd.f32 %v5554_v42, %v2968_v51  ;;  %v3100_v33 = vmul.f32 %v5548_v36, %v3068_v29  ;;  %v5786_v55 = vpop.f32.mrb[171].mxu0  ;;  %v5788_v45 = vpop.f32.mrb[171].mxu1 }
 0x24d   : > { %v3033_v57 = vmax.f32 %v3001_v19, 0.0  ;;  %v3129_v54 = vadd.f32 %v5554_v42, %v3097_v20  ;;  %v3002_v13 = vadd.f32 %v5554_v42, %v2966_v32  ;;  %v3098_v31 = vmul.f32 %v5548_v36, %v3066_v47 }
 0x24e   : > { %v3236_v52 = vadd.f32 %v3204_v10, %v3167_v4  ;;  %v3036_v46 = vmax.f32 %v3004_v12, 0.0  ;;  %v3132_v8 = vadd.f32 %v5554_v42, %v3100_v33  ;;  %v2907_v48 = vadd.f32 %v5717_v11, %v2746_v56 }
 0x24f   : > { %v3165_v62 = vmul.f32 %v5556_v37, %v3033_v57  ;;  %v3202_v15 = vmul.f32 %v5562_v30, %v3129_v54  ;;  %v3034_v60 = vmax.f32 %v3002_v13, 0.0  ;;  %v3130_v28 = vadd.f32 %v5554_v42, %v3098_v31 }
 0x250   : > { %3268 = vst.msk [vmem:[%s5588_s27 + $0x90] sm:$0xff] %vm1930_vm0, %v3236_v52  ;;  %v3168_v49 = vmul.f32 %v5556_v37, %v3036_v46  ;;  %v3205_v1 = vmul.f32 %v5562_v30, %v3132_v8  ;;  %v2971_v7 = vmul.f32 %v5548_v36, %v2907_v48  ;;  %v3071_v3 = vmax.f32 %v2907_v48, 0.0 }
 0x251   : > { %v3234_v59 = vadd.f32 %v3202_v15, %v3165_v62  ;;  %v3166_v11 = vmul.f32 %v5556_v37, %v3034_v60  ;;  %v3203_v56 = vmul.f32 %v5562_v30, %v3130_v28  ;;  %v2738_v25 = vadd.f32 %v5641_v43, %v5471_v17  ;;  %v5807_v51 = vpop.f32.mrb[172].mxu0  ;;  %v5809_v29 = vpop.f32.mrb[172].mxu1 }
 0x252   : > { %v3237_v19 = vadd.f32 %v3205_v1, %v3168_v49  ;;  %v3007_v20 = vadd.f32 %v5554_v42, %v2971_v7  ;;  %v3103_v32 = vmul.f32 %v5548_v36, %v3071_v3  ;;  %v2749_v47 = vadd.f32 %v5700_v9, %v5489_v14  ;;  %v5815_v4 = vpop.f32.mrb[173].mxu0  ;;  %v5817_v10 = vpop.f32.mrb[173].mxu1 }
 0x253   : > { %3266 = vst.msk [vmem:[%s5588_s27 + $0x80] sm:$0xff] %vm1930_vm0, %v3234_v59  ;;  %v3235_v17 = vadd.f32 %v3203_v56, %v3166_v11  ;;  %v2899_v43 = vadd.f32 %v5722_v53, %v2738_v25  ;;  %v4175_v12 = vadd.f32 %v5737_v63, %v5727_v22  ;;  %v2741_v33 = vadd.f32 %v5649_v26, %v5477_v61  ;;  %v5826_v57 = vpop.f32.mrb[174].mxu0  ;;  %v5828_v54 = vpop.f32.mrb[174].mxu1 }
 0x254   : > { %3269 = vst.msk [vmem:[%s5588_s27 + $0x98] sm:$0xff] %vm1930_vm0, %v3237_v19  ;;  %v3039_v14 = vmax.f32 %v3007_v20, 0.0  ;;  %v3135_v9 = vadd.f32 %v5554_v42, %v3103_v32  ;;  %v2910_v13 = vadd.f32 %v5729_v16, %v2749_v47  ;;  %v2762_v31 = vadd.f32 %v4172_v21, %v5507_v0  ;;  %v5835_v53 = vpop.f32.mrb[175].mxu0  ;;  %v5837_v52 = vpop.f32.mrb[175].mxu1 }
 0x255   : > { %3267 = vst.msk [vmem:[%s5588_s27 + $0x88] sm:$0xff] %vm1930_vm0, %v3235_v17  ;;  %v2969_v61 = vmul.f32 %v5548_v36, %v2899_v43  ;;  %v3069_v26 = vmax.f32 %v2899_v43, 0.0  ;;  %v2902_v22 = vadd.f32 %v5739_v50, %v2741_v33  ;;  %v4178_v63 = vadd.f32 %v4177_v35, %v5767_v58 }
 0x256   : > { %v3171_v46 = vmul.f32 %v5556_v37, %v3039_v14  ;;  %v3208_v16 = vmul.f32 %v5562_v30, %v3135_v9  ;;  %v2972_v0 = vmul.f32 %v5548_v36, %v2910_v13  ;;  %v3072_v21 = vmax.f32 %v2910_v13, 0.0 }
 0x257   : > { %v3005_v8 = vadd.f32 %v5554_v42, %v2969_v61  ;;  %v3101_v48 = vmul.f32 %v5548_v36, %v3069_v26  ;;  %v2970_v62 = vmul.f32 %v5548_v36, %v2902_v22  ;;  %v3070_v15 = vmax.f32 %v2902_v22, 0.0 }
 0x258   : > { %v3240_v60 = vadd.f32 %v3208_v16, %v3171_v46  ;;  %v3008_v50 = vadd.f32 %v5554_v42, %v2972_v0  ;;  %v3104_v58 = vmul.f32 %v5548_v36, %v3072_v21  ;;  %v2923_v35 = vadd.f32 %v5769_v41, %v2762_v31 }
 0x259   : > { %v3037_v28 = vmax.f32 %v3005_v8, 0.0  ;;  %v3133_v49 = vadd.f32 %v5554_v42, %v3101_v48  ;;  %v3006_v1 = vadd.f32 %v5554_v42, %v2970_v62  ;;  %v3102_v7 = vmul.f32 %v5548_v36, %v3070_v15 }
 0x25a   : > { %3272 = vst.msk [vmem:[%s5588_s27 + $0xb0] sm:$0xff] %vm1930_vm0, %v3240_v60  ;;  %v3040_v3 = vmax.f32 %v3008_v50, 0.0  ;;  %v3136_v59 = vadd.f32 %v5554_v42, %v3104_v58  ;;  %v2975_v11 = vmul.f32 %v5548_v36, %v2923_v35  ;;  %v3075_v56 = vmax.f32 %v2923_v35, 0.0 }
 0x25b   : > { %v3169_v25 = vmul.f32 %v5556_v37, %v3037_v28  ;;  %v3206_v41 = vmul.f32 %v5562_v30, %v3133_v49  ;;  %v3038_v19 = vmax.f32 %v3006_v1, 0.0  ;;  %v3134_v20 = vadd.f32 %v5554_v42, %v3102_v7 }
 0x25c   : > { %v3172_v32 = vmul.f32 %v5556_v37, %v3040_v3  ;;  %v3209_v47 = vmul.f32 %v5562_v30, %v3136_v59  ;;  %v3011_v17 = vadd.f32 %v5554_v42, %v2975_v11  ;;  %v3107_v43 = vmul.f32 %v5548_v36, %v3075_v56 }
 0x25d   : > { %v3238_v33 = vadd.f32 %v3206_v41, %v3169_v25  ;;  %v3170_v14 = vmul.f32 %v5556_v37, %v3038_v19  ;;  %v3207_v9 = vmul.f32 %v5562_v30, %v3134_v20  ;;  %v2754_v13 = vadd.f32 %v5735_v34, %v5495_v27 }
 0x25e   : > { %v3241_v31 = vadd.f32 %v3209_v47, %v3172_v32  ;;  %v3043_v61 = vmax.f32 %v3011_v17, 0.0  ;;  %v3139_v26 = vadd.f32 %v5554_v42, %v3107_v43  ;;  %v2765_v22 = vadd.f32 %v4175_v12, %v5513_v44 }
 0x25f   : > { %3270 = vst.msk [vmem:[%s5588_s27 + $0xa0] sm:$0xff] %vm1930_vm0, %v3238_v33  ;;  %v3239_v46 = vadd.f32 %v3207_v9, %v3170_v14  ;;  %v2915_v16 = vadd.f32 %v5773_v5, %v2754_v13  ;;  %v4181_v0 = vadd.f32 %v5786_v55, %v5778_v2  ;;  %v2757_v21 = vadd.f32 %v5752_v38, %v5501_v6 }
 0x260   : > { %3273 = vst.msk [vmem:[%s5588_s27 + $0xb8] sm:$0xff] %vm1930_vm0, %v3241_v31  ;;  %v3175_v27 = vmul.f32 %v5556_v37, %v3043_v61  ;;  %v3212_v34 = vmul.f32 %v5562_v30, %v3139_v26  ;;  %v2926_v44 = vadd.f32 %v5780_v39, %v2765_v22  ;;  %v4184_v12 = vadd.f32 %v5815_v4, %v5807_v51 }
 0x261   : > { %3271 = vst.msk [vmem:[%s5588_s27 + $0xa8] sm:$0xff] %vm1930_vm0, %v3239_v46  ;;  %v2973_v5 = vmul.f32 %v5548_v36, %v2915_v16  ;;  %v3073_v2 = vmax.f32 %v2915_v16, 0.0  ;;  %v2918_v55 = vadd.f32 %v5788_v45, %v2757_v21  ;;  %v2770_v6 = vadd.f32 %v4178_v63, %v5519_v24 }
 0x262   : > { %v3244_v38 = vadd.f32 %v3212_v34, %v3175_v27  ;;  %v2976_v8 = vmul.f32 %v5548_v36, %v2926_v44  ;;  %v3076_v48 = vmax.f32 %v2926_v44, 0.0  ;;  %v2778_v62 = vadd.f32 %v4184_v12, %v5531_v40 }
 0x263   : > { %v3009_v39 = vadd.f32 %v5554_v42, %v2973_v5  ;;  %v3105_v15 = vmul.f32 %v5548_v36, %v3073_v2  ;;  %v2974_v51 = vmul.f32 %v5548_v36, %v2918_v55  ;;  %v3074_v4 = vmax.f32 %v2918_v55, 0.0 }
 0x264   : > { %3276 = vst.msk [vmem:[%s5588_s27 + $0xd0] sm:$0xff] %vm1930_vm0, %v3244_v38  ;;  %v3012_v60 = vadd.f32 %v5554_v42, %v2976_v8  ;;  %v3108_v45 = vmul.f32 %v5548_v36, %v3076_v48  ;;  %v2939_v24 = vadd.f32 %v5809_v29, %v2778_v62  ;;  %v2931_v63 = vadd.f32 %v5817_v10, %v2770_v6 }
 0x265   : > { %v3041_v50 = vmax.f32 %v3009_v39, 0.0  ;;  %v3137_v40 = vadd.f32 %v5554_v42, %v3105_v15  ;;  %v3010_v58 = vadd.f32 %v5554_v42, %v2974_v51  ;;  %v3106_v35 = vmul.f32 %v5548_v36, %v3074_v4 }
 0x266   : > { %v3044_v28 = vmax.f32 %v3012_v60, 0.0  ;;  %v3140_v49 = vadd.f32 %v5554_v42, %v3108_v45  ;;  %v2979_v1 = vmul.f32 %v5548_v36, %v2939_v24  ;;  %v3079_v7 = vmax.f32 %v2939_v24, 0.0 }
 0x267   : > { %v3173_v3 = vmul.f32 %v5556_v37, %v3041_v50  ;;  %v3210_v29 = vmul.f32 %v5562_v30, %v3137_v40  ;;  %v3042_v59 = vmax.f32 %v3010_v58, 0.0  ;;  %v3138_v10 = vadd.f32 %v5554_v42, %v3106_v35 }
 0x268   : > { %v3176_v11 = vmul.f32 %v5556_v37, %v3044_v28  ;;  %v3213_v56 = vmul.f32 %v5562_v30, %v3140_v49  ;;  %v3015_v25 = vadd.f32 %v5554_v42, %v2979_v1  ;;  %v3111_v41 = vmul.f32 %v5548_v36, %v3079_v7 }
 0x269   : > { %v3242_v19 = vadd.f32 %v3210_v29, %v3173_v3  ;;  %v3174_v20 = vmul.f32 %v5556_v37, %v3042_v59  ;;  %v3211_v32 = vmul.f32 %v5562_v30, %v3138_v10  ;;  %v2977_v47 = vmul.f32 %v5548_v36, %v2931_v63 }
 0x26a   : > { %v3245_v17 = vadd.f32 %v3213_v56, %v3176_v11  ;;  %v3047_v43 = vmax.f32 %v3015_v25, 0.0  ;;  %v3143_v33 = vadd.f32 %v5554_v42, %v3111_v41  ;;  %v3077_v14 = vmax.f32 %v2931_v63, 0.0 }
 0x26b   : > { %3274 = vst.msk [vmem:[%s5588_s27 + $0xc0] sm:$0xff] %vm1930_vm0, %v3242_v19  ;;  %v3243_v9 = vadd.f32 %v3211_v32, %v3174_v20  ;;  %v3013_v13 = vadd.f32 %v5554_v42, %v2977_v47  ;;  %v4187_v31 = vadd.f32 %v5835_v53, %v5826_v57  ;;  %v2773_v61 = vadd.f32 %v4181_v0, %v5525_v23 }
 0x26c   : > { %3277 = vst.msk [vmem:[%s5588_s27 + $0xd8] sm:$0xff] %vm1930_vm0, %v3245_v17  ;;  %v3179_v26 = vmul.f32 %v5556_v37, %v3047_v43  ;;  %v3216_v22 = vmul.f32 %v5562_v30, %v3143_v33  ;;  %v3109_v46 = vmul.f32 %v5548_v36, %v3077_v14 }
 0x26d   : > { %3275 = vst.msk [vmem:[%s5588_s27 + $0xc8] sm:$0xff] %vm1930_vm0, %v3243_v9  ;;  %v3045_v16 = vmax.f32 %v3013_v13, 0.0  ;;  %v2781_v21 = vadd.f32 %v4187_v31, %v5540_v18  ;;  %v2934_v27 = vadd.f32 %v5837_v52, %v2773_v61 }
 0x26e   : > { %v3248_v34 = vadd.f32 %v3216_v22, %v3179_v26  ;;  %v3141_v57 = vadd.f32 %v5554_v42, %v3109_v46 }
 0x26f   : > { %v3177_v23 = vmul.f32 %v5556_v37, %v3045_v16  ;;  %v2942_v53 = vadd.f32 %v5828_v54, %v2781_v21  ;;  %v2978_v0 = vmul.f32 %v5548_v36, %v2934_v27  ;;  %v3078_v44 = vmax.f32 %v2934_v27, 0.0 }
 0x270   : > { %3280 = vst.msk [vmem:[%s5588_s27 + $0xf0] sm:$0xff] %vm1930_vm0, %v3248_v34  ;;  %v3214_v12 = vmul.f32 %v5562_v30, %v3141_v57 }
 0x271   : > { %v2980_v5 = vmul.f32 %v5548_v36, %v2942_v53  ;;  %v3080_v18 = vmax.f32 %v2942_v53, 0.0  ;;  %v3014_v52 = vadd.f32 %v5554_v42, %v2978_v0  ;;  %v3110_v2 = vmul.f32 %v5548_v36, %v3078_v44 }
 0x272   : > { %v3246_v55 = vadd.f32 %v3214_v12, %v3177_v23 }
 0x273   : > { %v3016_v6 = vadd.f32 %v5554_v42, %v2980_v5  ;;  %v3112_v54 = vmul.f32 %v5548_v36, %v3080_v18  ;;  %v3046_v38 = vmax.f32 %v3014_v52, 0.0  ;;  %v3142_v8 = vadd.f32 %v5554_v42, %v3110_v2 }
 0x274   : > { %3278 = vst.msk [vmem:[%s5588_s27 + $0xe0] sm:$0xff] %vm1930_vm0, %v3246_v55 }
 0x275   : > { %v3048_v48 = vmax.f32 %v3016_v6, 0.0  ;;  %v3144_v62 = vadd.f32 %v5554_v42, %v3112_v54  ;;  %v3178_v39 = vmul.f32 %v5556_v37, %v3046_v38  ;;  %v3215_v15 = vmul.f32 %v5562_v30, %v3142_v8 }
 0x277   : > { %v3180_v51 = vmul.f32 %v5556_v37, %v3048_v48  ;;  %v3217_v4 = vmul.f32 %v5562_v30, %v3144_v62  ;;  %v3247_v60 = vadd.f32 %v3215_v15, %v3178_v39 }
 0x279   : > { %v3249_v45 = vadd.f32 %v3217_v4, %v3180_v51  ;;  %3279 = vst.msk [vmem:[%s5588_s27 + $0xe8] sm:$0xff] %vm1930_vm0, %v3247_v60 }
 0x27b   : > { %3281 = vst.msk [vmem:[%s5588_s27 + $0xf8] sm:$0xff] %vm1930_vm0, %v3249_v45 }
 0x27c PF: > { %s13_s12 = sadd.s32 1, %s4619_s12  }
 0x27d   : > { %p10_p4 = scmp.ge.s32.totalorder %s13_s12, 4  }
 0x27f   :  { %12 = sbr.rel (!%p10_p4) target bundleno = 1 (0x1), region = 62 }

// kernel: mcnet_forward.21
= control target key start
LH: loop header
LB: loop body
LE: loop exit
PB: predicated region body
PF: predicated region fallthrough
CT: control target
= control target key end

     0   :  { %s1221_s12 = smov 0   ;;  %s1528_s0 = inlined_call_operand.vmem [shape: bf16[256,320], index: 0, kind: input, shape index: {}]   ;;  %s1529_s1 = inlined_call_operand.vmem [shape: bf16[320,64], index: 1, kind: input, shape index: {}]   ;;  %s1530_s2 = inlined_call_operand.vmem [shape: f32[4,64], index: 2, kind: input, shape index: {}]   ;;  %s1531_s3 = inlined_call_operand.vmem [shape: f32[256,64], index: 3, kind: output, shape index: {}]  }
   0x1 LB: > { %s950_s13 = sadd.s32 4294967295, %s1199_s12   ;;  %p954_p0 = scmp.ge.s32.totalorder %s1199_s12, 1  ;;  %s1199_s12 = sphi %s1221_s12, %s13_s12  }
   0x2   : > { %p139_p1 = scmp.lt.s32.totalorder %s1199_s12, 3 }
   0x4   : > { %p140_p2 = pnand %p954_p0, %p139_p1 }
   0x5   : > { %v1141_v0 = vld [vmem:[%s1529_s1 + $0x40] sm:$0xff] (!%p140_p2)   ;;  %s955_s16 = sshll.u32 (!%p140_p2), %s950_s13, 4  ;;  %v1143_v2 = vld [vmem:[%s1529_s1 + $0x48] sm:$0xff] (!%p140_p2)   ;;  %v1145_v4 = vld [vmem:[%s1529_s1 + $0x50] sm:$0xff] (!%p140_p2)   ;;  %vm498_vm0 = vcmask (!%p140_p2), 523264   ;;  %v821_v56 = vlaneseq (!%p140_p2) }
   0x6   : > { %143 = sbr.rel (%p140_p2) target bundleno = 321 (0x141), region = 32  ;;  %v1142_v1 = vld [vmem:[%s1529_s1] sm:$0xff] (!%p140_p2)   ;;  %1016 = vmatprep.subr.bf16.mxu0 (!%p140_p2), %v1141_v0  ;;  %1116 = vmatprep.subr.bf16.mxu1 (!%p140_p2), %v1141_v0  ;;  %p165_p3 = scmp.lt.s32.totalorder (!%p140_p2), %s955_s16, 31  ;;  %v1144_v3 = vld [vmem:[%s1529_s1 + $0x8] sm:$0xff] (!%p140_p2)   ;;  %v1146_v5 = vld [vmem:[%s1529_s1 + $0x10] sm:$0xff] (!%p140_p2)  }
   0x7   : > { %1017 = vmatpush3.bf16.msra.mxu0 (!%p140_p2), %v1142_v1  ;;  %1124 = vmatpush3.bf16.msra.mxu1 (!%p140_p2), %v1142_v1  ;;  %v1147_v6 = vld [vmem:[%s1529_s1 + $0x58] sm:$0xff] (!%p140_p2)   ;;  %v1149_v8 = vld [vmem:[%s1529_s1 + $0x60] sm:$0xff] (!%p140_p2)   ;;  %v1151_v10 = vld [vmem:[%s1529_s1 + $0x68] sm:$0xff] (!%p140_p2)   ;;  %v822_v1 = vshrl.u32 (!%p140_p2), %v821_v56, 7 }
   0x8   : > { %1018 = vmatprep.subr.bf16.mxu0 (!%p140_p2), %v1143_v2  ;;  %1117 = vmatprep.subr.bf16.mxu1 (!%p140_p2), %v1143_v2  ;;  %v1148_v7 = vld [vmem:[%s1529_s1 + $0x18] sm:$0xff] (!%p140_p2)   ;;  %v1150_v9 = vld [vmem:[%s1529_s1 + $0x20] sm:$0xff] (!%p140_p2)   ;;  %v1152_v13 = vld [vmem:[%s1529_s1 + $0x28] sm:$0xff] (!%p140_p2)  }
   0x9   : > { %v1153_v14 = vld [vmem:[%s1529_s1 + $0x70] sm:$0xff] (!%p140_p2)   ;;  %v1155_v16 = vld [vmem:[%s1529_s1 + $0x78] sm:$0xff] (!%p140_p2)   ;;  %v1163_v18 = vld [vmem:[%s1529_s1 + $0x80] sm:$0xff] (!%p140_p2)  }
   0xa   : > { %v1154_v15 = vld [vmem:[%s1529_s1 + $0x30] sm:$0xff] (!%p140_p2)   ;;  %v1156_v17 = vld [vmem:[%s1529_s1 + $0x38] sm:$0xff] (!%p140_p2)   ;;  %v1164_v21 = vld [vmem:[%s1529_s1 + $0x88] sm:$0xff] (!%p140_p2)  }
   0xb   : > { %1019 = vmatpush3.bf16.msra.mxu0 (!%p140_p2), %v1144_v3  ;;  %1125 = vmatpush3.bf16.msra.mxu1 (!%p140_p2), %v1144_v3  ;;  %v1171_v24 = vld [vmem:[%s1529_s1 + $0x90] sm:$0xff] (!%p140_p2)   ;;  %v1172_v28 = vld [vmem:[%s1529_s1 + $0x98] sm:$0xff] (!%p140_p2)  }
   0xc   : > { %1020 = vmatprep.subr.bf16.mxu0 (!%p140_p2), %v1145_v4  ;;  %1118 = vmatprep.subr.bf16.mxu1 (!%p140_p2), %v1145_v4 }
   0xd   : > { %s1533_s16 = smov (!%p165_p3, %s955_s16), 31 }
   0xe   : > { %s1132_s29 = smul.u32 12, %s1533_s16  ;;  %s958_s17 = sshll.u32 %s1533_s16, 3 }
   0xf   : > { %1021 = vmatpush3.bf16.msra.mxu0 %v1146_v5  ;;  %1126 = vmatpush3.bf16.msra.mxu1 %v1146_v5  ;;  %s1384_s19 = scalar_lea.vmem %s1531_s3, %s958_s17 }
  0x10   : > { %1022 = vmatprep.subr.bf16.mxu0 %v1147_v6  ;;  %1119 = vmatprep.subr.bf16.mxu1 %v1147_v6  ;;  %s1262_s9 = scalar_lea.vmem %s1528_s0, %s1132_s29  ;;  %v253_v6 = vld [vmem:[%s1530_s2 + $0x3] sm:$0x1] }
  0x11   : > { %v1159_v11 = vld [vmem:[%s1262_s9 + $0x4] ss:$12 sps:$4 sm:$0xff]   ;;  %v1162_v12 = vld [vmem:[%s1262_s9 + $0x94] ss:$12 sps:$4 sm:$0xff]   ;;  %v1165_v22 = vld [vmem:[%s1262_s9 + $0x1c] ss:$12 sps:$4 sm:$0xff]  }
  0x12   : > { %555 = vmatprep.mubr.bf16.mxu0 %v1159_v11  ;;  %603 = vmatprep.mubr.bf16.mxu1 %v1162_v12  ;;  %v1157_v19 = vld [vmem:[%s1262_s9] ss:$12 sps:$4 sm:$0xff]   ;;  %v1160_v20 = vld [vmem:[%s1262_s9 + $0x90] ss:$12 sps:$4 sm:$0xff]   ;;  %v1169_v25 = vld [vmem:[%s1262_s9 + $0x18] ss:$12 sps:$4 sm:$0xff]  }
  0x13   : > { %1023 = vmatpush3.bf16.msra.mxu0 %v1148_v7  ;;  %1127 = vmatpush3.bf16.msra.mxu1 %v1148_v7  ;;  %v1167_v23 = vld [vmem:[%s1262_s9 + $0xac] ss:$12 sps:$4 sm:$0xff]   ;;  %v1170_v26 = vld [vmem:[%s1262_s9 + $0xa8] ss:$12 sps:$4 sm:$0xff]   ;;  %v1176_v30 = vld [vmem:[%s1262_s9 + $0x30] ss:$12 sps:$4 sm:$0xff]  }
  0x14   : > { %1024 = vmatprep.subr.bf16.mxu0 %v1149_v8  ;;  %1120 = vmatprep.subr.bf16.mxu1 %v1149_v8  ;;  %v1173_v27 = vld [vmem:[%s1262_s9 + $0x34] ss:$12 sps:$4 sm:$0xff]   ;;  %v1178_v32 = vld [vmem:[%s1262_s9 + $0x4c] ss:$12 sps:$4 sm:$0xff]   ;;  %v1182_v35 = vld [vmem:[%s1262_s9 + $0x50] ss:$12 sps:$4 sm:$0xff]  }
  0x15   : > { %v1175_v29 = vld [vmem:[%s1262_s9 + $0x8] ss:$12 sps:$4 sm:$0xff]   ;;  %v1177_v31 = vld [vmem:[%s1262_s9 + $0x20] ss:$12 sps:$4 sm:$0xff]   ;;  %v1180_v33 = vld [vmem:[%s1262_s9 + $0x38] ss:$12 sps:$4 sm:$0xff]  }
  0x16   : > { %v1181_v34 = vld [vmem:[%s1262_s9 + $0x48] ss:$12 sps:$4 sm:$0xff]   ;;  %v1183_v36 = vld [vmem:[%s1262_s9 + $0x64] ss:$12 sps:$4 sm:$0xff]   ;;  %v1186_v38 = vld [vmem:[%s1262_s9 + $0x60] ss:$12 sps:$4 sm:$0xff]  }
  0x17   : > { %1025 = vmatpush3.bf16.msra.mxu0 %v1150_v9  ;;  %1128 = vmatpush3.bf16.msra.mxu1 %v1150_v9  ;;  %v1185_v37 = vld [vmem:[%s1262_s9 + $0x68] ss:$12 sps:$4 sm:$0xff]   ;;  %v1187_v39 = vld [vmem:[%s1262_s9 + $0x80] ss:$12 sps:$4 sm:$0xff]   ;;  %v1190_v41 = vld [vmem:[%s1262_s9 + $0x98] ss:$12 sps:$4 sm:$0xff]  }
  0x18   : > { %1026 = vmatprep.subr.bf16.mxu0 %v1151_v10  ;;  %1121 = vmatprep.subr.bf16.mxu1 %v1151_v10  ;;  %v1188_v40 = vld [vmem:[%s1262_s9 + $0x7c] ss:$12 sps:$4 sm:$0xff]   ;;  %v1191_v42 = vld [vmem:[%s1262_s9 + $0x78] ss:$12 sps:$4 sm:$0xff]   ;;  %v1343_v7 = vld [vmem:[%s1530_s2] ss:$0 sm:$0xff] }
  0x19   : > { %v1192_v43 = vld [vmem:[%s1262_s9 + $0xb0] ss:$12 sps:$4 sm:$0xff]   ;;  %v823_v8 = vsub.s32 0, %v822_v1  ;;  %v841_v10 = vsub.f32 1.0, %v253_v6  ;;  %v1349_v12 = vld [vmem:[%s1530_s2 + $0x1] ss:$0 sm:$0xff] }
  0x1b   : > { %1027 = vmatpush3.bf16.msra.mxu0 %v1152_v13  ;;  %1129 = vmatpush3.bf16.msra.mxu1 %v1152_v13 }
  0x1c   : > { %1028 = vmatprep.subr.bf16.mxu0 %v1153_v14  ;;  %1122 = vmatprep.subr.bf16.mxu1 %v1153_v14 }
  0x1f   : > { %1029 = vmatpush3.bf16.msra.mxu0 %v1154_v15  ;;  %1130 = vmatpush3.bf16.msra.mxu1 %v1154_v15 }
  0x20   : > { %1030 = vmatprep.subr.bf16.mxu0 %v1155_v16  ;;  %1123 = vmatprep.subr.bf16.mxu1 %v1155_v16 }
  0x23   : > { %1031 = vmatpush3.bf16.msra.mxu0 %v1156_v17  ;;  %1131 = vmatpush3.bf16.msra.mxu1 %v1156_v17 }
  0x24   : > { %1092 = vmatprep.subr.bf16.mxu1 %v1163_v18 }
  0x26   : > { %556 = vmatmul.mubr.bf16.vlgmr.msra.gmra.mrb[0].mxu0 %v1157_v19  ;;  %604 = vmatmul.mubr.bf16.vlgmr.msra.gmra.mrb[0].mxu1 %v1160_v20  ;;  %v1356_v19 = vld [vmem:[%s1530_s2 + $0x2] ss:$0 sm:$0xff]  ;;  %v1358_v20 = vrot.slane %v253_v6, %v823_v8 }
  0x27   : > { %1093 = vmatpush3.bf16.msra.mxu1 %v1163_v18  ;;  %563 = vmatprep.mubr.bf16.mxu0 %v1165_v22 }
  0x28   : > { %1094 = vmatprep.subr.bf16.mxu1 %v1164_v21  ;;  %611 = vmatprep.mubr.bf16.mxu1 %v1167_v23 }
  0x2b   : > { %1095 = vmatpush3.bf16.msra.mxu1 %v1164_v21 }
  0x2c   : > { %1096 = vmatprep.subr.bf16.mxu1 %v1171_v24 }
  0x2e   : > { %564 = vmatmul.mubr.bf16.gmra.mrb[4].mxu0 %v1169_v25  ;;  %612 = vmatmul.mubr.bf16.gmra.mrb[4].mxu1 %v1170_v26 }
  0x2f   : > { %1097 = vmatpush3.bf16.msra.mxu1 %v1171_v24  ;;  %571 = vmatprep.mubr.bf16.mxu0 %v1173_v27 }
  0x30   : > { %1098 = vmatprep.subr.bf16.mxu1 %v1172_v28  ;;  %1100 = vmatprep.mubr.msk.bf16.mxu1 %vm498_vm0, %v1175_v29 }
  0x33   : > { %1099 = vmatpush3.bf16.msra.mxu1 %v1172_v28  ;;  %v1362_v28 = vrot.slane %v841_v10, %v823_v8 }
  0x36   : > { %572 = vmatmul.mubr.bf16.gmra.mrb[8].mxu0 %v1176_v30  ;;  %1101 = vmatmul.mubr.msk.bf16.vlgmr.msra.gmra.mrb[8].mxu1 %vm498_vm0, %v1177_v31 }
  0x37   : > { %579 = vmatprep.mubr.bf16.mxu0 %v1178_v32  ;;  %1104 = vmatprep.mubr.msk.bf16.mxu1 %vm498_vm0, %v1180_v33 }
  0x3e   : > { %580 = vmatmul.mubr.bf16.gmra.mrb[12].mxu0 %v1181_v34  ;;  %1105 = vmatmul.mubr.msk.bf16.gmra.mrb[12].mxu1 %vm498_vm0, %v1182_v35 }
  0x3f   : > { %587 = vmatprep.mubr.bf16.mxu0 %v1183_v36  ;;  %1108 = vmatprep.mubr.msk.bf16.mxu1 %vm498_vm0, %v1185_v37 }
  0x46   : > { %588 = vmatmul.mubr.bf16.gmra.mrb[16].mxu0 %v1186_v38  ;;  %1109 = vmatmul.mubr.msk.bf16.gmra.mrb[16].mxu1 %vm498_vm0, %v1187_v39 }
  0x47   : > { %595 = vmatprep.mubr.bf16.mxu0 %v1188_v40  ;;  %1112 = vmatprep.mubr.msk.bf16.mxu1 %vm498_vm0, %v1190_v41 }
  0x4e   : > { %596 = vmatmul.mubr.bf16.gmra.mrb[20].mxu0 %v1191_v42  ;;  %1113 = vmatmul.mubr.msk.bf16.gmra.mrb[20].mxu1 %vm498_vm0, %v1192_v43 }
  0xf9   : > { %v1032_v44 = vpop.f32.mrb[0].mxu0  ;;  %v1068_v45 = vpop.f32.mrb[0].mxu1 }
  0xfa   : > { %v1033_v46 = vpop.f32.mrb[1].mxu0  ;;  %v1069_v47 = vpop.f32.mrb[1].mxu1 }
  0xfb   : > { %v1034_v48 = vadd.f32 %v1033_v46, %v1032_v44  ;;  %v1035_v49 = vpop.f32.mrb[2].mxu0  ;;  %v1329_v50 = vadd.f32 %v1069_v47, %v1068_v45  ;;  %v1071_v51 = vpop.f32.mrb[2].mxu1 }
  0xfc   : > { %v1036_v52 = vpop.f32.mrb[3].mxu0  ;;  %v1072_v53 = vpop.f32.mrb[3].mxu1 }
  0xfd   : > { %v1037_v54 = vadd.f32 %v1036_v52, %v1035_v49  ;;  %v1331_v55 = vadd.f32 %v1072_v53, %v1071_v51  ;;  %v558_v14 = vadd.f32 %v1034_v48, %v1343_v7 }
  0xff   : > { %v561_v25 = vadd.f32 %v1037_v54, %v1343_v7 }
 0x101   : > { %v1038_v57 = vpop.f32.mrb[4].mxu0  ;;  %v1074_v58 = vpop.f32.mrb[4].mxu1 }
 0x102   : > { %v1039_v59 = vpop.f32.mrb[5].mxu0  ;;  %v1075_v60 = vpop.f32.mrb[5].mxu1 }
 0x103   : > { %v1040_v61 = vadd.f32 %v1039_v59, %v1038_v57  ;;  %v1041_v62 = vpop.f32.mrb[6].mxu0  ;;  %v1333_v63 = vadd.f32 %v1075_v60, %v1074_v58  ;;  %v1077_v0 = vpop.f32.mrb[6].mxu1 }
 0x104   : > { %v1042_v2 = vpop.f32.mrb[7].mxu0  ;;  %v1078_v3 = vpop.f32.mrb[7].mxu1 }
 0x105   : > { %v1043_v4 = vadd.f32 %v1042_v2, %v1041_v62  ;;  %v1335_v5 = vadd.f32 %v1078_v3, %v1077_v0  ;;  %v566_v9 = vadd.f32 %v1040_v61, %v1343_v7 }
 0x107   : > { %v569_v18 = vadd.f32 %v1043_v4, %v1343_v7 }
 0x109   : > { %v1044_v11 = vpop.f32.mrb[8].mxu0  ;;  %v1102_v13 = vpop.f32.mrb[8].mxu1 }
 0x10a   : > { %v663_v15 = vadd.f32 %v1102_v13, %v566_v9  ;;  %v1045_v16 = vpop.f32.mrb[9].mxu0  ;;  %v654_v17 = vpop.f32.mrb[9].mxu1 }
 0x10b   : > { %v1046_v21 = vadd.f32 %v1045_v16, %v1044_v11  ;;  %v655_v22 = vadd.f32 %v654_v17, %v558_v14  ;;  %v1047_v23 = vpop.f32.mrb[10].mxu0  ;;  %v1103_v24 = vpop.f32.mrb[10].mxu1 }
 0x10c   : > { %v723_v26 = vmul.f32 %v1349_v12, %v663_v15  ;;  %v775_v27 = vmax.f32 %v663_v15, 0.0  ;;  %v666_v29 = vadd.f32 %v1103_v24, %v569_v18  ;;  %v1048_v30 = vpop.f32.mrb[11].mxu0  ;;  %v657_v31 = vpop.f32.mrb[11].mxu1 }
 0x10d   : > { %v721_v32 = vmul.f32 %v1349_v12, %v655_v22  ;;  %v773_v33 = vmax.f32 %v655_v22, 0.0  ;;  %v1049_v34 = vadd.f32 %v1048_v30, %v1047_v23  ;;  %v658_v35 = vadd.f32 %v657_v31, %v561_v25 }
 0x10e   : > { %v743_v36 = vadd.f32 %v1356_v19, %v723_v26  ;;  %v791_v37 = vmul.f32 %v1349_v12, %v775_v27  ;;  %v724_v38 = vmul.f32 %v1349_v12, %v666_v29  ;;  %v776_v39 = vmax.f32 %v666_v29, 0.0 }
 0x10f   : > { %v741_v40 = vadd.f32 %v1356_v19, %v721_v32  ;;  %v789_v41 = vmul.f32 %v1349_v12, %v773_v33  ;;  %v722_v42 = vmul.f32 %v1349_v12, %v658_v35  ;;  %v774_v43 = vmax.f32 %v658_v35, 0.0 }
 0x110   : > { %v759_v44 = vmax.f32 %v743_v36, 0.0  ;;  %v807_v45 = vadd.f32 %v1356_v19, %v791_v37  ;;  %v744_v46 = vadd.f32 %v1356_v19, %v724_v38  ;;  %v792_v47 = vmul.f32 %v1349_v12, %v776_v39 }
 0x111   : > { %v757_v48 = vmax.f32 %v741_v40, 0.0  ;;  %v805_v49 = vadd.f32 %v1356_v19, %v789_v41  ;;  %v742_v51 = vadd.f32 %v1356_v19, %v722_v42  ;;  %v790_v52 = vmul.f32 %v1349_v12, %v774_v43  ;;  %v1050_v53 = vpop.f32.mrb[12].mxu0  ;;  %v1106_v54 = vpop.f32.mrb[12].mxu1 }
 0x112   : > { %v827_v56 = vmul.f32 %v1358_v20, %v759_v44  ;;  %v848_v57 = vmul.f32 %v1362_v28, %v807_v45  ;;  %v760_v58 = vmax.f32 %v744_v46, 0.0  ;;  %v808_v59 = vadd.f32 %v1356_v19, %v792_v47  ;;  %v1051_v60 = vpop.f32.mrb[13].mxu0  ;;  %v670_v61 = vpop.f32.mrb[13].mxu1 }
 0x113   : > { %v825_v62 = vmul.f32 %v1358_v20, %v757_v48  ;;  %v846_v0 = vmul.f32 %v1362_v28, %v805_v49  ;;  %v758_v1 = vmax.f32 %v742_v51, 0.0  ;;  %v806_v2 = vadd.f32 %v1356_v19, %v790_v52  ;;  %v1053_v3 = vpop.f32.mrb[14].mxu0  ;;  %v1107_v4 = vpop.f32.mrb[14].mxu1 }
 0x114   : > { %v864_v6 = vadd.f32 %v848_v57, %v827_v56  ;;  %v828_v8 = vmul.f32 %v1358_v20, %v760_v58  ;;  %v849_v9 = vmul.f32 %v1362_v28, %v808_v59  ;;  %v1052_v10 = vadd.f32 %v1051_v60, %v1050_v53  ;;  %v1054_v11 = vpop.f32.mrb[15].mxu0  ;;  %v673_v13 = vpop.f32.mrb[15].mxu1 }
 0x115   : > { %v862_v14 = vadd.f32 %v846_v0, %v825_v62  ;;  %v826_v15 = vmul.f32 %v1358_v20, %v758_v1  ;;  %v847_v16 = vmul.f32 %v1362_v28, %v806_v2  ;;  %v574_v17 = vadd.f32 %v1046_v21, %v1343_v7 }
 0x116   : > { %880 = vst.msk [vmem:[%s1384_s19 + $0x10] sm:$0xff] %vm498_vm0, %v864_v6  ;;  %v865_v18 = vadd.f32 %v849_v9, %v828_v8  ;;  %v582_v22 = vadd.f32 %v1052_v10, %v1343_v7  ;;  %v1055_v23 = vadd.f32 %v1054_v11, %v1053_v3  ;;  %v577_v24 = vadd.f32 %v1049_v34, %v1343_v7 }
 0x117   : > { %878 = vst.msk [vmem:[%s1384_s19] sm:$0xff] %vm498_vm0, %v862_v14  ;;  %v863_v25 = vadd.f32 %v847_v16, %v826_v15  ;;  %v671_v26 = vadd.f32 %v670_v61, %v574_v17  ;;  %v1402_v27 = vadd.f32 %v1329_v50, %v1343_v7  ;;  %v1409_v31 = vadd.f32 %v1331_v55, %v1343_v7 }
 0x118   : > { %881 = vst.msk [vmem:[%s1384_s19 + $0x18] sm:$0xff] %vm498_vm0, %v865_v18  ;;  %v679_v29 = vadd.f32 %v1106_v54, %v582_v22  ;;  %v585_v21 = vadd.f32 %v1055_v23, %v1343_v7  ;;  %v674_v30 = vadd.f32 %v673_v13, %v577_v24  ;;  %v614_v50 = vadd.f32 %v1333_v63, %v1343_v7 }
 0x119   : > { %879 = vst.msk [vmem:[%s1384_s19 + $0x8] sm:$0xff] %vm498_vm0, %v863_v25  ;;  %v725_v32 = vmul.f32 %v1349_v12, %v671_v26  ;;  %v777_v33 = vmax.f32 %v671_v26, 0.0  ;;  %v1056_v34 = vpop.f32.mrb[16].mxu0  ;;  %v1414_v35 = vpop.f32.mrb[16].mxu1  ;;  %v617_v36 = vadd.f32 %v1335_v5, %v1343_v7 }
 0x11a   : > { %v727_v37 = vmul.f32 %v1349_v12, %v679_v29  ;;  %v779_v38 = vmax.f32 %v679_v29, 0.0  ;;  %v682_v39 = vadd.f32 %v1107_v4, %v585_v21  ;;  %v726_v55 = vmul.f32 %v1349_v12, %v674_v30  ;;  %v1057_v40 = vpop.f32.mrb[17].mxu0  ;;  %v686_v41 = vpop.f32.mrb[17].mxu1 }
 0x11b   : > { %v745_v42 = vadd.f32 %v1356_v19, %v725_v32  ;;  %v793_v43 = vmul.f32 %v1349_v12, %v777_v33  ;;  %v778_v44 = vmax.f32 %v674_v30, 0.0  ;;  %v1058_v45 = vadd.f32 %v1057_v40, %v1056_v34  ;;  %v1059_v46 = vpop.f32.mrb[18].mxu0  ;;  %v1424_v47 = vpop.f32.mrb[18].mxu1 }
 0x11c   : > { %v747_v63 = vadd.f32 %v1356_v19, %v727_v37  ;;  %v795_v5 = vmul.f32 %v1349_v12, %v779_v38  ;;  %v728_v48 = vmul.f32 %v1349_v12, %v682_v39  ;;  %v780_v49 = vmax.f32 %v682_v39, 0.0  ;;  %v1060_v51 = vpop.f32.mrb[19].mxu0  ;;  %v689_v52 = vpop.f32.mrb[19].mxu1 }
 0x11d   : > { %v761_v53 = vmax.f32 %v745_v42, 0.0  ;;  %v809_v54 = vadd.f32 %v1356_v19, %v793_v43  ;;  %v746_v56 = vadd.f32 %v1356_v19, %v726_v55  ;;  %v794_v57 = vmul.f32 %v1349_v12, %v778_v44 }
 0x11e   : > { %v763_v58 = vmax.f32 %v747_v63, 0.0  ;;  %v811_v59 = vadd.f32 %v1356_v19, %v795_v5  ;;  %v748_v60 = vadd.f32 %v1356_v19, %v728_v48  ;;  %v796_v61 = vmul.f32 %v1349_v12, %v780_v49 }
 0x11f   : > { %v829_v62 = vmul.f32 %v1358_v20, %v761_v53  ;;  %v850_v0 = vmul.f32 %v1362_v28, %v809_v54  ;;  %v762_v1 = vmax.f32 %v746_v56, 0.0  ;;  %v810_v2 = vadd.f32 %v1356_v19, %v794_v57 }
 0x120   : > { %v831_v3 = vmul.f32 %v1358_v20, %v763_v58  ;;  %v852_v4 = vmul.f32 %v1362_v28, %v811_v59  ;;  %v764_v6 = vmax.f32 %v748_v60, 0.0  ;;  %v812_v8 = vadd.f32 %v1356_v19, %v796_v61 }
 0x121   : > { %v866_v9 = vadd.f32 %v850_v0, %v829_v62  ;;  %v830_v10 = vmul.f32 %v1358_v20, %v762_v1  ;;  %v851_v11 = vmul.f32 %v1362_v28, %v810_v2  ;;  %v590_v13 = vadd.f32 %v1058_v45, %v1343_v7  ;;  %v1062_v14 = vpop.f32.mrb[20].mxu0  ;;  %v1114_v15 = vpop.f32.mrb[20].mxu1 }
 0x122   : > { %v868_v16 = vadd.f32 %v852_v4, %v831_v3  ;;  %v832_v17 = vmul.f32 %v1358_v20, %v764_v6  ;;  %v853_v18 = vmul.f32 %v1362_v28, %v812_v8  ;;  %v1061_v22 = vadd.f32 %v1060_v51, %v1059_v46  ;;  %v1063_v23 = vpop.f32.mrb[21].mxu0  ;;  %v702_v24 = vpop.f32.mrb[21].mxu1 }
 0x123   : > { %882 = vst.msk [vmem:[%s1384_s19 + $0x20] sm:$0xff] %vm498_vm0, %v866_v9  ;;  %v867_v25 = vadd.f32 %v851_v11, %v830_v10  ;;  %v687_v26 = vadd.f32 %v686_v41, %v590_v13  ;;  %v711_v29 = vadd.f32 %v1114_v15, %v614_v50  ;;  %v1064_v21 = vadd.f32 %v1063_v23, %v1062_v14  ;;  %v1065_v30 = vpop.f32.mrb[22].mxu0  ;;  %v1115_v32 = vpop.f32.mrb[22].mxu1 }
 0x124   : > { %884 = vst.msk [vmem:[%s1384_s19 + $0x30] sm:$0xff] %vm498_vm0, %v868_v16  ;;  %v869_v33 = vadd.f32 %v853_v18, %v832_v17  ;;  %v593_v34 = vadd.f32 %v1061_v22, %v1343_v7  ;;  %v703_v37 = vadd.f32 %v702_v24, %v1402_v27  ;;  %v714_v38 = vadd.f32 %v1115_v32, %v617_v36  ;;  %v1066_v39 = vpop.f32.mrb[23].mxu0  ;;  %v705_v55 = vpop.f32.mrb[23].mxu1 }
 0x125   : > { %883 = vst.msk [vmem:[%s1384_s19 + $0x28] sm:$0xff] %vm498_vm0, %v867_v25  ;;  %v729_v40 = vmul.f32 %v1349_v12, %v687_v26  ;;  %v781_v41 = vmax.f32 %v687_v26, 0.0  ;;  %v735_v50 = vmul.f32 %v1349_v12, %v711_v29  ;;  %v787_v42 = vmax.f32 %v711_v29, 0.0 }
 0x126   : > { %885 = vst.msk [vmem:[%s1384_s19 + $0x38] sm:$0xff] %vm498_vm0, %v869_v33  ;;  %v690_v43 = vadd.f32 %v689_v52, %v593_v34  ;;  %v598_v44 = vadd.f32 %v1064_v21, %v1343_v7  ;;  %v733_v45 = vmul.f32 %v1349_v12, %v703_v37  ;;  %v785_v46 = vmax.f32 %v703_v37, 0.0 }
 0x127   : > { %v749_v27 = vadd.f32 %v1356_v19, %v729_v40  ;;  %v797_v36 = vmul.f32 %v1349_v12, %v781_v41  ;;  %v755_v63 = vadd.f32 %v1356_v19, %v735_v50  ;;  %v803_v5 = vmul.f32 %v1349_v12, %v787_v42 }
 0x128   : > { %v730_v48 = vmul.f32 %v1349_v12, %v690_v43  ;;  %v782_v49 = vmax.f32 %v690_v43, 0.0  ;;  %v695_v51 = vadd.f32 %v1414_v35, %v598_v44  ;;  %v753_v52 = vadd.f32 %v1356_v19, %v733_v45 }
 0x129   : > { %v765_v53 = vmax.f32 %v749_v27, 0.0  ;;  %v813_v54 = vadd.f32 %v1356_v19, %v797_v36  ;;  %v771_v56 = vmax.f32 %v755_v63, 0.0  ;;  %v819_v57 = vadd.f32 %v1356_v19, %v803_v5 }
 0x12a   : > { %v750_v58 = vadd.f32 %v1356_v19, %v730_v48  ;;  %v798_v59 = vmul.f32 %v1349_v12, %v782_v49  ;;  %v731_v60 = vmul.f32 %v1349_v12, %v695_v51  ;;  %v783_v61 = vmax.f32 %v695_v51, 0.0 }
 0x12b   : > { %v833_v62 = vmul.f32 %v1358_v20, %v765_v53  ;;  %v854_v35 = vmul.f32 %v1362_v28, %v813_v54  ;;  %v839_v0 = vmul.f32 %v1358_v20, %v771_v56  ;;  %v860_v1 = vmul.f32 %v1362_v28, %v819_v57 }
 0x12c   : > { %v766_v2 = vmax.f32 %v750_v58, 0.0  ;;  %v814_v3 = vadd.f32 %v1356_v19, %v798_v59  ;;  %v751_v4 = vadd.f32 %v1356_v19, %v731_v60  ;;  %v799_v6 = vmul.f32 %v1349_v12, %v783_v61 }
 0x12d   : > { %v870_v8 = vadd.f32 %v854_v35, %v833_v62  ;;  %v876_v9 = vadd.f32 %v860_v1, %v839_v0  ;;  %v769_v10 = vmax.f32 %v753_v52, 0.0  ;;  %v801_v11 = vmul.f32 %v1349_v12, %v785_v46 }
 0x12e   : > { %v834_v13 = vmul.f32 %v1358_v20, %v766_v2  ;;  %v855_v14 = vmul.f32 %v1362_v28, %v814_v3  ;;  %v767_v15 = vmax.f32 %v751_v4, 0.0  ;;  %v815_v16 = vadd.f32 %v1356_v19, %v799_v6 }
 0x12f   : > { %886 = vst.msk [vmem:[%s1384_s19 + $0x40] sm:$0xff] %vm498_vm0, %v870_v8  ;;  %892 = vst.msk [vmem:[%s1384_s19 + $0x70] sm:$0xff] %vm498_vm0, %v876_v9  ;;  %v817_v17 = vadd.f32 %v1356_v19, %v801_v11  ;;  %v837_v18 = vmul.f32 %v1358_v20, %v769_v10  ;;  %v736_v22 = vmul.f32 %v1349_v12, %v714_v38  ;;  %v788_v23 = vmax.f32 %v714_v38, 0.0 }
 0x130   : > { %v871_v24 = vadd.f32 %v855_v14, %v834_v13  ;;  %v835_v25 = vmul.f32 %v1358_v20, %v767_v15  ;;  %v856_v26 = vmul.f32 %v1362_v28, %v815_v16  ;;  %v1067_v29 = vadd.f32 %v1066_v39, %v1065_v30 }
 0x131   : > { %v858_v21 = vmul.f32 %v1362_v28, %v817_v17  ;;  %v756_v32 = vadd.f32 %v1356_v19, %v736_v22  ;;  %v804_v33 = vmul.f32 %v1349_v12, %v788_v23  ;;  %v706_v34 = vadd.f32 %v705_v55, %v1409_v31 }
 0x132   : > { %887 = vst.msk [vmem:[%s1384_s19 + $0x48] sm:$0xff] %vm498_vm0, %v871_v24  ;;  %v872_v37 = vadd.f32 %v856_v26, %v835_v25  ;;  %v601_v38 = vadd.f32 %v1067_v29, %v1343_v7 }
 0x133   : > { %v874_v40 = vadd.f32 %v858_v21, %v837_v18  ;;  %v772_v41 = vmax.f32 %v756_v32, 0.0  ;;  %v820_v50 = vadd.f32 %v1356_v19, %v804_v33  ;;  %v734_v42 = vmul.f32 %v1349_v12, %v706_v34 }
 0x134   : > { %888 = vst.msk [vmem:[%s1384_s19 + $0x50] sm:$0xff] %vm498_vm0, %v872_v37  ;;  %v698_v30 = vadd.f32 %v1424_v47, %v601_v38  ;;  %v786_v39 = vmax.f32 %v706_v34, 0.0 }
 0x135   : > { %890 = vst.msk [vmem:[%s1384_s19 + $0x60] sm:$0xff] %vm498_vm0, %v874_v40  ;;  %v840_v31 = vmul.f32 %v1358_v20, %v772_v41  ;;  %v861_v55 = vmul.f32 %v1362_v28, %v820_v50  ;;  %v754_v7 = vadd.f32 %v1356_v19, %v734_v42 }
 0x136   : > { %v732_v43 = vmul.f32 %v1349_v12, %v698_v30  ;;  %v784_v44 = vmax.f32 %v698_v30, 0.0  ;;  %v802_v45 = vmul.f32 %v1349_v12, %v786_v39 }
 0x137   : > { %v877_v46 = vadd.f32 %v861_v55, %v840_v31  ;;  %v770_v27 = vmax.f32 %v754_v7, 0.0 }
 0x138   : > { %v752_v47 = vadd.f32 %v1356_v19, %v732_v43  ;;  %v800_v36 = vmul.f32 %v1349_v12, %v784_v44  ;;  %v818_v63 = vadd.f32 %v1356_v19, %v802_v45 }
 0x139   : > { %893 = vst.msk [vmem:[%s1384_s19 + $0x78] sm:$0xff] %vm498_vm0, %v877_v46  ;;  %v838_v5 = vmul.f32 %v1358_v20, %v770_v27 }
 0x13a   : > { %v768_v48 = vmax.f32 %v752_v47, 0.0  ;;  %v816_v49 = vadd.f32 %v1356_v19, %v800_v36  ;;  %v859_v51 = vmul.f32 %v1362_v28, %v818_v63 }
 0x13c   : > { %v836_v52 = vmul.f32 %v1358_v20, %v768_v48  ;;  %v857_v53 = vmul.f32 %v1362_v28, %v816_v49  ;;  %v875_v54 = vadd.f32 %v859_v51, %v838_v5 }
 0x13e   : > { %v873_v56 = vadd.f32 %v857_v53, %v836_v52  ;;  %891 = vst.msk [vmem:[%s1384_s19 + $0x68] sm:$0xff] %vm498_vm0, %v875_v54 }
 0x140   : > { %889 = vst.msk [vmem:[%s1384_s19 + $0x58] sm:$0xff] %vm498_vm0, %v873_v56 }
 0x141 PF: > { %s13_s12 = sadd.s32 1, %s1199_s12  }
 0x142   : > { %p10_p4 = scmp.ge.s32.totalorder %s13_s12, 4  }
 0x144   :  { %12 = sbr.rel (!%p10_p4) target bundleno = 1 (0x1), region = 62 }

// kernel: mcnet_forward.23
= control target key start
LH: loop header
LB: loop body
LE: loop exit
PB: predicated region body
PF: predicated region fallthrough
CT: control target
= control target key end

     0   :  { %vm83_vm0 = vcmask 523264   ;;  %v217_v8 = vlaneseq  ;;  %vm250_vm1 = vcmask 261120   ;;  %s466_s1 = inlined_call_operand.vmem [shape: bf16[64,32], index: 1, kind: input, shape index: {}]   ;;  %s467_s0 = inlined_call_operand.vmem [shape: bf16[64,64], index: 0, kind: input, shape index: {}]   ;;  %s468_s2 = inlined_call_operand.vmem [shape: f32[4,32], index: 2, kind: input, shape index: {}]   ;;  %s469_s3 = inlined_call_operand.vmem [shape: f32[64,32], index: 3, kind: output, shape index: {}]  }
   0x1   :  { %v310_v0 = vld [vmem:[%s466_s1] sm:$0xff]   ;;  %v311_v1 = vld [vmem:[%s466_s1 + $0x8] sm:$0xff]   ;;  %v312_v2 = vld [vmem:[%s466_s1 + $0x10] sm:$0xff]  }
   0x2   :  { %286 = vmatprep.subr.bf16.mxu0 %v310_v0  ;;  %302 = vmatprep.subr.bf16.mxu1 %v310_v0  ;;  %v314_v3 = vld [vmem:[%s467_s0] sm:$0xff]   ;;  %v315_v4 = vld [vmem:[%s467_s0 + $0x10] sm:$0xff]   ;;  %v313_v5 = vld [vmem:[%s466_s1 + $0x18] sm:$0xff]   ;;  %v218_v9 = vshrl.u32 %v217_v8, 7 }
   0x3   :  { %287 = vmatpush3.bf16.msra.mxu0 %v310_v0  ;;  %306 = vmatpush3.bf16.msra.mxu1 %v310_v0  ;;  %v316_v6 = vld [vmem:[%s467_s0 + $0x8] sm:$0xff]   ;;  %v317_v7 = vld [vmem:[%s467_s0 + $0x18] sm:$0xff]   ;;  %v34_v10 = vld [vmem:[%s468_s2 + $0x3] sm:$0x1] }
   0x4   :  { %288 = vmatprep.subr.bf16.mxu0 %v311_v1  ;;  %303 = vmatprep.subr.bf16.mxu1 %v311_v1  ;;  %v219_v11 = vsub.s32 0, %v218_v9  ;;  %v263_v12 = vld [vmem:[%s468_s2] ss:$0 sm:$0xff]  ;;  %v229_v13 = vsub.f32 1.0, %v34_v10  ;;  %v375_v14 = vld [vmem:[%s468_s2 + $0x1] ss:$0 sm:$0xff] }
   0x5   :  { %294 = vmatprep.mubr.msk.bf16.mxu0 %vm83_vm0, %v314_v3  ;;  %298 = vmatprep.mubr.msk.bf16.mxu1 %vm83_vm0, %v315_v4  ;;  %v382_v22 = vld [vmem:[%s468_s2 + $0x2] ss:$0 sm:$0xff] }
   0x6   :  { %v377_v18 = vrot.slane %v34_v10, %v219_v11  ;;  %v384_v23 = vrot.slane %v229_v13, %v219_v11 }
   0x7   :  { %289 = vmatpush3.bf16.msra.mxu0 %v311_v1  ;;  %307 = vmatpush3.bf16.msra.mxu1 %v311_v1 }
   0x8   :  { %290 = vmatprep.subr.bf16.mxu0 %v312_v2  ;;  %304 = vmatprep.subr.bf16.mxu1 %v312_v2 }
   0xb   :  { %291 = vmatpush3.bf16.msra.mxu0 %v312_v2  ;;  %308 = vmatpush3.bf16.msra.mxu1 %v312_v2 }
   0xc   :  { %292 = vmatprep.subr.bf16.mxu0 %v313_v5  ;;  %305 = vmatprep.subr.bf16.mxu1 %v313_v5 }
   0xf   :  { %293 = vmatpush3.bf16.msra.mxu0 %v313_v5  ;;  %309 = vmatpush3.bf16.msra.mxu1 %v313_v5 }
  0x12   :  { %295 = vmatmul.mubr.msk.bf16.vlgmr.msra.gmra.mrb[0].mxu0 %vm83_vm0, %v316_v6  ;;  %299 = vmatmul.mubr.msk.bf16.vlgmr.msra.gmra.mrb[0].mxu1 %vm83_vm0, %v317_v7 }
  0xe5   :  { %v296_v15 = vpop.f32.mrb[0].mxu0  ;;  %v300_v16 = vpop.f32.mrb[0].mxu1 }
  0xe6   :  { %v139_v17 = vadd.f32 %v296_v15, %v263_v12  ;;  %v155_v19 = vadd.f32 %v300_v16, %v263_v12  ;;  %v130_v20 = vpop.f32.mrb[1].mxu0  ;;  %v146_v21 = vpop.f32.mrb[1].mxu1 }
  0xe7   :  { %v131_v24 = vadd.f32 %v263_v12, %v130_v20  ;;  %v147_v25 = vadd.f32 %v263_v12, %v146_v21  ;;  %v297_v26 = vpop.f32.mrb[2].mxu0  ;;  %v301_v27 = vpop.f32.mrb[2].mxu1 }
  0xe8   :  { %v167_v28 = vmul.f32 %v375_v14, %v139_v17  ;;  %v195_v29 = vmax.f32 %v139_v17, 0.0  ;;  %v171_v30 = vmul.f32 %v375_v14, %v155_v19  ;;  %v199_v31 = vmax.f32 %v155_v19, 0.0  ;;  %v133_v32 = vpop.f32.mrb[3].mxu0  ;;  %v149_v33 = vpop.f32.mrb[3].mxu1 }
  0xe9   :  { %v165_v34 = vmul.f32 %v375_v14, %v131_v24  ;;  %v193_v35 = vmax.f32 %v131_v24, 0.0  ;;  %v169_v36 = vmul.f32 %v375_v14, %v147_v25  ;;  %v197_v37 = vmax.f32 %v147_v25, 0.0 }
  0xea   :  { %v179_v38 = vadd.f32 %v382_v22, %v167_v28  ;;  %v203_v39 = vmul.f32 %v375_v14, %v195_v29  ;;  %v183_v40 = vadd.f32 %v382_v22, %v171_v30  ;;  %v207_v41 = vmul.f32 %v375_v14, %v199_v31 }
  0xeb   :  { %v177_v42 = vadd.f32 %v382_v22, %v165_v34  ;;  %v201_v43 = vmul.f32 %v375_v14, %v193_v35  ;;  %v181_v44 = vadd.f32 %v382_v22, %v169_v36  ;;  %v205_v45 = vmul.f32 %v375_v14, %v197_v37 }
  0xec   :  { %v187_v46 = vmax.f32 %v179_v38, 0.0  ;;  %v211_v47 = vadd.f32 %v382_v22, %v203_v39  ;;  %v191_v48 = vmax.f32 %v183_v40, 0.0  ;;  %v215_v49 = vadd.f32 %v382_v22, %v207_v41 }
  0xed   :  { %v185_v50 = vmax.f32 %v177_v42, 0.0  ;;  %v209_v51 = vadd.f32 %v382_v22, %v201_v43  ;;  %v189_v52 = vmax.f32 %v181_v44, 0.0  ;;  %v213_v53 = vadd.f32 %v382_v22, %v205_v45 }
  0xee   :  { %v223_v54 = vmul.f32 %v377_v18, %v187_v46  ;;  %v236_v55 = vmul.f32 %v384_v23, %v211_v47  ;;  %v227_v56 = vmul.f32 %v377_v18, %v191_v48  ;;  %v240_v57 = vmul.f32 %v384_v23, %v215_v49 }
  0xef   :  { %v221_v58 = vmul.f32 %v377_v18, %v185_v50  ;;  %v234_v59 = vmul.f32 %v384_v23, %v209_v51  ;;  %v225_v60 = vmul.f32 %v377_v18, %v189_v52  ;;  %v238_v61 = vmul.f32 %v384_v23, %v213_v53 }
  0xf0   :  { %v244_v62 = vadd.f32 %v236_v55, %v223_v54  ;;  %v248_v63 = vadd.f32 %v240_v57, %v227_v56  ;;  %v142_v0 = vadd.f32 %v297_v26, %v263_v12  ;;  %v158_v1 = vadd.f32 %v301_v27, %v263_v12 }
  0xf1   :  { %v242_v2 = vadd.f32 %v234_v59, %v221_v58  ;;  %v246_v3 = vadd.f32 %v238_v61, %v225_v60  ;;  %v134_v4 = vadd.f32 %v263_v12, %v133_v32  ;;  %v150_v5 = vadd.f32 %v263_v12, %v149_v33 }
  0xf2   :  { %253 = vst.msk [vmem:[%s469_s3 + $0x10] sm:$0xff] %vm250_vm1, %v244_v62  ;;  %257 = vst.msk [vmem:[%s469_s3 + $0x30] sm:$0xff] %vm250_vm1, %v248_v63  ;;  %v168_v6 = vmul.f32 %v375_v14, %v142_v0  ;;  %v196_v7 = vmax.f32 %v142_v0, 0.0  ;;  %v172_v8 = vmul.f32 %v375_v14, %v158_v1  ;;  %v200_v9 = vmax.f32 %v158_v1, 0.0 }
  0xf3   :  { %251 = vst.msk [vmem:[%s469_s3] sm:$0xff] %vm250_vm1, %v242_v2  ;;  %255 = vst.msk [vmem:[%s469_s3 + $0x20] sm:$0xff] %vm250_vm1, %v246_v3  ;;  %v166_v10 = vmul.f32 %v375_v14, %v134_v4  ;;  %v194_v11 = vmax.f32 %v134_v4, 0.0  ;;  %v170_v12 = vmul.f32 %v375_v14, %v150_v5  ;;  %v198_v13 = vmax.f32 %v150_v5, 0.0 }
  0xf4   :  { %v180_v15 = vadd.f32 %v382_v22, %v168_v6  ;;  %v204_v16 = vmul.f32 %v375_v14, %v196_v7  ;;  %v184_v17 = vadd.f32 %v382_v22, %v172_v8  ;;  %v208_v19 = vmul.f32 %v375_v14, %v200_v9 }
  0xf5   :  { %v178_v20 = vadd.f32 %v382_v22, %v166_v10  ;;  %v202_v21 = vmul.f32 %v375_v14, %v194_v11  ;;  %v182_v24 = vadd.f32 %v382_v22, %v170_v12  ;;  %v206_v25 = vmul.f32 %v375_v14, %v198_v13 }
  0xf6   :  { %v188_v26 = vmax.f32 %v180_v15, 0.0  ;;  %v212_v27 = vadd.f32 %v382_v22, %v204_v16  ;;  %v192_v28 = vmax.f32 %v184_v17, 0.0  ;;  %v216_v29 = vadd.f32 %v382_v22, %v208_v19 }
  0xf7   :  { %v186_v30 = vmax.f32 %v178_v20, 0.0  ;;  %v210_v31 = vadd.f32 %v382_v22, %v202_v21  ;;  %v190_v32 = vmax.f32 %v182_v24, 0.0  ;;  %v214_v33 = vadd.f32 %v382_v22, %v206_v25 }
  0xf8   :  { %v224_v34 = vmul.f32 %v377_v18, %v188_v26  ;;  %v237_v35 = vmul.f32 %v384_v23, %v212_v27  ;;  %v228_v36 = vmul.f32 %v377_v18, %v192_v28  ;;  %v241_v14 = vmul.f32 %v384_v23, %v216_v29 }
  0xf9   :  { %v222_v37 = vmul.f32 %v377_v18, %v186_v30  ;;  %v235_v38 = vmul.f32 %v384_v23, %v210_v31  ;;  %v226_v39 = vmul.f32 %v377_v18, %v190_v32  ;;  %v239_v40 = vmul.f32 %v384_v23, %v214_v33 }
  0xfa   :  { %v245_v41 = vadd.f32 %v237_v35, %v224_v34  ;;  %v249_v42 = vadd.f32 %v241_v14, %v228_v36 }
  0xfb   :  { %v243_v43 = vadd.f32 %v235_v38, %v222_v37  ;;  %v247_v22 = vadd.f32 %v239_v40, %v226_v39 }
  0xfc   :  { %254 = vst.msk [vmem:[%s469_s3 + $0x18] sm:$0xff] %vm250_vm1, %v245_v41  ;;  %258 = vst.msk [vmem:[%s469_s3 + $0x38] sm:$0xff] %vm250_vm1, %v249_v42 }
  0xfd   :  { %252 = vst.msk [vmem:[%s469_s3 + $0x8] sm:$0xff] %vm250_vm1, %v243_v43  ;;  %256 = vst.msk [vmem:[%s469_s3 + $0x28] sm:$0xff] %vm250_vm1, %v247_v22 }

// kernel: mcnet_forward.24
= control target key start
LH: loop header
LB: loop body
LE: loop exit
PB: predicated region body
PF: predicated region fallthrough
CT: control target
= control target key end

     0   :  { %v394_v0 = vmov 0   ;;  %vm147_vm0 = vcmask 261120   ;;  %v281_v19 = vlaneseq  ;;  %s575_s1 = inlined_call_operand.vmem [shape: bf16[160,128], index: 1, kind: input, shape index: {}]   ;;  %s576_s0 = inlined_call_operand.vmem [shape: bf16[64,160], index: 0, kind: input, shape index: {}]   ;;  %s577_s2 = inlined_call_operand.vmem [shape: f32[4,128], index: 2, kind: input, shape index: {}]   ;;  %s578_s3 = inlined_call_operand.vmem [shape: f32[64,128], index: 3, kind: output, shape index: {}]  }
   0x1   :  { %160 = vmatprep.subr.bf16.mxu0 %v394_v0  ;;  %351 = vmatprep.subr.bf16.mxu1 %v394_v0  ;;  %v372_v1 = vld [vmem:[%s575_s1] sm:$0xff]   ;;  %v373_v2 = vld [vmem:[%s575_s1 + $0x8] sm:$0xff]   ;;  %v374_v3 = vld [vmem:[%s575_s1 + $0x10] sm:$0xff]  }
   0x2   :  { %161 = vmatpush1.bf16.msra.mxu0 %v372_v1  ;;  %361 = vmatpush1.bf16.msra.mxu1 %v372_v1  ;;  %v375_v4 = vld [vmem:[%s575_s1 + $0x18] sm:$0xff]   ;;  %v384_v5 = vld [vmem:[%s576_s0 + $0x4] ss:$8 sps:$4 sm:$0xff]   ;;  %v378_v9 = vld [vmem:[%s575_s1 + $0x30] sm:$0xff]   ;;  %v282_v20 = vshrl.u32 %v281_v19, 7 }
   0x3   :  { %162 = vmatprep.subr.bf16.mxu0 %v394_v0  ;;  %352 = vmatprep.subr.bf16.mxu1 %v394_v0  ;;  %v387_v6 = vld [vmem:[%s576_s0 + $0x24] ss:$8 sps:$4 sm:$0xff]   ;;  %v379_v10 = vld [vmem:[%s575_s1 + $0x38] sm:$0xff]   ;;  %v382_v13 = vld [vmem:[%s576_s0] ss:$8 sps:$4 sm:$0xff]  }
   0x4   :  { %345 = vmatprep.mubr.msk.bf16.mxu0 %vm147_vm0, %v384_v5  ;;  %v376_v7 = vld [vmem:[%s575_s1 + $0x20] sm:$0xff]   ;;  %347 = vmatprep.mubr.msk.bf16.mxu1 %vm147_vm0, %v387_v6  ;;  %v377_v8 = vld [vmem:[%s575_s1 + $0x28] sm:$0xff]   ;;  %v388_v15 = vld [vmem:[%s576_s0 + $0x14] ss:$8 sps:$4 sm:$0xff]   ;;  %v283_v25 = vsub.s32 0, %v282_v20 }
   0x5   :  { %v380_v11 = vld [vmem:[%s575_s1 + $0x40] sm:$0xff]   ;;  %v381_v12 = vld [vmem:[%s575_s1 + $0x48] sm:$0xff]   ;;  %v390_v16 = vld [vmem:[%s576_s0 + $0x34] ss:$8 sps:$4 sm:$0xff]  }
   0x6   :  { %163 = vmatpush1.bf16.msra.mxu0 %v373_v2  ;;  %362 = vmatpush1.bf16.msra.mxu1 %v373_v2  ;;  %v385_v14 = vld [vmem:[%s576_s0 + $0x20] ss:$8 sps:$4 sm:$0xff]   ;;  %v392_v17 = vld [vmem:[%s576_s0 + $0x10] ss:$8 sps:$4 sm:$0xff]  }
   0x7   :  { %164 = vmatprep.subr.bf16.mxu0 %v394_v0  ;;  %353 = vmatprep.subr.bf16.mxu1 %v394_v0  ;;  %v393_v18 = vld [vmem:[%s576_s0 + $0x30] ss:$8 sps:$4 sm:$0xff]   ;;  %v46_v21 = vld [vmem:[%s577_s2 + $0x3] sm:$0x1]  ;;  %v479_v22 = vld [vmem:[%s577_s2] ss:$0 sm:$0xff] }
   0x8   :  { %v484_v23 = vld [vmem:[%s577_s2 + $0x1] ss:$0 sm:$0xff]  ;;  %v293_v26 = vsub.f32 1.0, %v46_v21  ;;  %v491_v32 = vld [vmem:[%s577_s2 + $0x2] ss:$0 sm:$0xff]  ;;  %v495_v41 = vrot.slane %v46_v21, %v283_v25 }
   0xa   :  { %165 = vmatpush1.bf16.msra.mxu0 %v374_v3  ;;  %363 = vmatpush1.bf16.msra.mxu1 %v374_v3  ;;  %v497_v42 = vrot.slane %v293_v26, %v283_v25 }
   0xb   :  { %166 = vmatprep.subr.bf16.mxu0 %v394_v0  ;;  %354 = vmatprep.subr.bf16.mxu1 %v394_v0 }
   0xe   :  { %167 = vmatpush1.bf16.msra.mxu0 %v375_v4  ;;  %364 = vmatpush1.bf16.msra.mxu1 %v375_v4 }
   0xf   :  { %168 = vmatprep.subr.bf16.mxu0 %v394_v0  ;;  %355 = vmatprep.subr.bf16.mxu1 %v394_v0 }
  0x12   :  { %169 = vmatpush1.bf16.msra.mxu0 %v376_v7  ;;  %365 = vmatpush1.bf16.msra.mxu1 %v376_v7 }
  0x13   :  { %170 = vmatprep.subr.bf16.mxu0 %v394_v0  ;;  %356 = vmatprep.subr.bf16.mxu1 %v394_v0 }
  0x16   :  { %171 = vmatpush1.bf16.msra.mxu0 %v377_v8  ;;  %366 = vmatpush1.bf16.msra.mxu1 %v377_v8 }
  0x17   :  { %172 = vmatprep.subr.bf16.mxu0 %v394_v0  ;;  %357 = vmatprep.subr.bf16.mxu1 %v394_v0 }
  0x1a   :  { %173 = vmatpush1.bf16.msra.mxu0 %v378_v9  ;;  %367 = vmatpush1.bf16.msra.mxu1 %v378_v9 }
  0x1b   :  { %174 = vmatprep.subr.bf16.mxu0 %v394_v0  ;;  %358 = vmatprep.subr.bf16.mxu1 %v394_v0 }
  0x1e   :  { %175 = vmatpush1.bf16.msra.mxu0 %v379_v10  ;;  %368 = vmatpush1.bf16.msra.mxu1 %v379_v10 }
  0x1f   :  { %176 = vmatprep.subr.bf16.mxu0 %v394_v0  ;;  %359 = vmatprep.subr.bf16.mxu1 %v394_v0 }
  0x22   :  { %177 = vmatpush1.bf16.msra.mxu0 %v380_v11  ;;  %369 = vmatpush1.bf16.msra.mxu1 %v380_v11 }
  0x23   :  { %178 = vmatprep.subr.bf16.mxu0 %v394_v0  ;;  %360 = vmatprep.subr.bf16.mxu1 %v394_v0 }
  0x26   :  { %179 = vmatpush1.bf16.msra.mxu0 %v381_v12  ;;  %370 = vmatpush1.bf16.msra.mxu1 %v381_v12 }
  0x29   :  { %193 = vmatmul.mubr.bf16.vlgmr.msra.gmra.mrb[0].mxu0 %v382_v13  ;;  %209 = vmatmul.mubr.bf16.vlgmr.msra.gmra.mrb[0].mxu1 %v385_v14 }
  0x2a   :  { %346 = vmatprep.mubr.msk.bf16.mxu0 %vm147_vm0, %v388_v15  ;;  %348 = vmatprep.mubr.msk.bf16.mxu1 %vm147_vm0, %v390_v16 }
  0x31   :  { %201 = vmatmul.mubr.bf16.gmra.mrb[4].mxu0 %v392_v17  ;;  %217 = vmatmul.mubr.bf16.gmra.mrb[4].mxu1 %v393_v18 }
  0xfc   :  { %v194_v24 = vpop.f32.mrb[0].mxu0  ;;  %v210_v27 = vpop.f32.mrb[0].mxu1 }
  0xfd   :  { %v195_v28 = vadd.f32 %v479_v22, %v194_v24  ;;  %v211_v29 = vadd.f32 %v479_v22, %v210_v27  ;;  %v196_v30 = vpop.f32.mrb[1].mxu0  ;;  %v212_v31 = vpop.f32.mrb[1].mxu1 }
  0xfe   :  { %v197_v33 = vpop.f32.mrb[2].mxu0  ;;  %v213_v34 = vpop.f32.mrb[2].mxu1 }
  0xff   :  { %v229_v35 = vmul.f32 %v484_v23, %v195_v28  ;;  %v257_v36 = vmax.f32 %v195_v28, 0.0  ;;  %v233_v37 = vmul.f32 %v484_v23, %v211_v29  ;;  %v261_v38 = vmax.f32 %v211_v29, 0.0  ;;  %v199_v39 = vpop.f32.mrb[3].mxu0  ;;  %v215_v40 = vpop.f32.mrb[3].mxu1 }
 0x100   :  { %v198_v43 = vadd.f32 %v479_v22, %v197_v33  ;;  %v214_v44 = vadd.f32 %v479_v22, %v213_v34 }
 0x101   :  { %v241_v45 = vadd.f32 %v491_v32, %v229_v35  ;;  %v265_v46 = vmul.f32 %v484_v23, %v257_v36  ;;  %v245_v47 = vadd.f32 %v491_v32, %v233_v37  ;;  %v269_v48 = vmul.f32 %v484_v23, %v261_v38 }
 0x102   :  { %v230_v49 = vmul.f32 %v484_v23, %v198_v43  ;;  %v258_v50 = vmax.f32 %v198_v43, 0.0  ;;  %v234_v51 = vmul.f32 %v484_v23, %v214_v44  ;;  %v262_v52 = vmax.f32 %v214_v44, 0.0 }
 0x103   :  { %v249_v53 = vmax.f32 %v241_v45, 0.0  ;;  %v273_v54 = vadd.f32 %v491_v32, %v265_v46  ;;  %v253_v55 = vmax.f32 %v245_v47, 0.0  ;;  %v277_v56 = vadd.f32 %v491_v32, %v269_v48 }
 0x104   :  { %v242_v57 = vadd.f32 %v491_v32, %v230_v49  ;;  %v266_v58 = vmul.f32 %v484_v23, %v258_v50  ;;  %v246_v59 = vadd.f32 %v491_v32, %v234_v51  ;;  %v270_v60 = vmul.f32 %v484_v23, %v262_v52  ;;  %v202_v61 = vpop.f32.mrb[4].mxu0  ;;  %v218_v62 = vpop.f32.mrb[4].mxu1 }
 0x105   :  { %v285_v63 = vmul.f32 %v495_v41, %v249_v53  ;;  %v298_v0 = vmul.f32 %v497_v42, %v273_v54  ;;  %v289_v1 = vmul.f32 %v495_v41, %v253_v55  ;;  %v302_v2 = vmul.f32 %v497_v42, %v277_v56  ;;  %v204_v3 = vpop.f32.mrb[5].mxu0  ;;  %v220_v4 = vpop.f32.mrb[5].mxu1 }
 0x106   :  { %v250_v5 = vmax.f32 %v242_v57, 0.0  ;;  %v274_v6 = vadd.f32 %v491_v32, %v266_v58  ;;  %v254_v7 = vmax.f32 %v246_v59, 0.0  ;;  %v278_v8 = vadd.f32 %v491_v32, %v270_v60  ;;  %v205_v9 = vpop.f32.mrb[6].mxu0  ;;  %v221_v10 = vpop.f32.mrb[6].mxu1 }
 0x107   :  { %v306_v11 = vadd.f32 %v298_v0, %v285_v63  ;;  %v310_v12 = vadd.f32 %v302_v2, %v289_v1  ;;  %v203_v13 = vadd.f32 %v479_v22, %v202_v61  ;;  %v219_v14 = vadd.f32 %v479_v22, %v218_v62  ;;  %v207_v15 = vpop.f32.mrb[7].mxu0  ;;  %v223_v16 = vpop.f32.mrb[7].mxu1 }
 0x108   :  { %v286_v17 = vmul.f32 %v495_v41, %v250_v5  ;;  %v299_v18 = vmul.f32 %v497_v42, %v274_v6  ;;  %v290_v19 = vmul.f32 %v495_v41, %v254_v7  ;;  %v303_v20 = vmul.f32 %v497_v42, %v278_v8 }
 0x109   :  { %314 = vst [vmem:[%s578_s3] sm:$0xff] %v306_v11  ;;  %318 = vst [vmem:[%s578_s3 + $0x20] sm:$0xff] %v310_v12  ;;  %v231_v21 = vmul.f32 %v484_v23, %v203_v13  ;;  %v259_v24 = vmax.f32 %v203_v13, 0.0  ;;  %v235_v25 = vmul.f32 %v484_v23, %v219_v14  ;;  %v263_v26 = vmax.f32 %v219_v14, 0.0 }
 0x10a   :  { %v307_v27 = vadd.f32 %v299_v18, %v286_v17  ;;  %v311_v28 = vadd.f32 %v303_v20, %v290_v19  ;;  %v206_v29 = vadd.f32 %v479_v22, %v205_v9  ;;  %v222_v30 = vadd.f32 %v479_v22, %v221_v10 }
 0x10b   :  { %v243_v31 = vadd.f32 %v491_v32, %v231_v21  ;;  %v267_v33 = vmul.f32 %v484_v23, %v259_v24  ;;  %v247_v34 = vadd.f32 %v491_v32, %v235_v25  ;;  %v271_v35 = vmul.f32 %v484_v23, %v263_v26 }
 0x10c   :  { %315 = vst [vmem:[%s578_s3 + $0x8] sm:$0xff] %v307_v27  ;;  %319 = vst [vmem:[%s578_s3 + $0x28] sm:$0xff] %v311_v28  ;;  %v232_v36 = vmul.f32 %v484_v23, %v206_v29  ;;  %v260_v37 = vmax.f32 %v206_v29, 0.0  ;;  %v236_v22 = vmul.f32 %v484_v23, %v222_v30  ;;  %v264_v38 = vmax.f32 %v222_v30, 0.0 }
 0x10d   :  { %v251_v39 = vmax.f32 %v243_v31, 0.0  ;;  %v275_v40 = vadd.f32 %v491_v32, %v267_v33  ;;  %v255_v43 = vmax.f32 %v247_v34, 0.0  ;;  %v279_v44 = vadd.f32 %v491_v32, %v271_v35 }
 0x10e   :  { %v244_v45 = vadd.f32 %v491_v32, %v232_v36  ;;  %v268_v46 = vmul.f32 %v484_v23, %v260_v37  ;;  %v248_v47 = vadd.f32 %v491_v32, %v236_v22  ;;  %v272_v48 = vmul.f32 %v484_v23, %v264_v38 }
 0x10f   :  { %v287_v49 = vmul.f32 %v495_v41, %v251_v39  ;;  %v300_v50 = vmul.f32 %v497_v42, %v275_v40  ;;  %v291_v51 = vmul.f32 %v495_v41, %v255_v43  ;;  %v304_v52 = vmul.f32 %v497_v42, %v279_v44 }
 0x110   :  { %v252_v53 = vmax.f32 %v244_v45, 0.0  ;;  %v276_v54 = vadd.f32 %v491_v32, %v268_v46  ;;  %v256_v55 = vmax.f32 %v248_v47, 0.0  ;;  %v280_v56 = vadd.f32 %v491_v32, %v272_v48 }
 0x111   :  { %v308_v57 = vadd.f32 %v300_v50, %v287_v49  ;;  %v312_v58 = vadd.f32 %v304_v52, %v291_v51 }
 0x112   :  { %v288_v59 = vmul.f32 %v495_v41, %v252_v53  ;;  %v301_v23 = vmul.f32 %v497_v42, %v276_v54  ;;  %v292_v60 = vmul.f32 %v495_v41, %v256_v55  ;;  %v305_v61 = vmul.f32 %v497_v42, %v280_v56 }
 0x113   :  { %316 = vst [vmem:[%s578_s3 + $0x10] sm:$0xff] %v308_v57  ;;  %320 = vst [vmem:[%s578_s3 + $0x30] sm:$0xff] %v312_v58 }
 0x114   :  { %v309_v62 = vadd.f32 %v301_v23, %v288_v59  ;;  %v313_v32 = vadd.f32 %v305_v61, %v292_v60 }
 0x116   :  { %317 = vst [vmem:[%s578_s3 + $0x18] sm:$0xff] %v309_v62  ;;  %321 = vst [vmem:[%s578_s3 + $0x38] sm:$0xff] %v313_v32 }

// kernel: mcnet_forward.22
= control target key start
LH: loop header
LB: loop body
LE: loop exit
PB: predicated region body
PF: predicated region fallthrough
CT: control target
= control target key end

     0   :  { %vm83_vm0 = vcmask 523264   ;;  %v217_v8 = vlaneseq  ;;  %s457_s1 = inlined_call_operand.vmem [shape: bf16[64,128], index: 1, kind: input, shape index: {}]   ;;  %s458_s0 = inlined_call_operand.vmem [shape: bf16[64,64], index: 0, kind: input, shape index: {}]   ;;  %s459_s2 = inlined_call_operand.vmem [shape: f32[4,128], index: 2, kind: input, shape index: {}]   ;;  %s460_s3 = inlined_call_operand.vmem [shape: f32[64,128], index: 3, kind: output, shape index: {}]  }
   0x1   :  { %v309_v0 = vld [vmem:[%s457_s1] sm:$0xff]   ;;  %v310_v1 = vld [vmem:[%s457_s1 + $0x8] sm:$0xff]   ;;  %v311_v2 = vld [vmem:[%s457_s1 + $0x10] sm:$0xff]  }
   0x2   :  { %285 = vmatprep.subr.bf16.mxu0 %v309_v0  ;;  %301 = vmatprep.subr.bf16.mxu1 %v309_v0  ;;  %v313_v3 = vld [vmem:[%s458_s0] sm:$0xff]   ;;  %v314_v4 = vld [vmem:[%s458_s0 + $0x10] sm:$0xff]   ;;  %v312_v5 = vld [vmem:[%s457_s1 + $0x18] sm:$0xff]   ;;  %v218_v9 = vshrl.u32 %v217_v8, 7 }
   0x3   :  { %286 = vmatpush3.bf16.msra.mxu0 %v309_v0  ;;  %305 = vmatpush3.bf16.msra.mxu1 %v309_v0  ;;  %v315_v6 = vld [vmem:[%s458_s0 + $0x8] sm:$0xff]   ;;  %v316_v7 = vld [vmem:[%s458_s0 + $0x18] sm:$0xff]   ;;  %v34_v10 = vld [vmem:[%s459_s2 + $0x3] sm:$0x1] }
   0x4   :  { %287 = vmatprep.subr.bf16.mxu0 %v310_v1  ;;  %302 = vmatprep.subr.bf16.mxu1 %v310_v1  ;;  %v262_v11 = vld [vmem:[%s459_s2] ss:$0 sm:$0xff]  ;;  %v219_v12 = vsub.s32 0, %v218_v9  ;;  %v229_v13 = vsub.f32 1.0, %v34_v10  ;;  %v374_v14 = vld [vmem:[%s459_s2 + $0x1] ss:$0 sm:$0xff] }
   0x5   :  { %293 = vmatprep.mubr.msk.bf16.mxu0 %vm83_vm0, %v313_v3  ;;  %297 = vmatprep.mubr.msk.bf16.mxu1 %vm83_vm0, %v314_v4  ;;  %v379_v21 = vld [vmem:[%s459_s2 + $0x2] ss:$0 sm:$0xff] }
   0x6   :  { %v381_v22 = vrot.slane %v34_v10, %v219_v12  ;;  %v383_v23 = vrot.slane %v229_v13, %v219_v12 }
   0x7   :  { %288 = vmatpush3.bf16.msra.mxu0 %v310_v1  ;;  %306 = vmatpush3.bf16.msra.mxu1 %v310_v1 }
   0x8   :  { %289 = vmatprep.subr.bf16.mxu0 %v311_v2  ;;  %303 = vmatprep.subr.bf16.mxu1 %v311_v2 }
   0xb   :  { %290 = vmatpush3.bf16.msra.mxu0 %v311_v2  ;;  %307 = vmatpush3.bf16.msra.mxu1 %v311_v2 }
   0xc   :  { %291 = vmatprep.subr.bf16.mxu0 %v312_v5  ;;  %304 = vmatprep.subr.bf16.mxu1 %v312_v5 }
   0xf   :  { %292 = vmatpush3.bf16.msra.mxu0 %v312_v5  ;;  %308 = vmatpush3.bf16.msra.mxu1 %v312_v5 }
  0x12   :  { %294 = vmatmul.mubr.msk.bf16.vlgmr.msra.gmra.mrb[0].mxu0 %vm83_vm0, %v315_v6  ;;  %298 = vmatmul.mubr.msk.bf16.vlgmr.msra.gmra.mrb[0].mxu1 %vm83_vm0, %v316_v7 }
  0xe5   :  { %v295_v15 = vpop.f32.mrb[0].mxu0  ;;  %v299_v16 = vpop.f32.mrb[0].mxu1 }
  0xe6   :  { %v139_v17 = vadd.f32 %v295_v15, %v262_v11  ;;  %v155_v18 = vadd.f32 %v299_v16, %v262_v11  ;;  %v130_v19 = vpop.f32.mrb[1].mxu0  ;;  %v146_v20 = vpop.f32.mrb[1].mxu1 }
  0xe7   :  { %v131_v24 = vadd.f32 %v262_v11, %v130_v19  ;;  %v147_v25 = vadd.f32 %v262_v11, %v146_v20  ;;  %v296_v26 = vpop.f32.mrb[2].mxu0  ;;  %v300_v27 = vpop.f32.mrb[2].mxu1 }
  0xe8   :  { %v167_v28 = vmul.f32 %v374_v14, %v139_v17  ;;  %v195_v29 = vmax.f32 %v139_v17, 0.0  ;;  %v171_v30 = vmul.f32 %v374_v14, %v155_v18  ;;  %v199_v31 = vmax.f32 %v155_v18, 0.0  ;;  %v133_v32 = vpop.f32.mrb[3].mxu0  ;;  %v149_v33 = vpop.f32.mrb[3].mxu1 }
  0xe9   :  { %v165_v34 = vmul.f32 %v374_v14, %v131_v24  ;;  %v193_v35 = vmax.f32 %v131_v24, 0.0  ;;  %v169_v36 = vmul.f32 %v374_v14, %v147_v25  ;;  %v197_v37 = vmax.f32 %v147_v25, 0.0 }
  0xea   :  { %v179_v38 = vadd.f32 %v379_v21, %v167_v28  ;;  %v203_v39 = vmul.f32 %v374_v14, %v195_v29  ;;  %v183_v40 = vadd.f32 %v379_v21, %v171_v30  ;;  %v207_v41 = vmul.f32 %v374_v14, %v199_v31 }
  0xeb   :  { %v177_v42 = vadd.f32 %v379_v21, %v165_v34  ;;  %v201_v43 = vmul.f32 %v374_v14, %v193_v35  ;;  %v181_v44 = vadd.f32 %v379_v21, %v169_v36  ;;  %v205_v45 = vmul.f32 %v374_v14, %v197_v37 }
  0xec   :  { %v187_v46 = vmax.f32 %v179_v38, 0.0  ;;  %v211_v47 = vadd.f32 %v379_v21, %v203_v39  ;;  %v191_v48 = vmax.f32 %v183_v40, 0.0  ;;  %v215_v49 = vadd.f32 %v379_v21, %v207_v41 }
  0xed   :  { %v185_v50 = vmax.f32 %v177_v42, 0.0  ;;  %v209_v51 = vadd.f32 %v379_v21, %v201_v43  ;;  %v189_v52 = vmax.f32 %v181_v44, 0.0  ;;  %v213_v53 = vadd.f32 %v379_v21, %v205_v45 }
  0xee   :  { %v223_v54 = vmul.f32 %v381_v22, %v187_v46  ;;  %v236_v55 = vmul.f32 %v383_v23, %v211_v47  ;;  %v227_v56 = vmul.f32 %v381_v22, %v191_v48  ;;  %v240_v57 = vmul.f32 %v383_v23, %v215_v49 }
  0xef   :  { %v221_v58 = vmul.f32 %v381_v22, %v185_v50  ;;  %v234_v59 = vmul.f32 %v383_v23, %v209_v51  ;;  %v225_v60 = vmul.f32 %v381_v22, %v189_v52  ;;  %v238_v61 = vmul.f32 %v383_v23, %v213_v53 }
  0xf0   :  { %v244_v62 = vadd.f32 %v236_v55, %v223_v54  ;;  %v248_v63 = vadd.f32 %v240_v57, %v227_v56  ;;  %v142_v0 = vadd.f32 %v296_v26, %v262_v11  ;;  %v158_v1 = vadd.f32 %v300_v27, %v262_v11 }
  0xf1   :  { %v242_v2 = vadd.f32 %v234_v59, %v221_v58  ;;  %v246_v3 = vadd.f32 %v238_v61, %v225_v60  ;;  %v134_v4 = vadd.f32 %v262_v11, %v133_v32  ;;  %v150_v5 = vadd.f32 %v262_v11, %v149_v33 }
  0xf2   :  { %252 = vst [vmem:[%s460_s3 + $0x10] sm:$0xff] %v244_v62  ;;  %256 = vst [vmem:[%s460_s3 + $0x30] sm:$0xff] %v248_v63  ;;  %v168_v6 = vmul.f32 %v374_v14, %v142_v0  ;;  %v196_v7 = vmax.f32 %v142_v0, 0.0  ;;  %v172_v8 = vmul.f32 %v374_v14, %v158_v1  ;;  %v200_v9 = vmax.f32 %v158_v1, 0.0 }
  0xf3   :  { %250 = vst [vmem:[%s460_s3] sm:$0xff] %v242_v2  ;;  %254 = vst [vmem:[%s460_s3 + $0x20] sm:$0xff] %v246_v3  ;;  %v166_v10 = vmul.f32 %v374_v14, %v134_v4  ;;  %v194_v11 = vmax.f32 %v134_v4, 0.0  ;;  %v170_v12 = vmul.f32 %v374_v14, %v150_v5  ;;  %v198_v13 = vmax.f32 %v150_v5, 0.0 }
  0xf4   :  { %v180_v15 = vadd.f32 %v379_v21, %v168_v6  ;;  %v204_v16 = vmul.f32 %v374_v14, %v196_v7  ;;  %v184_v17 = vadd.f32 %v379_v21, %v172_v8  ;;  %v208_v18 = vmul.f32 %v374_v14, %v200_v9 }
  0xf5   :  { %v178_v19 = vadd.f32 %v379_v21, %v166_v10  ;;  %v202_v20 = vmul.f32 %v374_v14, %v194_v11  ;;  %v182_v24 = vadd.f32 %v379_v21, %v170_v12  ;;  %v206_v25 = vmul.f32 %v374_v14, %v198_v13 }
  0xf6   :  { %v188_v26 = vmax.f32 %v180_v15, 0.0  ;;  %v212_v27 = vadd.f32 %v379_v21, %v204_v16  ;;  %v192_v28 = vmax.f32 %v184_v17, 0.0  ;;  %v216_v29 = vadd.f32 %v379_v21, %v208_v18 }
  0xf7   :  { %v186_v30 = vmax.f32 %v178_v19, 0.0  ;;  %v210_v31 = vadd.f32 %v379_v21, %v202_v20  ;;  %v190_v32 = vmax.f32 %v182_v24, 0.0  ;;  %v214_v33 = vadd.f32 %v379_v21, %v206_v25 }
  0xf8   :  { %v224_v34 = vmul.f32 %v381_v22, %v188_v26  ;;  %v237_v35 = vmul.f32 %v383_v23, %v212_v27  ;;  %v228_v36 = vmul.f32 %v381_v22, %v192_v28  ;;  %v241_v14 = vmul.f32 %v383_v23, %v216_v29 }
  0xf9   :  { %v222_v37 = vmul.f32 %v381_v22, %v186_v30  ;;  %v235_v38 = vmul.f32 %v383_v23, %v210_v31  ;;  %v226_v39 = vmul.f32 %v381_v22, %v190_v32  ;;  %v239_v40 = vmul.f32 %v383_v23, %v214_v33 }
  0xfa   :  { %v245_v41 = vadd.f32 %v237_v35, %v224_v34  ;;  %v249_v42 = vadd.f32 %v241_v14, %v228_v36 }
  0xfb   :  { %v243_v43 = vadd.f32 %v235_v38, %v222_v37  ;;  %v247_v21 = vadd.f32 %v239_v40, %v226_v39 }
  0xfc   :  { %253 = vst [vmem:[%s460_s3 + $0x18] sm:$0xff] %v245_v41  ;;  %257 = vst [vmem:[%s460_s3 + $0x38] sm:$0xff] %v249_v42 }
  0xfd   :  { %251 = vst [vmem:[%s460_s3 + $0x8] sm:$0xff] %v243_v43  ;;  %255 = vst [vmem:[%s460_s3 + $0x28] sm:$0xff] %v247_v21 }

// kernel: mcnet_forward.25
= control target key start
LH: loop header
LB: loop body
LE: loop exit
PB: predicated region body
PF: predicated region fallthrough
CT: control target
= control target key end

     0   :  { %v184_v10 = vlaneseq  ;;  %vm205_vm0 = vcmask 261120   ;;  %s345_s1 = inlined_call_operand.vmem [shape: bf16[128,32], index: 1, kind: input, shape index: {}]   ;;  %s346_s0 = inlined_call_operand.vmem [shape: bf16[32,128], index: 0, kind: input, shape index: {}]   ;;  %s347_s2 = inlined_call_operand.vmem [shape: f32[4,32], index: 2, kind: input, shape index: {}]   ;;  %s348_s3 = inlined_call_operand.vmem [shape: f32[32,32], index: 3, kind: output, shape index: {}]  }
   0x1   :  { %v257_v0 = vld [vmem:[%s345_s1] sm:$0xff]   ;;  %v258_v1 = vld [vmem:[%s345_s1 + $0x8] sm:$0xff]   ;;  %v259_v2 = vld [vmem:[%s345_s1 + $0x10] sm:$0xff]  }
   0x2   :  { %237 = vmatprep.subr.bf16.mxu0 %v257_v0  ;;  %v260_v3 = vld [vmem:[%s345_s1 + $0x18] sm:$0xff]   ;;  %v265_v4 = vld [vmem:[%s346_s0] sm:$0xff]   ;;  %v262_v6 = vld [vmem:[%s345_s1 + $0x28] sm:$0xff]   ;;  %v185_v11 = vshrl.u32 %v184_v10, 7 }
   0x3   :  { %238 = vmatpush3.bf16.msra.mxu0 %v257_v0  ;;  %253 = vmatprep.mubr.bf16.mxu0 %v265_v4  ;;  %v261_v5 = vld [vmem:[%s345_s1 + $0x20] sm:$0xff]   ;;  %v263_v7 = vld [vmem:[%s345_s1 + $0x30] sm:$0xff]   ;;  %v264_v8 = vld [vmem:[%s345_s1 + $0x38] sm:$0xff]  }
   0x4   :  { %239 = vmatprep.subr.bf16.mxu0 %v258_v1  ;;  %v266_v9 = vld [vmem:[%s346_s0 + $0x8] sm:$0xff]   ;;  %v38_v12 = vld [vmem:[%s347_s2 + $0x3] sm:$0x1]  ;;  %v214_v13 = vld [vmem:[%s347_s2] ss:$0 sm:$0xff]  ;;  %v186_v14 = vsub.s32 0, %v185_v11 }
   0x5   :  { %v192_v15 = vsub.f32 1.0, %v38_v12  ;;  %v225_v16 = vld [vmem:[%s347_s2 + $0x1] ss:$0 sm:$0xff]  ;;  %v226_v20 = vld [vmem:[%s347_s2 + $0x2] ss:$0 sm:$0xff] }
   0x6   :  { %v187_v21 = vrot.slane %v38_v12, %v186_v14 }
   0x7   :  { %240 = vmatpush3.bf16.msra.mxu0 %v258_v1  ;;  %v196_v26 = vrot.slane %v192_v15, %v186_v14 }
   0x8   :  { %241 = vmatprep.subr.bf16.mxu0 %v259_v2 }
   0xb   :  { %242 = vmatpush3.bf16.msra.mxu0 %v259_v2 }
   0xc   :  { %243 = vmatprep.subr.bf16.mxu0 %v260_v3 }
   0xf   :  { %244 = vmatpush3.bf16.msra.mxu0 %v260_v3 }
  0x10   :  { %245 = vmatprep.subr.bf16.mxu0 %v261_v5 }
  0x13   :  { %246 = vmatpush3.bf16.msra.mxu0 %v261_v5 }
  0x14   :  { %247 = vmatprep.subr.bf16.mxu0 %v262_v6 }
  0x17   :  { %248 = vmatpush3.bf16.msra.mxu0 %v262_v6 }
  0x18   :  { %249 = vmatprep.subr.bf16.mxu0 %v263_v7 }
  0x1b   :  { %250 = vmatpush3.bf16.msra.mxu0 %v263_v7 }
  0x1c   :  { %251 = vmatprep.subr.bf16.mxu0 %v264_v8 }
  0x1f   :  { %252 = vmatpush3.bf16.msra.mxu0 %v264_v8 }
  0x22   :  { %254 = vmatmul.mubr.bf16.vlgmr.msra.gmra.mrb[0].mxu0 %v266_v9 }
  0xf5   :  { %v255_v17 = vpop.f32.mrb[0].mxu0 }
  0xf6   :  { %v146_v18 = vadd.f32 %v255_v17, %v214_v13  ;;  %v137_v19 = vpop.f32.mrb[1].mxu0 }
  0xf7   :  { %v138_v22 = vadd.f32 %v214_v13, %v137_v19  ;;  %v256_v23 = vpop.f32.mrb[2].mxu0 }
  0xf8   :  { %v158_v24 = vmul.f32 %v225_v16, %v146_v18  ;;  %v174_v25 = vmax.f32 %v146_v18, 0.0  ;;  %v149_v27 = vadd.f32 %v256_v23, %v214_v13  ;;  %v140_v28 = vpop.f32.mrb[3].mxu0 }
  0xf9   :  { %v156_v29 = vmul.f32 %v225_v16, %v138_v22  ;;  %v172_v30 = vmax.f32 %v138_v22, 0.0  ;;  %v141_v31 = vadd.f32 %v214_v13, %v140_v28 }
  0xfa   :  { %v166_v32 = vadd.f32 %v226_v20, %v158_v24  ;;  %v178_v33 = vmul.f32 %v225_v16, %v174_v25  ;;  %v159_v34 = vmul.f32 %v225_v16, %v149_v27  ;;  %v175_v35 = vmax.f32 %v149_v27, 0.0 }
  0xfb   :  { %v164_v36 = vadd.f32 %v226_v20, %v156_v29  ;;  %v176_v37 = vmul.f32 %v225_v16, %v172_v30  ;;  %v157_v38 = vmul.f32 %v225_v16, %v141_v31  ;;  %v173_v39 = vmax.f32 %v141_v31, 0.0 }
  0xfc   :  { %v170_v40 = vmax.f32 %v166_v32, 0.0  ;;  %v182_v41 = vadd.f32 %v226_v20, %v178_v33  ;;  %v167_v42 = vadd.f32 %v226_v20, %v159_v34  ;;  %v179_v43 = vmul.f32 %v225_v16, %v175_v35 }
  0xfd   :  { %v168_v44 = vmax.f32 %v164_v36, 0.0  ;;  %v180_v45 = vadd.f32 %v226_v20, %v176_v37  ;;  %v165_v46 = vadd.f32 %v226_v20, %v157_v38  ;;  %v177_v47 = vmul.f32 %v225_v16, %v173_v39 }
  0xfe   :  { %v190_v48 = vmul.f32 %v187_v21, %v170_v40  ;;  %v199_v49 = vmul.f32 %v196_v26, %v182_v41  ;;  %v171_v50 = vmax.f32 %v167_v42, 0.0  ;;  %v183_v51 = vadd.f32 %v226_v20, %v179_v43 }
  0xff   :  { %v188_v52 = vmul.f32 %v187_v21, %v168_v44  ;;  %v197_v53 = vmul.f32 %v196_v26, %v180_v45  ;;  %v169_v54 = vmax.f32 %v165_v46, 0.0  ;;  %v181_v55 = vadd.f32 %v226_v20, %v177_v47 }
 0x100   :  { %v203_v56 = vadd.f32 %v199_v49, %v190_v48  ;;  %v191_v57 = vmul.f32 %v187_v21, %v171_v50  ;;  %v200_v58 = vmul.f32 %v196_v26, %v183_v51 }
 0x101   :  { %v201_v59 = vadd.f32 %v197_v53, %v188_v52  ;;  %v189_v60 = vmul.f32 %v187_v21, %v169_v54  ;;  %v198_v61 = vmul.f32 %v196_v26, %v181_v55 }
 0x102   :  { %208 = vst.msk [vmem:[%s348_s3 + $0x10] sm:$0xff] %vm205_vm0, %v203_v56  ;;  %v204_v62 = vadd.f32 %v200_v58, %v191_v57 }
 0x103   :  { %206 = vst.msk [vmem:[%s348_s3] sm:$0xff] %vm205_vm0, %v201_v59  ;;  %v202_v63 = vadd.f32 %v198_v61, %v189_v60 }
 0x104   :  { %209 = vst.msk [vmem:[%s348_s3 + $0x18] sm:$0xff] %vm205_vm0, %v204_v62 }
 0x105   :  { %207 = vst.msk [vmem:[%s348_s3 + $0x8] sm:$0xff] %vm205_vm0, %v202_v63 }

// kernel: mcnet_forward.28
= control target key start
LH: loop header
LB: loop body
LE: loop exit
PB: predicated region body
PF: predicated region fallthrough
CT: control target
= control target key end

     0   :  { %v298_v0 = vmov 0   ;;  %vm125_vm0 = vcmask 261120   ;;  %v213_v15 = vlaneseq  ;;  %s385_s1 = inlined_call_operand.vmem [shape: bf16[160,128], index: 1, kind: input, shape index: {}]   ;;  %s386_s0 = inlined_call_operand.vmem [shape: bf16[32,160], index: 0, kind: input, shape index: {}]   ;;  %s387_s2 = inlined_call_operand.vmem [shape: f32[4,128], index: 2, kind: input, shape index: {}]   ;;  %s388_s3 = inlined_call_operand.vmem [shape: f32[32,128], index: 3, kind: output, shape index: {}]  }
   0x1   :  { %132 = vmatprep.subr.bf16.mxu0 %v298_v0  ;;  %261 = vmatprep.subr.bf16.mxu1 %v298_v0  ;;  %v282_v1 = vld [vmem:[%s385_s1] sm:$0xff]   ;;  %v283_v2 = vld [vmem:[%s385_s1 + $0x8] sm:$0xff]   ;;  %v284_v3 = vld [vmem:[%s385_s1 + $0x10] sm:$0xff]  }
   0x2   :  { %133 = vmatpush1.bf16.msra.mxu0 %v282_v1  ;;  %271 = vmatpush1.bf16.msra.mxu1 %v282_v1  ;;  %v285_v4 = vld [vmem:[%s385_s1 + $0x18] sm:$0xff]   ;;  %v294_v5 = vld [vmem:[%s386_s0 + $0x4] ss:$8 sps:$4 sm:$0xff]   ;;  %v288_v9 = vld [vmem:[%s385_s1 + $0x30] sm:$0xff]   ;;  %v214_v16 = vshrl.u32 %v213_v15, 7 }
   0x3   :  { %134 = vmatprep.subr.bf16.mxu0 %v298_v0  ;;  %262 = vmatprep.subr.bf16.mxu1 %v298_v0  ;;  %v297_v6 = vld [vmem:[%s386_s0 + $0x14] ss:$8 sps:$4 sm:$0xff]   ;;  %v286_v7 = vld [vmem:[%s385_s1 + $0x20] sm:$0xff]   ;;  %v287_v8 = vld [vmem:[%s385_s1 + $0x28] sm:$0xff]  }
   0x4   :  { %257 = vmatprep.mubr.msk.bf16.mxu0 %vm125_vm0, %v294_v5  ;;  %258 = vmatprep.mubr.msk.bf16.mxu1 %vm125_vm0, %v297_v6  ;;  %v289_v10 = vld [vmem:[%s385_s1 + $0x38] sm:$0xff]   ;;  %v290_v11 = vld [vmem:[%s385_s1 + $0x40] sm:$0xff]   ;;  %v291_v12 = vld [vmem:[%s385_s1 + $0x48] sm:$0xff]   ;;  %v215_v21 = vsub.s32 0, %v214_v16 }
   0x5   :  { %v292_v13 = vld [vmem:[%s386_s0] ss:$8 sps:$4 sm:$0xff]   ;;  %v295_v14 = vld [vmem:[%s386_s0 + $0x10] ss:$8 sps:$4 sm:$0xff]  }
   0x6   :  { %135 = vmatpush1.bf16.msra.mxu0 %v283_v2  ;;  %272 = vmatpush1.bf16.msra.mxu1 %v283_v2  ;;  %v42_v17 = vld [vmem:[%s387_s2 + $0x3] sm:$0x1]  ;;  %v242_v18 = vld [vmem:[%s387_s2] ss:$0 sm:$0xff]  ;;  %v259_v19 = vld [vmem:[%s387_s2 + $0x1] ss:$0 sm:$0xff] }
   0x7   :  { %136 = vmatprep.subr.bf16.mxu0 %v298_v0  ;;  %263 = vmatprep.subr.bf16.mxu1 %v298_v0  ;;  %v221_v22 = vsub.f32 1.0, %v42_v17  ;;  %v260_v28 = vld [vmem:[%s387_s2 + $0x2] ss:$0 sm:$0xff]  ;;  %v216_v37 = vrot.slane %v42_v17, %v215_v21 }
   0x9   :  { %v225_v38 = vrot.slane %v221_v22, %v215_v21 }
   0xa   :  { %137 = vmatpush1.bf16.msra.mxu0 %v284_v3  ;;  %273 = vmatpush1.bf16.msra.mxu1 %v284_v3 }
   0xb   :  { %138 = vmatprep.subr.bf16.mxu0 %v298_v0  ;;  %264 = vmatprep.subr.bf16.mxu1 %v298_v0 }
   0xe   :  { %139 = vmatpush1.bf16.msra.mxu0 %v285_v4  ;;  %274 = vmatpush1.bf16.msra.mxu1 %v285_v4 }
   0xf   :  { %140 = vmatprep.subr.bf16.mxu0 %v298_v0  ;;  %265 = vmatprep.subr.bf16.mxu1 %v298_v0 }
  0x12   :  { %141 = vmatpush1.bf16.msra.mxu0 %v286_v7  ;;  %275 = vmatpush1.bf16.msra.mxu1 %v286_v7 }
  0x13   :  { %142 = vmatprep.subr.bf16.mxu0 %v298_v0  ;;  %266 = vmatprep.subr.bf16.mxu1 %v298_v0 }
  0x16   :  { %143 = vmatpush1.bf16.msra.mxu0 %v287_v8  ;;  %276 = vmatpush1.bf16.msra.mxu1 %v287_v8 }
  0x17   :  { %144 = vmatprep.subr.bf16.mxu0 %v298_v0  ;;  %267 = vmatprep.subr.bf16.mxu1 %v298_v0 }
  0x1a   :  { %145 = vmatpush1.bf16.msra.mxu0 %v288_v9  ;;  %277 = vmatpush1.bf16.msra.mxu1 %v288_v9 }
  0x1b   :  { %146 = vmatprep.subr.bf16.mxu0 %v298_v0  ;;  %268 = vmatprep.subr.bf16.mxu1 %v298_v0 }
  0x1e   :  { %147 = vmatpush1.bf16.msra.mxu0 %v289_v10  ;;  %278 = vmatpush1.bf16.msra.mxu1 %v289_v10 }
  0x1f   :  { %148 = vmatprep.subr.bf16.mxu0 %v298_v0  ;;  %269 = vmatprep.subr.bf16.mxu1 %v298_v0 }
  0x22   :  { %149 = vmatpush1.bf16.msra.mxu0 %v290_v11  ;;  %279 = vmatpush1.bf16.msra.mxu1 %v290_v11 }
  0x23   :  { %150 = vmatprep.subr.bf16.mxu0 %v298_v0  ;;  %270 = vmatprep.subr.bf16.mxu1 %v298_v0 }
  0x26   :  { %151 = vmatpush1.bf16.msra.mxu0 %v291_v12  ;;  %280 = vmatpush1.bf16.msra.mxu1 %v291_v12 }
  0x29   :  { %165 = vmatmul.mubr.bf16.vlgmr.msra.gmra.mrb[0].mxu0 %v292_v13  ;;  %173 = vmatmul.mubr.bf16.vlgmr.msra.gmra.mrb[0].mxu1 %v295_v14 }
  0xfc   :  { %v166_v20 = vpop.f32.mrb[0].mxu0  ;;  %v174_v23 = vpop.f32.mrb[0].mxu1 }
  0xfd   :  { %v167_v24 = vadd.f32 %v242_v18, %v166_v20  ;;  %v175_v25 = vadd.f32 %v242_v18, %v174_v23  ;;  %v168_v26 = vpop.f32.mrb[1].mxu0  ;;  %v176_v27 = vpop.f32.mrb[1].mxu1 }
  0xfe   :  { %v169_v29 = vpop.f32.mrb[2].mxu0  ;;  %v177_v30 = vpop.f32.mrb[2].mxu1 }
  0xff   :  { %v185_v31 = vmul.f32 %v259_v19, %v167_v24  ;;  %v201_v32 = vmax.f32 %v167_v24, 0.0  ;;  %v187_v33 = vmul.f32 %v259_v19, %v175_v25  ;;  %v203_v34 = vmax.f32 %v175_v25, 0.0  ;;  %v171_v35 = vpop.f32.mrb[3].mxu0  ;;  %v179_v36 = vpop.f32.mrb[3].mxu1 }
 0x100   :  { %v170_v39 = vadd.f32 %v242_v18, %v169_v29  ;;  %v178_v40 = vadd.f32 %v242_v18, %v177_v30 }
 0x101   :  { %v193_v41 = vadd.f32 %v260_v28, %v185_v31  ;;  %v205_v42 = vmul.f32 %v259_v19, %v201_v32  ;;  %v195_v43 = vadd.f32 %v260_v28, %v187_v33  ;;  %v207_v44 = vmul.f32 %v259_v19, %v203_v34 }
 0x102   :  { %v186_v45 = vmul.f32 %v259_v19, %v170_v39  ;;  %v202_v46 = vmax.f32 %v170_v39, 0.0  ;;  %v188_v47 = vmul.f32 %v259_v19, %v178_v40  ;;  %v204_v48 = vmax.f32 %v178_v40, 0.0 }
 0x103   :  { %v197_v49 = vmax.f32 %v193_v41, 0.0  ;;  %v209_v50 = vadd.f32 %v260_v28, %v205_v42  ;;  %v199_v51 = vmax.f32 %v195_v43, 0.0  ;;  %v211_v52 = vadd.f32 %v260_v28, %v207_v44 }
 0x104   :  { %v194_v53 = vadd.f32 %v260_v28, %v186_v45  ;;  %v206_v54 = vmul.f32 %v259_v19, %v202_v46  ;;  %v196_v55 = vadd.f32 %v260_v28, %v188_v47  ;;  %v208_v56 = vmul.f32 %v259_v19, %v204_v48 }
 0x105   :  { %v217_v57 = vmul.f32 %v216_v37, %v197_v49  ;;  %v226_v58 = vmul.f32 %v225_v38, %v209_v50  ;;  %v219_v59 = vmul.f32 %v216_v37, %v199_v51  ;;  %v228_v60 = vmul.f32 %v225_v38, %v211_v52 }
 0x106   :  { %v198_v61 = vmax.f32 %v194_v53, 0.0  ;;  %v210_v62 = vadd.f32 %v260_v28, %v206_v54  ;;  %v200_v63 = vmax.f32 %v196_v55, 0.0  ;;  %v212_v0 = vadd.f32 %v260_v28, %v208_v56 }
 0x107   :  { %v230_v1 = vadd.f32 %v226_v58, %v217_v57  ;;  %v232_v2 = vadd.f32 %v228_v60, %v219_v59 }
 0x108   :  { %v218_v3 = vmul.f32 %v216_v37, %v198_v61  ;;  %v227_v4 = vmul.f32 %v225_v38, %v210_v62  ;;  %v220_v5 = vmul.f32 %v216_v37, %v200_v63  ;;  %v229_v6 = vmul.f32 %v225_v38, %v212_v0 }
 0x109   :  { %234 = vst [vmem:[%s388_s3] sm:$0xff] %v230_v1  ;;  %236 = vst [vmem:[%s388_s3 + $0x10] sm:$0xff] %v232_v2 }
 0x10a   :  { %v231_v7 = vadd.f32 %v227_v4, %v218_v3  ;;  %v233_v8 = vadd.f32 %v229_v6, %v220_v5 }
 0x10c   :  { %235 = vst [vmem:[%s388_s3 + $0x8] sm:$0xff] %v231_v7  ;;  %237 = vst [vmem:[%s388_s3 + $0x18] sm:$0xff] %v233_v8 }

// kernel: mcnet_forward.26
= control target key start
LH: loop header
LB: loop body
LE: loop exit
PB: predicated region body
PF: predicated region fallthrough
CT: control target
= control target key end

     0   :  { %v309_v0 = vmov 0   ;;  %vm128_vm0 = vcmask 261120   ;;  %v216_v15 = vlaneseq  ;;  %s413_s1 = inlined_call_operand.vmem [shape: bf16[160,128], index: 1, kind: input, shape index: {}]   ;;  %s414_s0 = inlined_call_operand.vmem [shape: bf16[32,160], index: 0, kind: input, shape index: {}]   ;;  %s415_s2 = inlined_call_operand.vmem [shape: f32[4,128], index: 2, kind: input, shape index: {}]   ;;  %s416_s3 = inlined_call_operand.vmem [shape: f32[32,128], index: 3, kind: input, shape index: {}]   ;;  %s417_s4 = inlined_call_operand.vmem [shape: f32[32,128], index: 4, kind: output, shape index: {}]  }
   0x1   :  { %135 = vmatprep.subr.bf16.mxu0 %v309_v0  ;;  %272 = vmatprep.subr.bf16.mxu1 %v309_v0  ;;  %v293_v1 = vld [vmem:[%s413_s1] sm:$0xff]   ;;  %v294_v2 = vld [vmem:[%s413_s1 + $0x8] sm:$0xff]   ;;  %v295_v3 = vld [vmem:[%s413_s1 + $0x10] sm:$0xff]  }
   0x2   :  { %136 = vmatpush1.bf16.msra.mxu0 %v293_v1  ;;  %282 = vmatpush1.bf16.msra.mxu1 %v293_v1  ;;  %v296_v4 = vld [vmem:[%s413_s1 + $0x18] sm:$0xff]   ;;  %v305_v5 = vld [vmem:[%s414_s0 + $0x4] ss:$8 sps:$4 sm:$0xff]   ;;  %v299_v9 = vld [vmem:[%s413_s1 + $0x30] sm:$0xff]   ;;  %v217_v16 = vshrl.u32 %v216_v15, 7 }
   0x3   :  { %137 = vmatprep.subr.bf16.mxu0 %v309_v0  ;;  %273 = vmatprep.subr.bf16.mxu1 %v309_v0  ;;  %v308_v6 = vld [vmem:[%s414_s0 + $0x14] ss:$8 sps:$4 sm:$0xff]   ;;  %v297_v7 = vld [vmem:[%s413_s1 + $0x20] sm:$0xff]   ;;  %v298_v8 = vld [vmem:[%s413_s1 + $0x28] sm:$0xff]  }
   0x4   :  { %268 = vmatprep.mubr.msk.bf16.mxu0 %vm128_vm0, %v305_v5  ;;  %269 = vmatprep.mubr.msk.bf16.mxu1 %vm128_vm0, %v308_v6  ;;  %v300_v10 = vld [vmem:[%s413_s1 + $0x38] sm:$0xff]   ;;  %v301_v11 = vld [vmem:[%s413_s1 + $0x40] sm:$0xff]   ;;  %v302_v12 = vld [vmem:[%s413_s1 + $0x48] sm:$0xff]   ;;  %v218_v21 = vsub.s32 0, %v217_v16 }
   0x5   :  { %v303_v13 = vld [vmem:[%s414_s0] ss:$8 sps:$4 sm:$0xff]   ;;  %v306_v14 = vld [vmem:[%s414_s0 + $0x10] ss:$8 sps:$4 sm:$0xff]  }
   0x6   :  { %138 = vmatpush1.bf16.msra.mxu0 %v294_v2  ;;  %283 = vmatpush1.bf16.msra.mxu1 %v294_v2  ;;  %v45_v17 = vld [vmem:[%s415_s2 + $0x3] sm:$0x1]  ;;  %v253_v18 = vld [vmem:[%s415_s2] ss:$0 sm:$0xff]  ;;  %v270_v19 = vld [vmem:[%s415_s2 + $0x1] ss:$0 sm:$0xff] }
   0x7   :  { %139 = vmatprep.subr.bf16.mxu0 %v309_v0  ;;  %274 = vmatprep.subr.bf16.mxu1 %v309_v0  ;;  %v224_v22 = vsub.f32 1.0, %v45_v17  ;;  %v271_v28 = vld [vmem:[%s415_s2 + $0x2] ss:$0 sm:$0xff]  ;;  %v219_v37 = vrot.slane %v45_v17, %v218_v21  ;;  %v239_v62 = vld [vmem:[%s416_s3 + $0x10] sm:$0xff] }
   0x8   :  { %v237_v61 = vld [vmem:[%s416_s3] sm:$0xff] }
   0x9   :  { %v228_v38 = vrot.slane %v224_v22, %v218_v21 }
   0xa   :  { %140 = vmatpush1.bf16.msra.mxu0 %v295_v3  ;;  %284 = vmatpush1.bf16.msra.mxu1 %v295_v3 }
   0xb   :  { %141 = vmatprep.subr.bf16.mxu0 %v309_v0  ;;  %275 = vmatprep.subr.bf16.mxu1 %v309_v0 }
   0xe   :  { %142 = vmatpush1.bf16.msra.mxu0 %v296_v4  ;;  %285 = vmatpush1.bf16.msra.mxu1 %v296_v4 }
   0xf   :  { %143 = vmatprep.subr.bf16.mxu0 %v309_v0  ;;  %276 = vmatprep.subr.bf16.mxu1 %v309_v0 }
  0x12   :  { %144 = vmatpush1.bf16.msra.mxu0 %v297_v7  ;;  %286 = vmatpush1.bf16.msra.mxu1 %v297_v7 }
  0x13   :  { %145 = vmatprep.subr.bf16.mxu0 %v309_v0  ;;  %277 = vmatprep.subr.bf16.mxu1 %v309_v0 }
  0x16   :  { %146 = vmatpush1.bf16.msra.mxu0 %v298_v8  ;;  %287 = vmatpush1.bf16.msra.mxu1 %v298_v8 }
  0x17   :  { %147 = vmatprep.subr.bf16.mxu0 %v309_v0  ;;  %278 = vmatprep.subr.bf16.mxu1 %v309_v0 }
  0x1a   :  { %148 = vmatpush1.bf16.msra.mxu0 %v299_v9  ;;  %288 = vmatpush1.bf16.msra.mxu1 %v299_v9 }
  0x1b   :  { %149 = vmatprep.subr.bf16.mxu0 %v309_v0  ;;  %279 = vmatprep.subr.bf16.mxu1 %v309_v0 }
  0x1e   :  { %150 = vmatpush1.bf16.msra.mxu0 %v300_v10  ;;  %289 = vmatpush1.bf16.msra.mxu1 %v300_v10 }
  0x1f   :  { %151 = vmatprep.subr.bf16.mxu0 %v309_v0  ;;  %280 = vmatprep.subr.bf16.mxu1 %v309_v0 }
  0x22   :  { %152 = vmatpush1.bf16.msra.mxu0 %v301_v11  ;;  %290 = vmatpush1.bf16.msra.mxu1 %v301_v11  ;;  %v238_v11 = vld [vmem:[%s416_s3 + $0x8] sm:$0xff] }
  0x23   :  { %153 = vmatprep.subr.bf16.mxu0 %v309_v0  ;;  %281 = vmatprep.subr.bf16.mxu1 %v309_v0 }
  0x26   :  { %154 = vmatpush1.bf16.msra.mxu0 %v302_v12  ;;  %291 = vmatpush1.bf16.msra.mxu1 %v302_v12  ;;  %v240_v12 = vld [vmem:[%s416_s3 + $0x18] sm:$0xff] }
  0x29   :  { %168 = vmatmul.mubr.bf16.vlgmr.msra.gmra.mrb[0].mxu0 %v303_v13  ;;  %176 = vmatmul.mubr.bf16.vlgmr.msra.gmra.mrb[0].mxu1 %v306_v14 }
  0xfc   :  { %v169_v20 = vpop.f32.mrb[0].mxu0  ;;  %v177_v23 = vpop.f32.mrb[0].mxu1 }
  0xfd   :  { %v170_v24 = vadd.f32 %v253_v18, %v169_v20  ;;  %v178_v25 = vadd.f32 %v253_v18, %v177_v23  ;;  %v171_v26 = vpop.f32.mrb[1].mxu0  ;;  %v179_v27 = vpop.f32.mrb[1].mxu1 }
  0xfe   :  { %v172_v29 = vpop.f32.mrb[2].mxu0  ;;  %v180_v30 = vpop.f32.mrb[2].mxu1 }
  0xff   :  { %v188_v31 = vmul.f32 %v270_v19, %v170_v24  ;;  %v204_v32 = vmax.f32 %v170_v24, 0.0  ;;  %v190_v33 = vmul.f32 %v270_v19, %v178_v25  ;;  %v206_v34 = vmax.f32 %v178_v25, 0.0  ;;  %v174_v35 = vpop.f32.mrb[3].mxu0  ;;  %v182_v36 = vpop.f32.mrb[3].mxu1 }
 0x100   :  { %v173_v39 = vadd.f32 %v253_v18, %v172_v29  ;;  %v181_v40 = vadd.f32 %v253_v18, %v180_v30 }
 0x101   :  { %v196_v41 = vadd.f32 %v271_v28, %v188_v31  ;;  %v208_v42 = vmul.f32 %v270_v19, %v204_v32  ;;  %v198_v43 = vadd.f32 %v271_v28, %v190_v33  ;;  %v210_v44 = vmul.f32 %v270_v19, %v206_v34 }
 0x102   :  { %v189_v45 = vmul.f32 %v270_v19, %v173_v39  ;;  %v205_v46 = vmax.f32 %v173_v39, 0.0  ;;  %v191_v47 = vmul.f32 %v270_v19, %v181_v40  ;;  %v207_v48 = vmax.f32 %v181_v40, 0.0 }
 0x103   :  { %v200_v49 = vmax.f32 %v196_v41, 0.0  ;;  %v212_v50 = vadd.f32 %v271_v28, %v208_v42  ;;  %v202_v51 = vmax.f32 %v198_v43, 0.0  ;;  %v214_v52 = vadd.f32 %v271_v28, %v210_v44 }
 0x104   :  { %v197_v53 = vadd.f32 %v271_v28, %v189_v45  ;;  %v209_v54 = vmul.f32 %v270_v19, %v205_v46  ;;  %v199_v55 = vadd.f32 %v271_v28, %v191_v47  ;;  %v211_v56 = vmul.f32 %v270_v19, %v207_v48 }
 0x105   :  { %v220_v57 = vmul.f32 %v219_v37, %v200_v49  ;;  %v229_v58 = vmul.f32 %v228_v38, %v212_v50  ;;  %v222_v59 = vmul.f32 %v219_v37, %v202_v51  ;;  %v231_v60 = vmul.f32 %v228_v38, %v214_v52 }
 0x106   :  { %v201_v63 = vmax.f32 %v197_v53, 0.0  ;;  %v213_v0 = vadd.f32 %v271_v28, %v209_v54  ;;  %v203_v1 = vmax.f32 %v199_v55, 0.0  ;;  %v215_v2 = vadd.f32 %v271_v28, %v211_v56 }
 0x107   :  { %v233_v3 = vadd.f32 %v229_v58, %v220_v57  ;;  %v235_v4 = vadd.f32 %v231_v60, %v222_v59 }
 0x108   :  { %v221_v5 = vmul.f32 %v219_v37, %v201_v63  ;;  %v230_v6 = vmul.f32 %v228_v38, %v213_v0  ;;  %v223_v7 = vmul.f32 %v219_v37, %v203_v1  ;;  %v232_v8 = vmul.f32 %v228_v38, %v215_v2 }
 0x109   :  { %v241_v9 = vadd.f32 %v237_v61, %v233_v3  ;;  %v243_v10 = vadd.f32 %v239_v62, %v235_v4 }
 0x10a   :  { %v234_v13 = vadd.f32 %v230_v6, %v221_v5  ;;  %v236_v14 = vadd.f32 %v232_v8, %v223_v7 }
 0x10b   :  { %245 = vst [vmem:[%s417_s4] sm:$0xff] %v241_v9  ;;  %247 = vst [vmem:[%s417_s4 + $0x10] sm:$0xff] %v243_v10 }
 0x10c   :  { %v242_v15 = vadd.f32 %v238_v11, %v234_v13  ;;  %v244_v16 = vadd.f32 %v240_v12, %v236_v14 }
 0x10e   :  { %246 = vst [vmem:[%s417_s4 + $0x8] sm:$0xff] %v242_v15  ;;  %248 = vst [vmem:[%s417_s4 + $0x18] sm:$0xff] %v244_v16 }

// kernel: mcnet_forward.29
= control target key start
LH: loop header
LB: loop body
LE: loop exit
PB: predicated region body
PF: predicated region fallthrough
CT: control target
= control target key end

     0   :  { %v230_v0 = vmov 0.0   ;;  %vm231_vm0 = vmmov 0   ;;  %v156_v10 = vlaneseq  ;;  %vm171_vm1 = vcmask 261120   ;;  %s297_s1 = inlined_call_operand.vmem [shape: bf16[128,32], index: 1, kind: input, shape index: {}]   ;;  %s298_s0 = inlined_call_operand.vmem [shape: bf16[16,128], index: 0, kind: input, shape index: {}]   ;;  %s299_s2 = inlined_call_operand.vmem [shape: f32[4,32], index: 2, kind: input, shape index: {}]   ;;  %s300_s3 = inlined_call_operand.vmem [shape: f32[16,32], index: 3, kind: output, shape index: {}]  }
   0x1   :  { %199 = vmatprep.subr.bf16.mxu0 %v230_v0  ;;  %v221_v1 = vld [vmem:[%s297_s1] sm:$0xff]   ;;  %215 = vmatprep.mubr.msk.bf16.mxu0 %vm231_vm0, %v230_v0  ;;  %v222_v2 = vld [vmem:[%s297_s1 + $0x8] sm:$0xff]   ;;  %v223_v3 = vld [vmem:[%s297_s1 + $0x10] sm:$0xff]  }
   0x2   :  { %200 = vmatpush3.bf16.msra.mxu0 %v221_v1  ;;  %v224_v4 = vld [vmem:[%s297_s1 + $0x18] sm:$0xff]   ;;  %v225_v5 = vld [vmem:[%s297_s1 + $0x20] sm:$0xff]   ;;  %v226_v6 = vld [vmem:[%s297_s1 + $0x28] sm:$0xff]   ;;  %v157_v11 = vshrl.u32 %v156_v10, 7 }
   0x3   :  { %201 = vmatprep.subr.bf16.mxu0 %v230_v0  ;;  %v227_v7 = vld [vmem:[%s297_s1 + $0x30] sm:$0xff]   ;;  %v228_v8 = vld [vmem:[%s297_s1 + $0x38] sm:$0xff]   ;;  %v229_v9 = vld [vmem:[%s298_s0] sm:$0xff]  }
   0x4   :  { %v36_v12 = vld [vmem:[%s299_s2 + $0x3] sm:$0x1]  ;;  %v178_v13 = vld [vmem:[%s299_s2] ss:$0 sm:$0xff]  ;;  %v188_v14 = vld [vmem:[%s299_s2 + $0x1] ss:$0 sm:$0xff] }
   0x5   :  { %v158_v16 = vsub.s32 0, %v157_v11  ;;  %v162_v17 = vsub.f32 1.0, %v36_v12  ;;  %v189_v20 = vld [vmem:[%s299_s2 + $0x2] ss:$0 sm:$0xff] }
   0x6   :  { %202 = vmatpush3.bf16.msra.mxu0 %v222_v2 }
   0x7   :  { %203 = vmatprep.subr.bf16.mxu0 %v230_v0  ;;  %v159_v26 = vrot.slane %v36_v12, %v158_v16  ;;  %v166_v27 = vrot.slane %v162_v17, %v158_v16 }
   0xa   :  { %204 = vmatpush3.bf16.msra.mxu0 %v223_v3 }
   0xb   :  { %205 = vmatprep.subr.bf16.mxu0 %v230_v0 }
   0xe   :  { %206 = vmatpush3.bf16.msra.mxu0 %v224_v4 }
   0xf   :  { %207 = vmatprep.subr.bf16.mxu0 %v230_v0 }
  0x12   :  { %208 = vmatpush3.bf16.msra.mxu0 %v225_v5 }
  0x13   :  { %209 = vmatprep.subr.bf16.mxu0 %v230_v0 }
  0x16   :  { %210 = vmatpush3.bf16.msra.mxu0 %v226_v6 }
  0x17   :  { %211 = vmatprep.subr.bf16.mxu0 %v230_v0 }
  0x1a   :  { %212 = vmatpush3.bf16.msra.mxu0 %v227_v7 }
  0x1b   :  { %213 = vmatprep.subr.bf16.mxu0 %v230_v0 }
  0x1e   :  { %214 = vmatpush3.bf16.msra.mxu0 %v228_v8 }
  0x21   :  { %216 = vmatmul.mubr.bf16.vlgmr.msra.gmra.mrb[0].mxu0 %v229_v9 }
  0xf4   :  { %v129_v15 = vpop.f32.mrb[0].mxu0 }
  0xf5   :  { %v130_v18 = vadd.f32 %v178_v13, %v129_v15  ;;  %v217_v19 = vpop.f32.mrb[1].mxu0 }
  0xf6   :  { %v132_v21 = vpop.f32.mrb[2].mxu0 }
  0xf7   :  { %v140_v22 = vmul.f32 %v188_v14, %v130_v18  ;;  %v150_v23 = vmax.f32 %v130_v18, 0.0  ;;  %v133_v24 = vadd.f32 %v178_v13, %v132_v21  ;;  %v218_v25 = vpop.f32.mrb[3].mxu0 }
  0xf9   :  { %v146_v28 = vadd.f32 %v189_v20, %v140_v22  ;;  %v152_v29 = vmul.f32 %v188_v14, %v150_v23  ;;  %v141_v30 = vmul.f32 %v188_v14, %v133_v24  ;;  %v151_v31 = vmax.f32 %v133_v24, 0.0 }
  0xfb   :  { %v148_v32 = vmax.f32 %v146_v28, 0.0  ;;  %v154_v33 = vadd.f32 %v189_v20, %v152_v29  ;;  %v147_v34 = vadd.f32 %v189_v20, %v141_v30  ;;  %v153_v35 = vmul.f32 %v188_v14, %v151_v31 }
  0xfd   :  { %v160_v36 = vmul.f32 %v159_v26, %v148_v32  ;;  %v167_v37 = vmul.f32 %v166_v27, %v154_v33  ;;  %v149_v38 = vmax.f32 %v147_v34, 0.0  ;;  %v155_v39 = vadd.f32 %v189_v20, %v153_v35 }
  0xff   :  { %v169_v40 = vadd.f32 %v167_v37, %v160_v36  ;;  %v161_v41 = vmul.f32 %v159_v26, %v149_v38  ;;  %v168_v42 = vmul.f32 %v166_v27, %v155_v39 }
 0x101   :  { %172 = vst.msk [vmem:[%s300_s3] sm:$0xff] %vm171_vm1, %v169_v40  ;;  %v170_v43 = vadd.f32 %v168_v42, %v161_v41 }
 0x103   :  { %173 = vst.msk [vmem:[%s300_s3 + $0x8] sm:$0xff] %vm171_vm1, %v170_v43 }

// kernel: mcnet_forward.30
= control target key start
LH: loop header
LB: loop body
LE: loop exit
PB: predicated region body
PF: predicated region fallthrough
CT: control target
= control target key end

     0   :  { %v237_v0 = vmov 0   ;;  %vm117_vm0 = vcmask 261120   ;;  %v182_v13 = vlaneseq  ;;  %s323_s1 = inlined_call_operand.vmem [shape: bf16[160,128], index: 1, kind: input, shape index: {}]   ;;  %s324_s0 = inlined_call_operand.vmem [shape: bf16[16,160], index: 0, kind: input, shape index: {}]   ;;  %s325_s2 = inlined_call_operand.vmem [shape: f32[4,128], index: 2, kind: input, shape index: {}]   ;;  %s326_s3 = inlined_call_operand.vmem [shape: f32[16,128], index: 3, kind: input, shape index: {}]   ;;  %s327_s4 = inlined_call_operand.vmem [shape: f32[16,128], index: 4, kind: output, shape index: {}]  }
   0x1   :  { %121 = vmatprep.subr.bf16.mxu0 %v237_v0  ;;  %v224_v1 = vld [vmem:[%s323_s1] sm:$0xff]   ;;  %v225_v2 = vld [vmem:[%s323_s1 + $0x8] sm:$0xff]   ;;  %v226_v3 = vld [vmem:[%s323_s1 + $0x10] sm:$0xff]  }
   0x2   :  { %122 = vmatpush1.bf16.msra.mxu0 %v224_v1  ;;  %v227_v4 = vld [vmem:[%s323_s1 + $0x18] sm:$0xff]   ;;  %v236_v5 = vld [vmem:[%s324_s0 + $0x4] ss:$8 sps:$4 sm:$0xff]   ;;  %v230_v8 = vld [vmem:[%s323_s1 + $0x30] sm:$0xff]   ;;  %v183_v14 = vshrl.u32 %v182_v13, 7 }
   0x3   :  { %123 = vmatprep.subr.bf16.mxu0 %v237_v0  ;;  %220 = vmatprep.mubr.msk.bf16.mxu0 %vm117_vm0, %v236_v5  ;;  %v228_v6 = vld [vmem:[%s323_s1 + $0x20] sm:$0xff]   ;;  %v229_v7 = vld [vmem:[%s323_s1 + $0x28] sm:$0xff]   ;;  %v231_v9 = vld [vmem:[%s323_s1 + $0x38] sm:$0xff]  }
   0x4   :  { %v232_v10 = vld [vmem:[%s323_s1 + $0x40] sm:$0xff]   ;;  %v233_v11 = vld [vmem:[%s323_s1 + $0x48] sm:$0xff]   ;;  %v184_v19 = vsub.s32 0, %v183_v14 }
   0x5   :  { %v234_v12 = vld [vmem:[%s324_s0] ss:$8 sps:$4 sm:$0xff]  }
   0x6   :  { %124 = vmatpush1.bf16.msra.mxu0 %v225_v2  ;;  %v43_v15 = vld [vmem:[%s325_s2 + $0x3] sm:$0x1]  ;;  %v207_v16 = vld [vmem:[%s325_s2] ss:$0 sm:$0xff]  ;;  %v221_v17 = vld [vmem:[%s325_s2 + $0x1] ss:$0 sm:$0xff] }
   0x7   :  { %125 = vmatprep.subr.bf16.mxu0 %v237_v0  ;;  %v188_v20 = vsub.f32 1.0, %v43_v15  ;;  %v222_v23 = vld [vmem:[%s325_s2 + $0x2] ss:$0 sm:$0xff]  ;;  %v185_v29 = vrot.slane %v43_v15, %v184_v19  ;;  %v198_v47 = vld [vmem:[%s326_s3 + $0x8] sm:$0xff] }
   0x8   :  { %v197_v43 = vld [vmem:[%s326_s3] sm:$0xff] }
   0x9   :  { %v192_v30 = vrot.slane %v188_v20, %v184_v19 }
   0xa   :  { %126 = vmatpush1.bf16.msra.mxu0 %v226_v3 }
   0xb   :  { %127 = vmatprep.subr.bf16.mxu0 %v237_v0 }
   0xe   :  { %128 = vmatpush1.bf16.msra.mxu0 %v227_v4 }
   0xf   :  { %129 = vmatprep.subr.bf16.mxu0 %v237_v0 }
  0x12   :  { %130 = vmatpush1.bf16.msra.mxu0 %v228_v6 }
  0x13   :  { %131 = vmatprep.subr.bf16.mxu0 %v237_v0 }
  0x16   :  { %132 = vmatpush1.bf16.msra.mxu0 %v229_v7 }
  0x17   :  { %133 = vmatprep.subr.bf16.mxu0 %v237_v0 }
  0x1a   :  { %134 = vmatpush1.bf16.msra.mxu0 %v230_v8 }
  0x1b   :  { %135 = vmatprep.subr.bf16.mxu0 %v237_v0 }
  0x1e   :  { %136 = vmatpush1.bf16.msra.mxu0 %v231_v9 }
  0x1f   :  { %137 = vmatprep.subr.bf16.mxu0 %v237_v0 }
  0x22   :  { %138 = vmatpush1.bf16.msra.mxu0 %v232_v10 }
  0x23   :  { %139 = vmatprep.subr.bf16.mxu0 %v237_v0 }
  0x26   :  { %140 = vmatpush1.bf16.msra.mxu0 %v233_v11 }
  0x29   :  { %154 = vmatmul.mubr.bf16.vlgmr.msra.gmra.mrb[0].mxu0 %v234_v12 }
  0xfc   :  { %v155_v18 = vpop.f32.mrb[0].mxu0 }
  0xfd   :  { %v156_v21 = vadd.f32 %v207_v16, %v155_v18  ;;  %v157_v22 = vpop.f32.mrb[1].mxu0 }
  0xfe   :  { %v158_v24 = vpop.f32.mrb[2].mxu0 }
  0xff   :  { %v166_v25 = vmul.f32 %v221_v17, %v156_v21  ;;  %v176_v26 = vmax.f32 %v156_v21, 0.0  ;;  %v159_v27 = vadd.f32 %v207_v16, %v158_v24  ;;  %v160_v28 = vpop.f32.mrb[3].mxu0 }
 0x101   :  { %v172_v31 = vadd.f32 %v222_v23, %v166_v25  ;;  %v178_v32 = vmul.f32 %v221_v17, %v176_v26  ;;  %v167_v33 = vmul.f32 %v221_v17, %v159_v27  ;;  %v177_v34 = vmax.f32 %v159_v27, 0.0 }
 0x103   :  { %v174_v35 = vmax.f32 %v172_v31, 0.0  ;;  %v180_v36 = vadd.f32 %v222_v23, %v178_v32  ;;  %v173_v37 = vadd.f32 %v222_v23, %v167_v33  ;;  %v179_v38 = vmul.f32 %v221_v17, %v177_v34 }
 0x105   :  { %v186_v39 = vmul.f32 %v185_v29, %v174_v35  ;;  %v193_v40 = vmul.f32 %v192_v30, %v180_v36  ;;  %v175_v41 = vmax.f32 %v173_v37, 0.0  ;;  %v181_v42 = vadd.f32 %v222_v23, %v179_v38 }
 0x107   :  { %v195_v44 = vadd.f32 %v193_v40, %v186_v39  ;;  %v187_v45 = vmul.f32 %v185_v29, %v175_v41  ;;  %v194_v46 = vmul.f32 %v192_v30, %v181_v42 }
 0x109   :  { %v199_v48 = vadd.f32 %v197_v43, %v195_v44  ;;  %v196_v49 = vadd.f32 %v194_v46, %v187_v45 }
 0x10b   :  { %201 = vst [vmem:[%s327_s4] sm:$0xff] %v199_v48  ;;  %v200_v50 = vadd.f32 %v198_v47, %v196_v49 }
 0x10d   :  { %202 = vst [vmem:[%s327_s4 + $0x8] sm:$0xff] %v200_v50 }

// kernel: mcnet_forward.32
= control target key start
LH: loop header
LB: loop body
LE: loop exit
PB: predicated region body
PF: predicated region fallthrough
CT: control target
= control target key end

     0   :  { %v230_v0 = vmov 0   ;;  %vm114_vm0 = vcmask 261120   ;;  %v179_v13 = vlaneseq  ;;  %s305_s1 = inlined_call_operand.vmem [shape: bf16[160,128], index: 1, kind: input, shape index: {}]   ;;  %s306_s0 = inlined_call_operand.vmem [shape: bf16[16,160], index: 0, kind: input, shape index: {}]   ;;  %s307_s2 = inlined_call_operand.vmem [shape: f32[4,128], index: 2, kind: input, shape index: {}]   ;;  %s308_s3 = inlined_call_operand.vmem [shape: f32[16,128], index: 3, kind: output, shape index: {}]  }
   0x1   :  { %118 = vmatprep.subr.bf16.mxu0 %v230_v0  ;;  %v217_v1 = vld [vmem:[%s305_s1] sm:$0xff]   ;;  %v218_v2 = vld [vmem:[%s305_s1 + $0x8] sm:$0xff]   ;;  %v219_v3 = vld [vmem:[%s305_s1 + $0x10] sm:$0xff]  }
   0x2   :  { %119 = vmatpush1.bf16.msra.mxu0 %v217_v1  ;;  %v220_v4 = vld [vmem:[%s305_s1 + $0x18] sm:$0xff]   ;;  %v229_v5 = vld [vmem:[%s306_s0 + $0x4] ss:$8 sps:$4 sm:$0xff]   ;;  %v223_v8 = vld [vmem:[%s305_s1 + $0x30] sm:$0xff]   ;;  %v180_v14 = vshrl.u32 %v179_v13, 7 }
   0x3   :  { %120 = vmatprep.subr.bf16.mxu0 %v230_v0  ;;  %213 = vmatprep.mubr.msk.bf16.mxu0 %vm114_vm0, %v229_v5  ;;  %v221_v6 = vld [vmem:[%s305_s1 + $0x20] sm:$0xff]   ;;  %v222_v7 = vld [vmem:[%s305_s1 + $0x28] sm:$0xff]   ;;  %v224_v9 = vld [vmem:[%s305_s1 + $0x38] sm:$0xff]  }
   0x4   :  { %v225_v10 = vld [vmem:[%s305_s1 + $0x40] sm:$0xff]   ;;  %v226_v11 = vld [vmem:[%s305_s1 + $0x48] sm:$0xff]   ;;  %v181_v19 = vsub.s32 0, %v180_v14 }
   0x5   :  { %v227_v12 = vld [vmem:[%s306_s0] ss:$8 sps:$4 sm:$0xff]  }
   0x6   :  { %121 = vmatpush1.bf16.msra.mxu0 %v218_v2  ;;  %v40_v15 = vld [vmem:[%s307_s2 + $0x3] sm:$0x1]  ;;  %v200_v16 = vld [vmem:[%s307_s2] ss:$0 sm:$0xff]  ;;  %v214_v17 = vld [vmem:[%s307_s2 + $0x1] ss:$0 sm:$0xff] }
   0x7   :  { %122 = vmatprep.subr.bf16.mxu0 %v230_v0  ;;  %v185_v20 = vsub.f32 1.0, %v40_v15  ;;  %v215_v23 = vld [vmem:[%s307_s2 + $0x2] ss:$0 sm:$0xff]  ;;  %v182_v29 = vrot.slane %v40_v15, %v181_v19 }
   0x9   :  { %v189_v30 = vrot.slane %v185_v20, %v181_v19 }
   0xa   :  { %123 = vmatpush1.bf16.msra.mxu0 %v219_v3 }
   0xb   :  { %124 = vmatprep.subr.bf16.mxu0 %v230_v0 }
   0xe   :  { %125 = vmatpush1.bf16.msra.mxu0 %v220_v4 }
   0xf   :  { %126 = vmatprep.subr.bf16.mxu0 %v230_v0 }
  0x12   :  { %127 = vmatpush1.bf16.msra.mxu0 %v221_v6 }
  0x13   :  { %128 = vmatprep.subr.bf16.mxu0 %v230_v0 }
  0x16   :  { %129 = vmatpush1.bf16.msra.mxu0 %v222_v7 }
  0x17   :  { %130 = vmatprep.subr.bf16.mxu0 %v230_v0 }
  0x1a   :  { %131 = vmatpush1.bf16.msra.mxu0 %v223_v8 }
  0x1b   :  { %132 = vmatprep.subr.bf16.mxu0 %v230_v0 }
  0x1e   :  { %133 = vmatpush1.bf16.msra.mxu0 %v224_v9 }
  0x1f   :  { %134 = vmatprep.subr.bf16.mxu0 %v230_v0 }
  0x22   :  { %135 = vmatpush1.bf16.msra.mxu0 %v225_v10 }
  0x23   :  { %136 = vmatprep.subr.bf16.mxu0 %v230_v0 }
  0x26   :  { %137 = vmatpush1.bf16.msra.mxu0 %v226_v11 }
  0x29   :  { %151 = vmatmul.mubr.bf16.vlgmr.msra.gmra.mrb[0].mxu0 %v227_v12 }
  0xfc   :  { %v152_v18 = vpop.f32.mrb[0].mxu0 }
  0xfd   :  { %v153_v21 = vadd.f32 %v200_v16, %v152_v18  ;;  %v154_v22 = vpop.f32.mrb[1].mxu0 }
  0xfe   :  { %v155_v24 = vpop.f32.mrb[2].mxu0 }
  0xff   :  { %v163_v25 = vmul.f32 %v214_v17, %v153_v21  ;;  %v173_v26 = vmax.f32 %v153_v21, 0.0  ;;  %v156_v27 = vadd.f32 %v200_v16, %v155_v24  ;;  %v157_v28 = vpop.f32.mrb[3].mxu0 }
 0x101   :  { %v169_v31 = vadd.f32 %v215_v23, %v163_v25  ;;  %v175_v32 = vmul.f32 %v214_v17, %v173_v26  ;;  %v164_v33 = vmul.f32 %v214_v17, %v156_v27  ;;  %v174_v34 = vmax.f32 %v156_v27, 0.0 }
 0x103   :  { %v171_v35 = vmax.f32 %v169_v31, 0.0  ;;  %v177_v36 = vadd.f32 %v215_v23, %v175_v32  ;;  %v170_v37 = vadd.f32 %v215_v23, %v164_v33  ;;  %v176_v38 = vmul.f32 %v214_v17, %v174_v34 }
 0x105   :  { %v183_v39 = vmul.f32 %v182_v29, %v171_v35  ;;  %v190_v40 = vmul.f32 %v189_v30, %v177_v36  ;;  %v172_v41 = vmax.f32 %v170_v37, 0.0  ;;  %v178_v42 = vadd.f32 %v215_v23, %v176_v38 }
 0x107   :  { %v192_v43 = vadd.f32 %v190_v40, %v183_v39  ;;  %v184_v44 = vmul.f32 %v182_v29, %v172_v41  ;;  %v191_v45 = vmul.f32 %v189_v30, %v178_v42 }
 0x109   :  { %194 = vst [vmem:[%s308_s3] sm:$0xff] %v192_v43  ;;  %v193_v46 = vadd.f32 %v191_v45, %v184_v44 }
 0x10b   :  { %195 = vst [vmem:[%s308_s3 + $0x8] sm:$0xff] %v193_v46 }

// kernel: mcnet_forward.33
= control target key start
LH: loop header
LB: loop body
LE: loop exit
PB: predicated region body
PF: predicated region fallthrough
CT: control target
= control target key end

     0   :  { %v210_v0 = vmov 0.0   ;;  %vm211_vm0 = vmmov 0   ;;  %v142_v10 = vlaneseq  ;;  %vm154_vm1 = vcmask 523264   ;;  %s274_s1 = inlined_call_operand.vmem [shape: bf16[128,64], index: 1, kind: input, shape index: {}]   ;;  %s275_s0 = inlined_call_operand.vmem [shape: bf16[8,128], index: 0, kind: input, shape index: {}]   ;;  %s276_s2 = inlined_call_operand.vmem [shape: f32[4,64], index: 2, kind: input, shape index: {}]   ;;  %s277_s3 = inlined_call_operand.vmem [shape: f32[8,64], index: 3, kind: output, shape index: {}]  }
   0x1   :  { %180 = vmatprep.subr.bf16.mxu0 %v210_v0  ;;  %v202_v1 = vld [vmem:[%s274_s1] sm:$0xff]   ;;  %196 = vmatprep.mubr.msk.bf16.mxu0 %vm211_vm0, %v210_v0  ;;  %v203_v2 = vld [vmem:[%s274_s1 + $0x8] sm:$0xff]   ;;  %v204_v3 = vld [vmem:[%s274_s1 + $0x10] sm:$0xff]  }
   0x2   :  { %181 = vmatpush3.bf16.msra.mxu0 %v202_v1  ;;  %v205_v4 = vld [vmem:[%s274_s1 + $0x18] sm:$0xff]   ;;  %v206_v5 = vld [vmem:[%s274_s1 + $0x20] sm:$0xff]   ;;  %v207_v6 = vld [vmem:[%s274_s1 + $0x28] sm:$0xff]   ;;  %v143_v11 = vshrl.u32 %v142_v10, 7 }
   0x3   :  { %182 = vmatprep.subr.bf16.mxu0 %v210_v0  ;;  %v208_v7 = vld [vmem:[%s274_s1 + $0x30] sm:$0xff]   ;;  %v209_v8 = vld [vmem:[%s274_s1 + $0x38] sm:$0xff]   ;;  %v15_v9 = vld [vmem:[%s275_s0] sm:$0xf] }
   0x4   :  { %v160_v12 = vld [vmem:[%s276_s2] ss:$0 sm:$0xff]  ;;  %v35_v13 = vld [vmem:[%s276_s2 + $0x3] sm:$0x1]  ;;  %v169_v14 = vld [vmem:[%s276_s2 + $0x1] ss:$0 sm:$0xff] }
   0x5   :  { %v144_v17 = vsub.s32 0, %v143_v11  ;;  %v147_v18 = vsub.f32 1.0, %v35_v13  ;;  %v170_v20 = vld [vmem:[%s276_s2 + $0x2] ss:$0 sm:$0xff] }
   0x6   :  { %183 = vmatpush3.bf16.msra.mxu0 %v203_v2 }
   0x7   :  { %184 = vmatprep.subr.bf16.mxu0 %v210_v0  ;;  %v145_v27 = vrot.slane %v35_v13, %v144_v17  ;;  %v151_v28 = vrot.slane %v147_v18, %v144_v17 }
   0xa   :  { %185 = vmatpush3.bf16.msra.mxu0 %v204_v3 }
   0xb   :  { %186 = vmatprep.subr.bf16.mxu0 %v210_v0 }
   0xe   :  { %187 = vmatpush3.bf16.msra.mxu0 %v205_v4 }
   0xf   :  { %188 = vmatprep.subr.bf16.mxu0 %v210_v0 }
  0x12   :  { %189 = vmatpush3.bf16.msra.mxu0 %v206_v5 }
  0x13   :  { %190 = vmatprep.subr.bf16.mxu0 %v210_v0 }
  0x16   :  { %191 = vmatpush3.bf16.msra.mxu0 %v207_v6 }
  0x17   :  { %192 = vmatprep.subr.bf16.mxu0 %v210_v0 }
  0x1a   :  { %193 = vmatpush3.bf16.msra.mxu0 %v208_v7 }
  0x1b   :  { %194 = vmatprep.subr.bf16.mxu0 %v210_v0 }
  0x1e   :  { %195 = vmatpush3.bf16.msra.mxu0 %v209_v8 }
  0x21   :  { %197 = vmatmul.mubr.bf16.vlgmr.msra.gmra.mrb[0].mxu0 %v15_v9 }
  0xf4   :  { %v122_v15 = vpop.f32.mrb[0].mxu0 }
  0xf5   :  { %v123_v16 = vadd.f32 %v160_v12, %v122_v15  ;;  %v198_v19 = vpop.f32.mrb[1].mxu0 }
  0xf6   :  { %v125_v21 = vpop.f32.mrb[2].mxu0 }
  0xf7   :  { %v132_v22 = vmul.f32 %v169_v14, %v123_v16  ;;  %v139_v23 = vmax.f32 %v123_v16, 0.0  ;;  %v199_v24 = vpop.f32.mrb[3].mxu0 }
  0xf9   :  { %v137_v25 = vadd.f32 %v170_v20, %v132_v22  ;;  %v140_v26 = vmul.f32 %v169_v14, %v139_v23 }
  0xfb   :  { %v138_v29 = vmax.f32 %v137_v25, 0.0  ;;  %v141_v30 = vadd.f32 %v170_v20, %v140_v26 }
  0xfd   :  { %v146_v31 = vmul.f32 %v145_v27, %v138_v29  ;;  %v152_v32 = vmul.f32 %v151_v28, %v141_v30 }
  0xff   :  { %v153_v33 = vadd.f32 %v152_v32, %v146_v31 }
 0x101   :  { %155 = vst.msk [vmem:[%s277_s3] sm:$0xff] %vm154_vm1, %v153_v33 }

// kernel: mcnet_forward.35
= control target key start
LH: loop header
LB: loop body
LE: loop exit
PB: predicated region body
PF: predicated region fallthrough
CT: control target
= control target key end

     0   :  { %v21_v47 = vlaneseq  ;;  %v466_v57 = vmov 1983009808   ;;  %s706_s0 = inlined_call_operand.vmem [shape: f32[2,512], index: 0, kind: input, shape index: {}]   ;;  %s707_s1 = inlined_call_operand.vmem [shape: f32[1,512], index: 1, kind: input, shape index: {}]   ;;  %s708_s2 = inlined_call_operand.vmem [shape: f32[512,128], index: 2, kind: input, shape index: {}]   ;;  %s709_s3 = inlined_call_operand.vmem [shape: f32[1,128], index: 3, kind: input, shape index: {}]   ;;  %s710_s4 = inlined_call_operand.hbm [shape: f32[2,128], index: 4, kind: output, shape index: {}]  }
   0x1   :  { %v73_v0 = vld [vmem:[%s708_s2 + $0x80] sm:$0xff]  ;;  %v74_v1 = vld [vmem:[%s708_s2 + $0x88] sm:$0xff]  ;;  %v75_v11 = vld [vmem:[%s708_s2 + $0x90] sm:$0xff]  ;;  %v40_v58 = vunpack.c.l.s4 %v466_v57 }
   0x2   :  { %v57_v2 = vld [vmem:[%s708_s2] sm:$0xff]  ;;  %v376_v3 = vpack.c.bf16 %v74_v1, %v73_v0  ;;  %v58_v4 = vld [vmem:[%s708_s2 + $0x8] sm:$0xff]  ;;  %v76_v13 = vld [vmem:[%s708_s2 + $0x98] sm:$0xff]  ;;  %v22_v63 = vshrl.u32 %v21_v47, 7 }
   0x3   :  { %v105_v5 = vld [vmem:[%s708_s2 + $0x180] sm:$0xff]  ;;  %v106_v6 = vld [vmem:[%s708_s2 + $0x188] sm:$0xff]  ;;  %v378_v7 = vpack.c.bf16 %v58_v4, %v57_v2  ;;  %v59_v14 = vld [vmem:[%s708_s2 + $0x10] sm:$0xff]  ;;  %v380_v16 = vpack.c.bf16 %v76_v13, %v75_v11 }
   0x4   :  { %v408_v8 = vpack.c.bf16 %v106_v6, %v105_v5  ;;  %v89_v9 = vld [vmem:[%s708_s2 + $0x100] sm:$0xff]  ;;  %v90_v10 = vld [vmem:[%s708_s2 + $0x108] sm:$0xff]  ;;  %377 = vmatprep.subr.bf16.mxu0 %v376_v3  ;;  %v60_v15 = vld [vmem:[%s708_s2 + $0x18] sm:$0xff]  ;;  %v23_v13 = vsub.s32 0, %v22_v63 }
   0x5   :  { %v410_v12 = vpack.c.bf16 %v90_v10, %v89_v9  ;;  %379 = vmatpush3.bf16.msra.mxu0 %v378_v7  ;;  %v382_v17 = vpack.c.bf16 %v60_v15, %v59_v14  ;;  %v107_v18 = vld [vmem:[%s708_s2 + $0x190] sm:$0xff]  ;;  %v108_v19 = vld [vmem:[%s708_s2 + $0x198] sm:$0xff]  ;;  %v77_v23 = vld [vmem:[%s708_s2 + $0xa0] sm:$0xff]  ;;  %v27_v14 = vsub.s32 1, %v22_v63  ;;  %v31_v15 = vsub.s32 2, %v22_v63 }
   0x6   :  { %409 = vmatprep.subr.bf16.mxu1 %v408_v8  ;;  %v91_v20 = vld [vmem:[%s708_s2 + $0x110] sm:$0xff]  ;;  %v412_v21 = vpack.c.bf16 %v108_v19, %v107_v18  ;;  %v92_v22 = vld [vmem:[%s708_s2 + $0x118] sm:$0xff]  ;;  %v78_v24 = vld [vmem:[%s708_s2 + $0xa8] sm:$0xff]  ;;  %381 = vmatprep.subr.bf16.mxu0 %v380_v16  ;;  %v41_v8 = vunpack.c.0.s8 %v40_v58  ;;  %v35_v18 = vsub.s32 3, %v22_v63 }
   0x7   :  { %411 = vmatpush3.bf16.msra.mxu1 %v410_v12  ;;  %v414_v25 = vpack.c.bf16 %v92_v22, %v91_v20  ;;  %v384_v26 = vpack.c.bf16 %v78_v24, %v77_v23  ;;  %v61_v27 = vld [vmem:[%s708_s2 + $0x20] sm:$0xff]  ;;  %v62_v28 = vld [vmem:[%s708_s2 + $0x28] sm:$0xff]  ;;  %v79_v35 = vld [vmem:[%s708_s2 + $0xb0] sm:$0xff] }
   0x8   :  { %v109_v29 = vld [vmem:[%s708_s2 + $0x1a0] sm:$0xff]  ;;  %413 = vmatprep.subr.bf16.mxu1 %v412_v21  ;;  %v110_v30 = vld [vmem:[%s708_s2 + $0x1a8] sm:$0xff]  ;;  %v386_v33 = vpack.c.bf16 %v62_v28, %v61_v27  ;;  %v80_v36 = vld [vmem:[%s708_s2 + $0xb8] sm:$0xff]  ;;  %v44_v27 = vsub.s32 %v41_v8, %v22_v63 }
   0x9   :  { %v93_v31 = vld [vmem:[%s708_s2 + $0x120] sm:$0xff]  ;;  %v94_v32 = vld [vmem:[%s708_s2 + $0x128] sm:$0xff]  ;;  %383 = vmatpush3.bf16.msra.mxu0 %v382_v17  ;;  %v416_v34 = vpack.c.bf16 %v110_v30, %v109_v29  ;;  %v63_v37 = vld [vmem:[%s708_s2 + $0x30] sm:$0xff]  ;;  %v388_v39 = vpack.c.bf16 %v80_v36, %v79_v35 }
   0xa   :  { %385 = vmatprep.subr.bf16.mxu0 %v384_v26  ;;  %v418_v38 = vpack.c.bf16 %v94_v32, %v93_v31  ;;  %v64_v40 = vld [vmem:[%s708_s2 + $0x38] sm:$0xff]  ;;  %v111_v41 = vld [vmem:[%s708_s2 + $0x1b0] sm:$0xff]  ;;  %v81_v46 = vld [vmem:[%s708_s2 + $0xc0] sm:$0xff] }
   0xb   :  { %415 = vmatpush3.bf16.msra.mxu1 %v414_v25  ;;  %v112_v42 = vld [vmem:[%s708_s2 + $0x1b8] sm:$0xff]  ;;  %v95_v44 = vld [vmem:[%s708_s2 + $0x130] sm:$0xff]  ;;  %v82_v48 = vld [vmem:[%s708_s2 + $0xc8] sm:$0xff]  ;;  %v390_v49 = vpack.c.bf16 %v64_v40, %v63_v37 }
   0xc   :  { %417 = vmatprep.subr.bf16.mxu1 %v416_v34  ;;  %v420_v43 = vpack.c.bf16 %v112_v42, %v111_v41  ;;  %v96_v45 = vld [vmem:[%s708_s2 + $0x138] sm:$0xff]  ;;  %v113_v50 = vld [vmem:[%s708_s2 + $0x1c0] sm:$0xff]  ;;  %v114_v51 = vld [vmem:[%s708_s2 + $0x1c8] sm:$0xff]  ;;  %v392_v53 = vpack.c.bf16 %v82_v48, %v81_v46 }
   0xd   :  { %387 = vmatpush3.bf16.msra.mxu0 %v386_v33  ;;  %v422_v52 = vpack.c.bf16 %v96_v45, %v95_v44  ;;  %v65_v54 = vld [vmem:[%s708_s2 + $0x40] sm:$0xff]  ;;  %v66_v55 = vld [vmem:[%s708_s2 + $0x48] sm:$0xff]  ;;  %v424_v59 = vpack.c.bf16 %v114_v51, %v113_v50  ;;  %v83_v61 = vld [vmem:[%s708_s2 + $0xd0] sm:$0xff] }
   0xe   :  { %389 = vmatprep.subr.bf16.mxu0 %v388_v39  ;;  %v97_v56 = vld [vmem:[%s708_s2 + $0x140] sm:$0xff]  ;;  %v98_v60 = vld [vmem:[%s708_s2 + $0x148] sm:$0xff]  ;;  %v84_v62 = vld [vmem:[%s708_s2 + $0xd8] sm:$0xff]  ;;  %v394_v2 = vpack.c.bf16 %v66_v55, %v65_v54 }
   0xf   :  { %419 = vmatpush3.bf16.msra.mxu1 %v418_v38  ;;  %v115_v0 = vld [vmem:[%s708_s2 + $0x1d0] sm:$0xff]  ;;  %v116_v1 = vld [vmem:[%s708_s2 + $0x1d8] sm:$0xff]  ;;  %v426_v3 = vpack.c.bf16 %v98_v60, %v97_v56  ;;  %v396_v4 = vpack.c.bf16 %v84_v62, %v83_v61  ;;  %v85_v11 = vld [vmem:[%s708_s2 + $0xe0] sm:$0xff] }
  0x10   :  { %421 = vmatprep.subr.bf16.mxu1 %v420_v43  ;;  %v67_v5 = vld [vmem:[%s708_s2 + $0x50] sm:$0xff]  ;;  %v68_v6 = vld [vmem:[%s708_s2 + $0x58] sm:$0xff]  ;;  %v428_v9 = vpack.c.bf16 %v116_v1, %v115_v0  ;;  %v86_v12 = vld [vmem:[%s708_s2 + $0xe8] sm:$0xff] }
  0x11   :  { %391 = vmatpush3.bf16.msra.mxu0 %v390_v49  ;;  %v99_v7 = vld [vmem:[%s708_s2 + $0x150] sm:$0xff]  ;;  %v100_v10 = vld [vmem:[%s708_s2 + $0x158] sm:$0xff]  ;;  %v117_v16 = vld [vmem:[%s708_s2 + $0x1e0] sm:$0xff]  ;;  %v398_v19 = vpack.c.bf16 %v68_v6, %v67_v5  ;;  %v400_v23 = vpack.c.bf16 %v86_v12, %v85_v11 }
  0x12   :  { %393 = vmatprep.subr.bf16.mxu0 %v392_v53  ;;  %v118_v17 = vld [vmem:[%s708_s2 + $0x1e8] sm:$0xff]  ;;  %v69_v20 = vld [vmem:[%s708_s2 + $0x60] sm:$0xff]  ;;  %v430_v22 = vpack.c.bf16 %v100_v10, %v99_v7  ;;  %v87_v29 = vld [vmem:[%s708_s2 + $0xf0] sm:$0xff] }
  0x13   :  { %423 = vmatpush3.bf16.msra.mxu1 %v422_v52  ;;  %v70_v21 = vld [vmem:[%s708_s2 + $0x68] sm:$0xff]  ;;  %v101_v24 = vld [vmem:[%s708_s2 + $0x160] sm:$0xff]  ;;  %v432_v28 = vpack.c.bf16 %v118_v17, %v117_v16  ;;  %v88_v30 = vld [vmem:[%s708_s2 + $0xf8] sm:$0xff] }
  0x14   :  { %425 = vmatprep.subr.bf16.mxu1 %v424_v59  ;;  %v102_v25 = vld [vmem:[%s708_s2 + $0x168] sm:$0xff]  ;;  %v19_v26 = vld [vmem:[%s707_s1] sm:$0xf] }
  0x15   :  { %395 = vmatpush3.bf16.msra.mxu0 %v394_v2  ;;  %v24_v31 = vrot.slane %v19_v26, %v23_v13  ;;  %v28_v32 = vrot.slane %v19_v26, %v27_v14  ;;  %v32_v33 = vrot.slane %v19_v26, %v31_v15 }
  0x16   :  { %397 = vmatprep.subr.bf16.mxu0 %v396_v4 }
  0x17   :  { %427 = vmatpush3.bf16.msra.mxu1 %v426_v3 }
  0x18   :  { %429 = vmatprep.subr.bf16.mxu1 %v428_v9 }
  0x19   :  { %9 = vsyncpa [#allocation3], 0  ;;  %v119_v34 = vld [vmem:[%s708_s2 + $0x1f0] sm:$0xff]  ;;  %v120_v35 = vld [vmem:[%s708_s2 + $0x1f8] sm:$0xff]  ;;  %v36_v36 = vrot.slane %v19_v26, %v35_v18  ;;  %399 = vmatpush3.bf16.msra.mxu0 %v398_v19  ;;  %v402_v37 = vpack.c.bf16 %v70_v21, %v69_v20  ;;  %v37_v38 = vcombine.low %v24_v31, %v28_v32  ;;  %v434_v39 = vpack.c.bf16 %v102_v25, %v101_v24  ;;  %s467_s16 = smov [#allocation2]  }
  0x1a   :  { %401 = vmatprep.subr.bf16.mxu0 %v400_v23  ;;  %v404_v40 = vpack.c.bf16 %v88_v30, %v87_v29  ;;  %v71_v41 = vld [vmem:[%s708_s2 + $0x70] sm:$0xff]  ;;  %v72_v42 = vld [vmem:[%s708_s2 + $0x78] sm:$0xff]  ;;  %v436_v44 = vpack.c.bf16 %v120_v35, %v119_v34  ;;  %v18_v50 = vld [vmem:[%s706_s0] sm:$0xff]  ;;  %s297_s17 = sshll.u32 %s467_s16, 4  ;;  %s298_s17 = int_to_ptr.vmem [resolvable:$true] %s297_s17 }
  0x1b   :  { %431 = vmatpush3.bf16.msra.mxu1 %v430_v22  ;;  %v38_v43 = vcombine.low %v32_v33, %v36_v36  ;;  %v103_v45 = vld [vmem:[%s708_s2 + $0x170] sm:$0xff]  ;;  %v104_v46 = vld [vmem:[%s708_s2 + $0x178] sm:$0xff]  ;;  %v45_v47 = vrot.slane %v37_v38, %v44_v27  ;;  %v406_v49 = vpack.c.bf16 %v72_v42, %v71_v41  ;;  %v305_v61 = vld [vmem:[%s709_s3] ss:$0 sm:$0xff]  ;;  %s442_s18 = scalar_lea.vmem %s298_s17, 32  ;;  %p447_p1 = scmp.lt.s32.totalorder %s298_s17, %s298_s17 }
  0x1c   :  { %433 = vmatprep.subr.bf16.mxu1 %v432_v28  ;;  %v438_v51 = vpack.c.bf16 %v104_v46, %v103_v45  ;;  %p443_p0 = scmp.ne.s32.totalorder %s298_s17, %s442_s18  ;;  %p448_p2 = scmp.lt.s32.totalorder %s442_s18, %s442_s18 }
  0x1d   :  { %v52_v48 = vrot.slane %v38_v43, %v44_v27  ;;  %403 = vmatpush3.bf16.msra.mxu0 %v402_v37 }
  0x1e   :  { %405 = vmatprep.subr.bf16.mxu0 %v404_v40  ;;  %p449_p3 = por %p448_p2, %p447_p1 }
  0x1f   :  { %435 = vmatpush3.bf16.msra.mxu1 %v434_v39  ;;  %v53_v52 = vcombine.low %v45_v47, %v52_v48 }
  0x20   :  { %437 = vmatprep.subr.bf16.mxu1 %v436_v44  ;;  %p450_p4 = pnand %p449_p3, %p443_p0 }
  0x21   :  { %v55_v53 = vmul.f32 %v53_v52, %v18_v50  ;;  %407 = vmatpush3.bf16.msra.mxu0 %v406_v49 }
  0x23   :  { %439 = vmatpush3.bf16.msra.mxu1 %v438_v51  ;;  %v56_v54 = vmax.f32 %v55_v53, 0.0 }
  0x25   :  { %v136_v55 = vrot.slane %v56_v54, %v44_v27  ;;  %v129_v56 = vcombine.high %v56_v54, %v56_v54 }
  0x27   :  { %v144_v57 = vcombine.high %v136_v55, %v136_v55  ;;  %v143_v58 = vrot.slane %v129_v56, %v44_v27 }
  0x29   :  { %214 = vmatprep.mubr.f32.mxu0 %v144_v57  ;;  %v145_v59 = vcombine.high %v143_v58, %v143_v58 }
  0x2a   :  { %215 = vmatmul.mubr.f32.vlgmr.msra.gmra.mrb[0].mxu0 %v136_v55 }
  0x2b   :  { %284 = vmatprep.mubr.f32.mxu1 %v145_v59 }
  0x2c   :  { %285 = vmatmul.mubr.f32.vlgmr.msra.gmra.mrb[0].mxu1 %v143_v58 }
  0xfd   :  { %v338_v60 = vpop.f32.mrb[0].mxu0 }
  0xfe   :  { %v339_v62 = vpop.f32.mrb[1].mxu0 }
  0xff   :  { %v340_v63 = vadd.f32 %v339_v62, %v338_v60  ;;  %v373_v0 = vpop.f32.mrb[0].mxu1 }
 0x100   :  { %v374_v1 = vpop.f32.mrb[1].mxu1 }
 0x101   :  { %v217_v2 = vadd.f32 %v340_v63, %v305_v61  ;;  %v375_v3 = vadd.f32 %v374_v1, %v373_v0 }
 0x103   :  { %v287_v4 = vadd.f32 %v375_v3, %v217_v2 }
 0x105   :  { %290 = vst [vmem:[#allocation2] sm:$0x3] %v287_v4 }
 0x106   :  { %453 = shalt.err (!%p450_p4)
}
 0x107   :  { %s454_s20 = scalar_lea.hbm %s710_s4, 32 }
 0x108   :  { %p455_p5 = scmp.ne.s32.totalorder %s710_s4, %s454_s20  ;;  %p458_p6 = scmp.lt.u32.totalorder %s454_s20, %s710_s4 }
 0x10a   :  { %p460_p7 = pnand %p458_p6, %p455_p5 }
 0x10c   :  { %463 = shalt.err (!%p460_p7)
}
 0x10d   :  { %300 = dma.vmem_to_hbm [thread:$0]  %s298_s17, 32, %s710_s4, [#allocation3]  }
 0x10e   :  { %464 = dma.done.wait [#allocation3], 32  }
 0x10f   :  { %465 = vsyncadd [#allocation3], 4294967264 }
 0x110   :  { %304 = vsyncpa [#allocation3], 1 }

// kernel: mcnet_forward.34
= control target key start
LH: loop header
LB: loop body
LE: loop exit
PB: predicated region body
PF: predicated region fallthrough
CT: control target
= control target key end

     0   :  { %v912_v1 = vmov 0   ;;  %vm450_vm0 = vcmask 523264   ;;  %v913_v56 = vmov 0.0   ;;  %vm914_vm1 = vmmov 0   ;;  %s1148_s1 = inlined_call_operand.vmem [shape: bf16[320,384], index: 1, kind: input, shape index: {}]   ;;  %s1149_s0 = inlined_call_operand.vmem [shape: bf16[8,320], index: 0, kind: input, shape index: {}]   ;;  %s1150_s2 = inlined_call_operand.vmem [shape: f32[4,384], index: 2, kind: input, shape index: {}]   ;;  %s1151_s3 = inlined_call_operand.vmem [shape: f32[8,384], index: 3, kind: output, shape index: {}]  }
   0x1   :  { %v829_v0 = vld [vmem:[%s1148_s1 + $0x4] ss:$12 sps:$4 sm:$0xff]   ;;  %527 = vmatprep.mubr.bf16.mxu1 %v912_v1  ;;  %v833_v3 = vld [vmem:[%s1148_s1] ss:$12 sps:$4 sm:$0xff]   ;;  %v835_v5 = vld [vmem:[%s1148_s1 + $0x1c] ss:$12 sps:$4 sm:$0xff]  }
   0x2   :  { %v831_v2 = vld [vmem:[%s1148_s1 + $0x184] ss:$12 sps:$4 sm:$0xff]   ;;  %454 = vmatprep.subr.bf16.mxu0 %v829_v0  ;;  %v834_v4 = vld [vmem:[%s1148_s1 + $0x180] ss:$12 sps:$4 sm:$0xff]   ;;  %v837_v6 = vld [vmem:[%s1148_s1 + $0x19c] ss:$12 sps:$4 sm:$0xff]  }
   0x3   :  { %495 = vmatprep.subr.bf16.mxu1 %v831_v2  ;;  %455 = vmatpush1.bf16.msra.mxu0 %v833_v3  ;;  %v839_v7 = vld [vmem:[%s1148_s1 + $0x18] ss:$12 sps:$4 sm:$0xff]   ;;  %v841_v9 = vld [vmem:[%s1148_s1 + $0x34] ss:$12 sps:$4 sm:$0xff]   ;;  %v845_v11 = vld [vmem:[%s1148_s1 + $0x30] ss:$12 sps:$4 sm:$0xff]  }
   0x4   :  { %496 = vmatpush1.bf16.msra.mxu1 %v834_v4  ;;  %456 = vmatprep.subr.bf16.mxu0 %v835_v5  ;;  %v840_v8 = vld [vmem:[%s1148_s1 + $0x198] ss:$12 sps:$4 sm:$0xff]   ;;  %v843_v10 = vld [vmem:[%s1148_s1 + $0x1b4] ss:$12 sps:$4 sm:$0xff]   ;;  %v846_v12 = vld [vmem:[%s1148_s1 + $0x1b0] ss:$12 sps:$4 sm:$0xff]  }
   0x5   :  { %497 = vmatprep.subr.bf16.mxu1 %v837_v6  ;;  %v847_v13 = vld [vmem:[%s1148_s1 + $0x4c] ss:$12 sps:$4 sm:$0xff]   ;;  %v851_v15 = vld [vmem:[%s1148_s1 + $0x48] ss:$12 sps:$4 sm:$0xff]   ;;  %v853_v17 = vld [vmem:[%s1148_s1 + $0x64] ss:$12 sps:$4 sm:$0xff]   ;;  %v105_v6 = vlaneseq }
   0x6   :  { %v849_v14 = vld [vmem:[%s1148_s1 + $0x1cc] ss:$12 sps:$4 sm:$0xff]   ;;  %v852_v16 = vld [vmem:[%s1148_s1 + $0x1c8] ss:$12 sps:$4 sm:$0xff]   ;;  %v867_v28 = vld [vmem:[%s1148_s1 + $0x90] ss:$12 sps:$4 sm:$0xff]  }
   0x7   :  { %457 = vmatpush1.bf16.msra.mxu0 %v839_v7  ;;  %v855_v18 = vld [vmem:[%s1148_s1 + $0xc8] ss:$12 sps:$4 sm:$0xff]   ;;  %v856_v19 = vld [vmem:[%s1148_s1 + $0x60] ss:$12 sps:$4 sm:$0xff]   ;;  %v862_v24 = vld [vmem:[%s1148_s1 + $0x78] ss:$12 sps:$4 sm:$0xff]  }
   0x8   :  { %498 = vmatpush1.bf16.msra.mxu1 %v840_v8  ;;  %458 = vmatprep.subr.bf16.mxu0 %v841_v9  ;;  %v995_v20 = vld [vmem:[%s1149_s0 + $0x8] ss:$0 sps:$4 sm:$0xff]   ;;  %v861_v23 = vld [vmem:[%s1148_s1 + $0xe0] ss:$12 sps:$4 sm:$0xff]   ;;  %v866_v27 = vld [vmem:[%s1148_s1 + $0xf8] ss:$12 sps:$4 sm:$0xff]  }
   0x9   :  { %499 = vmatprep.subr.bf16.mxu1 %v843_v10  ;;  %v858_v21 = vld [vmem:[%s1148_s1 + $0x8] ss:$12 sps:$4 sm:$0xff]   ;;  %v863_v25 = vld [vmem:[%s1148_s1 + $0x20] ss:$12 sps:$4 sm:$0xff]   ;;  %v868_v29 = vld [vmem:[%s1148_s1 + $0x38] ss:$12 sps:$4 sm:$0xff]  }
   0xa   :  { %v859_v22 = vld [vmem:[%s1148_s1 + $0x7c] ss:$12 sps:$4 sm:$0xff]   ;;  %v864_v26 = vld [vmem:[%s1148_s1 + $0x94] ss:$12 sps:$4 sm:$0xff]   ;;  %v869_v30 = vld [vmem:[%s1148_s1 + $0xac] ss:$12 sps:$4 sm:$0xff]  }
   0xb   :  { %459 = vmatpush1.bf16.msra.mxu0 %v845_v11  ;;  %v871_v31 = vld [vmem:[%s1148_s1 + $0x110] ss:$12 sps:$4 sm:$0xff]   ;;  %v872_v32 = vld [vmem:[%s1148_s1 + $0xa8] ss:$12 sps:$4 sm:$0xff]   ;;  %v877_v36 = vld [vmem:[%s1148_s1 + $0xc0] ss:$12 sps:$4 sm:$0xff]  }
   0xc   :  { %500 = vmatpush1.bf16.msra.mxu1 %v846_v12  ;;  %460 = vmatprep.subr.bf16.mxu0 %v847_v13  ;;  %v873_v33 = vld [vmem:[%s1148_s1 + $0x50] ss:$12 sps:$4 sm:$0xff]   ;;  %v876_v35 = vld [vmem:[%s1148_s1 + $0x128] ss:$12 sps:$4 sm:$0xff]   ;;  %v881_v39 = vld [vmem:[%s1148_s1 + $0x140] ss:$12 sps:$4 sm:$0xff]  }
   0xd   :  { %501 = vmatprep.subr.bf16.mxu1 %v849_v14  ;;  %v874_v34 = vld [vmem:[%s1148_s1 + $0xc4] ss:$12 sps:$4 sm:$0xff]   ;;  %v878_v37 = vld [vmem:[%s1148_s1 + $0x68] ss:$12 sps:$4 sm:$0xff]   ;;  %v883_v41 = vld [vmem:[%s1148_s1 + $0x80] ss:$12 sps:$4 sm:$0xff]  }
   0xe   :  { %v879_v38 = vld [vmem:[%s1148_s1 + $0xdc] ss:$12 sps:$4 sm:$0xff]   ;;  %v882_v40 = vld [vmem:[%s1148_s1 + $0xd8] ss:$12 sps:$4 sm:$0xff]   ;;  %v884_v42 = vld [vmem:[%s1148_s1 + $0xf4] ss:$12 sps:$4 sm:$0xff]  }
   0xf   :  { %461 = vmatpush1.bf16.msra.mxu0 %v851_v15  ;;  %v886_v43 = vld [vmem:[%s1148_s1 + $0x158] ss:$12 sps:$4 sm:$0xff]   ;;  %v887_v44 = vld [vmem:[%s1148_s1 + $0xf0] ss:$12 sps:$4 sm:$0xff]   ;;  %v892_v50 = vld [vmem:[%s1148_s1 + $0x108] ss:$12 sps:$4 sm:$0xff]  }
  0x10   :  { %502 = vmatpush1.bf16.msra.mxu1 %v852_v16  ;;  %462 = vmatprep.subr.bf16.mxu0 %v853_v17  ;;  %v15_v45 = vld [vmem:[%s1149_s0] sm:$0xff]  ;;  %v889_v48 = vld [vmem:[%s1148_s1 + $0x10c] ss:$12 sps:$4 sm:$0xff]   ;;  %v891_v49 = vld [vmem:[%s1148_s1 + $0x170] ss:$12 sps:$4 sm:$0xff]   ;;  %v106_v12 = vshrl.u32 %v105_v6, 7 }
  0x11   :  { %783 = vmatprep.subr.bf16.mxu1 %v855_v18  ;;  %v888_v46 = vld [vmem:[%s1148_s1 + $0x98] ss:$12 sps:$4 sm:$0xff]   ;;  %v719_v47 = vcombine.high %v15_v45, %v15_v45  ;;  %v893_v51 = vld [vmem:[%s1148_s1 + $0xb0] ss:$12 sps:$4 sm:$0xff]   ;;  %v718_v53 = vcombine.low %v15_v45, %v15_v45  ;;  %v898_v54 = vld [vmem:[%s1148_s1 + $0x120] ss:$12 sps:$4 sm:$0xff]  }
  0x12   :  { %v894_v52 = vld [vmem:[%s1148_s1 + $0x124] ss:$12 sps:$4 sm:$0xff]   ;;  %v899_v55 = vld [vmem:[%s1148_s1 + $0x188] ss:$12 sps:$4 sm:$0xff]   ;;  %v903_v59 = vld [vmem:[%s1148_s1 + $0x1a0] ss:$12 sps:$4 sm:$0xff]  }
  0x13   :  { %781 = vmatmul.mubr.msk.bf16.vlgmr.msra.gmra.mrb[0].mxu1 %vm450_vm0, %v995_v20  ;;  %463 = vmatpush1.bf16.msra.mxu0 %v856_v19  ;;  %v900_v57 = vld [vmem:[%s1148_s1 + $0x13c] ss:$12 sps:$4 sm:$0xff]   ;;  %v902_v58 = vld [vmem:[%s1148_s1 + $0x138] ss:$12 sps:$4 sm:$0xff]   ;;  %v904_v60 = vld [vmem:[%s1148_s1 + $0x154] ss:$12 sps:$4 sm:$0xff]  }
  0x14   :  { %784 = vmatpush3.bf16.msra.mxu1 %v858_v21  ;;  %464 = vmatprep.subr.bf16.mxu0 %v859_v22  ;;  %v906_v61 = vld [vmem:[%s1148_s1 + $0x150] ss:$12 sps:$4 sm:$0xff]   ;;  %v907_v62 = vld [vmem:[%s1148_s1 + $0x1b8] ss:$12 sps:$4 sm:$0xff]   ;;  %v910_v0 = vld [vmem:[%s1148_s1 + $0x168] ss:$12 sps:$4 sm:$0xff]  }
  0x15   :  { %785 = vmatprep.subr.bf16.mxu1 %v861_v23  ;;  %568 = vmatprep.mubr.bf16.mxu1 %v719_v47  ;;  %v908_v63 = vld [vmem:[%s1148_s1 + $0x16c] ss:$12 sps:$4 sm:$0xff]   ;;  %v911_v1 = vld [vmem:[%s1148_s1 + $0x1d0] ss:$12 sps:$4 sm:$0xff]   ;;  %v115_v13 = vsub.s32 2, %v106_v12  ;;  %v107_v15 = vsub.s32 0, %v106_v12 }
  0x16   :  { %486 = vmatprep.mubr.bf16.mxu0 %v719_v47  ;;  %v97_v14 = vld [vmem:[%s1150_s2] ss:$4 sm:$0x7]  ;;  %v111_v16 = vsub.s32 1, %v106_v12 }
  0x17   :  { %465 = vmatpush1.bf16.msra.mxu0 %v862_v24  ;;  %v116_v17 = vrot.slane %v97_v14, %v115_v13  ;;  %v715_v18 = vld [vmem:[%s1150_s2 + $0x1] ss:$4 sm:$0x7]  ;;  %v717_v19 = vld [vmem:[%s1150_s2 + $0x3] ss:$4 sm:$0x7] }
  0x18   :  { %786 = vmatpush3.bf16.msra.mxu1 %v863_v25  ;;  %466 = vmatprep.subr.bf16.mxu0 %v864_v26  ;;  %v716_v21 = vld [vmem:[%s1150_s2 + $0x2] ss:$4 sm:$0x7]  ;;  %v112_v22 = vrot.slane %v97_v14, %v111_v16  ;;  %v628_v24 = vrot.slane %v715_v18, %v115_v13  ;;  %v685_v26 = vsub.f32 1.0, %v717_v19 }
  0x19   :  { %787 = vmatprep.subr.bf16.mxu1 %v866_v27  ;;  %v643_v47 = vrot.slane %v716_v21, %v111_v16 }
  0x1a   :  { %v698_v45 = vrot.slane %v685_v26, %v115_v13 }
  0x1b   :  { %467 = vmatpush1.bf16.msra.mxu0 %v867_v28 }
  0x1c   :  { %788 = vmatpush3.bf16.msra.mxu1 %v868_v29  ;;  %468 = vmatprep.subr.bf16.mxu0 %v869_v30  ;;  %v620_v29 = vrot.slane %v715_v18, %v107_v15 }
  0x1d   :  { %789 = vmatprep.subr.bf16.mxu1 %v871_v31  ;;  %v647_v31 = vrot.slane %v716_v21, %v115_v13 }
  0x1f   :  { %469 = vmatpush1.bf16.msra.mxu0 %v872_v32 }
  0x20   :  { %790 = vmatpush3.bf16.msra.mxu1 %v873_v33  ;;  %470 = vmatprep.subr.bf16.mxu0 %v874_v34 }
  0x21   :  { %791 = vmatprep.subr.bf16.mxu1 %v876_v35  ;;  %v624_v35 = vrot.slane %v715_v18, %v111_v16 }
  0x23   :  { %471 = vmatpush1.bf16.msra.mxu0 %v877_v36 }
  0x24   :  { %792 = vmatpush3.bf16.msra.mxu1 %v878_v37  ;;  %472 = vmatprep.subr.bf16.mxu0 %v879_v38 }
  0x25   :  { %793 = vmatprep.subr.bf16.mxu1 %v881_v39  ;;  %v639_v39 = vrot.slane %v716_v21, %v107_v15 }
  0x27   :  { %473 = vmatpush1.bf16.msra.mxu0 %v882_v40 }
  0x28   :  { %794 = vmatpush3.bf16.msra.mxu1 %v883_v41  ;;  %474 = vmatprep.subr.bf16.mxu0 %v884_v42 }
  0x29   :  { %795 = vmatprep.subr.bf16.mxu1 %v886_v43 }
  0x2b   :  { %475 = vmatpush1.bf16.msra.mxu0 %v887_v44  ;;  %v678_v44 = vrot.slane %v717_v19, %v115_v13 }
  0x2c   :  { %796 = vmatpush3.bf16.msra.mxu1 %v888_v46  ;;  %476 = vmatprep.subr.bf16.mxu0 %v889_v48 }
  0x2d   :  { %797 = vmatprep.subr.bf16.mxu1 %v891_v49 }
  0x2f   :  { %477 = vmatpush1.bf16.msra.mxu0 %v892_v50 }
  0x30   :  { %798 = vmatpush3.bf16.msra.mxu1 %v893_v51  ;;  %478 = vmatprep.subr.bf16.mxu0 %v894_v52  ;;  %v670_v52 = vrot.slane %v717_v19, %v107_v15 }
  0x31   :  { %810 = vmatprep.subr.bf16.mxu1 %v913_v56 }
  0x33   :  { %569 = vmatmul.mubr.bf16.vlgmr.msra.gmra.mrb[4].mxu1 %v718_v53  ;;  %479 = vmatpush1.bf16.msra.mxu0 %v898_v54 }
  0x34   :  { %811 = vmatpush3.bf16.msra.mxu1 %v899_v55  ;;  %480 = vmatprep.subr.bf16.mxu0 %v900_v57 }
  0x35   :  { %812 = vmatprep.subr.bf16.mxu1 %v913_v56  ;;  %818 = vmatprep.mubr.msk.bf16.mxu1 %vm914_vm1, %v913_v56 }
  0x37   :  { %481 = vmatpush1.bf16.msra.mxu0 %v902_v58 }
  0x38   :  { %813 = vmatpush3.bf16.msra.mxu1 %v903_v59  ;;  %482 = vmatprep.subr.bf16.mxu0 %v904_v60 }
  0x39   :  { %814 = vmatprep.subr.bf16.mxu1 %v913_v56 }
  0x3b   :  { %483 = vmatpush1.bf16.msra.mxu0 %v906_v61 }
  0x3c   :  { %815 = vmatpush3.bf16.msra.mxu1 %v907_v62  ;;  %484 = vmatprep.subr.bf16.mxu0 %v908_v63  ;;  %v674_v62 = vrot.slane %v717_v19, %v111_v16  ;;  %v694_v63 = vrot.slane %v685_v26, %v111_v16 }
  0x3d   :  { %816 = vmatprep.subr.bf16.mxu1 %v913_v56 }
  0x3f   :  { %485 = vmatpush1.bf16.msra.mxu0 %v910_v0 }
  0x40   :  { %817 = vmatpush3.bf16.msra.mxu1 %v911_v1 }
  0x42   :  { %487 = vmatmul.mubr.bf16.vlgmr.msra.gmra.mrb[0].mxu0 %v718_v53  ;;  %v690_v53 = vrot.slane %v685_v26, %v107_v15 }
  0x43   :  { %819 = vmatmul.mubr.msk.bf16.vlgmr.msra.gmra.mrb[8].mxu1 %vm450_vm0, %v995_v20  ;;  %v108_v20 = vrot.slane %v97_v14, %v107_v15 }
  0xe6   :  { %v529_v2 = vpop.f32.mrb[0].mxu1 }
  0xe7   :  { %v531_v3 = vpop.f32.mrb[1].mxu1 }
  0xe8   :  { %v533_v4 = vpop.f32.mrb[2].mxu1 }
  0xe9   :  { %v534_v5 = vpop.f32.mrb[3].mxu1 }
 0x106   :  { %v799_v7 = vpop.f32.mrb[4].mxu1 }
 0x107   :  { %v800_v8 = vpop.f32.mrb[5].mxu1 }
 0x108   :  { %v801_v9 = vadd.f32 %v800_v8, %v799_v7  ;;  %v802_v10 = vpop.f32.mrb[6].mxu1 }
 0x109   :  { %v803_v11 = vpop.f32.mrb[7].mxu1 }
 0x10a   :  { %v571_v23 = vadd.f32 %v801_v9, %v116_v17 }
 0x115   :  { %v488_v25 = vpop.f32.mrb[0].mxu0 }
 0x116   :  { %v610_v27 = vpop.f32.mrb[8].mxu1  ;;  %v489_v28 = vadd.f32 %v488_v25, %v108_v20  ;;  %v490_v32 = vpop.f32.mrb[1].mxu0 }
 0x117   :  { %v611_v30 = vadd.f32 %v610_v27, %v571_v23  ;;  %v820_v33 = vpop.f32.mrb[9].mxu1  ;;  %v491_v34 = vadd.f32 %v490_v32, %v112_v22  ;;  %v492_v36 = vpop.f32.mrb[2].mxu0 }
 0x118   :  { %v613_v37 = vpop.f32.mrb[10].mxu1  ;;  %v530_v38 = vadd.f32 %v529_v2, %v489_v28  ;;  %v493_v42 = vpop.f32.mrb[3].mxu0 }
 0x119   :  { %v634_v40 = vmul.f32 %v628_v24, %v611_v30  ;;  %v659_v41 = vmax.f32 %v611_v30, 0.0  ;;  %v821_v43 = vpop.f32.mrb[11].mxu1  ;;  %v532_v46 = vadd.f32 %v531_v3, %v491_v34 }
 0x11a   :  { %v632_v48 = vmul.f32 %v620_v29, %v530_v38  ;;  %v657_v49 = vmax.f32 %v530_v38, 0.0 }
 0x11b   :  { %v653_v50 = vadd.f32 %v647_v31, %v634_v40  ;;  %v662_v51 = vmul.f32 %v659_v41, %v628_v24  ;;  %v633_v54 = vmul.f32 %v624_v35, %v532_v46  ;;  %v658_v55 = vmax.f32 %v532_v46, 0.0 }
 0x11c   :  { %v651_v56 = vadd.f32 %v639_v39, %v632_v48  ;;  %v660_v57 = vmul.f32 %v657_v49, %v620_v29 }
 0x11d   :  { %v656_v58 = vmax.f32 %v653_v50, 0.0  ;;  %v665_v59 = vadd.f32 %v662_v51, %v647_v31  ;;  %v652_v60 = vadd.f32 %v643_v47, %v633_v54  ;;  %v661_v61 = vmul.f32 %v658_v55, %v624_v35 }
 0x11e   :  { %v654_v0 = vmax.f32 %v651_v56, 0.0  ;;  %v663_v1 = vadd.f32 %v660_v57, %v639_v39 }
 0x11f   :  { %v684_v2 = vmul.f32 %v678_v44, %v656_v58  ;;  %v704_v3 = vmul.f32 %v698_v45, %v665_v59  ;;  %v655_v4 = vmax.f32 %v652_v60, 0.0  ;;  %v664_v5 = vadd.f32 %v661_v61, %v643_v47 }
 0x120   :  { %v682_v6 = vmul.f32 %v670_v52, %v654_v0  ;;  %v702_v7 = vmul.f32 %v690_v53, %v663_v1 }
 0x121   :  { %v707_v8 = vadd.f32 %v704_v3, %v684_v2  ;;  %v683_v9 = vmul.f32 %v674_v62, %v655_v4  ;;  %v703_v10 = vmul.f32 %v694_v63, %v664_v5 }
 0x122   :  { %v705_v11 = vadd.f32 %v702_v7, %v682_v6 }
 0x123   :  { %710 = vst [vmem:[%s1151_s3 + $0x10] sm:$0xff] %v707_v8  ;;  %v706_v12 = vadd.f32 %v703_v10, %v683_v9 }
 0x124   :  { %708 = vst [vmem:[%s1151_s3] sm:$0xff] %v705_v11 }
 0x125   :  { %709 = vst [vmem:[%s1151_s3 + $0x8] sm:$0xff] %v706_v12 }

</bundles_post_ra>
